<compile_context>
chip_gen: v6e
topology: v6e:2x2x1
jax: 0.10.0
libtpu: 0.0.40
codegen_flags: <defaults>
</compile_context>

<pallas_src>
import functools

import jax
import jax.numpy as jnp
import numpy as np
from jax import lax
from jax.experimental import pallas as pl
from jax.experimental.pallas import tpu as pltpu


def _convlstm_kernel(x_col_ref, w_ref, b_ref, out_ref, c_out_ref,
                     hpad_sc, hnew_sc, c_sc, col_sc,
                     *, k, hid, H, W, cin, y_tile):
    t = pl.program_id(1)
    last_t = pl.num_programs(1) - 1
    p = k // 2
    kk_cin = k * k * cin
    mt = y_tile * W                     # matmul rows per M-tile (e.g. 128)

    @pl.when(t == 0)
    def _():
        hpad_sc[...] = jnp.zeros_like(hpad_sc)   # zero halo stays zero forever
        c_sc[...] = jnp.zeros_like(c_sc)

    for tile in range(H // y_tile):
        y0 = tile * y_tile
        r0 = y0 * W

        # --- build the im2col tile: columns = [x taps | h taps], K = k*k*(Cin+hid)
        col_sc[:, 0:kk_cin] = x_col_ref[0, 0, r0:r0 + mt, :]
        for ky in range(k):
            for kx in range(k):
                c0 = kk_cin + (ky * k + kx) * hid
                win = hpad_sc[y0 + ky:y0 + ky + y_tile, kx:kx + W, :]
                col_sc[:, c0:c0 + hid] = win.reshape(mt, hid)

        # --- one MXU contraction for all 4 gates (bf16 in, f32 accumulate)
        gates = jnp.dot(col_sc[...], w_ref[...],
                        preferred_element_type=jnp.float32) + b_ref[...]

        # --- LSTM gate math, kept 2-D on the (mt, 4*hid) result
        gi = jax.nn.sigmoid(gates[:, 0 * hid:1 * hid])
        gf = jax.nn.sigmoid(gates[:, 1 * hid:2 * hid])
        go = jax.nn.sigmoid(gates[:, 2 * hid:3 * hid])
        gg = jnp.tanh(gates[:, 3 * hid:4 * hid])

        c_next = gf * c_sc[r0:r0 + mt, :] + gi * gg
        h_next = go * jnp.tanh(c_next)

        c_sc[r0:r0 + mt, :] = c_next
        hnew_sc[r0:r0 + mt, :] = h_next.astype(hnew_sc.dtype)
        out_ref[0, 0, y0:y0 + y_tile] = h_next.reshape(y_tile, W, hid)

        @pl.when(t == last_t)
        def _():
            # resident output block over the T axis: only the final c matters
            c_out_ref[0, y0:y0 + y_tile] = c_next.reshape(y_tile, W, hid)

    # Publish h_t into the padded carry for step t+1 AFTER all tiles have read
    # h_{t-1} (avoids the halo-row read/write hazard between spatial tiles).
    hpad_sc[p:p + H, p:p + W, :] = hnew_sc[...].reshape(H, W, hid)


def conv_lstm_forward(x_nchw, weight_oihw, bias, hidden_dim, kernel_size):
    """x_nchw: (B, T, Cin, H, W); weight_oihw: (4*hid, Cin+hid, k, k); bias: (4*hid,)."""
    B, T, Cin, H, W = x_nchw.shape
    k, hid = kernel_size, hidden_dim
    C = Cin + hid
    p = k // 2
    cdt = jnp.bfloat16                  # MXU operand dtype (f32 accumulation)

    # M-tile of ~128 matmul rows (rows are (y, x) pixels); must divide H.
    y_tile = max(1, min(H, 128 // max(W, 1)))
    while H % y_tile:
        y_tile -= 1

    # ---- x side: zero-pad spatially + fold the k*k taps into the contraction
    #      dim once in the wrapper (layout plumbing only, no compute hoisted).
    x_bthwc = jnp.transpose(x_nchw, (0, 1, 3, 4, 2)).astype(jnp.float32)
    x_pad = jnp.pad(x_bthwc, ((0, 0), (0, 0), (p, p), (p, p), (0, 0)))
    wins = [x_pad[:, :, ky:ky + H, kx:kx + W, :]
            for ky in range(k) for kx in range(k)]
    x_col = jnp.concatenate(wins, axis=-1).reshape(B, T, H * W, k * k * Cin)
    x_col = x_col.astype(cdt)

    # ---- weights: (4*hid, C, k, k) -> rows ordered [x taps | h taps]
    w_t = jnp.transpose(weight_oihw, (2, 3, 1, 0))            # (k, k, C, 4*hid)
    wx = w_t[:, :, :Cin, :].reshape(k * k * Cin, 4 * hid)
    wh = w_t[:, :, Cin:, :].reshape(k * k * hid, 4 * hid)
    w_cat = jnp.concatenate([wx, wh], axis=0).astype(cdt)     # (k*k*C, 4*hid)
    b_k = bias.reshape(1, 4 * hid).astype(jnp.float32)

    kernel = functools.partial(_convlstm_kernel, k=k, hid=hid, H=H, W=W,
                               cin=Cin, y_tile=y_tile)
    out, c_fin = pl.pallas_call(
        kernel,
        out_shape=(jax.ShapeDtypeStruct((B, T, H, W, hid), jnp.float32),
                   jax.ShapeDtypeStruct((B, H, W, hid), jnp.float32)),
        grid_spec=pltpu.PrefetchScalarGridSpec(
            num_scalar_prefetch=0,
            grid=(B, T),
            in_specs=[
                pl.BlockSpec((1, 1, H * W, k * k * Cin),
                             lambda b, t: (b, t, 0, 0)),
                pl.BlockSpec((k * k * C, 4 * hid), lambda b, t: (0, 0)),
                pl.BlockSpec((1, 4 * hid), lambda b, t: (0, 0)),
            ],
            out_specs=(
                pl.BlockSpec((1, 1, H, W, hid), lambda b, t: (b, t, 0, 0, 0)),
                pl.BlockSpec((1, H, W, hid), lambda b, t: (b, 0, 0, 0)),
            ),
            scratch_shapes=[
                pltpu.VMEM((H + 2 * p, W + 2 * p, hid), cdt),      # h_{t-1}, padded
                pltpu.VMEM((H * W, hid), cdt),                     # h_t staging
                pltpu.VMEM((H * W, hid), jnp.float32),             # c carry
                pltpu.VMEM((y_tile * W, k * k * C), cdt),          # im2col tile
            ],
        ),
        compiler_params=pltpu.CompilerParams(
            dimension_semantics=("parallel", "arbitrary")),
    )(x_col, w_cat, b_k)

    outputs = jnp.transpose(out, (0, 1, 4, 2, 3))          # (B, T, hid, H, W)
    h_final = outputs[:, -1]                               # (B, hid, H, W)
    c_final = jnp.transpose(c_fin, (0, 3, 1, 2))           # (B, hid, H, W)
    return outputs, (h_final, c_final)


def conv_lstm_reference(x_nchw, weight_oihw, bias, hidden_dim, kernel_size):
    """Pure-JAX (f32) reference matching the PyTorch module semantics (NCHW)."""
    B, T, Cin, H, W = x_nchw.shape
    hid = hidden_dim
    h = jnp.zeros((B, hid, H, W), jnp.float32)
    c = jnp.zeros((B, hid, H, W), jnp.float32)
    outs = []
    for t in range(T):
        combined = jnp.concatenate([x_nchw[:, t], h], axis=1)
        conv = lax.conv_general_dilated(
            combined, weight_oihw, window_strides=(1, 1), padding="SAME",
            dimension_numbers=("NCHW", "OIHW", "NCHW"))
        conv = conv + bias[None, :, None, None]
        cc_i, cc_f, cc_o, cc_g = jnp.split(conv, 4, axis=1)
        i = jax.nn.sigmoid(cc_i)
        f = jax.nn.sigmoid(cc_f)
        o = jax.nn.sigmoid(cc_o)
        g = jnp.tanh(cc_g)
        c = f * c + i * g
        h = o * jnp.tanh(c)
        outs.append(h)
    return jnp.stack(outs, axis=1), (h, c)


if __name__ == "__main__":
    # Small shapes consistent with the module's forward:
    # x: (batch, seq, input_dim, H, W)
    B, T, Cin, H, W = 2, 8, 4, 16, 16
    hid, k = 32, 3

    key = jax.random.PRNGKey(0)
    kx, kw, kb = jax.random.split(key, 3)
    x = jax.random.normal(kx, (B, T, Cin, H, W), dtype=jnp.float32)
    # nn.Conv2d parameter shapes: (4*hid, Cin+hid, k, k), (4*hid,)
    weight = 0.1 * jax.random.normal(kw, (4 * hid, Cin + hid, k, k), dtype=jnp.float32)
    bias = 0.1 * jax.random.normal(kb, (4 * hid,), dtype=jnp.float32)

    outputs, (h_fin, c_fin) = conv_lstm_forward(x, weight, bias, hid, k)
    outputs = jax.block_until_ready(outputs)
    h_fin = jax.block_until_ready(h_fin)
    c_fin = jax.block_until_ready(c_fin)

    # Correctness check vs the f32 reference.  Tolerance is loosened because the
    # MXU contraction runs with bf16 operands (f32 accumulation), per review.
    ref_out, (ref_h, ref_c) = conv_lstm_reference(x, weight, bias, hid, k)
    np.testing.assert_allclose(np.asarray(outputs), np.asarray(ref_out),
                               rtol=5e-2, atol=5e-2)
    np.testing.assert_allclose(np.asarray(h_fin), np.asarray(ref_h),
                               rtol=5e-2, atol=5e-2)
    np.testing.assert_allclose(np.asarray(c_fin), np.asarray(ref_c),
                               rtol=5e-2, atol=5e-2)

    print("KERNEL_OK")
</pallas_src>

<mosaic_0001>
module attributes {stable_mosaic.version = 11 : i64} {
  func.func @_convlstm_kernel(%arg0: i32, %arg1: i32, %arg2: memref<1x1x256x36xbf16, #tpu.memory_space<vmem>>, %arg3: memref<324x128xbf16, #tpu.memory_space<vmem>>, %arg4: memref<1x128xf32, #tpu.memory_space<vmem>>, %arg5: memref<1x1x16x16x32xf32, #tpu.memory_space<vmem>>, %arg6: memref<1x16x16x32xf32, #tpu.memory_space<vmem>>, %arg7: memref<18x18x32xbf16, #tpu.memory_space<vmem>>, %arg8: memref<256x32xbf16, #tpu.memory_space<vmem>>, %arg9: memref<256x32xf32, #tpu.memory_space<vmem>>, %arg10: memref<128x324xbf16, #tpu.memory_space<vmem>>) attributes {dimension_semantics = [#tpu.dimension_semantics<parallel>, #tpu.dimension_semantics<arbitrary>], iteration_bounds = array<i64: 2, 8>, scalar_prefetch = 0 : i64, scratch_operands = 4 : i64, tpu.core_type = #tpu.core_type<tc>, window_params = [{transform_indices = @transform_0, window_bounds = array<i64: 1, 1, 256, 36>}, {pipeline_mode = #tpu.pipeline_mode<synchronous>, transform_indices = @transform_1, window_bounds = array<i64: 324, 128>}, {pipeline_mode = #tpu.pipeline_mode<synchronous>, transform_indices = @transform_2, window_bounds = array<i64: 1, 128>}, {transform_indices = @transform_3, window_bounds = array<i64: 1, 1, 16, 16, 32>}, {transform_indices = @transform_4, window_bounds = array<i64: 1, 16, 16, 32>}]} {
    %c0_i32 = arith.constant 0 : i32
    %0 = arith.cmpi eq, %arg1, %c0_i32 : i32
    %1 = arith.extui %0 : i1 to i32
    %c0_i32_0 = arith.constant 0 : i32
    %2 = arith.cmpi ne, %1, %c0_i32_0 : i32
    scf.if %2 {
      %cst_136 = arith.constant 0.000000e+00 : bf16
      %150 = vector.broadcast %cst_136 : bf16 to vector<18x18x32xbf16>
      %c0_137 = arith.constant 0 : index
      %c0_138 = arith.constant 0 : index
      %c0_139 = arith.constant 0 : index
      %151 = vector.load %arg7[%c0_137, %c0_138, %c0_139] : memref<18x18x32xbf16, #tpu.memory_space<vmem>>, vector<18x18x32xbf16>
      tpu.vector_store %arg7[%c0_137, %c0_138, %c0_139], %150 {strides = array<i32>} : memref<18x18x32xbf16, #tpu.memory_space<vmem>>, vector<18x18x32xbf16>,
      %cst_140 = arith.constant 0.000000e+00 : f32
      %152 = vector.broadcast %cst_140 : f32 to vector<256x32xf32>
      %c0_141 = arith.constant 0 : index
      %c0_142 = arith.constant 0 : index
      %153 = vector.load %arg9[%c0_141, %c0_142] : memref<256x32xf32, #tpu.memory_space<vmem>>, vector<256x32xf32>
      tpu.vector_store %arg9[%c0_141, %c0_142], %152 {strides = array<i32>} : memref<256x32xf32, #tpu.memory_space<vmem>>, vector<256x32xf32>,
    } else {
    }
    %c0 = arith.constant 0 : index
    %c0_1 = arith.constant 0 : index
    %c0_2 = arith.constant 0 : index
    %c0_3 = arith.constant 0 : index
    %3 = vector.load %arg2[%c0, %c0_1, %c0_2, %c0_3] : memref<1x1x256x36xbf16, #tpu.memory_space<vmem>>, vector<1x1x128x36xbf16>
    %4 = vector.shape_cast %3 : vector<1x1x128x36xbf16> to vector<128x36xbf16>
    %c0_4 = arith.constant 0 : index
    %c0_5 = arith.constant 0 : index
    %5 = vector.load %arg10[%c0_4, %c0_5] : memref<128x324xbf16, #tpu.memory_space<vmem>>, vector<128x36xbf16>
    tpu.vector_store %arg10[%c0_4, %c0_5], %4 {strides = array<i32>} : memref<128x324xbf16, #tpu.memory_space<vmem>>, vector<128x36xbf16>,
    %c0_6 = arith.constant 0 : index
    %c0_7 = arith.constant 0 : index
    %c0_8 = arith.constant 0 : index
    %6 = vector.load %arg7[%c0_6, %c0_7, %c0_8] : memref<18x18x32xbf16, #tpu.memory_space<vmem>>, vector<8x16x32xbf16>
    %7 = vector.shape_cast %6 : vector<8x16x32xbf16> to vector<128x32xbf16>
    %c0_9 = arith.constant 0 : index
    %c36 = arith.constant 36 : index
    %8 = vector.load %arg10[%c0_9, %c36] : memref<128x324xbf16, #tpu.memory_space<vmem>>, vector<128x32xbf16>
    tpu.vector_store %arg10[%c0_9, %c36], %7 {strides = array<i32>} : memref<128x324xbf16, #tpu.memory_space<vmem>>, vector<128x32xbf16>,
    %c0_10 = arith.constant 0 : index
    %c1 = arith.constant 1 : index
    %c0_11 = arith.constant 0 : index
    %9 = vector.load %arg7[%c0_10, %c1, %c0_11] : memref<18x18x32xbf16, #tpu.memory_space<vmem>>, vector<8x16x32xbf16>
    %10 = vector.shape_cast %9 : vector<8x16x32xbf16> to vector<128x32xbf16>
    %c0_12 = arith.constant 0 : index
    %c68 = arith.constant 68 : index
    %11 = vector.load %arg10[%c0_12, %c68] : memref<128x324xbf16, #tpu.memory_space<vmem>>, vector<128x32xbf16>
    tpu.vector_store %arg10[%c0_12, %c68], %10 {strides = array<i32>} : memref<128x324xbf16, #tpu.memory_space<vmem>>, vector<128x32xbf16>,
    %c0_13 = arith.constant 0 : index
    %c2 = arith.constant 2 : index
    %c0_14 = arith.constant 0 : index
    %12 = vector.load %arg7[%c0_13, %c2, %c0_14] : memref<18x18x32xbf16, #tpu.memory_space<vmem>>, vector<8x16x32xbf16>
    %13 = vector.shape_cast %12 : vector<8x16x32xbf16> to vector<128x32xbf16>
    %c0_15 = arith.constant 0 : index
    %c100 = arith.constant 100 : index
    %14 = vector.load %arg10[%c0_15, %c100] : memref<128x324xbf16, #tpu.memory_space<vmem>>, vector<128x32xbf16>
    tpu.vector_store %arg10[%c0_15, %c100], %13 {strides = array<i32>} : memref<128x324xbf16, #tpu.memory_space<vmem>>, vector<128x32xbf16>,
    %c1_16 = arith.constant 1 : index
    %c0_17 = arith.constant 0 : index
    %c0_18 = arith.constant 0 : index
    %15 = vector.load %arg7[%c1_16, %c0_17, %c0_18] : memref<18x18x32xbf16, #tpu.memory_space<vmem>>, vector<8x16x32xbf16>
    %16 = vector.shape_cast %15 : vector<8x16x32xbf16> to vector<128x32xbf16>
    %c0_19 = arith.constant 0 : index
    %c132 = arith.constant 132 : index
    %17 = vector.load %arg10[%c0_19, %c132] : memref<128x324xbf16, #tpu.memory_space<vmem>>, vector<128x32xbf16>
    tpu.vector_store %arg10[%c0_19, %c132], %16 {strides = array<i32>} : memref<128x324xbf16, #tpu.memory_space<vmem>>, vector<128x32xbf16>,
    %c1_20 = arith.constant 1 : index
    %c1_21 = arith.constant 1 : index
    %c0_22 = arith.constant 0 : index
    %18 = vector.load %arg7[%c1_20, %c1_21, %c0_22] : memref<18x18x32xbf16, #tpu.memory_space<vmem>>, vector<8x16x32xbf16>
    %19 = vector.shape_cast %18 : vector<8x16x32xbf16> to vector<128x32xbf16>
    %c0_23 = arith.constant 0 : index
    %c164 = arith.constant 164 : index
    %20 = vector.load %arg10[%c0_23, %c164] : memref<128x324xbf16, #tpu.memory_space<vmem>>, vector<128x32xbf16>
    tpu.vector_store %arg10[%c0_23, %c164], %19 {strides = array<i32>} : memref<128x324xbf16, #tpu.memory_space<vmem>>, vector<128x32xbf16>,
    %c1_24 = arith.constant 1 : index
    %c2_25 = arith.constant 2 : index
    %c0_26 = arith.constant 0 : index
    %21 = vector.load %arg7[%c1_24, %c2_25, %c0_26] : memref<18x18x32xbf16, #tpu.memory_space<vmem>>, vector<8x16x32xbf16>
    %22 = vector.shape_cast %21 : vector<8x16x32xbf16> to vector<128x32xbf16>
    %c0_27 = arith.constant 0 : index
    %c196 = arith.constant 196 : index
    %23 = vector.load %arg10[%c0_27, %c196] : memref<128x324xbf16, #tpu.memory_space<vmem>>, vector<128x32xbf16>
    tpu.vector_store %arg10[%c0_27, %c196], %22 {strides = array<i32>} : memref<128x324xbf16, #tpu.memory_space<vmem>>, vector<128x32xbf16>,
    %c2_28 = arith.constant 2 : index
    %c0_29 = arith.constant 0 : index
    %c0_30 = arith.constant 0 : index
    %24 = vector.load %arg7[%c2_28, %c0_29, %c0_30] : memref<18x18x32xbf16, #tpu.memory_space<vmem>>, vector<8x16x32xbf16>
    %25 = vector.shape_cast %24 : vector<8x16x32xbf16> to vector<128x32xbf16>
    %c0_31 = arith.constant 0 : index
    %c228 = arith.constant 228 : index
    %26 = vector.load %arg10[%c0_31, %c228] : memref<128x324xbf16, #tpu.memory_space<vmem>>, vector<128x32xbf16>
    tpu.vector_store %arg10[%c0_31, %c228], %25 {strides = array<i32>} : memref<128x324xbf16, #tpu.memory_space<vmem>>, vector<128x32xbf16>,
    %c2_32 = arith.constant 2 : index
    %c1_33 = arith.constant 1 : index
    %c0_34 = arith.constant 0 : index
    %27 = vector.load %arg7[%c2_32, %c1_33, %c0_34] : memref<18x18x32xbf16, #tpu.memory_space<vmem>>, vector<8x16x32xbf16>
    %28 = vector.shape_cast %27 : vector<8x16x32xbf16> to vector<128x32xbf16>
    %c0_35 = arith.constant 0 : index
    %c260 = arith.constant 260 : index
    %29 = vector.load %arg10[%c0_35, %c260] : memref<128x324xbf16, #tpu.memory_space<vmem>>, vector<128x32xbf16>
    tpu.vector_store %arg10[%c0_35, %c260], %28 {strides = array<i32>} : memref<128x324xbf16, #tpu.memory_space<vmem>>, vector<128x32xbf16>,
    %c2_36 = arith.constant 2 : index
    %c2_37 = arith.constant 2 : index
    %c0_38 = arith.constant 0 : index
    %30 = vector.load %arg7[%c2_36, %c2_37, %c0_38] : memref<18x18x32xbf16, #tpu.memory_space<vmem>>, vector<8x16x32xbf16>
    %31 = vector.shape_cast %30 : vector<8x16x32xbf16> to vector<128x32xbf16>
    %c0_39 = arith.constant 0 : index
    %c292 = arith.constant 292 : index
    %32 = vector.load %arg10[%c0_39, %c292] : memref<128x324xbf16, #tpu.memory_space<vmem>>, vector<128x32xbf16>
    tpu.vector_store %arg10[%c0_39, %c292], %31 {strides = array<i32>} : memref<128x324xbf16, #tpu.memory_space<vmem>>, vector<128x32xbf16>,
    %c0_40 = arith.constant 0 : index
    %c0_41 = arith.constant 0 : index
    %33 = vector.load %arg10[%c0_40, %c0_41] : memref<128x324xbf16, #tpu.memory_space<vmem>>, vector<128x324xbf16>
    %c0_42 = arith.constant 0 : index
    %c0_43 = arith.constant 0 : index
    %34 = vector.load %arg3[%c0_42, %c0_43] : memref<324x128xbf16, #tpu.memory_space<vmem>>, vector<324x128xbf16>
    %cst = arith.constant dense<0.000000e+00> : vector<128x128xf32>
    %35 = tpu.matmul %33, %34, %cst {dimension_numbers = #tpu.dot_dimension_numbers<[1], [0], [0], [1], [0, 0, 1, 1], [], []>} : vector<128x324xbf16>, vector<324x128xbf16>, vector<128x128xf32> -> vector<128x128xf32>
    %c0_44 = arith.constant 0 : index
    %c0_45 = arith.constant 0 : index
    %36 = vector.load %arg4[%c0_44, %c0_45] : memref<1x128xf32, #tpu.memory_space<vmem>>, vector<1x128xf32>
    %37 = vector.broadcast %36 : vector<1x128xf32> to vector<128x128xf32>
    %38 = arith.addf %35, %37 : vector<128x128xf32>
    %39 = vector.extract_strided_slice %38 {offsets = [0, 0], sizes = [128, 32], strides = [1, 1]} : vector<128x128xf32> to vector<128x32xf32>
    %40 = arith.negf %39 : vector<128x32xf32>
    %41 = math.exp %40 : vector<128x32xf32>
    %cst_46 = arith.constant 1.000000e+00 : f32
    %42 = vector.broadcast %cst_46 : f32 to vector<128x32xf32>
    %43 = arith.addf %42, %41 : vector<128x32xf32>
    %44 = arith.divf %42, %43 : vector<128x32xf32>
    %45 = vector.extract_strided_slice %38 {offsets = [0, 32], sizes = [128, 32], strides = [1, 1]} : vector<128x128xf32> to vector<128x32xf32>
    %46 = arith.negf %45 : vector<128x32xf32>
    %47 = math.exp %46 : vector<128x32xf32>
    %cst_47 = arith.constant 1.000000e+00 : f32
    %48 = vector.broadcast %cst_47 : f32 to vector<128x32xf32>
    %49 = arith.addf %48, %47 : vector<128x32xf32>
    %50 = arith.divf %48, %49 : vector<128x32xf32>
    %51 = vector.extract_strided_slice %38 {offsets = [0, 64], sizes = [128, 32], strides = [1, 1]} : vector<128x128xf32> to vector<128x32xf32>
    %52 = arith.negf %51 : vector<128x32xf32>
    %53 = math.exp %52 : vector<128x32xf32>
    %cst_48 = arith.constant 1.000000e+00 : f32
    %54 = vector.broadcast %cst_48 : f32 to vector<128x32xf32>
    %55 = arith.addf %54, %53 : vector<128x32xf32>
    %56 = arith.divf %54, %55 : vector<128x32xf32>
    %57 = vector.extract_strided_slice %38 {offsets = [0, 96], sizes = [128, 32], strides = [1, 1]} : vector<128x128xf32> to vector<128x32xf32>
    %58 = math.tanh %57 : vector<128x32xf32>
    %c0_49 = arith.constant 0 : index
    %c0_50 = arith.constant 0 : index
    %59 = vector.load %arg9[%c0_49, %c0_50] : memref<256x32xf32, #tpu.memory_space<vmem>>, vector<128x32xf32>
    %60 = arith.mulf %50, %59 : vector<128x32xf32>
    %61 = arith.mulf %44, %58 : vector<128x32xf32>
    %62 = arith.addf %60, %61 : vector<128x32xf32>
    %63 = math.tanh %62 : vector<128x32xf32>
    %64 = arith.mulf %56, %63 : vector<128x32xf32>
    %c0_51 = arith.constant 0 : index
    %c0_52 = arith.constant 0 : index
    %65 = vector.load %arg9[%c0_51, %c0_52] : memref<256x32xf32, #tpu.memory_space<vmem>>, vector<128x32xf32>
    tpu.vector_store %arg9[%c0_51, %c0_52], %62 {strides = array<i32>} : memref<256x32xf32, #tpu.memory_space<vmem>>, vector<128x32xf32>,
    %66 = arith.truncf %64 : vector<128x32xf32> to vector<128x32xbf16>
    %c0_53 = arith.constant 0 : index
    %c0_54 = arith.constant 0 : index
    %67 = vector.load %arg8[%c0_53, %c0_54] : memref<256x32xbf16, #tpu.memory_space<vmem>>, vector<128x32xbf16>
    tpu.vector_store %arg8[%c0_53, %c0_54], %66 {strides = array<i32>} : memref<256x32xbf16, #tpu.memory_space<vmem>>, vector<128x32xbf16>,
    %68 = vector.shape_cast %64 : vector<128x32xf32> to vector<8x16x32xf32>
    %c0_55 = arith.constant 0 : index
    %c0_56 = arith.constant 0 : index
    %c0_57 = arith.constant 0 : index
    %c0_58 = arith.constant 0 : index
    %c0_59 = arith.constant 0 : index
    %69 = vector.load %arg5[%c0_55, %c0_56, %c0_57, %c0_58, %c0_59] : memref<1x1x16x16x32xf32, #tpu.memory_space<vmem>>, vector<1x1x8x16x32xf32>
    %70 = vector.shape_cast %69 : vector<1x1x8x16x32xf32> to vector<8x16x32xf32>
    %71 = vector.shape_cast %68 : vector<8x16x32xf32> to vector<1x1x8x16x32xf32>
    tpu.vector_store %arg5[%c0_55, %c0_56, %c0_57, %c0_58, %c0_59], %71 {strides = array<i32>} : memref<1x1x16x16x32xf32, #tpu.memory_space<vmem>>, vector<1x1x8x16x32xf32>,
    %c7_i32 = arith.constant 7 : i32
    %72 = arith.cmpi eq, %arg1, %c7_i32 : i32
    %73 = arith.extui %72 : i1 to i32
    %c0_i32_60 = arith.constant 0 : i32
    %74 = arith.cmpi ne, %73, %c0_i32_60 : i32
    scf.if %74 {
      %150 = vector.shape_cast %62 : vector<128x32xf32> to vector<8x16x32xf32>
      %c0_136 = arith.constant 0 : index
      %c0_137 = arith.constant 0 : index
      %c0_138 = arith.constant 0 : index
      %c0_139 = arith.constant 0 : index
      %151 = vector.load %arg6[%c0_136, %c0_137, %c0_138, %c0_139] : memref<1x16x16x32xf32, #tpu.memory_space<vmem>>, vector<1x8x16x32xf32>
      %152 = vector.shape_cast %151 : vector<1x8x16x32xf32> to vector<8x16x32xf32>
      %153 = vector.shape_cast %150 : vector<8x16x32xf32> to vector<1x8x16x32xf32>
      tpu.vector_store %arg6[%c0_136, %c0_137, %c0_138, %c0_139], %153 {strides = array<i32>} : memref<1x16x16x32xf32, #tpu.memory_space<vmem>>, vector<1x8x16x32xf32>,
    } else {
    }
    %c0_61 = arith.constant 0 : index
    %c0_62 = arith.constant 0 : index
    %c128 = arith.constant 128 : index
    %c0_63 = arith.constant 0 : index
    %75 = vector.load %arg2[%c0_61, %c0_62, %c128, %c0_63] : memref<1x1x256x36xbf16, #tpu.memory_space<vmem>>, vector<1x1x128x36xbf16>
    %76 = vector.shape_cast %75 : vector<1x1x128x36xbf16> to vector<128x36xbf16>
    %c0_64 = arith.constant 0 : index
    %c0_65 = arith.constant 0 : index
    %77 = vector.load %arg10[%c0_64, %c0_65] : memref<128x324xbf16, #tpu.memory_space<vmem>>, vector<128x36xbf16>
    tpu.vector_store %arg10[%c0_64, %c0_65], %76 {strides = array<i32>} : memref<128x324xbf16, #tpu.memory_space<vmem>>, vector<128x36xbf16>,
    %c8 = arith.constant 8 : index
    %c0_66 = arith.constant 0 : index
    %c0_67 = arith.constant 0 : index
    %78 = vector.load %arg7[%c8, %c0_66, %c0_67] : memref<18x18x32xbf16, #tpu.memory_space<vmem>>, vector<8x16x32xbf16>
    %79 = vector.shape_cast %78 : vector<8x16x32xbf16> to vector<128x32xbf16>
    %c0_68 = arith.constant 0 : index
    %c36_69 = arith.constant 36 : index
    %80 = vector.load %arg10[%c0_68, %c36_69] : memref<128x324xbf16, #tpu.memory_space<vmem>>, vector<128x32xbf16>
    tpu.vector_store %arg10[%c0_68, %c36_69], %79 {strides = array<i32>} : memref<128x324xbf16, #tpu.memory_space<vmem>>, vector<128x32xbf16>,
    %c8_70 = arith.constant 8 : index
    %c1_71 = arith.constant 1 : index
    %c0_72 = arith.constant 0 : index
    %81 = vector.load %arg7[%c8_70, %c1_71, %c0_72] : memref<18x18x32xbf16, #tpu.memory_space<vmem>>, vector<8x16x32xbf16>
    %82 = vector.shape_cast %81 : vector<8x16x32xbf16> to vector<128x32xbf16>
    %c0_73 = arith.constant 0 : index
    %c68_74 = arith.constant 68 : index
    %83 = vector.load %arg10[%c0_73, %c68_74] : memref<128x324xbf16, #tpu.memory_space<vmem>>, vector<128x32xbf16>
    tpu.vector_store %arg10[%c0_73, %c68_74], %82 {strides = array<i32>} : memref<128x324xbf16, #tpu.memory_space<vmem>>, vector<128x32xbf16>,
    %c8_75 = arith.constant 8 : index
    %c2_76 = arith.constant 2 : index
    %c0_77 = arith.constant 0 : index
    %84 = vector.load %arg7[%c8_75, %c2_76, %c0_77] : memref<18x18x32xbf16, #tpu.memory_space<vmem>>, vector<8x16x32xbf16>
    %85 = vector.shape_cast %84 : vector<8x16x32xbf16> to vector<128x32xbf16>
    %c0_78 = arith.constant 0 : index
    %c100_79 = arith.constant 100 : index
    %86 = vector.load %arg10[%c0_78, %c100_79] : memref<128x324xbf16, #tpu.memory_space<vmem>>, vector<128x32xbf16>
    tpu.vector_store %arg10[%c0_78, %c100_79], %85 {strides = array<i32>} : memref<128x324xbf16, #tpu.memory_space<vmem>>, vector<128x32xbf16>,
    %c9 = arith.constant 9 : index
    %c0_80 = arith.constant 0 : index
    %c0_81 = arith.constant 0 : index
    %87 = vector.load %arg7[%c9, %c0_80, %c0_81] : memref<18x18x32xbf16, #tpu.memory_space<vmem>>, vector<8x16x32xbf16>
    %88 = vector.shape_cast %87 : vector<8x16x32xbf16> to vector<128x32xbf16>
    %c0_82 = arith.constant 0 : index
    %c132_83 = arith.constant 132 : index
    %89 = vector.load %arg10[%c0_82, %c132_83] : memref<128x324xbf16, #tpu.memory_space<vmem>>, vector<128x32xbf16>
    tpu.vector_store %arg10[%c0_82, %c132_83], %88 {strides = array<i32>} : memref<128x324xbf16, #tpu.memory_space<vmem>>, vector<128x32xbf16>,
    %c9_84 = arith.constant 9 : index
    %c1_85 = arith.constant 1 : index
    %c0_86 = arith.constant 0 : index
    %90 = vector.load %arg7[%c9_84, %c1_85, %c0_86] : memref<18x18x32xbf16, #tpu.memory_space<vmem>>, vector<8x16x32xbf16>
    %91 = vector.shape_cast %90 : vector<8x16x32xbf16> to vector<128x32xbf16>
    %c0_87 = arith.constant 0 : index
    %c164_88 = arith.constant 164 : index
    %92 = vector.load %arg10[%c0_87, %c164_88] : memref<128x324xbf16, #tpu.memory_space<vmem>>, vector<128x32xbf16>
    tpu.vector_store %arg10[%c0_87, %c164_88], %91 {strides = array<i32>} : memref<128x324xbf16, #tpu.memory_space<vmem>>, vector<128x32xbf16>,
    %c9_89 = arith.constant 9 : index
    %c2_90 = arith.constant 2 : index
    %c0_91 = arith.constant 0 : index
    %93 = vector.load %arg7[%c9_89, %c2_90, %c0_91] : memref<18x18x32xbf16, #tpu.memory_space<vmem>>, vector<8x16x32xbf16>
    %94 = vector.shape_cast %93 : vector<8x16x32xbf16> to vector<128x32xbf16>
    %c0_92 = arith.constant 0 : index
    %c196_93 = arith.constant 196 : index
    %95 = vector.load %arg10[%c0_92, %c196_93] : memref<128x324xbf16, #tpu.memory_space<vmem>>, vector<128x32xbf16>
    tpu.vector_store %arg10[%c0_92, %c196_93], %94 {strides = array<i32>} : memref<128x324xbf16, #tpu.memory_space<vmem>>, vector<128x32xbf16>,
    %c10 = arith.constant 10 : index
    %c0_94 = arith.constant 0 : index
    %c0_95 = arith.constant 0 : index
    %96 = vector.load %arg7[%c10, %c0_94, %c0_95] : memref<18x18x32xbf16, #tpu.memory_space<vmem>>, vector<8x16x32xbf16>
    %97 = vector.shape_cast %96 : vector<8x16x32xbf16> to vector<128x32xbf16>
    %c0_96 = arith.constant 0 : index
    %c228_97 = arith.constant 228 : index
    %98 = vector.load %arg10[%c0_96, %c228_97] : memref<128x324xbf16, #tpu.memory_space<vmem>>, vector<128x32xbf16>
    tpu.vector_store %arg10[%c0_96, %c228_97], %97 {strides = array<i32>} : memref<128x324xbf16, #tpu.memory_space<vmem>>, vector<128x32xbf16>,
    %c10_98 = arith.constant 10 : index
    %c1_99 = arith.constant 1 : index
    %c0_100 = arith.constant 0 : index
    %99 = vector.load %arg7[%c10_98, %c1_99, %c0_100] : memref<18x18x32xbf16, #tpu.memory_space<vmem>>, vector<8x16x32xbf16>
    %100 = vector.shape_cast %99 : vector<8x16x32xbf16> to vector<128x32xbf16>
    %c0_101 = arith.constant 0 : index
    %c260_102 = arith.constant 260 : index
    %101 = vector.load %arg10[%c0_101, %c260_102] : memref<128x324xbf16, #tpu.memory_space<vmem>>, vector<128x32xbf16>
    tpu.vector_store %arg10[%c0_101, %c260_102], %100 {strides = array<i32>} : memref<128x324xbf16, #tpu.memory_space<vmem>>, vector<128x32xbf16>,
    %c10_103 = arith.constant 10 : index
    %c2_104 = arith.constant 2 : index
    %c0_105 = arith.constant 0 : index
    %102 = vector.load %arg7[%c10_103, %c2_104, %c0_105] : memref<18x18x32xbf16, #tpu.memory_space<vmem>>, vector<8x16x32xbf16>
    %103 = vector.shape_cast %102 : vector<8x16x32xbf16> to vector<128x32xbf16>
    %c0_106 = arith.constant 0 : index
    %c292_107 = arith.constant 292 : index
    %104 = vector.load %arg10[%c0_106, %c292_107] : memref<128x324xbf16, #tpu.memory_space<vmem>>, vector<128x32xbf16>
    tpu.vector_store %arg10[%c0_106, %c292_107], %103 {strides = array<i32>} : memref<128x324xbf16, #tpu.memory_space<vmem>>, vector<128x32xbf16>,
    %c0_108 = arith.constant 0 : index
    %c0_109 = arith.constant 0 : index
    %105 = vector.load %arg10[%c0_108, %c0_109] : memref<128x324xbf16, #tpu.memory_space<vmem>>, vector<128x324xbf16>
    %c0_110 = arith.constant 0 : index
    %c0_111 = arith.constant 0 : index
    %106 = vector.load %arg3[%c0_110, %c0_111] : memref<324x128xbf16, #tpu.memory_space<vmem>>, vector<324x128xbf16>
    %cst_112 = arith.constant dense<0.000000e+00> : vector<128x128xf32>
    %107 = tpu.matmul %105, %106, %cst_112 {dimension_numbers = #tpu.dot_dimension_numbers<[1], [0], [0], [1], [0, 0, 1, 1], [], []>} : vector<128x324xbf16>, vector<324x128xbf16>, vector<128x128xf32> -> vector<128x128xf32>
    %c0_113 = arith.constant 0 : index
    %c0_114 = arith.constant 0 : index
    %108 = vector.load %arg4[%c0_113, %c0_114] : memref<1x128xf32, #tpu.memory_space<vmem>>, vector<1x128xf32>
    %109 = vector.broadcast %108 : vector<1x128xf32> to vector<128x128xf32>
    %110 = arith.addf %107, %109 : vector<128x128xf32>
    %111 = vector.extract_strided_slice %110 {offsets = [0, 0], sizes = [128, 32], strides = [1, 1]} : vector<128x128xf32> to vector<128x32xf32>
    %112 = arith.negf %111 : vector<128x32xf32>
    %113 = math.exp %112 : vector<128x32xf32>
    %cst_115 = arith.constant 1.000000e+00 : f32
    %114 = vector.broadcast %cst_115 : f32 to vector<128x32xf32>
    %115 = arith.addf %114, %113 : vector<128x32xf32>
    %116 = arith.divf %114, %115 : vector<128x32xf32>
    %117 = vector.extract_strided_slice %110 {offsets = [0, 32], sizes = [128, 32], strides = [1, 1]} : vector<128x128xf32> to vector<128x32xf32>
    %118 = arith.negf %117 : vector<128x32xf32>
    %119 = math.exp %118 : vector<128x32xf32>
    %cst_116 = arith.constant 1.000000e+00 : f32
    %120 = vector.broadcast %cst_116 : f32 to vector<128x32xf32>
    %121 = arith.addf %120, %119 : vector<128x32xf32>
    %122 = arith.divf %120, %121 : vector<128x32xf32>
    %123 = vector.extract_strided_slice %110 {offsets = [0, 64], sizes = [128, 32], strides = [1, 1]} : vector<128x128xf32> to vector<128x32xf32>
    %124 = arith.negf %123 : vector<128x32xf32>
    %125 = math.exp %124 : vector<128x32xf32>
    %cst_117 = arith.constant 1.000000e+00 : f32
    %126 = vector.broadcast %cst_117 : f32 to vector<128x32xf32>
    %127 = arith.addf %126, %125 : vector<128x32xf32>
    %128 = arith.divf %126, %127 : vector<128x32xf32>
    %129 = vector.extract_strided_slice %110 {offsets = [0, 96], sizes = [128, 32], strides = [1, 1]} : vector<128x128xf32> to vector<128x32xf32>
    %130 = math.tanh %129 : vector<128x32xf32>
    %c128_118 = arith.constant 128 : index
    %c0_119 = arith.constant 0 : index
    %131 = vector.load %arg9[%c128_118, %c0_119] : memref<256x32xf32, #tpu.memory_space<vmem>>, vector<128x32xf32>
    %132 = arith.mulf %122, %131 : vector<128x32xf32>
    %133 = arith.mulf %116, %130 : vector<128x32xf32>
    %134 = arith.addf %132, %133 : vector<128x32xf32>
    %135 = math.tanh %134 : vector<128x32xf32>
    %136 = arith.mulf %128, %135 : vector<128x32xf32>
    %c128_120 = arith.constant 128 : index
    %c0_121 = arith.constant 0 : index
    %137 = vector.load %arg9[%c128_120, %c0_121] : memref<256x32xf32, #tpu.memory_space<vmem>>, vector<128x32xf32>
    tpu.vector_store %arg9[%c128_120, %c0_121], %134 {strides = array<i32>} : memref<256x32xf32, #tpu.memory_space<vmem>>, vector<128x32xf32>,
    %138 = arith.truncf %136 : vector<128x32xf32> to vector<128x32xbf16>
    %c128_122 = arith.constant 128 : index
    %c0_123 = arith.constant 0 : index
    %139 = vector.load %arg8[%c128_122, %c0_123] : memref<256x32xbf16, #tpu.memory_space<vmem>>, vector<128x32xbf16>
    tpu.vector_store %arg8[%c128_122, %c0_123], %138 {strides = array<i32>} : memref<256x32xbf16, #tpu.memory_space<vmem>>, vector<128x32xbf16>,
    %140 = vector.shape_cast %136 : vector<128x32xf32> to vector<8x16x32xf32>
    %c0_124 = arith.constant 0 : index
    %c0_125 = arith.constant 0 : index
    %c8_126 = arith.constant 8 : index
    %c0_127 = arith.constant 0 : index
    %c0_128 = arith.constant 0 : index
    %141 = vector.load %arg5[%c0_124, %c0_125, %c8_126, %c0_127, %c0_128] : memref<1x1x16x16x32xf32, #tpu.memory_space<vmem>>, vector<1x1x8x16x32xf32>
    %142 = vector.shape_cast %141 : vector<1x1x8x16x32xf32> to vector<8x16x32xf32>
    %143 = vector.shape_cast %140 : vector<8x16x32xf32> to vector<1x1x8x16x32xf32>
    tpu.vector_store %arg5[%c0_124, %c0_125, %c8_126, %c0_127, %c0_128], %143 {strides = array<i32>} : memref<1x1x16x16x32xf32, #tpu.memory_space<vmem>>, vector<1x1x8x16x32xf32>,
    %c7_i32_129 = arith.constant 7 : i32
    %144 = arith.cmpi eq, %arg1, %c7_i32_129 : i32
    %145 = arith.extui %144 : i1 to i32
    %c0_i32_130 = arith.constant 0 : i32
    %146 = arith.cmpi ne, %145, %c0_i32_130 : i32
    scf.if %146 {
      %150 = vector.shape_cast %134 : vector<128x32xf32> to vector<8x16x32xf32>
      %c0_136 = arith.constant 0 : index
      %c8_137 = arith.constant 8 : index
      %c0_138 = arith.constant 0 : index
      %c0_139 = arith.constant 0 : index
      %151 = vector.load %arg6[%c0_136, %c8_137, %c0_138, %c0_139] : memref<1x16x16x32xf32, #tpu.memory_space<vmem>>, vector<1x8x16x32xf32>
      %152 = vector.shape_cast %151 : vector<1x8x16x32xf32> to vector<8x16x32xf32>
      %153 = vector.shape_cast %150 : vector<8x16x32xf32> to vector<1x8x16x32xf32>
      tpu.vector_store %arg6[%c0_136, %c8_137, %c0_138, %c0_139], %153 {strides = array<i32>} : memref<1x16x16x32xf32, #tpu.memory_space<vmem>>, vector<1x8x16x32xf32>,
    } else {
    }
    %c0_131 = arith.constant 0 : index
    %c0_132 = arith.constant 0 : index
    %147 = vector.load %arg8[%c0_131, %c0_132] : memref<256x32xbf16, #tpu.memory_space<vmem>>, vector<256x32xbf16>
    %148 = vector.shape_cast %147 : vector<256x32xbf16> to vector<16x16x32xbf16>
    %c1_133 = arith.constant 1 : index
    %c1_134 = arith.constant 1 : index
    %c0_135 = arith.constant 0 : index
    %149 = vector.load %arg7[%c1_133, %c1_134, %c0_135] : memref<18x18x32xbf16, #tpu.memory_space<vmem>>, vector<16x16x32xbf16>
    tpu.vector_store %arg7[%c1_133, %c1_134, %c0_135], %148 {strides = array<i32>} : memref<18x18x32xbf16, #tpu.memory_space<vmem>>, vector<16x16x32xbf16>,
    return
  }
  func.func @transform_0(%arg0: i32, %arg1: i32) -> (i32, i32, i32, i32) {
    %c0_i32 = arith.constant 0 : i32
    %c0_i32_0 = arith.constant 0 : i32
    %c0_i32_1 = arith.constant 0 : i32
    return %arg0, %arg1, %c0_i32, %c0_i32_0 : i32, i32, i32, i32
  }
  func.func @transform_1(%arg0: i32, %arg1: i32) -> (i32, i32) {
    %c0_i32 = arith.constant 0 : i32
    %c0_i32_0 = arith.constant 0 : i32
    %c0_i32_1 = arith.constant 0 : i32
    return %c0_i32, %c0_i32_0 : i32, i32
  }
  func.func @transform_2(%arg0: i32, %arg1: i32) -> (i32, i32) {
    %c0_i32 = arith.constant 0 : i32
    %c0_i32_0 = arith.constant 0 : i32
    %c0_i32_1 = arith.constant 0 : i32
    return %c0_i32, %c0_i32_0 : i32, i32
  }
  func.func @transform_3(%arg0: i32, %arg1: i32) -> (i32, i32, i32, i32, i32) {
    %c0_i32 = arith.constant 0 : i32
    %c0_i32_0 = arith.constant 0 : i32
    %c0_i32_1 = arith.constant 0 : i32
    %c0_i32_2 = arith.constant 0 : i32
    return %arg0, %arg1, %c0_i32, %c0_i32_0, %c0_i32_1 : i32, i32, i32, i32, i32
  }
  func.func @transform_4(%arg0: i32, %arg1: i32) -> (i32, i32, i32, i32) {
    %c0_i32 = arith.constant 0 : i32
    %c0_i32_0 = arith.constant 0 : i32
    %c0_i32_1 = arith.constant 0 : i32
    %c0_i32_2 = arith.constant 0 : i32
    return %arg0, %c0_i32, %c0_i32_0, %c0_i32_1 : i32, i32, i32, i32
  }
}

</mosaic_0001>

<bundles_post_ra>
// kernel: tpu_custom_call.1
= control target key start
LH: loop header
LB: loop body
LE: loop exit
PB: predicated region body
PF: predicated region fallthrough
CT: control target
= control target key end

     0   :  { %s11168_s0 = inlined_call_operand.vmem [shape: bf16[2,8,256,36], index: 0, kind: input, shape index: {}]   ;;  %s11169_s1 = inlined_call_operand.hbm [shape: bf16[324,128], index: 1, kind: input, shape index: {}]   ;;  %s11170_s2 = inlined_call_operand.hbm [shape: f32[1,128], index: 2, kind: input, shape index: {}]   ;;  %s11171_s3 = inlined_call_operand.hbm [shape: f32[2,8,16,16,32], index: 3, kind: output, shape index: {0}]   ;;  %s11172_s4 = inlined_call_operand.hbm [shape: f32[2,16,16,32], index: 4, kind: output, shape index: {1}]  }
   0x1   :  { %11180 = sst [smem:[#allocation24_spill]] %s11169_s1 }
   0x2   :  { %11181 = sst [smem:[#allocation25_spill]] %s11170_s2 }
   0x3   :  { %10 = vsyncpa [#allocation7], 0 }
   0x4   :  { %11 = vsyncpa [#allocation10], 0 }
   0x5   :  { %12 = vsyncpa [#allocation8], 0 }
   0x6   :  { %14 = vsyncpa [#allocation8 + $0x1], 0 }
   0x7   :  { %15 = vsyncpa [#allocation13], 0 }
   0x8   :  { %17 = vsyncpa [#allocation13 + $0x1], 0  ;;  %s8350_s15 = smov 0   ;;  %s8352_s16 = smov 0  }
   0x9   :  { %s8354_s17 = smov 0   ;;  %s8356_s18 = smov 0  }
   0xa   :  { %s8358_s19 = smov 0   ;;  %s8360_s20 = smov 0  }
   0xb   :  { %s8362_s21 = smov 0   ;;  %s8364_s22 = smov 0  }
   0xc   :  { %s8366_s23 = smov 0   ;;  %s8368_s24 = smov 0  }
   0xd   :  { %s8370_s25 = smov 0  }
   0xe LB: > { %11182 = sst [smem:[#allocation18_spill]] %s8286_s20  ;;  %s11173_s26 = sadd.s32 4294967295, %s8306_s25   ;;  %s8306_s25 = sphi %s8370_s25, %s23_s25   ;;  %s8302_s24 = sphi %s8368_s24, %s11220_s24   ;;  %s8298_s23 = sphi %s8366_s23, %s11219_s23   ;;  %s8294_s22 = sphi %s8364_s22, %s11218_s22   ;;  %s8290_s21 = sphi %s8362_s21, %s11217_s21   ;;  %s8286_s20 = sphi %s8360_s20, %s11216_s20   ;;  %s8282_s19 = sphi %s8358_s19, %s11225_s19   ;;  %s8278_s18 = sphi %s8356_s18, %s11224_s18   ;;  %s8274_s17 = sphi %s8354_s17, %s11223_s17   ;;  %s8270_s16 = sphi %s8352_s16, %s11222_s16   ;;  %s8266_s15 = sphi %s8350_s15, %s11221_s15  }
   0xf   : > { %11183 = sst [smem:[#allocation19_spill]] %s8298_s23  ;;  %s7086_s27 = sadd.s32 4294967294, %s8306_s25  }
  0x10   : > { %11184 = sst [smem:[#allocation20_spill]] %s8302_s24  ;;  %s32_s28 = sadd.s32 1, %s8298_s23 }
  0x11   : > { %s35_s29 = sadd.s32 1, %s8302_s24  ;;  %p33_p0 = scmp.ge.s32.totalorder %s32_s28, 8 }
  0x12   : > { %s114_s30 = sadd.s32 1, %s8286_s20  ;;  %p124_p1 = scmp.ne.s32.totalorder %s8286_s20, %s8282_s19 }
  0x13   : > { %p8414_p2 = scmp.eq.s32.totalorder %s11173_s26, 15  ;;  %s11227_s28 = smov (%p33_p0, %s32_s28), 0 }
  0x14   : > { %11186 = sst [smem:[#allocation21_spill]] %s11227_s28  ;;  %s11229_s29 = smov (!%p33_p0, %s35_s29), %s8302_s24 }
  0x15   : > { %s110_s6 = ssub.s32 %s8298_s23, %s11227_s28  ;;  %p8425_p3 = por %p8414_p2, %p124_p1 }
  0x16   : > { %p37_p4 = scmp.ge.s32.totalorder %s11229_s29, 2  ;;  %p130_p5 = scmp.ne.s32.totalorder %s8282_s19, %s8278_s18 }
  0x17   : > { %p8431_p6 = scmp.eq.s32.totalorder %s7086_s27, 15  ;;  %s140_s9 = sadd.s32 1, %s8274_s17 }
  0x18   : > { %s11231_s29 = smov (%p37_p4, %s11229_s29), 0  ;;  %p150_p8 = scmp.ne.s32.totalorder %s8274_s17, %s8270_s16 }
  0x19   : > { %11189 = sst [smem:[#allocation22_spill]] %s11231_s29  ;;  %p8440_p7 = por %p8431_p6, %p130_p5 }
  0x1a   : > { %s109_s11 = ssub.s32 %s8302_s24, %s11231_s29  ;;  %p156_p9 = scmp.ne.s32.totalorder %s8270_s16, %s8266_s15 }
  0x1b   : > { %s11190_s10 = scalar_select %p8440_p7, 1, 0 }
  0x1c   : > { %s111_s12 = sor.u32 %s110_s6, %s109_s11  ;;  %p138_p10 = scmp.eq.s32.totalorder %s109_s11, 0 }
  0x1d   : > { %p112_p11 = scmp.eq.s32.totalorder %s111_s12, 0  ;;  %p8452_p12 = por %p150_p8, %p8414_p2 }
  0x1e   : > { %s8457_s14 = scalar_select %p138_p10, %s8274_s17, %s140_s9  }
  0x1f   : > { %s11191_s13 = scalar_select %p8452_p12, 1, 0 }
  0x20   : > { %s8460_s27 = scalar_select %p112_p11, %s8286_s20, %s114_s30  }
  0x21   : > { %p8464_p13 = por %p156_p9, %p8431_p6  ;;  %p7087_p0 = scmp.ge.s32.totalorder %s8306_s25, 1 }
  0x22   : > { %11192 = sst [smem:[#allocation23_spill]] %s8460_s27  ;;  %p164_p1 = scmp.lt.s32.totalorder %s8306_s25, 17 }
  0x23   : > { %s11193_s26 = scalar_select %p8464_p13, 1, 0 }
  0x24   : > { %s11194_s29 = sadd.s32 4294967295, %s8306_s25   ;;  %p8476_p2 = pnand %p7087_p0, %p164_p1 }
  0x25   : > { %p8472_p4 = scmp.eq.s32.totalorder %s11194_s29, 0  ;;  %s8308_s30 = smov [#allocation6]  }
  0x26   : > { %s176_s9 = sshll.u32 %s8308_s30, 4  ;;  %p7616_p5 = pneg %p8476_p2  ;;  %s177_s9 = int_to_ptr.vmem [resolvable:$true] %s176_s9 }
  0x27   : > { %s8309_s29 = smov [#allocation9]   ;;  %s8111_s12 = scalar_lea.vmem %s177_s9, 2624 }
  0x28   : > { %p8484_p6 = pnand %p8472_p4, %p7616_p5  ;;  %s190_s11 = sshll.u32 %s8309_s29, 4  ;;  %s191_s11 = int_to_ptr.vmem [resolvable:$true] %s190_s11 }
  0x29   : > { %p8112_p9 = scmp.ne.s32.totalorder %s177_s9, %s8111_s12  ;;  %p8119_p0 = scmp.lt.s32.totalorder %s177_s9, %s177_s9 }
  0x2a   : > { %p8102_p8 = pneg %p8484_p6  ;;  %p8120_p1 = scmp.lt.s32.totalorder %s8111_s12, %s8111_s12 }
  0x2c   : > { %p8114_p10 = pnand %p8112_p9, %p8102_p8  ;;  %p8121_p13 = por %p8120_p1, %p8119_p0 }
  0x2e   : > { %p8115_p11 = pneg %p8114_p10 }
  0x30   : > { %p8122_p5 = pnand %p8121_p13, %p8115_p11 }
  0x32   : > { %8125 = shalt.err (!%p8122_p5)
}
  0x33   : > { %s8310_s30 = smov 64   ;;  %s8311_s28 = smov 4  }
  0x34   : > { %s11198_s1 = sld [smem:[#allocation24_spill]]  ;;  %s8137_s23 = scalar_lea.vmem %s191_s11, 16 }
  0x35   : > { %p8138_p7 = scmp.ne.s32.totalorder %s191_s11, %s8137_s23  ;;  %s8144_s27 = scalar_lea.vmem %s191_s11, 32 }
  0x36   : > { %p8145_p12 = scmp.lt.s32.totalorder %s191_s11, %s191_s11  ;;  %p8146_p0 = scmp.lt.s32.totalorder %s8144_s27, %s8137_s23 }
  0x37   : > { %p8140_p9 = pnand %p8138_p7, %p8102_p8 }
  0x38   : > { %p8147_p13 = por %p8146_p0, %p8145_p12 }
  0x39   : > { %p8141_p10 = pneg %p8140_p9 }
  0x3a   : > { %7619 = dma.hbm_to_vmem [thread:$0]  (!%p8484_p6), %s11198_s1, 2624, %s177_s9, [#allocation7], %s8310_s30, %s8310_s30, %s8311_s28  }
  0x3b   : > { %p8148_p11 = pnand %p8147_p13, %p8141_p10 }
  0x3d   : > { %8151 = shalt.err (!%p8148_p11)
}
  0x3e   : > { %s11199_s2 = sld [smem:[#allocation25_spill]] }
  0x40   : > { %215 = sbr.rel (%p8476_p2) target bundleno = 2494 (0x9be), region = 32 }
  0x44   : > { %7622 = dma.hbm_to_vmem [thread:$0]  (!%p8484_p6), %s11199_s2, 16, %s191_s11, [#allocation10]  }
  0x45   : > { %8249 = dma.done.wait (%p8472_p4), [#allocation7], 2624  }
  0x46   : > { %8251 = vsyncadd (%p8472_p4), [#allocation7], 4294964672 }
  0x47   : > { %8253 = dma.done.wait (%p8472_p4), [#allocation10], 16  }
  0x48   : > { %8255 = vsyncadd (%p8472_p4), [#allocation10], 4294967280  ;;  %s244_s20 = sand.u32 1, %s8282_s19   ;;  %s251_s23 = sand.u32 1, %s8270_s16  }
  0x49   : > { %s7094_s24 = sshll.u32 %s244_s20, 8  ;;  %s7095_s28 = sshll.u32 %s251_s23, 8 }
  0x4a   : > { %p254_p7 = scmp.lt.s32.totalorder %s8294_s22, 1  ;;  %p256_p12 = scmp.lt.s32.totalorder %s8290_s21, 7 }
  0x4b   : > { %s8531_s1 = scalar_lea.vmem [#allocation11], %s7094_s24  ;;  %s8533_s2 = scalar_lea.vmem [#allocation12], %s7095_s28 }
  0x4c   : > { %s255_s27 = scalar_select %p254_p7, %s8294_s22, 1 }
  0x4d   : > { %s257_s5 = scalar_select %p256_p12, %s8290_s21, 7 }
  0x4e   : > { %s7097_s6 = sshll.u32 %s255_s27, 8  ;;  %p7099_p4 = scmp.ne.s32.totalorder %s8290_s21, 0 }
  0x4f   : > { %s7096_s9 = sshll.u32 %s257_s5, 5 }
  0x50   : > { %s260_s8 = sadd.s32 %s7097_s6, %s7096_s9  ;;  %267 = sbr.rel (%p7099_p4) target bundleno = 129 (0x81), region = 44 }
  0x51   : > { %s7098_s11 = sshll.u32 %s260_s8, 2 }
  0x52   : > { %s8529_s12 = scalar_lea.vmem %s11168_s0, %s7098_s11 }
  0x55   : > { %vm268_vm0 = vcmask 257024   ;;  %vm271_vm1 = vcmask 253952   ;;  %vm324_vm2 = vcmask 261120   ;;  %v8312_v0 = vmov 0  }
  0x56   : > { %269 = vst.msk [vmem:[#allocation2] sm:$0xf] %vm268_vm0, %v8312_v0  ;;  %270 = vst.msk [vmem:[#allocation2 + $0x4] sm:$0xf] %vm268_vm0, %v8312_v0  ;;  %v8313_v1 = vmov 0.0  }
  0x57   : > { %273 = vst.msk [vmem:[#allocation2 + $0xc] sm:$0xf] %vm268_vm0, %v8312_v0  ;;  %274 = vst.msk [vmem:[#allocation2 + $0x10] sm:$0xf] %vm268_vm0, %v8312_v0 }
  0x58   : > { %276 = vst.msk [vmem:[#allocation2 + $0x18] sm:$0xf] %vm268_vm0, %v8312_v0  ;;  %277 = vst.msk [vmem:[#allocation2 + $0x1c] sm:$0xf] %vm268_vm0, %v8312_v0 }
  0x59   : > { %279 = vst.msk [vmem:[#allocation2 + $0x24] sm:$0xf] %vm268_vm0, %v8312_v0  ;;  %280 = vst.msk [vmem:[#allocation2 + $0x28] sm:$0xf] %vm268_vm0, %v8312_v0 }
  0x5a   : > { %282 = vst.msk [vmem:[#allocation2 + $0x30] sm:$0xf] %vm268_vm0, %v8312_v0  ;;  %283 = vst.msk [vmem:[#allocation2 + $0x34] sm:$0xf] %vm268_vm0, %v8312_v0 }
  0x5b   : > { %285 = vst.msk [vmem:[#allocation2 + $0x3c] sm:$0xf] %vm268_vm0, %v8312_v0  ;;  %286 = vst.msk [vmem:[#allocation2 + $0x40] sm:$0xf] %vm268_vm0, %v8312_v0 }
  0x5c   : > { %288 = vst.msk [vmem:[#allocation2 + $0x48] sm:$0xf] %vm268_vm0, %v8312_v0  ;;  %289 = vst.msk [vmem:[#allocation2 + $0x4c] sm:$0xf] %vm268_vm0, %v8312_v0 }
  0x5d   : > { %291 = vst.msk [vmem:[#allocation2 + $0x54] sm:$0xf] %vm268_vm0, %v8312_v0  ;;  %292 = vst.msk [vmem:[#allocation2 + $0x58] sm:$0xf] %vm268_vm0, %v8312_v0 }
  0x5e   : > { %294 = vst.msk [vmem:[#allocation2 + $0x60] sm:$0xf] %vm268_vm0, %v8312_v0  ;;  %295 = vst.msk [vmem:[#allocation2 + $0x64] sm:$0xf] %vm268_vm0, %v8312_v0 }
  0x5f   : > { %297 = vst.msk [vmem:[#allocation2 + $0x6c] sm:$0xf] %vm268_vm0, %v8312_v0  ;;  %298 = vst.msk [vmem:[#allocation2 + $0x70] sm:$0xf] %vm268_vm0, %v8312_v0 }
  0x60   : > { %300 = vst.msk [vmem:[#allocation2 + $0x78] sm:$0xf] %vm268_vm0, %v8312_v0  ;;  %301 = vst.msk [vmem:[#allocation2 + $0x7c] sm:$0xf] %vm268_vm0, %v8312_v0 }
  0x61   : > { %303 = vst.msk [vmem:[#allocation2 + $0x84] sm:$0xf] %vm268_vm0, %v8312_v0  ;;  %304 = vst.msk [vmem:[#allocation2 + $0x88] sm:$0xf] %vm268_vm0, %v8312_v0 }
  0x62   : > { %306 = vst.msk [vmem:[#allocation2 + $0x90] sm:$0xf] %vm268_vm0, %v8312_v0  ;;  %307 = vst.msk [vmem:[#allocation2 + $0x94] sm:$0xf] %vm268_vm0, %v8312_v0 }
  0x63   : > { %309 = vst.msk [vmem:[#allocation2 + $0x9c] sm:$0xf] %vm268_vm0, %v8312_v0  ;;  %310 = vst.msk [vmem:[#allocation2 + $0xa0] sm:$0xf] %vm268_vm0, %v8312_v0 }
  0x64   : > { %312 = vst.msk [vmem:[#allocation2 + $0xa8] sm:$0xf] %vm268_vm0, %v8312_v0  ;;  %313 = vst.msk [vmem:[#allocation2 + $0xac] sm:$0xf] %vm268_vm0, %v8312_v0 }
  0x65   : > { %315 = vst.msk [vmem:[#allocation2 + $0xb4] sm:$0xf] %vm268_vm0, %v8312_v0  ;;  %316 = vst.msk [vmem:[#allocation2 + $0xb8] sm:$0xf] %vm268_vm0, %v8312_v0 }
  0x66   : > { %318 = vst.msk [vmem:[#allocation2 + $0xc0] sm:$0xf] %vm268_vm0, %v8312_v0  ;;  %319 = vst.msk [vmem:[#allocation2 + $0xc4] sm:$0xf] %vm268_vm0, %v8312_v0 }
  0x67   : > { %321 = vst.msk [vmem:[#allocation2 + $0xcc] sm:$0xf] %vm268_vm0, %v8312_v0  ;;  %322 = vst.msk [vmem:[#allocation2 + $0xd0] sm:$0xf] %vm268_vm0, %v8312_v0 }
  0x68   : > { %272 = vst.msk [vmem:[#allocation2 + $0x8] sm:$0x1] %vm271_vm1, %v8312_v0  ;;  %275 = vst.msk [vmem:[#allocation2 + $0x14] sm:$0x1] %vm271_vm1, %v8312_v0 }
  0x69   : > { %278 = vst.msk [vmem:[#allocation2 + $0x20] sm:$0x1] %vm271_vm1, %v8312_v0  ;;  %281 = vst.msk [vmem:[#allocation2 + $0x2c] sm:$0x1] %vm271_vm1, %v8312_v0 }
  0x6a   : > { %284 = vst.msk [vmem:[#allocation2 + $0x38] sm:$0x1] %vm271_vm1, %v8312_v0  ;;  %287 = vst.msk [vmem:[#allocation2 + $0x44] sm:$0x1] %vm271_vm1, %v8312_v0 }
  0x6b   : > { %290 = vst.msk [vmem:[#allocation2 + $0x50] sm:$0x1] %vm271_vm1, %v8312_v0  ;;  %293 = vst.msk [vmem:[#allocation2 + $0x5c] sm:$0x1] %vm271_vm1, %v8312_v0 }
  0x6c   : > { %296 = vst.msk [vmem:[#allocation2 + $0x68] sm:$0x1] %vm271_vm1, %v8312_v0  ;;  %299 = vst.msk [vmem:[#allocation2 + $0x74] sm:$0x1] %vm271_vm1, %v8312_v0 }
  0x6d   : > { %302 = vst.msk [vmem:[#allocation2 + $0x80] sm:$0x1] %vm271_vm1, %v8312_v0  ;;  %305 = vst.msk [vmem:[#allocation2 + $0x8c] sm:$0x1] %vm271_vm1, %v8312_v0 }
  0x6e   : > { %308 = vst.msk [vmem:[#allocation2 + $0x98] sm:$0x1] %vm271_vm1, %v8312_v0  ;;  %311 = vst.msk [vmem:[#allocation2 + $0xa4] sm:$0x1] %vm271_vm1, %v8312_v0 }
  0x6f   : > { %314 = vst.msk [vmem:[#allocation2 + $0xb0] sm:$0x1] %vm271_vm1, %v8312_v0  ;;  %317 = vst.msk [vmem:[#allocation2 + $0xbc] sm:$0x1] %vm271_vm1, %v8312_v0 }
  0x70   : > { %320 = vst.msk [vmem:[#allocation2 + $0xc8] sm:$0x1] %vm271_vm1, %v8312_v0  ;;  %323 = vst.msk [vmem:[#allocation2 + $0xd4] sm:$0x1] %vm271_vm1, %v8312_v0 }
  0x71   : > { %325 = vst.msk [vmem:[#allocation4] sm:$0xff] %vm324_vm2, %v8313_v1  ;;  %326 = vst.msk [vmem:[#allocation4 + $0x8] sm:$0xff] %vm324_vm2, %v8313_v1 }
  0x72   : > { %327 = vst.msk [vmem:[#allocation4 + $0x10] sm:$0xff] %vm324_vm2, %v8313_v1  ;;  %328 = vst.msk [vmem:[#allocation4 + $0x18] sm:$0xff] %vm324_vm2, %v8313_v1 }
  0x73   : > { %329 = vst.msk [vmem:[#allocation4 + $0x20] sm:$0xff] %vm324_vm2, %v8313_v1  ;;  %330 = vst.msk [vmem:[#allocation4 + $0x28] sm:$0xff] %vm324_vm2, %v8313_v1 }
  0x74   : > { %331 = vst.msk [vmem:[#allocation4 + $0x30] sm:$0xff] %vm324_vm2, %v8313_v1  ;;  %332 = vst.msk [vmem:[#allocation4 + $0x38] sm:$0xff] %vm324_vm2, %v8313_v1 }
  0x75   : > { %333 = vst.msk [vmem:[#allocation4 + $0x40] sm:$0xff] %vm324_vm2, %v8313_v1  ;;  %334 = vst.msk [vmem:[#allocation4 + $0x48] sm:$0xff] %vm324_vm2, %v8313_v1 }
  0x76   : > { %335 = vst.msk [vmem:[#allocation4 + $0x50] sm:$0xff] %vm324_vm2, %v8313_v1  ;;  %336 = vst.msk [vmem:[#allocation4 + $0x58] sm:$0xff] %vm324_vm2, %v8313_v1 }
  0x77   : > { %337 = vst.msk [vmem:[#allocation4 + $0x60] sm:$0xff] %vm324_vm2, %v8313_v1  ;;  %338 = vst.msk [vmem:[#allocation4 + $0x68] sm:$0xff] %vm324_vm2, %v8313_v1 }
  0x78   : > { %339 = vst.msk [vmem:[#allocation4 + $0x70] sm:$0xff] %vm324_vm2, %v8313_v1  ;;  %340 = vst.msk [vmem:[#allocation4 + $0x78] sm:$0xff] %vm324_vm2, %v8313_v1 }
  0x79   : > { %341 = vst.msk [vmem:[#allocation4 + $0x80] sm:$0xff] %vm324_vm2, %v8313_v1  ;;  %342 = vst.msk [vmem:[#allocation4 + $0x88] sm:$0xff] %vm324_vm2, %v8313_v1 }
  0x7a   : > { %343 = vst.msk [vmem:[#allocation4 + $0x90] sm:$0xff] %vm324_vm2, %v8313_v1  ;;  %344 = vst.msk [vmem:[#allocation4 + $0x98] sm:$0xff] %vm324_vm2, %v8313_v1 }
  0x7b   : > { %345 = vst.msk [vmem:[#allocation4 + $0xa0] sm:$0xff] %vm324_vm2, %v8313_v1  ;;  %346 = vst.msk [vmem:[#allocation4 + $0xa8] sm:$0xff] %vm324_vm2, %v8313_v1 }
  0x7c   : > { %347 = vst.msk [vmem:[#allocation4 + $0xb0] sm:$0xff] %vm324_vm2, %v8313_v1  ;;  %348 = vst.msk [vmem:[#allocation4 + $0xb8] sm:$0xff] %vm324_vm2, %v8313_v1 }
  0x7d   : > { %349 = vst.msk [vmem:[#allocation4 + $0xc0] sm:$0xff] %vm324_vm2, %v8313_v1  ;;  %350 = vst.msk [vmem:[#allocation4 + $0xc8] sm:$0xff] %vm324_vm2, %v8313_v1 }
  0x7e   : > { %351 = vst.msk [vmem:[#allocation4 + $0xd0] sm:$0xff] %vm324_vm2, %v8313_v1  ;;  %352 = vst.msk [vmem:[#allocation4 + $0xd8] sm:$0xff] %vm324_vm2, %v8313_v1 }
  0x7f   : > { %353 = vst.msk [vmem:[#allocation4 + $0xe0] sm:$0xff] %vm324_vm2, %v8313_v1  ;;  %354 = vst.msk [vmem:[#allocation4 + $0xe8] sm:$0xff] %vm324_vm2, %v8313_v1 }
  0x80   : > { %355 = vst.msk [vmem:[#allocation4 + $0xf0] sm:$0xff] %vm324_vm2, %v8313_v1  ;;  %356 = vst.msk [vmem:[#allocation4 + $0xf8] sm:$0xff] %vm324_vm2, %v8313_v1 }
  0x81 PF: > { %v390_v2 = vld [vmem:[#allocation2] sm:$0xf]  ;;  %vm819_vm3 = vcmask 1042432   ;;  %s8314_s24 = smov 36   ;;  %v772_v4 = vld [vmem:[#allocation2 + $0x4] sm:$0xf] }
  0x82   : > { %v771_v3 = vld [vmem:[#allocation2] sm:$0xe]  ;;  %422 = vrot.lane.b32.xlu1 %v390_v2, %s8314_s24  ;;  %vm820_vm4 = vcmask 1046532   ;;  %v824_v7 = vrot.slane %v772_v4, 5  ;;  %v391_v8 = vld [vmem:[#allocation2 + $0x4] sm:$0xf] }
  0x83   : > { %v7100_v5 = vrot.slane %v771_v3, 9  ;;  %vm8623_vm5 = vmor %vm819_vm3, %vm820_vm4  ;;  %v773_v9 = vld [vmem:[#allocation2 + $0x8] sm:$0x1]  ;;  %v488_v11 = vld [vmem:[#allocation2 + $0x4] sm:$0xf]  ;;  %s8315_s28 = smov 100  }
  0x84   : > { %v827_v10 = vrot.slane %v773_v9, 5  ;;  %v489_v12 = vld [vmem:[#allocation2 + $0x8] sm:$0x1]  ;;  %v826_v14 = vrot.slane %v824_v7, 4  ;;  %v7738_v15 = vld [vmem:[#allocation6 + $0x78] sm:$0xff]   ;;  %v524_v16 = vshll.u32 %v488_v11, 16 }
  0x85   : > { %v825_v13 = vsel %vm8623_vm5, %v7100_v5, %v824_v7  ;;  %v528_v17 = vshrl.u32 %v488_v11, 16  ;;  %v534_v18 = vshll.u32 %v489_v12, 16  ;;  %v487_v19 = vld [vmem:[#allocation2] sm:$0xf]  ;;  %7396 = vmatprep.subr.bf16.mxu0 %v7738_v15  ;;  %vm511_vm6 = vsmask.f32 3328 }
  0x86   : > { %878 = vrot.lane.b32.xlu0 %v825_v13, %s8315_s28  ;;  %424 = vrot.lane.b32.xlu1 %v391_v8, %s8314_s24  ;;  %v828_v20 = vsel %vm8623_vm5, %v826_v14, %v827_v10  ;;  %v515_v21 = vshrl.u32 %v487_v19, 16  ;;  %v518_v22 = vshll.u32 %v487_v19, 16  ;;  %vm512_vm7 = vsmask.f32 7440  ;;  %v1077_v27 = vld [vmem:[#allocation2 + $0x10] sm:$0xf] }
  0x87   : > { %v526_v23 = vrot.slane %v524_v16, 5  ;;  %v530_v24 = vrot.slane %v528_v17, 4  ;;  %v536_v29 = vrot.slane %v534_v18, 5  ;;  %v1110_v30 = vshll.u32 %v1077_v27, 16  ;;  %v1076_v32 = vld [vmem:[#allocation2 + $0xc] sm:$0xf]  ;;  %vm8634_vm8 = vmor %vm511_vm6, %vm512_vm7 }
  0x88   : > { %v517_v25 = vrot.slane %v515_v21, 4  ;;  %v520_v26 = vrot.slane %v518_v22, 5  ;;  %v1114_v31 = vshrl.u32 %v1077_v27, 16  ;;  %v1101_v35 = vshrl.u32 %v1076_v32, 16  ;;  %v7739_v37 = vld [vmem:[#allocation6 + $0x38] sm:$0xff]   ;;  %s8316_s27 = smov 68  }
  0x89   : > { %v531_v28 = vor.u32 %v530_v24, %v526_v23  ;;  %v1104_v36 = vshll.u32 %v1076_v32, 16  ;;  %v1112_v39 = vrot.slane %v1110_v30, 5  ;;  %v1078_v42 = vld [vmem:[#allocation2 + $0x14] sm:$0x1]  ;;  %7397 = vmatpush3.bf16.msra.mxu0 %v7739_v37  ;;  %v980_v47 = vld [vmem:[#allocation2 + $0x10] sm:$0xf] }
  0x8a   : > { %880 = vrot.lane.b32.xlu0 %v828_v20, %s8315_s28  ;;  %v521_v34 = vor.u32 %v520_v26, %v517_v25  ;;  %v1116_v40 = vrot.slane %v1114_v31, 4  ;;  %v1103_v43 = vrot.slane %v1101_v35, 4  ;;  %v1120_v49 = vshll.u32 %v1078_v42, 16  ;;  %v1357_v50 = vld [vmem:[#allocation2 + $0x10] sm:$0xf]  ;;  %v7740_v51 = vld [vmem:[#allocation6 + $0x70] sm:$0xff]  }
  0x8b   : > { %v532_v38 = vrot.slane %v531_v28, 4  ;;  %v1106_v44 = vrot.slane %v1104_v36, 5  ;;  %v979_v52 = vld [vmem:[#allocation2 + $0xc] sm:$0xf]  ;;  %7398 = vmatprep.subr.bf16.mxu0 %v7740_v51  ;;  %s8317_s5 = smov 4   ;;  %v1406_v55 = vrot.slane %v1357_v50, 5 }
  0x8c   : > { %v522_v41 = vrot.slane %v521_v34, 4  ;;  %v1117_v48 = vor.u32 %v1116_v40, %v1112_v39  ;;  %v1526_v54 = vld [vmem:[#allocation2 + $0x1c] sm:$0xf]  ;;  %v1525_v56 = vld [vmem:[#allocation2 + $0x18] sm:$0xf]  ;;  %v1122_v58 = vrot.slane %v1120_v49, 5 }
  0x8d   : > { %v537_v45 = vsel %vm8634_vm8, %v532_v38, %v536_v29  ;;  %v1107_v53 = vor.u32 %v1106_v44, %v1103_v43  ;;  %v1358_v59 = vld [vmem:[#allocation2 + $0x14] sm:$0x1]  ;;  %v775_v61 = vld [vmem:[#allocation2 + $0x10] sm:$0xf]  ;;  %v1356_v63 = vld [vmem:[#allocation2 + $0xc] sm:$0xe] }
  0x8e   : > { %708 = vrot.lane.b32.xlu1 %v537_v45, %s8316_s27  ;;  %v527_v46 = vsel %vm8634_vm8, %v522_v41, %v526_v23  ;;  %v1118_v57 = vrot.slane %v1117_v48, 4  ;;  %v491_v62 = vld [vmem:[#allocation2 + $0x10] sm:$0xf]  ;;  %v490_v0 = vld [vmem:[#allocation2 + $0xc] sm:$0xf]  ;;  %v1408_v2 = vrot.slane %v1406_v55, 4 }
  0x8f   : > { %706 = vrot.lane.b32.xlu0 %v527_v46, %s8316_s27  ;;  %v1108_v60 = vrot.slane %v1107_v53, 4  ;;  %v7741_v1 = vld [vmem:[#allocation6 + $0x30] sm:$0xff]   ;;  %v1409_v3 = vrot.slane %v1358_v59, 5  ;;  %v831_v5 = vrot.slane %v775_v61, 5  ;;  %v548_v7 = vshll.u32 %v491_v62, 16  ;;  %v7742_v9 = vld [vmem:[#allocation6 + $0x68] sm:$0xff]  }
  0x90   : > { %v1123_v4 = vsel %vm8634_vm8, %v1118_v57, %v1122_v58  ;;  %v552_v8 = vshrl.u32 %v491_v62, 16  ;;  %7399 = vmatpush3.bf16.msra.mxu0 %v7741_v1  ;;  %v7108_v11 = vrot.slane %v1356_v63, 9  ;;  %v776_v12 = vld [vmem:[#allocation2 + $0x14] sm:$0x1]  ;;  %v539_v13 = vshrl.u32 %v490_v0, 16  ;;  %v7743_v17 = vld [vmem:[#allocation6 + $0x28] sm:$0xff]  }
  0x91   : > { %v1113_v10 = vsel %vm8634_vm8, %v1108_v60, %v1112_v39  ;;  %v542_v14 = vshll.u32 %v490_v0, 16  ;;  %v774_v15 = vld [vmem:[#allocation2 + $0xc] sm:$0xe]  ;;  %7400 = vmatprep.subr.bf16.mxu0 %v7742_v9  ;;  %v1410_v16 = vsel %vm8623_vm5, %v1408_v2, %v1409_v3  ;;  %v833_v18 = vrot.slane %v831_v5, 4  ;;  %v7744_v22 = vld [vmem:[#allocation6 + $0x60] sm:$0xff]   ;;  %v7746_v42 = vld [vmem:[#allocation6 + $0x58] sm:$0xff]  }
  0x92   : > { %1013 = vrot.lane.b32.xlu1 %v980_v47, %s8317_s5  ;;  %v834_v19 = vrot.slane %v776_v12, 5  ;;  %v550_v20 = vrot.slane %v548_v7, 5  ;;  %v554_v21 = vrot.slane %v552_v8, 4  ;;  %v1407_v23 = vsel %vm8623_vm5, %v7108_v11, %v1406_v55  ;;  %v492_v25 = vld [vmem:[#allocation2 + $0x14] sm:$0x1]  ;;  %v7745_v36 = vld [vmem:[#allocation6 + $0x20] sm:$0xff]  }
  0x93   : > { %1011 = vrot.lane.b32.xlu0 %v979_v52, %s8317_s5  ;;  %v7101_v24 = vrot.slane %v774_v15, 9  ;;  %v541_v26 = vrot.slane %v539_v13, 4  ;;  %v544_v27 = vrot.slane %v542_v14, 5  ;;  %v558_v30 = vshll.u32 %v492_v25, 16  ;;  %v1080_v34 = vld [vmem:[#allocation2 + $0x1c] sm:$0xf] }
  0x94   : > { %7401 = vmatpush3.bf16.msra.mxu0 %v7743_v17  ;;  %v835_v28 = vsel %vm8623_vm5, %v833_v18, %v834_v19  ;;  %v555_v29 = vor.u32 %v554_v21, %v550_v20  ;;  %v1079_v35 = vld [vmem:[#allocation2 + $0x18] sm:$0xf]  ;;  %v393_v37 = vld [vmem:[#allocation2 + $0x10] sm:$0xf]  ;;  %v1134_v40 = vshll.u32 %v1080_v34, 16  ;;  %v1138_v41 = vshrl.u32 %v1080_v34, 16 }
  0x95   : > { %7402 = vmatprep.subr.bf16.mxu0 %v7744_v22  ;;  %v832_v31 = vsel %vm8623_vm5, %v7101_v24, %v831_v5  ;;  %v545_v32 = vor.u32 %v544_v27, %v541_v26  ;;  %v560_v39 = vrot.slane %v558_v30, 5  ;;  %v392_v43 = vld [vmem:[#allocation2 + $0xc] sm:$0xf]  ;;  %v1125_v45 = vshrl.u32 %v1079_v35, 16  ;;  %v7747_v50 = vld [vmem:[#allocation6 + $0x18] sm:$0xff]   ;;  %v7750_v60 = vld [vmem:[#allocation6 + $0x48] sm:$0xff]  }
  0x96   : > { %1559 = vrot.lane.b32.xlu1 %v1526_v54, %s8315_s28  ;;  %v556_v38 = vrot.slane %v555_v29, 4  ;;  %v1128_v46 = vshll.u32 %v1079_v35, 16  ;;  %v8670_v48 = vrot.slane %v1134_v40, 5  ;;  %v1140_v49 = vrot.slane %v1138_v41, 4  ;;  %v1081_v52 = vld [vmem:[#allocation2 + $0x20] sm:$0x1] }
  0x97   : > { %1557 = vrot.lane.b32.xlu0 %v1525_v56, %s8315_s28  ;;  %v546_v44 = vrot.slane %v545_v32, 4  ;;  %v1127_v53 = vrot.slane %v1125_v45, 4  ;;  %v7748_v55 = vld [vmem:[#allocation6 + $0x50] sm:$0xff]   ;;  %v982_v57 = vld [vmem:[#allocation2 + $0x1c] sm:$0xf]  ;;  %v1144_v59 = vshll.u32 %v1081_v52, 16 }
  0x98   : > { %7403 = vmatpush3.bf16.msra.mxu0 %v7745_v36  ;;  %v561_v47 = vsel %vm8634_vm8, %v556_v38, %v560_v39  ;;  %v1130_v54 = vrot.slane %v1128_v46, 5  ;;  %v7749_v56 = vld [vmem:[#allocation6 + $0x10] sm:$0xff]   ;;  %v1141_v58 = vor.u32 %v1140_v49, %v8670_v48  ;;  %v981_v61 = vld [vmem:[#allocation2 + $0x18] sm:$0xf]  ;;  %v1360_v63 = vld [vmem:[#allocation2 + $0x1c] sm:$0xf] }
  0x99   : > { %7404 = vmatprep.subr.bf16.mxu0 %v7746_v42  ;;  %v551_v51 = vsel %vm8634_vm8, %v546_v44, %v550_v20  ;;  %v7751_v0 = vld [vmem:[#allocation6 + $0x8] sm:$0xff]   ;;  %v1528_v1 = vld [vmem:[#allocation2 + $0x28] sm:$0xf]  ;;  %v1413_v5 = vrot.slane %v1360_v63, 5  ;;  %v778_v7 = vld [vmem:[#allocation2 + $0x1c] sm:$0xf] }
  0x9a   : > { %1294 = vrot.lane.b32.xlu1 %v1123_v4, %s8314_s24  ;;  %v1131_v62 = vor.u32 %v1130_v54, %v1127_v53  ;;  %v1361_v2 = vld [vmem:[#allocation2 + $0x20] sm:$0x1]  ;;  %v1142_v3 = vrot.slane %v1141_v58, 4  ;;  %v1146_v4 = vrot.slane %v1144_v59, 5  ;;  %v7752_v8 = vld [vmem:[#allocation6 + $0x40] sm:$0xff]   ;;  %v838_v17 = vrot.slane %v778_v7, 5 }
  0x9b   : > { %1292 = vrot.lane.b32.xlu0 %v1113_v10, %s8314_s24  ;;  %v1527_v9 = vld [vmem:[#allocation2 + $0x24] sm:$0xf]  ;;  %v494_v11 = vld [vmem:[#allocation2 + $0x1c] sm:$0xf]  ;;  %v1359_v12 = vld [vmem:[#allocation2 + $0x18] sm:$0xe] }
  0x9c   : > { %7405 = vmatpush3.bf16.msra.mxu0 %v7747_v50  ;;  %v1132_v10 = vrot.slane %v1131_v62, 4  ;;  %v493_v13 = vld [vmem:[#allocation2 + $0x18] sm:$0xf]  ;;  %v1416_v15 = vrot.slane %v1361_v2, 5  ;;  %vm373_vm9 = vcmask 289792   ;;  %v1147_v18 = vsel %vm8634_vm8, %v1142_v3, %v1146_v4  ;;  %s8318_s6 = smov 32  }
  0x9d   : > { %7406 = vmatprep.subr.bf16.mxu0 %v7748_v55  ;;  %v7753_v14 = vld [vmem:[#allocation6] sm:$0xff]   ;;  %v1415_v19 = vrot.slane %v1413_v5, 4  ;;  %v572_v21 = vshll.u32 %v494_v11, 16  ;;  %v576_v22 = vshrl.u32 %v494_v11, 16  ;;  %v7109_v24 = vrot.slane %v1359_v12, 9  ;;  %s8319_s9 = smov 96  }
  0x9e   : > { %1462 = vrot.lane.b32.xlu1 %v1410_v16, %s8316_s27  ;;  %v779_v16 = vld [vmem:[#allocation2 + $0x20] sm:$0x1]  ;;  %v777_v20 = vld [vmem:[#allocation2 + $0x18] sm:$0xe]  ;;  %v563_v25 = vshrl.u32 %v493_v13, 16  ;;  %v566_v26 = vshll.u32 %v493_v13, 16 }
  0x9f   : > { %1460 = vrot.lane.b32.xlu0 %v1407_v23, %s8316_s27  ;;  %v1137_v23 = vsel %vm8634_vm8, %v1132_v10, %v8670_v48  ;;  %v357_v27 = vld [vmem:[%s8529_s12] sm:$0xf]  ;;  %v840_v29 = vrot.slane %v838_v17, 4  ;;  %v7102_v30 = vrot.slane %v777_v20, 9  ;;  %v358_v32 = vld [vmem:[%s8529_s12 + $0x4] sm:$0xf]  ;;  %v1417_v34 = vsel %vm8623_vm5, %v1415_v19, %v1416_v15 }
  0xa0   : > { %7407 = vmatpush3.bf16.msra.mxu0 %v7749_v56  ;;  %374 = vst.msk [vmem:[#allocation5] sm:$0xf] %vm373_vm9, %v357_v27  ;;  %v574_v35 = vrot.slane %v572_v21, 5  ;;  %v578_v36 = vrot.slane %v576_v22, 4  ;;  %375 = vst.msk [vmem:[#allocation5 + $0xc] sm:$0xf] %vm373_vm9, %v358_v32 }
  0xa1   : > { %7408 = vmatprep.subr.bf16.mxu0 %v7750_v60  ;;  %v565_v38 = vrot.slane %v563_v25, 4  ;;  %v568_v39 = vrot.slane %v566_v26, 5  ;;  %v1083_v41 = vld [vmem:[#allocation2 + $0x28] sm:$0xf]  ;;  %v839_v44 = vsel %vm8623_vm5, %v7102_v30, %v838_v17  ;;  %v1082_v46 = vld [vmem:[#allocation2 + $0x24] sm:$0xf] }
  0xa2   : > { %884 = vrot.lane.b32.xlu1 %v835_v28, %s8315_s28  ;;  %v841_v28 = vrot.slane %v779_v16, 5  ;;  %v1158_v48 = vshll.u32 %v1083_v41, 16  ;;  %v1162_v49 = vshrl.u32 %v1083_v41, 16  ;;  %v394_v50 = vld [vmem:[#allocation2 + $0x18] sm:$0xf]  ;;  %v1149_v54 = vshrl.u32 %v1082_v46, 16 }
  0xa3   : > { %882 = vrot.lane.b32.xlu0 %v832_v31, %s8315_s28  ;;  %v495_v31 = vld [vmem:[#allocation2 + $0x20] sm:$0x1]  ;;  %v569_v45 = vor.u32 %v568_v39, %v565_v38  ;;  %v1152_v55 = vshll.u32 %v1082_v46, 16  ;;  %v1084_v59 = vld [vmem:[#allocation2 + $0x2c] sm:$0x1]  ;;  %vm470_vm10 = vcmask 552224  }
  0xa4   : > { %7409 = vmatpush3.bf16.msra.mxu0 %v7751_v0  ;;  %v582_v40 = vshll.u32 %v495_v31, 16  ;;  %v842_v42 = vsel %vm8623_vm5, %v840_v29, %v841_v28  ;;  %v1160_v56 = vrot.slane %v1158_v48, 5  ;;  %v1168_v0 = vshll.u32 %v1084_v59, 16  ;;  %v1363_v2 = vld [vmem:[#allocation2 + $0x28] sm:$0xf]  ;;  %s8320_s8 = smov 64  }
  0xa5   : > { %7410 = vmatprep.subr.bf16.mxu0 %v7752_v8  ;;  %v570_v53 = vrot.slane %v569_v45, 4  ;;  %v1154_v62 = vrot.slane %v1152_v55, 5  ;;  %v983_v3 = vld [vmem:[#allocation2 + $0x24] sm:$0xf]  ;;  %v1364_v7 = vld [vmem:[#allocation2 + $0x2c] sm:$0x1] }
  0xa6   : > { %428 = vrot.lane.b32.xlu1 %v393_v37, %s8314_s24  ;;  %v1414_v37 = vsel %vm8623_vm5, %v7109_v24, %v1413_v5  ;;  %v584_v52 = vrot.slane %v582_v40, 5  ;;  %v1530_v5 = vld [vmem:[#allocation2 + $0x34] sm:$0xf]  ;;  %v1529_v8 = vld [vmem:[#allocation2 + $0x30] sm:$0xf]  ;;  %v1170_v10 = vrot.slane %v1168_v0, 5 }
  0xa7   : > { %426 = vrot.lane.b32.xlu0 %v392_v43, %s8314_s24  ;;  %v579_v43 = vor.u32 %v578_v36, %v574_v35  ;;  %v575_v60 = vsel %vm8634_vm8, %v570_v53, %v574_v35  ;;  %v1420_v11 = vrot.slane %v1363_v2, 5  ;;  %v781_v12 = vld [vmem:[#allocation2 + $0x28] sm:$0xf]  ;;  %v1362_v13 = vld [vmem:[#allocation2 + $0x24] sm:$0xe]  ;;  %v1423_v16 = vrot.slane %v1364_v7, 5 }
  0xa8   : > { %7411 = vmatpush3.bf16.msra.mxu0 %v7753_v14  ;;  %v497_v14 = vld [vmem:[#allocation2 + $0x28] sm:$0xf]  ;;  %v496_v17 = vld [vmem:[#allocation2 + $0x24] sm:$0xf]  ;;  %v782_v21 = vld [vmem:[#allocation2 + $0x2c] sm:$0x1] }
  0xa9   : > { %v359_v19 = vld [vmem:[%s8529_s12 + $0x8] sm:$0xf]  ;;  %v1422_v20 = vrot.slane %v1420_v11, 4  ;;  %v845_v22 = vrot.slane %v781_v12, 5  ;;  %v596_v24 = vshll.u32 %v497_v14, 16  ;;  %v600_v25 = vshrl.u32 %v497_v14, 16 }
  0xaa   : > { %712 = vrot.lane.b32.xlu1 %v561_v47, %s8316_s27  ;;  %v395_v47 = vld [vmem:[#allocation2 + $0x1c] sm:$0xf]  ;;  %376 = vst.msk [vmem:[#allocation5 + $0x18] sm:$0xf] %vm373_vm9, %v359_v19  ;;  %v7110_v27 = vrot.slane %v1362_v13, 9  ;;  %v587_v28 = vshrl.u32 %v496_v17, 16 }
  0xab   : > { %710 = vrot.lane.b32.xlu0 %v551_v51, %s8316_s27  ;;  %v580_v51 = vrot.slane %v579_v43, 4  ;;  %v590_v29 = vshll.u32 %v496_v17, 16  ;;  %v780_v30 = vld [vmem:[#allocation2 + $0x24] sm:$0xe]  ;;  %v848_v31 = vrot.slane %v782_v21, 5  ;;  %v1424_v32 = vsel %vm8623_vm5, %v1422_v20, %v1423_v16  ;;  %p7210_p2 = scmp.ne.s32.totalorder %s8290_s21, 7 }
  0xac   : > { %v598_v35 = vrot.slane %v596_v24, 5  ;;  %v602_v36 = vrot.slane %v600_v25, 4  ;;  %v7103_v38 = vrot.slane %v780_v30, 9  ;;  %v498_v39 = vld [vmem:[#allocation2 + $0x2c] sm:$0x1]  ;;  %v589_v40 = vrot.slane %v587_v28, 4 }
  0xad   : > { %v585_v58 = vsel %vm8634_vm8, %v580_v51, %v584_v52  ;;  %v592_v41 = vrot.slane %v590_v29, 5  ;;  %v1085_v48 = vld [vmem:[#allocation2 + $0x30] sm:$0xf]  ;;  %v1087_v0 = vld [vmem:[#allocation2 + $0x38] sm:$0x1]  ;;  %vm959_vm11 = vcmask 1044256  }
  0xae   : > { %1017 = vrot.lane.b32.xlu1 %v982_v57, %s8317_s5  ;;  %v1164_v57 = vrot.slane %v1162_v49, 4  ;;  %v603_v43 = vor.u32 %v602_v36, %v598_v35  ;;  %v846_v45 = vsel %vm8623_vm5, %v7103_v38, %v845_v22  ;;  %v397_v49 = vld [vmem:[#allocation2 + $0x28] sm:$0xf]  ;;  %v361_v59 = vld [vmem:[%s8529_s12 + $0x10] sm:$0xf]  ;;  %vm960_vm12 = vcmask 31748  }
  0xaf   : > { %1015 = vrot.lane.b32.xlu0 %v981_v61, %s8317_s5  ;;  %v1151_v61 = vrot.slane %v1149_v54, 4  ;;  %v593_v46 = vor.u32 %v592_v41, %v589_v40  ;;  %v396_v54 = vld [vmem:[#allocation2 + $0x24] sm:$0xf]  ;;  %378 = vst.msk [vmem:[#allocation5 + $0x30] sm:$0xf] %vm373_vm9, %v361_v59  ;;  %vm926_vm13 = vcmask 818176   ;;  %vm8795_vm15 = vmor %vm960_vm12, %vm959_vm11 }
  0xb0   : > { %v1165_v63 = vor.u32 %v1164_v57, %v1160_v56  ;;  %v1176_v57 = vshll.u32 %v1085_v48, 16  ;;  %v1366_v7 = vld [vmem:[#allocation2 + $0x34] sm:$0xf]  ;;  %v1531_v12 = vld [vmem:[#allocation2 + $0x3c] sm:$0xf]  ;;  %vm754_vm14 = vcmask 814624  }
  0xb1   : > { %v1155_v4 = vor.u32 %v1154_v62, %v1151_v61  ;;  %v594_v55 = vrot.slane %v593_v46, 4  ;;  %v784_v17 = vld [vmem:[#allocation2 + $0x34] sm:$0xf]  ;;  %v1365_v19 = vld [vmem:[#allocation2 + $0x30] sm:$0xe]  ;;  %vm1059_vm0 = vcmask 289824  }
  0xb2   : > { %1563 = vrot.lane.b32.xlu1 %v1528_v1, %s8315_s28  ;;  %v984_v1 = vld [vmem:[#allocation2 + $0x28] sm:$0xf]  ;;  %v1178_v2 = vrot.slane %v1176_v57, 5  ;;  %v499_v20 = vld [vmem:[#allocation2 + $0x30] sm:$0xf]  ;;  %v852_v25 = vrot.slane %v784_v17, 5 }
  0xb3   : > { %1561 = vrot.lane.b32.xlu0 %v1527_v9, %s8315_s28  ;;  %v1166_v9 = vrot.slane %v1165_v63, 4  ;;  %v1156_v15 = vrot.slane %v1155_v4, 4  ;;  %v599_v63 = vsel %vm8634_vm8, %v594_v55, %v598_v35  ;;  %v785_v24 = vld [vmem:[#allocation2 + $0x38] sm:$0x1]  ;;  %v7111_v29 = vrot.slane %v1365_v19, 9 }
  0xb4   : > { %v611_v30 = vshrl.u32 %v499_v20, 16  ;;  %v363_v35 = vld [vmem:[%s8529_s12 + $0x18] sm:$0xf]  ;;  %v855_v36 = vrot.slane %v785_v24, 5  ;;  %v854_v38 = vrot.slane %v852_v25, 4  ;;  %vm2449_vm1 = vcmask 1041408  }
  0xb5   : > { %v1161_v26 = vsel %vm8634_vm8, %v1156_v15, %v1160_v56  ;;  %v1173_v56 = vshrl.u32 %v1085_v48, 16  ;;  %v1367_v15 = vld [vmem:[#allocation2 + $0x38] sm:$0x1]  ;;  %380 = vst.msk [vmem:[#allocation5 + $0x48] sm:$0xf] %vm373_vm9, %v363_v35  ;;  %vm2424_vm2 = vcmask 556032  }
  0xb6   : > { %1298 = vrot.lane.b32.xlu1 %v1147_v18, %s8314_s24  ;;  %v360_v18 = vld [vmem:[%s8529_s12 + $0xc] sm:$0xf]  ;;  %v856_v46 = vsel %vm8623_vm5, %v854_v38, %v855_v36  ;;  %v399_v55 = vld [vmem:[#allocation2 + $0x34] sm:$0xf]  ;;  %v502_v36 = vld [vmem:[#allocation2 + $0x3c] sm:$0xf] }
  0xb7   : > { %1296 = vrot.lane.b32.xlu0 %v1137_v23, %s8314_s24  ;;  %377 = vst.msk [vmem:[#allocation5 + $0x24] sm:$0xf] %vm373_vm9, %v360_v18  ;;  %v1171_v23 = vsel %vm8634_vm8, %v1166_v9, %v1170_v10  ;;  %v1532_v10 = vld [vmem:[#allocation2 + $0x40] sm:$0xf]  ;;  %v500_v18 = vld [vmem:[#allocation2 + $0x34] sm:$0xf] }
  0xb8   : > { %v1368_v38 = vld [vmem:[#allocation2 + $0x3c] sm:$0xe]  ;;  %vm3175_vm3 = vcmask 261120   ;;  %vm3288_vm4 = vcmask 257024  }
  0xba   : > { %1466 = vrot.lane.b32.xlu1 %v1417_v34, %s8316_s27  ;;  %v847_v34 = vrot.slane %v845_v22, 4  ;;  %v1430_v22 = vrot.slane %v1367_v15, 5 }
  0xbb   : > { %1464 = vrot.lane.b32.xlu0 %v1414_v37, %s8316_s27  ;;  %v1421_v37 = vsel %vm8623_vm5, %v7110_v27, %v1420_v11  ;;  %v1427_v11 = vrot.slane %v1366_v7, 5  ;;  %v624_v27 = vshrl.u32 %v500_v18, 16 }
  0xbd   : > { %v1429_v21 = vrot.slane %v1427_v11, 4  ;;  %v626_v40 = vrot.slane %v624_v27, 4  ;;  %v1428_v41 = vsel %vm8623_vm5, %v7111_v29, %v1427_v11  ;;  %v366_v11 = vld [vmem:[%s8529_s12 + $0x24] sm:$0xf]  ;;  %v787_v27 = vld [vmem:[#allocation2 + $0x40] sm:$0xf] }
  0xbe   : > { %888 = vrot.lane.b32.xlu1 %v842_v42, %s8315_s28  ;;  %v849_v42 = vsel %vm8623_vm5, %v847_v34, %v848_v31  ;;  %v614_v31 = vshll.u32 %v499_v20, 16  ;;  %v783_v34 = vld [vmem:[#allocation2 + $0x30] sm:$0xe]  ;;  %383 = vst.msk [vmem:[#allocation5 + $0x6c] sm:$0xf] %vm373_vm9, %v366_v11 }
  0xbf   : > { %886 = vrot.lane.b32.xlu0 %v839_v44, %s8315_s28  ;;  %v606_v44 = vshll.u32 %v498_v39, 16  ;;  %v987_v20 = vld [vmem:[#allocation2 + $0x3c] sm:$0xf]  ;;  %v1370_v29 = vld [vmem:[#allocation2 + $0x44] sm:$0x1] }
  0xc1   : > { %v608_v51 = vrot.slane %v606_v44, 5  ;;  %v613_v44 = vrot.slane %v611_v30, 4 }
  0xc2   : > { %432 = vrot.lane.b32.xlu1 %v395_v47, %s8314_s24  ;;  %v1086_v47 = vld [vmem:[#allocation2 + $0x34] sm:$0xf] }
  0xc3   : > { %430 = vrot.lane.b32.xlu0 %v394_v50, %s8314_s24  ;;  %v604_v50 = vrot.slane %v603_v43, 4  ;;  %v1182_v52 = vshll.u32 %v1086_v47, 16  ;;  %v1186_v53 = vshrl.u32 %v1086_v47, 16  ;;  %v501_v43 = vld [vmem:[#allocation2 + $0x38] sm:$0x1] }
  0xc5   : > { %v1184_v61 = vrot.slane %v1182_v52, 5  ;;  %v1188_v62 = vrot.slane %v1186_v53, 4  ;;  %v1089_v52 = vld [vmem:[#allocation2 + $0x40] sm:$0xf]  ;;  %v1088_v53 = vld [vmem:[#allocation2 + $0x3c] sm:$0xf] }
  0xc6   : > { %716 = vrot.lane.b32.xlu1 %v585_v58, %s8316_s27  ;;  %v362_v58 = vld [vmem:[%s8529_s12 + $0x14] sm:$0xf]  ;;  %v1206_v59 = vshll.u32 %v1089_v52, 16 }
  0xc7   : > { %714 = vrot.lane.b32.xlu0 %v575_v60, %s8316_s27  ;;  %379 = vst.msk [vmem:[#allocation5 + $0x3c] sm:$0xf] %vm373_vm9, %v362_v58  ;;  %v609_v60 = vsel %vm8634_vm8, %v604_v50, %v608_v51  ;;  %v1189_v4 = vor.u32 %v1188_v62, %v1184_v61 }
  0xc9   : > { %v1190_v13 = vrot.slane %v1189_v4, 4  ;;  %v8782_v4 = vrot.slane %v1206_v59, 5 }
  0xca   : > { %1021 = vrot.lane.b32.xlu1 %v984_v1, %s8317_s5  ;;  %v1175_v1 = vrot.slane %v1173_v56, 4 }
  0xcb   : > { %1019 = vrot.lane.b32.xlu0 %v983_v3, %s8317_s5  ;;  %v986_v3 = vld [vmem:[#allocation2 + $0x34] sm:$0xf] }
  0xcc   : > { %v1179_v9 = vor.u32 %v1178_v2, %v1175_v1 }
  0xce   : > { %1567 = vrot.lane.b32.xlu1 %v1530_v5, %s8315_s28  ;;  %v1192_v5 = vshll.u32 %v1087_v0, 16  ;;  %v1180_v16 = vrot.slane %v1179_v9, 4  ;;  %v1200_v0 = vshll.u32 %v1088_v53, 16 }
  0xcf   : > { %1565 = vrot.lane.b32.xlu0 %v1529_v8, %s8315_s28  ;;  %v985_v8 = vld [vmem:[#allocation2 + $0x30] sm:$0xf] }
  0xd0   : > { %v1194_v14 = vrot.slane %v1192_v5, 5  ;;  %v1185_v28 = vsel %vm8634_vm8, %v1180_v16, %v1184_v61  ;;  %v398_v61 = vld [vmem:[#allocation2 + $0x30] sm:$0xf]  ;;  %v988_v16 = vld [vmem:[#allocation2 + $0x40] sm:$0xf] }
  0xd2   : > { %1302 = vrot.lane.b32.xlu1 %v1171_v23, %s8314_s24  ;;  %v1195_v23 = vsel %vm8634_vm8, %v1190_v13, %v1194_v14 }
  0xd3   : > { %1300 = vrot.lane.b32.xlu0 %v1161_v26, %s8314_s24  ;;  %v620_v26 = vshll.u32 %v500_v18, 16 }
  0xd5   : > { %v622_v39 = vrot.slane %v620_v26, 5 }
  0xd6   : > { %1470 = vrot.lane.b32.xlu1 %v1424_v32, %s8316_s27  ;;  %v364_v32 = vld [vmem:[%s8529_s12 + $0x1c] sm:$0xf] }
  0xd7   : > { %1468 = vrot.lane.b32.xlu0 %v1421_v37, %s8316_s27  ;;  %381 = vst.msk [vmem:[#allocation5 + $0x54] sm:$0xf] %vm373_vm9, %v364_v32  ;;  %v1431_v37 = vsel %vm8623_vm5, %v1429_v21, %v1430_v22  ;;  %v627_v48 = vor.u32 %v626_v40, %v622_v39  ;;  %v8800_v22 = vld [vmem:[#allocation2 + $0x40] sm:$0xf]  ;;  %v859_v40 = vrot.slane %v787_v27, 5 }
  0xd8   : > { %v1434_v30 = vrot.slane %v8800_v22, 5 }
  0xd9   : > { %v628_v57 = vrot.slane %v627_v48, 4  ;;  %v638_v48 = vshll.u32 %v502_v36, 16 }
  0xda   : > { %892 = vrot.lane.b32.xlu1 %v849_v42, %s8315_s28  ;;  %v7104_v42 = vrot.slane %v783_v34, 9  ;;  %v1533_v34 = vld [vmem:[#allocation2 + $0x48] sm:$0xf] }
  0xdb   : > { %890 = vrot.lane.b32.xlu0 %v846_v45, %s8315_s28  ;;  %v616_v45 = vrot.slane %v614_v31, 5  ;;  %v503_v31 = vld [vmem:[#allocation2 + $0x40] sm:$0xf] }
  0xdc   : > { %v853_v50 = vsel %vm8623_vm5, %v7104_v42, %v852_v25  ;;  %v1534_v25 = vld [vmem:[#allocation2 + $0x4c] sm:$0xf]  ;;  %v786_v42 = vld [vmem:[#allocation2 + $0x3c] sm:$0xe] }
  0xdd   : > { %v617_v51 = vor.u32 %v616_v45, %v613_v44  ;;  %v648_v44 = vshrl.u32 %v503_v31, 16 }
  0xde   : > { %436 = vrot.lane.b32.xlu1 %v397_v49, %s8314_s24  ;;  %v630_v49 = vshll.u32 %v501_v43, 16  ;;  %v644_v43 = vshll.u32 %v503_v31, 16 }
  0xdf   : > { %434 = vrot.lane.b32.xlu0 %v396_v54, %s8314_s24  ;;  %v618_v62 = vrot.slane %v617_v51, 4 }
  0xe0   : > { %v632_v58 = vrot.slane %v630_v49, 5  ;;  %v1654_v49 = vld [vmem:[#allocation2 + $0x1c] sm:$0xf]  ;;  %v8823_v59 = vrot.slane %v644_v43, 5 }
  0xe2   : > { %720 = vrot.lane.b32.xlu1 %v609_v60, %s8316_s27  ;;  %v1210_v60 = vshrl.u32 %v1089_v52, 16  ;;  %v633_v2 = vsel %vm8634_vm8, %v628_v57, %v632_v58  ;;  %v7112_v52 = vrot.slane %v1368_v38, 9  ;;  %v1653_v57 = vld [vmem:[#allocation2 + $0x18] sm:$0xf]  ;;  %v368_v58 = vld [vmem:[%s8529_s12 + $0x2c] sm:$0xf] }
  0xe3   : > { %718 = vrot.lane.b32.xlu0 %v599_v63, %s8316_s27  ;;  %v1197_v63 = vshrl.u32 %v1088_v53, 16  ;;  %385 = vst.msk [vmem:[#allocation5 + $0x84] sm:$0xf] %vm373_vm9, %v368_v58 }
  0xe4   : > { %v1212_v5 = vrot.slane %v1210_v60, 4  ;;  %v650_v60 = vrot.slane %v648_v44, 4 }
  0xe5   : > { %v1199_v9 = vrot.slane %v1197_v63, 4 }
  0xe6   : > { %1025 = vrot.lane.b32.xlu1 %v986_v3, %s8317_s5  ;;  %v1090_v3 = vld [vmem:[#allocation2 + $0x44] sm:$0x1]  ;;  %v1213_v18 = vor.u32 %v1212_v5, %v8782_v4  ;;  %v1435_v5 = vsel %vm8623_vm5, %v7112_v52, %v1434_v30 }
  0xe7   : > { %1023 = vrot.lane.b32.xlu0 %v985_v8, %s8317_s5  ;;  %v623_v8 = vsel %vm8634_vm8, %v618_v62, %v622_v39  ;;  %v1216_v14 = vshll.u32 %v1090_v3, 16  ;;  %v788_v39 = vld [vmem:[#allocation2 + $0x44] sm:$0x1]  ;;  %v367_v62 = vld [vmem:[%s8529_s12 + $0x28] sm:$0xf]  ;;  %v1691_v3 = vshrl.u32 %v1654_v49, 16 }
  0xe8   : > { %v862_v53 = vrot.slane %v788_v39, 5  ;;  %384 = vst.msk [vmem:[#allocation5 + $0x78] sm:$0xf] %vm373_vm9, %v367_v62 }
  0xe9   : > { %v1218_v26 = vrot.slane %v1216_v14, 5  ;;  %v1656_v14 = vld [vmem:[#allocation2 + $0x24] sm:$0xf]  ;;  %v1693_v22 = vrot.slane %v1691_v3, 4 }
  0xea   : > { %1571 = vrot.lane.b32.xlu1 %v1532_v10, %s8315_s28  ;;  %v1202_v10 = vrot.slane %v1200_v0, 5  ;;  %v504_v0 = vld [vmem:[#allocation2 + $0x44] sm:$0x1] }
  0xeb   : > { %1569 = vrot.lane.b32.xlu0 %v1531_v12, %s8315_s28  ;;  %v365_v12 = vld [vmem:[%s8529_s12 + $0x20] sm:$0xf] }
  0xec   : > { %382 = vst.msk [vmem:[#allocation5 + $0x60] sm:$0xf] %vm373_vm9, %v365_v12  ;;  %v1203_v21 = vor.u32 %v1202_v10, %v1199_v9  ;;  %v1657_v9 = vld [vmem:[#allocation2 + $0x28] sm:$0xf] }
  0xee   : > { %1306 = vrot.lane.b32.xlu1 %v1195_v23, %s8314_s24  ;;  %v1204_v35 = vrot.slane %v1203_v21, 4  ;;  %v1655_v21 = vld [vmem:[#allocation2 + $0x20] sm:$0x1] }
  0xef   : > { %1304 = vrot.lane.b32.xlu0 %v1185_v28, %s8314_s24  ;;  %v1214_v28 = vrot.slane %v1213_v18, 4  ;;  %v654_v18 = vshll.u32 %v504_v0, 16 }
  0xf0   : > { %v1209_v51 = vsel %vm8634_vm8, %v1204_v35, %v8782_v4 }
  0xf1   : > { %v1219_v45 = vsel %vm8634_vm8, %v1214_v28, %v1218_v26  ;;  %v1702_v28 = vshrl.u32 %v1656_v14, 16  ;;  %v656_v35 = vrot.slane %v654_v18, 5 }
  0xf2   : > { %1474 = vrot.lane.b32.xlu1 %v1431_v37, %s8316_s27 }
  0xf3   : > { %1472 = vrot.lane.b32.xlu0 %v1428_v41, %s8316_s27  ;;  %v1437_v41 = vrot.slane %v1370_v29, 5  ;;  %v1705_v29 = vshll.u32 %v1656_v14, 16 }
  0xf4   : > { %v423_v47 = vpop.permute.xlu1 %422 }
  0xf5   : > { %471 = vst.msk [vmem:[#allocation5] sm:$0xf] %vm470_vm10, %v423_v47  ;;  %v635_v47 = vshrl.u32 %v502_v36, 16  ;;  %v1697_v36 = vshll.u32 %v1655_v21, 16 }
  0xf6   : > { %896 = vrot.lane.b32.xlu1 %v856_v46, %s8315_s28  ;;  %v1436_v46 = vrot.slane %v1434_v30, 4 }
  0xf7   : > { %894 = vrot.lane.b32.xlu0 %v853_v50, %s8315_s28 }
  0xf8   : > { %v879_v54 = vpop.permute.xlu0 %878  ;;  %v425_v56 = vpop.permute.xlu1 %424  ;;  %v1438_v63 = vsel %vm8623_vm5, %v1436_v46, %v1437_v41  ;;  %v1704_v46 = vrot.slane %v1702_v28, 4 }
  0xf9   : > { %472 = vst.msk [vmem:[#allocation5 + $0xc] sm:$0xf] %vm470_vm10, %v425_v56  ;;  %v910_v13 = vrot.slane %v879_v54, 4  ;;  %v7105_v56 = vrot.slane %v786_v42, 9 }
  0xfa   : > { %440 = vrot.lane.b32.xlu1 %v399_v55, %s8314_s24  ;;  %v861_v55 = vrot.slane %v859_v40, 4 }
  0xfb   : > { %438 = vrot.lane.b32.xlu0 %v398_v61, %s8314_s24  ;;  %v927_v24 = vsel %vm926_vm13, %v910_v13, %v879_v54  ;;  %v1687_v61 = vshll.u32 %v1654_v49, 16  ;;  %v860_v13 = vsel %vm8623_vm5, %v7105_v56, %v859_v40  ;;  %v1699_v49 = vrot.slane %v1697_v36, 5 }
  0xfc   : > { %v881_v1 = vpop.permute.xlu0 %880  ;;  %v863_v12 = vsel %vm8623_vm5, %v861_v55, %v862_v53 }
  0xfd   : > { %v911_v7 = vrot.slane %v881_v1, 4 }
  0xfe   : > { %724 = vrot.lane.b32.xlu1 %v633_v2, %s8316_s27  ;;  %v640_v2 = vrot.slane %v638_v48, 5 }
  0xff   : > { %v928_v15 = vsel %vm926_vm13, %v911_v7, %v881_v1  ;;  %722 = vrot.lane.b32.xlu0 %v623_v8, %s8316_s27  ;;  %v637_v1 = vrot.slane %v635_v47, 4  ;;  %v1678_v7 = vshrl.u32 %v1653_v57, 16  ;;  %v1681_v8 = vshll.u32 %v1653_v57, 16 }
 0x100   : > { %v709_v19 = vpop.permute.xlu1 %708  ;;  %v1707_v47 = vrot.slane %v1705_v29, 5 }
 0x101   : > { %756 = vst.msk [vmem:[#allocation5 + $0xc] sm:$0xf] %vm754_vm14, %v709_v19  ;;  %v707_v23 = vpop.permute.xlu0 %706  ;;  %v8841_v19 = vrot.slane %v1687_v61, 5  ;;  %v1680_v26 = vrot.slane %v1678_v7, 4  ;;  %v1683_v27 = vrot.slane %v1681_v8, 5 }
 0x102   : > { %755 = vst.msk [vmem:[#allocation5] sm:$0xf] %vm754_vm14, %v707_v23  ;;  %1029 = vrot.lane.b32.xlu1 %v988_v16, %s8317_s5  ;;  %v651_v16 = vor.u32 %v650_v60, %v8823_v59  ;;  %v1711_v23 = vshll.u32 %v1657_v9, 16  ;;  %v1708_v58 = vor.u32 %v1707_v47, %v1704_v46  ;;  %v1935_v8 = vld [vmem:[#allocation2 + $0x20] sm:$0x1] }
 0x103   : > { %963 = vst.msk [vmem:[#allocation5 + $0xc] sm:$0xff] %vm8795_vm15, %v928_v15  ;;  %1027 = vrot.lane.b32.xlu0 %v987_v20, %s8317_s5  ;;  %962 = vst.msk [vmem:[#allocation5] sm:$0xff] %vm8795_vm15, %v927_v24  ;;  %v641_v20 = vor.u32 %v640_v2, %v637_v1  ;;  %v1715_v24 = vshrl.u32 %v1657_v9, 16  ;;  %v1694_v39 = vor.u32 %v1693_v22, %v8841_v19  ;;  %v7769_v9 = vld [vmem:[#allocation6 + $0xa0] ss:$0 sps:$4 sm:$0x33]  }
 0x104   : > { %v1014_v32 = vpop.permute.xlu1 %1013  ;;  %v652_v38 = vrot.slane %v651_v16, 4  ;;  %v8855_v40 = vrot.slane %v1711_v23, 5  ;;  %v1684_v44 = vor.u32 %v1683_v27, %v1680_v26  ;;  %v1709_v7 = vrot.slane %v1708_v58, 4  ;;  %7602 = vmatprep.subr.msk.bf16.mxu1 %vm2449_vm1, %v7769_v9  ;;  %v1092_v23 = vld [vmem:[#allocation2 + $0x4c] sm:$0xf] }
 0x105   : > { %1061 = vst.msk [vmem:[#allocation5 + $0x10] sm:$0xf] %vm1059_vm0, %v1014_v32  ;;  %v1012_v37 = vpop.permute.xlu0 %1011  ;;  %v1717_v41 = vrot.slane %v1715_v24, 4  ;;  %v642_v43 = vrot.slane %v641_v20, 4  ;;  %v2451_v14 = vsel %vm2449_vm1, %v7769_v9, 0  ;;  %v7771_v26 = vld [vmem:[#allocation6 + $0x90] sm:$0xff]  }
 0x106   : > { %1060 = vst.msk [vmem:[#allocation5 + $0x4] sm:$0xf] %vm1059_vm0, %v1012_v37  ;;  %1575 = vrot.lane.b32.xlu1 %v1534_v25, %s8315_s28  ;;  %v400_v37 = vld [vmem:[#allocation2 + $0x3c] sm:$0xf]  ;;  %v1685_v57 = vrot.slane %v1684_v44, 4  ;;  %7551 = vmatpush3.bf16.msra.mxu1 %v2451_v14  ;;  %v1714_v21 = vsel %vm8634_vm8, %v1709_v7, %v8855_v40  ;;  %v1230_v28 = vshll.u32 %v1092_v23, 16 }
 0x107   : > { %1573 = vrot.lane.b32.xlu0 %v1533_v34, %s8315_s28  ;;  %v401_v34 = vld [vmem:[#allocation2 + $0x40] sm:$0xf]  ;;  %v1718_v52 = vor.u32 %v1717_v41, %v8855_v40  ;;  %v647_v56 = vsel %vm8634_vm8, %v642_v43, %v8823_v59  ;;  %v1234_v29 = vshrl.u32 %v1092_v23, 16  ;;  %v1093_v40 = vld [vmem:[#allocation2 + $0x50] sm:$0x1] }
 0x108   : > { %v1560_v50 = vpop.permute.xlu1 %1559  ;;  %v8904_v41 = vrot.slane %v1230_v28, 5  ;;  %v989_v44 = vld [vmem:[#allocation2 + $0x48] sm:$0xf]  ;;  %v8911_v58 = vld [vmem:[#allocation2 + $0x4c] sm:$0xf] }
 0x109   : > { %v1558_v54 = vpop.permute.xlu0 %1557  ;;  %v1590_v10 = vrot.slane %v1560_v50, 4  ;;  %v1719_v2 = vrot.slane %v1718_v52, 4  ;;  %v1240_v52 = vshll.u32 %v1093_v40, 16  ;;  %v1441_v7 = vrot.slane %v8911_v58, 5 }
 0x10a   : > { %1310 = vrot.lane.b32.xlu1 %v1219_v45, %s8314_s24  ;;  %v1589_v15 = vrot.slane %v1558_v54, 4  ;;  %v1658_v45 = vld [vmem:[#allocation2 + $0x2c] sm:$0x1] }
 0x10b   : > { %1308 = vrot.lane.b32.xlu0 %v1209_v51, %s8314_s24  ;;  %v1606_v30 = vsel %vm926_vm13, %v1590_v10, %v1560_v50  ;;  %v657_v50 = vsel %vm8634_vm8, %v652_v38, %v656_v35  ;;  %v1695_v51 = vrot.slane %v1694_v39, 4  ;;  %v1721_v53 = vshll.u32 %v1658_v45, 16  ;;  %v7773_v38 = vld [vmem:[#allocation6 + $0x88] sm:$0xff]   ;;  %v1938_v45 = vld [vmem:[#allocation2 + $0x2c] sm:$0x1] }
 0x10c   : > { %v1295_v4 = vpop.permute.xlu1 %1294  ;;  %v1605_v32 = vsel %vm926_vm13, %v1589_v15, %v1558_v54  ;;  %v1934_v54 = vld [vmem:[#allocation2 + $0x1c] sm:$0xf]  ;;  %v7770_v15 = vld [vmem:[#allocation6 + $0x98] sm:$0xff]  }
 0x10d   : > { %1341 = vst.msk [vmem:[#allocation5 + $0x10] sm:$0xf] %vm470_vm10, %v1295_v4  ;;  %v1293_v11 = vpop.permute.xlu0 %1292  ;;  %v1700_v1 = vsel %vm8634_vm8, %v1695_v51, %v1699_v49  ;;  %v1723_v59 = vrot.slane %v1721_v53, 5  ;;  %v1983_v3 = vrot.slane %v1934_v54, 5  ;;  %7552 = vmatprep.subr.bf16.mxu1 %v7770_v15  ;;  %v7774_v53 = vld [vmem:[#allocation6 + $0x80] sm:$0xff]  }
 0x10e   : > { %1340 = vst.msk [vmem:[#allocation5 + $0x4] sm:$0xf] %vm470_vm10, %v1293_v11  ;;  %1478 = vrot.lane.b32.xlu1 %v1438_v63, %s8316_s27  ;;  %v7754_v63 = vld [vmem:[#allocation5] ss:$12 sps:$4 sm:$0xff]   ;;  %7553 = vmatpush3.bf16.msra.mxu1 %v7770_v15 }
 0x10f   : > { %1476 = vrot.lane.b32.xlu0 %v1435_v5, %s8316_s27  ;;  %v1690_v5 = vsel %vm8634_vm8, %v1685_v57, %v8841_v19  ;;  %v1724_v16 = vsel %vm8634_vm8, %v1719_v2, %v1723_v59  ;;  %v1985_v18 = vrot.slane %v1983_v3, 4  ;;  %v1986_v19 = vrot.slane %v1935_v8, 5  ;;  %7554 = vmatprep.subr.bf16.mxu1 %v7771_v26  ;;  %v1536_v54 = vld [vmem:[#allocation2 + $0x58] sm:$0xf]  ;;  %v506_v59 = vld [vmem:[#allocation2 + $0x4c] sm:$0xf] }
 0x110   : > { %v1463_v25 = vpop.permute.xlu1 %1462 }
 0x111   : > { %1509 = vst.msk [vmem:[#allocation5 + $0x10] sm:$0xf] %vm754_vm14, %v1463_v25  ;;  %v1461_v31 = vpop.permute.xlu0 %1460  ;;  %v1091_v25 = vld [vmem:[#allocation2 + $0x48] sm:$0xf]  ;;  %v1987_v27 = vsel %vm8623_vm5, %v1985_v18, %v1986_v19  ;;  %v668_v18 = vshll.u32 %v506_v59, 16 }
 0x112   : > { %1638 = vst.msk [vmem:[#allocation5 + $0x10] sm:$0xff] %vm8795_vm15, %v1606_v30  ;;  %900 = vrot.lane.b32.xlu1 %v863_v12, %s8315_s28  ;;  %v1933_v12 = vld [vmem:[#allocation2 + $0x18] sm:$0xe]  ;;  %v1224_v35 = vshll.u32 %v1091_v25, 16  ;;  %7555 = vmatpush3.bf16.msra.mxu1 %v7771_v26  ;;  %v505_v19 = vld [vmem:[#allocation2 + $0x48] sm:$0xf] }
 0x113   : > { %1508 = vst.msk [vmem:[#allocation5 + $0x4] sm:$0xf] %vm754_vm14, %v1461_v31  ;;  %898 = vrot.lane.b32.xlu0 %v860_v13, %s8315_s28  ;;  %v7116_v22 = vrot.slane %v1933_v12, 9  ;;  %7556 = vmatprep.subr.bf16.mxu1 %v7773_v38  ;;  %v1660_v26 = vld [vmem:[#allocation2 + $0x34] sm:$0xf] }
 0x114   : > { %1637 = vst.msk [vmem:[#allocation5 + $0x4] sm:$0xff] %vm8795_vm15, %v1605_v32  ;;  %v885_v42 = vpop.permute.xlu1 %884  ;;  %v8899_v32 = vld [vmem:[#allocation2 + $0x28] sm:$0xf]  ;;  %v1226_v47 = vrot.slane %v1224_v35, 5  ;;  %v8938_v35 = vrot.slane %v668_v18, 5 }
 0x115   : > { %v883_v48 = vpop.permute.xlu0 %882  ;;  %v913_v60 = vrot.slane %v885_v42, 4  ;;  %v1984_v31 = vsel %vm8623_vm5, %v7116_v22, %v1983_v3  ;;  %v1990_v39 = vrot.slane %v8899_v32, 5  ;;  %v1443_v22 = vrot.slane %v1441_v7, 4 }
 0x116   : > { %444 = vrot.lane.b32.xlu1 %v401_v34, %s8314_s24  ;;  %v912_v62 = vrot.slane %v883_v48, 4  ;;  %v1221_v34 = vshrl.u32 %v1091_v25, 16  ;;  %7557 = vmatpush3.bf16.msra.mxu1 %v7773_v38 }
 0x117   : > { %442 = vrot.lane.b32.xlu0 %v400_v37, %s8314_s24  ;;  %v930_v10 = vsel %vm926_vm13, %v913_v60, %v885_v42  ;;  %v990_v37 = vld [vmem:[#allocation2 + $0x4c] sm:$0xf]  ;;  %v1236_v42 = vrot.slane %v1234_v29, 4  ;;  %7558 = vmatprep.subr.bf16.mxu1 %v7774_v53  ;;  %v659_v29 = vshrl.u32 %v505_v19, 16 }
 0x118   : > { %v429_v55 = vpop.permute.xlu1 %428  ;;  %v929_v13 = vsel %vm926_vm13, %v912_v62, %v883_v48  ;;  %v1223_v46 = vrot.slane %v1221_v34, 4 }
 0x119   : > { %474 = vst.msk [vmem:[#allocation5 + $0x24] sm:$0xf] %vm470_vm10, %v429_v55  ;;  %v427_v61 = vpop.permute.xlu0 %426  ;;  %v1992_v55 = vrot.slane %v1990_v39, 4  ;;  %v1237_v57 = vor.u32 %v1236_v42, %v8904_v41  ;;  %v1735_v42 = vshll.u32 %v1660_v26, 16 }
 0x11a   : > { %473 = vst.msk [vmem:[#allocation5 + $0x18] sm:$0xf] %vm470_vm10, %v427_v61  ;;  %728 = vrot.lane.b32.xlu1 %v657_v50, %s8316_s27  ;;  %v1936_v50 = vld [vmem:[#allocation2 + $0x24] sm:$0xe]  ;;  %v1535_v61 = vld [vmem:[#allocation2 + $0x54] sm:$0xf]  ;;  %7559 = vmatpush3.bf16.msra.mxu1 %v7774_v53 }
 0x11b   : > { %v7756_v0 = vld [vmem:[#allocation5 + $0x4] ss:$12 sps:$4 sm:$0xff]   ;;  %726 = vrot.lane.b32.xlu0 %v647_v56, %s8316_s27  ;;  %v1993_v56 = vrot.slane %v1938_v45, 5  ;;  %v7117_v62 = vrot.slane %v1936_v50, 9  ;;  %v1238_v9 = vrot.slane %v1237_v57, 4  ;;  %v1739_v50 = vshrl.u32 %v1660_v26, 16 }
 0x11c   : > { %v713_v4 = vpop.permute.xlu1 %712  ;;  %2485 = vmatprep.mubr.bf16.mxu0 %v7756_v0  ;;  %v8913_v0 = vld [vmem:[#allocation2 + $0x4c] sm:$0xf] }
 0x11d   : > { %758 = vst.msk [vmem:[#allocation5 + $0x24] sm:$0xf] %vm754_vm14, %v713_v4  ;;  %v711_v11 = vpop.permute.xlu0 %710  ;;  %2486 = vmatmul.mubr.bf16.vlgmr.msra.gmra.mxu0 %v7754_v63  ;;  %v1227_v63 = vor.u32 %v1226_v47, %v1223_v46  ;;  %v1242_v4 = vrot.slane %v1240_v52, 5  ;;  %v1994_v8 = vsel %vm8623_vm5, %v1992_v55, %v1993_v56  ;;  %v866_v12 = vrot.slane %v8913_v0, 5  ;;  %v507_v47 = vld [vmem:[#allocation2 + $0x50] sm:$0x1] }
 0x11e   : > { %965 = vst.msk [vmem:[#allocation5 + $0x24] sm:$0xff] %vm8795_vm15, %v930_v10  ;;  %1871 = vrot.lane.b32.xlu1 %v1700_v1, %s8317_s5  ;;  %v1371_v10 = vld [vmem:[#allocation2 + $0x48] sm:$0xe]  ;;  %v1991_v14 = vsel %vm8623_vm5, %v7117_v62, %v1990_v39  ;;  %v1663_v55 = vld [vmem:[#allocation2 + $0x40] sm:$0xf]  ;;  %v678_v0 = vshll.u32 %v507_v47, 16 }
 0x11f   : > { %757 = vst.msk [vmem:[#allocation5 + $0x18] sm:$0xf] %vm754_vm14, %v711_v11  ;;  %1869 = vrot.lane.b32.xlu0 %v1690_v5, %s8317_s5  ;;  %v1373_v5 = vld [vmem:[#allocation2 + $0x50] sm:$0x1]  ;;  %v1228_v15 = vrot.slane %v1227_v63, 4  ;;  %v868_v34 = vrot.slane %v866_v12, 4 }
 0x120   : > { %964 = vst.msk [vmem:[#allocation5 + $0x18] sm:$0xff] %vm8795_vm15, %v929_v13  ;;  %v1018_v20 = vpop.permute.xlu1 %1017  ;;  %v791_v11 = vld [vmem:[#allocation2 + $0x50] sm:$0x1]  ;;  %v1444_v23 = vrot.slane %v1373_v5, 5  ;;  %v1763_v5 = vshrl.u32 %v1663_v55, 16 }
 0x121   : > { %1063 = vst.msk [vmem:[#allocation5 + $0x28] sm:$0xf] %vm1059_vm0, %v1018_v20  ;;  %v1016_v24 = vpop.permute.xlu0 %1015  ;;  %v869_v25 = vrot.slane %v791_v11, 5  ;;  %v1233_v32 = vsel %vm8634_vm8, %v1228_v15, %v8904_v41 }
 0x122   : > { %1062 = vst.msk [vmem:[#allocation5 + $0x1c] sm:$0xf] %vm1059_vm0, %v1016_v24  ;;  %1875 = vrot.lane.b32.xlu1 %v1724_v16, %s8317_s5  ;;  %v789_v16 = vld [vmem:[#allocation2 + $0x48] sm:$0xe]  ;;  %v7113_v24 = vrot.slane %v1371_v10, 9  ;;  %v1445_v46 = vsel %vm8623_vm5, %v1443_v22, %v1444_v23 }
 0x123   : > { %1873 = vrot.lane.b32.xlu0 %v1714_v21, %s8317_s5  ;;  %v672_v21 = vshrl.u32 %v506_v59, 16  ;;  %v7106_v28 = vrot.slane %v789_v16, 9  ;;  %v870_v58 = vsel %vm8623_vm5, %v868_v34, %v869_v25  ;;  %v1661_v59 = vld [vmem:[#allocation2 + $0x38] sm:$0x1]  ;;  %v402_v16 = vld [vmem:[#allocation2 + $0x48] sm:$0xf] }
 0x124   : > { %v1564_v30 = vpop.permute.xlu1 %1563  ;;  %v1442_v52 = vsel %vm8623_vm5, %v7113_v24, %v1441_v7  ;;  %v1745_v15 = vshll.u32 %v1661_v59, 16  ;;  %v1664_v25 = vld [vmem:[#allocation2 + $0x44] sm:$0x1] }
 0x125   : > { %v1562_v36 = vpop.permute.xlu0 %1561  ;;  %v1592_v48 = vrot.slane %v1564_v30, 4  ;;  %v674_v40 = vrot.slane %v672_v21, 4  ;;  %v1765_v21 = vrot.slane %v1763_v5, 4  ;;  %v1769_v34 = vshll.u32 %v1664_v25, 16  ;;  %v1943_v5 = vld [vmem:[#allocation2 + $0x40] sm:$0xf] }
 0x126   : > { %2039 = vrot.lane.b32.xlu1 %v1987_v27, %s8314_s24  ;;  %v1591_v51 = vrot.slane %v1562_v36, 4  ;;  %v1243_v27 = vsel %vm8634_vm8, %v1238_v9, %v1242_v4  ;;  %v1759_v4 = vshll.u32 %v1663_v55, 16  ;;  %v1095_v55 = vld [vmem:[#allocation2 + $0x58] sm:$0xf] }
 0x127   : > { %2037 = vrot.lane.b32.xlu0 %v1984_v31, %s8314_s24  ;;  %v1608_v1 = vsel %vm926_vm13, %v1592_v48, %v1564_v30  ;;  %v662_v30 = vshll.u32 %v505_v19, 16  ;;  %v7759_v45 = vld [vmem:[#allocation5 + $0x18] ss:$12 sps:$4 sm:$0xff]   ;;  %v661_v48 = vrot.slane %v659_v29, 4  ;;  %v675_v63 = vor.u32 %v674_v40, %v8938_v35  ;;  %v1940_v40 = vld [vmem:[#allocation2 + $0x34] sm:$0xf] }
 0x128   : > { %v1299_v43 = vpop.permute.xlu1 %1298  ;;  %v1607_v3 = vsel %vm926_vm13, %v1591_v51, %v1562_v36  ;;  %v1659_v36 = vld [vmem:[#allocation2 + $0x30] sm:$0xf]  ;;  %v1747_v29 = vrot.slane %v1745_v15, 5 }
 0x129   : > { %1343 = vst.msk [vmem:[#allocation5 + $0x28] sm:$0xf] %vm470_vm10, %v1299_v43  ;;  %v1297_v49 = vpop.permute.xlu0 %1296  ;;  %v369_v43 = vld [vmem:[%s8529_s12 + $0x30] sm:$0xf]  ;;  %v1726_v53 = vshrl.u32 %v1659_v36, 16  ;;  %v676_v18 = vrot.slane %v675_v63, 4 }
 0x12a   : > { %1342 = vst.msk [vmem:[#allocation5 + $0x1c] sm:$0xf] %vm470_vm10, %v1297_v49  ;;  %1033 = vrot.lane.b32.xlu1 %v990_v37, %s8317_s5  ;;  %v370_v37 = vld [vmem:[%s8529_s12 + $0x34] sm:$0xf]  ;;  %v664_v49 = vrot.slane %v662_v30, 5 }
 0x12b   : > { %1031 = vrot.lane.b32.xlu0 %v989_v44, %s8317_s5  ;;  %387 = vst.msk [vmem:[#allocation5 + $0x9c] sm:$0xf] %vm373_vm9, %v370_v37  ;;  %386 = vst.msk [vmem:[#allocation5 + $0x90] sm:$0xf] %vm373_vm9, %v369_v43 }
 0x12c   : > { %v1467_v60 = vpop.permute.xlu1 %1466 }
 0x12d   : > { %1511 = vst.msk [vmem:[#allocation5 + $0x28] sm:$0xf] %vm754_vm14, %v1467_v60  ;;  %v1465_v2 = vpop.permute.xlu0 %1464  ;;  %v867_v60 = vsel %vm8623_vm5, %v7106_v28, %v866_v12 }
 0x12e   : > { %1640 = vst.msk [vmem:[#allocation5 + $0x28] sm:$0xff] %vm8795_vm15, %v1608_v1  ;;  %1579 = vrot.lane.b32.xlu1 %v1536_v54, %s8315_s28  ;;  %v1729_v54 = vshll.u32 %v1659_v36, 16  ;;  %v8964_v1 = vrot.slane %v1735_v42, 5 }
 0x12f   : > { %1510 = vst.msk [vmem:[#allocation5 + $0x1c] sm:$0xf] %vm754_vm14, %v1465_v2  ;;  %1577 = vrot.lane.b32.xlu0 %v1535_v61, %s8315_s28  ;;  %v1662_v61 = vld [vmem:[#allocation2 + $0x3c] sm:$0xf]  ;;  %v665_v2 = vor.u32 %v664_v49, %v661_v48 }
 0x130   : > { %1639 = vst.msk [vmem:[#allocation5 + $0x1c] sm:$0xff] %vm8795_vm15, %v1607_v3  ;;  %v889_v13 = vpop.permute.xlu1 %888  ;;  %v1741_v3 = vrot.slane %v1739_v50, 4  ;;  %v1731_v9 = vrot.slane %v1729_v54, 5  ;;  %v1750_v10 = vshrl.u32 %v1662_v61, 16  ;;  %v1753_v11 = vshll.u32 %v1662_v61, 16 }
 0x131   : > { %v887_v20 = vpop.permute.xlu0 %886  ;;  %v915_v38 = vrot.slane %v889_v13, 4  ;;  %v666_v23 = vrot.slane %v665_v2, 4  ;;  %v1941_v50 = vld [vmem:[#allocation2 + $0x38] sm:$0x1]  ;;  %v1094_v2 = vld [vmem:[#allocation2 + $0x54] sm:$0xf] }
 0x132   : > { %2043 = vrot.lane.b32.xlu1 %v1994_v8, %s8314_s24  ;;  %v914_v44 = vrot.slane %v887_v20, 4  ;;  %v1728_v8 = vrot.slane %v1726_v53, 4  ;;  %v1742_v19 = vor.u32 %v1741_v3, %v8964_v1  ;;  %v1752_v26 = vrot.slane %v1750_v10, 4  ;;  %v1939_v53 = vld [vmem:[#allocation2 + $0x30] sm:$0xe] }
 0x133   : > { %2041 = vrot.lane.b32.xlu0 %v1991_v14, %s8314_s24  ;;  %v932_v56 = vsel %vm926_vm13, %v915_v38, %v889_v13  ;;  %v403_v13 = vld [vmem:[#allocation2 + $0x4c] sm:$0xf]  ;;  %v680_v14 = vrot.slane %v678_v0, 5  ;;  %v671_v37 = vsel %vm8634_vm8, %v666_v23, %v8938_v35  ;;  %v1997_v35 = vrot.slane %v1940_v40, 5 }
 0x134   : > { %v433_v31 = vpop.permute.xlu1 %432  ;;  %v931_v62 = vsel %vm926_vm13, %v914_v44, %v887_v20  ;;  %v1761_v20 = vrot.slane %v1759_v4, 5  ;;  %v1732_v24 = vor.u32 %v1731_v9, %v1728_v8  ;;  %v1254_v0 = vshll.u32 %v1095_v55, 16 }
 0x135   : > { %476 = vst.msk [vmem:[#allocation5 + $0x3c] sm:$0xf] %vm470_vm10, %v433_v31  ;;  %v431_v39 = vpop.permute.xlu0 %430  ;;  %v681_v30 = vsel %vm8634_vm8, %v676_v18, %v680_v14  ;;  %v1743_v31 = vrot.slane %v1742_v19, 4  ;;  %v1248_v8 = vshll.u32 %v1094_v2, 16  ;;  %v2004_v18 = vrot.slane %v1943_v5, 5 }
 0x136   : > { %475 = vst.msk [vmem:[#allocation5 + $0x30] sm:$0xf] %vm470_vm10, %v431_v39  ;;  %1314 = vrot.lane.b32.xlu1 %v1243_v27, %s8314_s24  ;;  %v1755_v27 = vrot.slane %v1753_v11, 5  ;;  %v1733_v38 = vrot.slane %v1732_v24, 4  ;;  %v9011_v11 = vrot.slane %v1254_v0, 5 }
 0x137   : > { %v7757_v41 = vld [vmem:[#allocation5 + $0x1c] ss:$12 sps:$4 sm:$0xff]   ;;  %1312 = vrot.lane.b32.xlu0 %v1233_v32, %s8314_s24  ;;  %v1766_v32 = vor.u32 %v1765_v21, %v1761_v20  ;;  %v1096_v19 = vld [vmem:[#allocation2 + $0x5c] sm:$0x1]  ;;  %v1250_v24 = vrot.slane %v1248_v8, 5 }
 0x138   : > { %v717_v51 = vpop.permute.xlu1 %716  ;;  %2493 = vmatprep.mubr.bf16.mxu0 %v7757_v41  ;;  %v1756_v39 = vor.u32 %v1755_v27, %v1752_v26  ;;  %v1748_v41 = vsel %vm8634_vm8, %v1743_v31, %v1747_v29  ;;  %v1738_v48 = vsel %vm8634_vm8, %v1733_v38, %v8964_v1  ;;  %v1258_v1 = vshrl.u32 %v1095_v55, 16  ;;  %v991_v21 = vld [vmem:[#allocation2 + $0x54] sm:$0xf]  ;;  %v1942_v27 = vld [vmem:[#allocation2 + $0x3c] sm:$0xe] }
 0x139   : > { %760 = vst.msk [vmem:[#allocation5 + $0x3c] sm:$0xf] %vm754_vm14, %v717_v51  ;;  %v715_v57 = vpop.permute.xlu0 %714  ;;  %2494 = vmatmul.mubr.bf16.gmra.mxu0 %v7759_v45  ;;  %v1767_v45 = vrot.slane %v1766_v32, 4  ;;  %v1538_v31 = vld [vmem:[#allocation2 + $0x64] sm:$0xf]  ;;  %v2006_v32 = vrot.slane %v2004_v18, 4 }
 0x13a   : > { %967 = vst.msk [vmem:[#allocation5 + $0x3c] sm:$0xff] %vm8795_vm15, %v932_v56  ;;  %1482 = vrot.lane.b32.xlu1 %v1445_v46, %s8316_s27  ;;  %v1771_v46 = vrot.slane %v1769_v34, 5  ;;  %v1757_v49 = vrot.slane %v1756_v39, 4  ;;  %v1537_v38 = vld [vmem:[#allocation2 + $0x60] sm:$0xf]  ;;  %v7119_v39 = vrot.slane %v1942_v27, 9 }
 0x13b   : > { %759 = vst.msk [vmem:[#allocation5 + $0x30] sm:$0xf] %vm754_vm14, %v715_v57  ;;  %1480 = vrot.lane.b32.xlu0 %v1442_v52, %s8316_s27  ;;  %v1999_v57 = vrot.slane %v1997_v35, 4  ;;  %v794_v55 = vld [vmem:[#allocation2 + $0x5c] sm:$0x1] }
 0x13c   : > { %966 = vst.msk [vmem:[#allocation5 + $0x30] sm:$0xff] %vm8795_vm15, %v931_v62  ;;  %v1022_v7 = vpop.permute.xlu1 %1021  ;;  %v1772_v56 = vsel %vm8634_vm8, %v1767_v45, %v1771_v46  ;;  %v1762_v61 = vsel %vm8634_vm8, %v1757_v49, %v1761_v20  ;;  %v7118_v62 = vrot.slane %v1939_v53, 9  ;;  %v876_v5 = vrot.slane %v794_v55, 5  ;;  %v1669_v27 = vld [vmem:[#allocation2 + $0x58] sm:$0xf] }
 0x13d   : > { %1065 = vst.msk [vmem:[#allocation5 + $0x40] sm:$0xf] %vm1059_vm0, %v1022_v7  ;;  %v1020_v12 = vpop.permute.xlu0 %1019  ;;  %v1245_v7 = vshrl.u32 %v1094_v2, 16 }
 0x13e   : > { %1064 = vst.msk [vmem:[#allocation5 + $0x34] sm:$0xf] %vm1059_vm0, %v1020_v12  ;;  %904 = vrot.lane.b32.xlu1 %v870_v58, %s8315_s28  ;;  %v2000_v58 = vrot.slane %v1941_v50, 5  ;;  %v1998_v4 = vsel %vm8623_vm5, %v7118_v62, %v1997_v35  ;;  %v1260_v12 = vrot.slane %v1258_v1, 4  ;;  %v1376_v35 = vld [vmem:[#allocation2 + $0x5c] sm:$0x1] }
 0x13f   : > { %902 = vrot.lane.b32.xlu0 %v867_v60, %s8315_s28  ;;  %v1247_v23 = vrot.slane %v1245_v7, 4  ;;  %v1666_v1 = vld [vmem:[#allocation2 + $0x4c] sm:$0xf]  ;;  %v372_v7 = vld [vmem:[%s8529_s12 + $0x3c] sm:$0xf] }
 0x140   : > { %v1568_v22 = vpop.permute.xlu1 %1567  ;;  %v2001_v59 = vsel %vm8623_vm5, %v1999_v57, %v2000_v58  ;;  %v1261_v29 = vor.u32 %v1260_v12, %v9011_v11  ;;  %v1451_v58 = vrot.slane %v1376_v35, 5  ;;  %v1665_v12 = vld [vmem:[#allocation2 + $0x48] sm:$0xf]  ;;  %389 = vst.msk [vmem:[#allocation5 + $0xb4] sm:$0xf] %vm373_vm9, %v372_v7 }
 0x141   : > { %v1566_v28 = vpop.permute.xlu0 %1565  ;;  %v1594_v42 = vrot.slane %v1568_v22, 4  ;;  %v1251_v40 = vor.u32 %v1250_v24, %v1247_v23 }
 0x142   : > { %448 = vrot.lane.b32.xlu1 %v403_v13, %s8314_s24  ;;  %v1593_v44 = vrot.slane %v1566_v28, 4 }
 0x143   : > { %446 = vrot.lane.b32.xlu0 %v402_v16, %s8314_s24  ;;  %v1610_v51 = vsel %vm926_vm13, %v1594_v42, %v1568_v22  ;;  %v7762_v15 = vld [vmem:[#allocation5 + $0x30] ss:$12 sps:$4 sm:$0xff]   ;;  %v992_v16 = vld [vmem:[#allocation2 + $0x58] sm:$0xf]  ;;  %v1944_v22 = vld [vmem:[#allocation2 + $0x44] sm:$0x1] }
 0x144   : > { %v1303_v36 = vpop.permute.xlu1 %1302  ;;  %v1609_v54 = vsel %vm926_vm13, %v1593_v44, %v1566_v28  ;;  %v2007_v34 = vrot.slane %v1944_v22, 5  ;;  %v1262_v44 = vrot.slane %v1261_v29, 4  ;;  %v1252_v49 = vrot.slane %v1251_v40, 4 }
 0x145   : > { %1345 = vst.msk [vmem:[#allocation5 + $0x40] sm:$0xf] %vm470_vm10, %v1303_v36  ;;  %v1301_v43 = vpop.permute.xlu0 %1300  ;;  %v9027_v36 = vld [vmem:[#allocation2 + $0x58] sm:$0xf] }
 0x146   : > { %1344 = vst.msk [vmem:[#allocation5 + $0x34] sm:$0xf] %vm470_vm10, %v1301_v43  ;;  %732 = vrot.lane.b32.xlu1 %v681_v30, %s8316_s27  ;;  %v1264_v30 = vshll.u32 %v1096_v19, 16  ;;  %v9030_v43 = vld [vmem:[#allocation2 + $0x58] sm:$0xf]  ;;  %v1448_v45 = vrot.slane %v9027_v36, 5  ;;  %v2008_v46 = vsel %vm8623_vm5, %v2006_v32, %v2007_v34 }
 0x147   : > { %730 = vrot.lane.b32.xlu0 %v671_v37, %s8316_s27  ;;  %v873_v50 = vrot.slane %v9030_v43, 5  ;;  %v1668_v32 = vld [vmem:[#allocation2 + $0x54] sm:$0xf]  ;;  %v1807_v43 = vshll.u32 %v1669_v27, 16 }
 0x148   : > { %v1471_v47 = vpop.permute.xlu1 %1470  ;;  %v1450_v57 = vrot.slane %v1448_v45, 4  ;;  %v1798_v35 = vshrl.u32 %v1668_v32, 16 }
 0x149   : > { %1513 = vst.msk [vmem:[#allocation5 + $0x40] sm:$0xf] %vm754_vm14, %v1471_v47  ;;  %v1469_v52 = vpop.permute.xlu0 %1468  ;;  %v9082_v55 = vrot.slane %v1807_v43, 5 }
 0x14a   : > { %1642 = vst.msk [vmem:[#allocation5 + $0x40] sm:$0xff] %vm8795_vm15, %v1610_v51  ;;  %1879 = vrot.lane.b32.xlu1 %v1748_v41, %s8317_s5  ;;  %v1266_v41 = vrot.slane %v1264_v30, 5  ;;  %v509_v51 = vld [vmem:[#allocation2 + $0x58] sm:$0xf] }
 0x14b   : > { %1512 = vst.msk [vmem:[#allocation5 + $0x34] sm:$0xf] %vm754_vm14, %v1469_v52  ;;  %1877 = vrot.lane.b32.xlu0 %v1738_v48, %s8317_s5  ;;  %v2005_v48 = vsel %vm8623_vm5, %v7119_v39, %v2004_v18  ;;  %v508_v52 = vld [vmem:[#allocation2 + $0x54] sm:$0xf]  ;;  %v696_v62 = vshrl.u32 %v509_v51, 16 }
 0x14c   : > { %1641 = vst.msk [vmem:[#allocation5 + $0x34] sm:$0xff] %vm8795_vm15, %v1609_v54  ;;  %v893_v60 = vpop.permute.xlu1 %892  ;;  %v1374_v54 = vld [vmem:[#allocation2 + $0x54] sm:$0xe]  ;;  %v686_v0 = vshll.u32 %v508_v52, 16  ;;  %v510_v18 = vld [vmem:[#allocation2 + $0x5c] sm:$0x1] }
 0x14d   : > { %v891_v63 = vpop.permute.xlu0 %890  ;;  %v917_v9 = vrot.slane %v893_v60, 4  ;;  %v702_v36 = vshll.u32 %v510_v18, 16 }
 0x14e   : > { %1883 = vrot.lane.b32.xlu1 %v1772_v56, %s8317_s5  ;;  %v916_v13 = vrot.slane %v891_v63, 4  ;;  %v1267_v56 = vsel %vm8634_vm8, %v1262_v44, %v1266_v41  ;;  %v688_v22 = vrot.slane %v686_v0, 5  ;;  %v1811_v44 = vshrl.u32 %v1669_v27, 16 }
 0x14f   : > { %1881 = vrot.lane.b32.xlu0 %v1762_v61, %s8317_s5  ;;  %v934_v25 = vsel %vm926_vm13, %v917_v9, %v893_v60  ;;  %v792_v60 = vld [vmem:[#allocation2 + $0x54] sm:$0xe]  ;;  %v692_v61 = vshll.u32 %v509_v51, 16  ;;  %v704_v51 = vrot.slane %v702_v36, 5 }
 0x150   : > { %v437_v3 = vpop.permute.xlu1 %436  ;;  %v933_v28 = vsel %vm926_vm13, %v916_v13, %v891_v63  ;;  %v683_v63 = vshrl.u32 %v508_v52, 16  ;;  %v371_v13 = vld [vmem:[%s8529_s12 + $0x38] sm:$0xf]  ;;  %v404_v52 = vld [vmem:[#allocation2 + $0x54] sm:$0xf] }
 0x151   : > { %478 = vst.msk [vmem:[#allocation5 + $0x54] sm:$0xf] %vm470_vm10, %v437_v3  ;;  %v435_v10 = vpop.permute.xlu0 %434  ;;  %v7114_v3 = vrot.slane %v1374_v54, 9  ;;  %v9058_v19 = vrot.slane %v692_v61, 5  ;;  %v1670_v61 = vld [vmem:[#allocation2 + $0x5c] sm:$0x1] }
 0x152   : > { %477 = vst.msk [vmem:[#allocation5 + $0x48] sm:$0xf] %vm470_vm10, %v435_v10  ;;  %2047 = vrot.lane.b32.xlu1 %v2001_v59, %s8314_s24  ;;  %v1257_v59 = vsel %vm8634_vm8, %v1252_v49, %v9011_v11  ;;  %v7107_v10 = vrot.slane %v792_v60, 9  ;;  %v1452_v11 = vsel %vm8623_vm5, %v1450_v57, %v1451_v58 }
 0x153   : > { %v7760_v14 = vld [vmem:[#allocation5 + $0x34] ss:$12 sps:$4 sm:$0xff]   ;;  %2045 = vrot.lane.b32.xlu0 %v1998_v4, %s8314_s24  ;;  %v875_v4 = vrot.slane %v873_v50, 4  ;;  %388 = vst.msk [vmem:[#allocation5 + $0xa8] sm:$0xf] %vm373_vm9, %v371_v13  ;;  %v1449_v24 = vsel %vm8623_vm5, %v7114_v3, %v1448_v45 }
 0x154   : > { %v721_v20 = vpop.permute.xlu1 %720  ;;  %2501 = vmatprep.mubr.bf16.mxu0 %v7760_v14 }
 0x155   : > { %762 = vst.msk [vmem:[#allocation5 + $0x54] sm:$0xf] %vm754_vm14, %v721_v20  ;;  %v719_v26 = vpop.permute.xlu0 %718  ;;  %2502 = vmatmul.mubr.bf16.gmra.mxu0 %v7762_v15  ;;  %v1783_v15 = vshll.u32 %v1666_v1, 16  ;;  %v698_v20 = vrot.slane %v696_v62, 4  ;;  %v877_v30 = vsel %vm8623_vm5, %v875_v4, %v876_v5  ;;  %v1800_v62 = vrot.slane %v1798_v35, 4 }
 0x156   : > { %969 = vst.msk [vmem:[#allocation5 + $0x54] sm:$0xff] %vm8795_vm15, %v934_v25  ;;  %1037 = vrot.lane.b32.xlu1 %v992_v16, %s8317_s5  ;;  %v1787_v16 = vshrl.u32 %v1666_v1, 16  ;;  %v1774_v25 = vshrl.u32 %v1665_v12, 16 }
 0x157   : > { %761 = vst.msk [vmem:[#allocation5 + $0x48] sm:$0xf] %vm754_vm14, %v719_v26  ;;  %1035 = vrot.lane.b32.xlu0 %v991_v21, %s8317_s5  ;;  %v685_v21 = vrot.slane %v683_v63, 4  ;;  %v1777_v26 = vshll.u32 %v1665_v12, 16  ;;  %v699_v40 = vor.u32 %v698_v20, %v9058_v19 }
 0x158   : > { %968 = vst.msk [vmem:[#allocation5 + $0x48] sm:$0xff] %vm8795_vm15, %v933_v28  ;;  %v1026_v37 = vpop.permute.xlu1 %1025  ;;  %v1789_v39 = vrot.slane %v1787_v16, 4  ;;  %v1776_v45 = vrot.slane %v1774_v25, 4 }
 0x159   : > { %1067 = vst.msk [vmem:[#allocation5 + $0x58] sm:$0xf] %vm1059_vm0, %v1026_v37  ;;  %v1024_v42 = vpop.permute.xlu0 %1023  ;;  %v1667_v37 = vld [vmem:[#allocation2 + $0x50] sm:$0x1] }
 0x15a   : > { %1066 = vst.msk [vmem:[#allocation5 + $0x4c] sm:$0xf] %vm1059_vm0, %v1024_v42  ;;  %1583 = vrot.lane.b32.xlu1 %v1538_v31, %s8315_s28  ;;  %v874_v31 = vsel %vm8623_vm5, %v7107_v10, %v873_v50  ;;  %v689_v42 = vor.u32 %v688_v22, %v685_v21  ;;  %v1793_v49 = vshll.u32 %v1667_v37, 16  ;;  %v405_v50 = vld [vmem:[#allocation2 + $0x58] sm:$0xf] }
 0x15b   : > { %1581 = vrot.lane.b32.xlu0 %v1537_v38, %s8315_s28  ;;  %v9073_v38 = vrot.slane %v1783_v15, 5 }
 0x15c   : > { %v1572_v47 = vpop.permute.xlu1 %1571  ;;  %v690_v58 = vrot.slane %v689_v42, 4 }
 0x15d   : > { %v1570_v53 = vpop.permute.xlu0 %1569  ;;  %v1596_v8 = vrot.slane %v1572_v47, 4  ;;  %v1790_v54 = vor.u32 %v1789_v39, %v9073_v38  ;;  %v1097_v39 = vld [vmem:[#allocation2 + $0x60] sm:$0xf] }
 0x15e   : > { %2051 = vrot.lane.b32.xlu1 %v2008_v46, %s8314_s24  ;;  %v1595_v14 = vrot.slane %v1570_v53, 4  ;;  %v1779_v46 = vrot.slane %v1777_v26, 5  ;;  %v695_v12 = vsel %vm8634_vm8, %v690_v58, %v9058_v19  ;;  %v1947_v26 = vld [vmem:[#allocation2 + $0x50] sm:$0x1]  ;;  %v1272_v35 = vshll.u32 %v1097_v39, 16 }
 0x15f   : > { %2049 = vrot.lane.b32.xlu0 %v2005_v48, %s8314_s24  ;;  %v1612_v28 = vsel %vm926_vm13, %v1596_v8, %v1572_v47  ;;  %v1801_v47 = vshll.u32 %v1668_v32, 16  ;;  %v7765_v4 = vld [vmem:[#allocation5 + $0x48] ss:$12 sps:$4 sm:$0xff]   ;;  %v1791_v7 = vrot.slane %v1790_v54, 4  ;;  %v1098_v32 = vld [vmem:[#allocation2 + $0x64] sm:$0xf] }
 0x160   : > { %v1307_v2 = vpop.permute.xlu1 %1306  ;;  %v1611_v34 = vsel %vm926_vm13, %v1595_v14, %v1570_v53  ;;  %v700_v53 = vrot.slane %v699_v40, 4  ;;  %v1780_v60 = vor.u32 %v1779_v46, %v1776_v45  ;;  %v1949_v40 = vld [vmem:[#allocation2 + $0x58] sm:$0xf]  ;;  %v1278_v42 = vshll.u32 %v1098_v32, 16 }
 0x161   : > { %1347 = vst.msk [vmem:[#allocation5 + $0x58] sm:$0xf] %vm470_vm10, %v1307_v2  ;;  %v1305_v9 = vpop.permute.xlu0 %1304  ;;  %v1803_v63 = vrot.slane %v1801_v47, 5  ;;  %v1795_v2 = vrot.slane %v1793_v49, 5  ;;  %v1282_v43 = vshrl.u32 %v1098_v32, 16  ;;  %v1269_v46 = vshrl.u32 %v1097_v39, 16 }
 0x162   : > { %1346 = vst.msk [vmem:[#allocation5 + $0x4c] sm:$0xf] %vm470_vm10, %v1305_v9  ;;  %1318 = vrot.lane.b32.xlu1 %v1267_v56, %s8314_s24  ;;  %v1813_v56 = vrot.slane %v1811_v44, 4  ;;  %v705_v5 = vsel %vm8634_vm8, %v700_v53, %v704_v51  ;;  %v1817_v9 = vshll.u32 %v1670_v61, 16  ;;  %v1781_v13 = vrot.slane %v1780_v60, 4 }
 0x163   : > { %1316 = vrot.lane.b32.xlu0 %v1257_v59, %s8314_s24  ;;  %v1804_v14 = vor.u32 %v1803_v63, %v1800_v62  ;;  %v1796_v19 = vsel %vm8634_vm8, %v1791_v7, %v1795_v2  ;;  %v1950_v49 = vld [vmem:[#allocation2 + $0x5c] sm:$0x1]  ;;  %v9127_v53 = vrot.slane %v1278_v42, 5  ;;  %v1284_v54 = vrot.slane %v1282_v43, 4  ;;  %v993_v60 = vld [vmem:[#allocation2 + $0x60] sm:$0xf] }
 0x164   : > { %v1475_v23 = vpop.permute.xlu1 %1474  ;;  %v1814_v8 = vor.u32 %v1813_v56, %v9082_v55  ;;  %v1819_v21 = vrot.slane %v1817_v9, 5  ;;  %v1099_v56 = vld [vmem:[#allocation2 + $0x68] sm:$0x1]  ;;  %v1271_v61 = vrot.slane %v1269_v46, 4  ;;  %v1274_v62 = vrot.slane %v1272_v35, 5 }
 0x165   : > { %1515 = vst.msk [vmem:[#allocation5 + $0x58] sm:$0xf] %vm754_vm14, %v1475_v23  ;;  %v1473_v29 = vpop.permute.xlu0 %1472  ;;  %v1805_v25 = vrot.slane %v1804_v14, 4  ;;  %v1672_v63 = vld [vmem:[#allocation2 + $0x64] sm:$0xf]  ;;  %v1288_v7 = vshll.u32 %v1099_v56, 16 }
 0x166   : > { %1644 = vst.msk [vmem:[#allocation5 + $0x58] sm:$0xff] %vm8795_vm15, %v1612_v28  ;;  %1486 = vrot.lane.b32.xlu1 %v1452_v11, %s8316_s27  ;;  %v1946_v11 = vld [vmem:[#allocation2 + $0x4c] sm:$0xf]  ;;  %v1815_v20 = vrot.slane %v1814_v8, 4  ;;  %v1945_v28 = vld [vmem:[#allocation2 + $0x48] sm:$0xe] }
 0x167   : > { %1514 = vst.msk [vmem:[#allocation5 + $0x4c] sm:$0xf] %vm754_vm14, %v1473_v29  ;;  %1484 = vrot.lane.b32.xlu0 %v1449_v24, %s8316_s27  ;;  %v2011_v22 = vrot.slane %v1946_v11, 5  ;;  %v1786_v24 = vsel %vm8634_vm8, %v1781_v13, %v9073_v38  ;;  %v1810_v36 = vsel %vm8634_vm8, %v1805_v25, %v9082_v55  ;;  %v7120_v37 = vrot.slane %v1945_v28, 9  ;;  %v994_v55 = vld [vmem:[#allocation2 + $0x64] sm:$0xf] }
 0x168   : > { %1643 = vst.msk [vmem:[#allocation5 + $0x4c] sm:$0xff] %vm8795_vm15, %v1611_v34  ;;  %v897_v41 = vpop.permute.xlu1 %896  ;;  %v1820_v29 = vsel %vm8634_vm8, %v1815_v20, %v1819_v21  ;;  %v9138_v8 = vld [vmem:[#allocation2 + $0x64] sm:$0xf]  ;;  %v1835_v13 = vshrl.u32 %v1672_v63, 16  ;;  %v1539_v11 = vld [vmem:[#allocation2 + $0x6c] sm:$0xf] }
 0x169   : > { %v895_v48 = vpop.permute.xlu0 %894  ;;  %v919_v0 = vrot.slane %v897_v41, 4  ;;  %v2012_v45 = vsel %vm8623_vm5, %v7120_v37, %v2011_v22  ;;  %v1379_v21 = vld [vmem:[#allocation2 + $0x68] sm:$0x1] }
 0x16a   : > { %908 = vrot.lane.b32.xlu1 %v877_v30, %s8315_s28  ;;  %v918_v59 = vrot.slane %v895_v48, 4  ;;  %v2013_v30 = vrot.slane %v2011_v22, 4  ;;  %v1455_v22 = vrot.slane %v9138_v8, 5  ;;  %v1952_v8 = vld [vmem:[#allocation2 + $0x64] sm:$0xf] }
 0x16b   : > { %906 = vrot.lane.b32.xlu0 %v874_v31, %s8315_s28  ;;  %v936_v15 = vsel %vm926_vm13, %v919_v0, %v897_v41  ;;  %v2014_v31 = vrot.slane %v1947_v26, 5  ;;  %v1290_v26 = vrot.slane %v1288_v7, 5 }
 0x16c   : > { %v441_v57 = vpop.permute.xlu1 %440  ;;  %v935_v18 = vsel %vm926_vm13, %v918_v59, %v895_v48  ;;  %v2021_v59 = vrot.slane %v1950_v49, 5 }
 0x16d   : > { %480 = vst.msk [vmem:[#allocation5 + $0x6c] sm:$0xf] %vm470_vm10, %v441_v57  ;;  %v439_v1 = vpop.permute.xlu0 %438  ;;  %v2015_v44 = vsel %vm8623_vm5, %v2013_v30, %v2014_v31  ;;  %v1671_v57 = vld [vmem:[#allocation2 + $0x60] sm:$0xf]  ;;  %v1837_v30 = vrot.slane %v1835_v13, 4 }
 0x16e   : > { %479 = vst.msk [vmem:[#allocation5 + $0x60] sm:$0xf] %vm470_vm10, %v439_v1  ;;  %452 = vrot.lane.b32.xlu1 %v405_v50, %s8314_s24  ;;  %v2018_v50 = vrot.slane %v1949_v40, 5  ;;  %v1822_v9 = vshrl.u32 %v1671_v57, 16 }
 0x16f   : > { %v7763_v3 = vld [vmem:[#allocation5 + $0x4c] ss:$12 sps:$4 sm:$0xff]   ;;  %450 = vrot.lane.b32.xlu0 %v404_v52, %s8314_s24  ;;  %v1948_v52 = vld [vmem:[#allocation2 + $0x54] sm:$0xe] }
 0x170   : > { %v725_v10 = vpop.permute.xlu1 %724  ;;  %2509 = vmatprep.mubr.bf16.mxu0 %v7763_v3  ;;  %v2020_v2 = vrot.slane %v2018_v50, 4  ;;  %v7121_v3 = vrot.slane %v1948_v52, 9  ;;  %v1824_v28 = vrot.slane %v1822_v9, 4 }
 0x171   : > { %764 = vst.msk [vmem:[#allocation5 + $0x6c] sm:$0xf] %vm754_vm14, %v725_v10  ;;  %v723_v16 = vpop.permute.xlu0 %722  ;;  %2510 = vmatmul.mubr.bf16.gmra.mxu0 %v7765_v4  ;;  %v1540_v10 = vld [vmem:[#allocation2 + $0x70] sm:$0xf] }
 0x172   : > { %971 = vst.msk [vmem:[#allocation5 + $0x6c] sm:$0xff] %vm8795_vm15, %v936_v15  ;;  %736 = vrot.lane.b32.xlu1 %v705_v5, %s8316_s27  ;;  %v1285_v5 = vor.u32 %v1284_v54, %v9127_v53  ;;  %v1275_v15 = vor.u32 %v1274_v62, %v1271_v61  ;;  %v2019_v20 = vsel %vm8623_vm5, %v7121_v3, %v2018_v50 }
 0x173   : > { %763 = vst.msk [vmem:[#allocation5 + $0x60] sm:$0xf] %vm754_vm14, %v723_v16  ;;  %734 = vrot.lane.b32.xlu0 %v695_v12, %s8316_s27  ;;  %v1831_v12 = vshll.u32 %v1672_v63, 16  ;;  %v1825_v16 = vshll.u32 %v1671_v57, 16 }
 0x174   : > { %970 = vst.msk [vmem:[#allocation5 + $0x60] sm:$0xff] %vm8795_vm15, %v935_v18  ;;  %v1030_v23 = vpop.permute.xlu1 %1029  ;;  %v1675_v18 = vld [vmem:[#allocation2 + $0x70] sm:$0xf]  ;;  %v1286_v25 = vrot.slane %v1285_v5, 4 }
 0x175   : > { %1069 = vst.msk [vmem:[#allocation5 + $0x70] sm:$0xf] %vm1059_vm0, %v1030_v23  ;;  %v1028_v27 = vpop.permute.xlu0 %1027  ;;  %v1674_v23 = vld [vmem:[#allocation2 + $0x6c] sm:$0xf]  ;;  %v1855_v31 = vshll.u32 %v1675_v18, 16  ;;  %v1859_v32 = vshrl.u32 %v1675_v18, 16 }
 0x176   : > { %1068 = vst.msk [vmem:[#allocation5 + $0x64] sm:$0xf] %vm1059_vm0, %v1028_v27  ;;  %1887 = vrot.lane.b32.xlu1 %v1796_v19, %s8317_s5  ;;  %v1377_v27 = vld [vmem:[#allocation2 + $0x60] sm:$0xe]  ;;  %v1827_v37 = vrot.slane %v1825_v16, 5  ;;  %v1846_v39 = vshrl.u32 %v1674_v23, 16  ;;  %v1291_v35 = vsel %vm8634_vm8, %v1286_v25, %v1290_v26 }
 0x177   : > { %1885 = vrot.lane.b32.xlu0 %v1786_v24, %s8317_s5  ;;  %v2022_v24 = vsel %vm8623_vm5, %v2020_v2, %v2021_v59  ;;  %v1849_v40 = vshll.u32 %v1674_v23, 16  ;;  %v1861_v52 = vrot.slane %v1859_v32, 4  ;;  %v1953_v18 = vld [vmem:[#allocation2 + $0x68] sm:$0x1] }
 0x178   : > { %v1576_v34 = vpop.permute.xlu1 %1575  ;;  %v1828_v56 = vor.u32 %v1827_v37, %v1824_v28  ;;  %v1848_v57 = vrot.slane %v1846_v39, 4 }
 0x179   : > { %v1574_v38 = vpop.permute.xlu0 %1573  ;;  %v1598_v47 = vrot.slane %v1576_v34, 4 }
 0x17a   : > { %1891 = vrot.lane.b32.xlu1 %v1820_v29, %s8317_s5  ;;  %v1597_v51 = vrot.slane %v1574_v38, 4  ;;  %v9150_v29 = vrot.slane %v1831_v12, 5  ;;  %v1829_v5 = vrot.slane %v1828_v56, 4 }
 0x17b   : > { %1889 = vrot.lane.b32.xlu0 %v1810_v36, %s8317_s5  ;;  %v1614_v0 = vsel %vm926_vm13, %v1598_v47, %v1576_v34  ;;  %v1276_v36 = vrot.slane %v1275_v15, 4 }
 0x17c   : > { %v1311_v41 = vpop.permute.xlu1 %1310  ;;  %v1613_v4 = vsel %vm926_vm13, %v1597_v51, %v1574_v38  ;;  %v1673_v38 = vld [vmem:[#allocation2 + $0x68] sm:$0x1]  ;;  %v1838_v49 = vor.u32 %v1837_v30, %v9150_v29  ;;  %v1857_v51 = vrot.slane %v1855_v31, 5  ;;  %v1834_v15 = vsel %vm8634_vm8, %v1829_v5, %v9150_v29  ;;  %v1956_v29 = vld [vmem:[#allocation2 + $0x74] sm:$0x1] }
 0x17d   : > { %1349 = vst.msk [vmem:[#allocation5 + $0x70] sm:$0xf] %vm470_vm10, %v1311_v41  ;;  %v1309_v48 = vpop.permute.xlu0 %1308  ;;  %v1458_v41 = vrot.slane %v1379_v21, 5  ;;  %v1841_v50 = vshll.u32 %v1673_v38, 16  ;;  %v1951_v21 = vld [vmem:[#allocation2 + $0x60] sm:$0xe] }
 0x17e   : > { %1348 = vst.msk [vmem:[#allocation5 + $0x64] sm:$0xf] %vm470_vm10, %v1309_v48  ;;  %2055 = vrot.lane.b32.xlu1 %v2015_v44, %s8314_s24  ;;  %v1457_v44 = vrot.slane %v1455_v22, 4  ;;  %v7768_v48 = vld [vmem:[#allocation5 + $0x60] ss:$12 sps:$4 sm:$0xff]   ;;  %v1862_v2 = vor.u32 %v1861_v52, %v1857_v51  ;;  %v7122_v28 = vrot.slane %v1951_v21, 9 }
 0x17f   : > { %2053 = vrot.lane.b32.xlu0 %v2012_v45, %s8314_s24  ;;  %v7115_v45 = vrot.slane %v1377_v27, 9  ;;  %v1954_v31 = vld [vmem:[#allocation2 + $0x6c] sm:$0xe] }
 0x180   : > { %v1479_v58 = vpop.permute.xlu1 %1478  ;;  %v1863_v12 = vrot.slane %v1862_v2, 4  ;;  %v7123_v39 = vrot.slane %v1954_v31, 9 }
 0x181   : > { %1517 = vst.msk [vmem:[#allocation5 + $0x70] sm:$0xf] %vm754_vm14, %v1479_v58  ;;  %v1477_v1 = vpop.permute.xlu0 %1476  ;;  %v1851_v58 = vrot.slane %v1849_v40, 5 }
 0x182   : > { %1646 = vst.msk [vmem:[#allocation5 + $0x70] sm:$0xff] %vm8795_vm15, %v1614_v0  ;;  %1041 = vrot.lane.b32.xlu1 %v994_v55, %s8317_s5  ;;  %v1281_v55 = vsel %vm8634_vm8, %v1276_v36, %v9127_v53  ;;  %v1459_v53 = vsel %vm8623_vm5, %v1457_v44, %v1458_v41  ;;  %v1839_v0 = vrot.slane %v1838_v49, 4  ;;  %v2035_v36 = vrot.slane %v1956_v29, 5 }
 0x183   : > { %1516 = vst.msk [vmem:[#allocation5 + $0x64] sm:$0xf] %vm754_vm14, %v1477_v1  ;;  %1039 = vrot.lane.b32.xlu0 %v993_v60, %s8317_s5  ;;  %v1676_v60 = vld [vmem:[#allocation2 + $0x74] sm:$0x1]  ;;  %v1843_v1 = vrot.slane %v1841_v50, 5  ;;  %v1852_v7 = vor.u32 %v1851_v58, %v1848_v57 }
 0x184   : > { %1645 = vst.msk [vmem:[#allocation5 + $0x64] sm:$0xff] %vm8795_vm15, %v1613_v4  ;;  %v901_v14 = vpop.permute.xlu1 %900  ;;  %v1865_v59 = vshll.u32 %v1676_v60, 16  ;;  %v1456_v4 = vsel %vm8623_vm5, %v7115_v45, %v1455_v22 }
 0x185   : > { %v899_v19 = vpop.permute.xlu0 %898  ;;  %v921_v42 = vrot.slane %v901_v14, 4  ;;  %v1853_v16 = vrot.slane %v1852_v7, 4 }
 0x186   : > { %1587 = vrot.lane.b32.xlu1 %v1540_v10, %s8315_s28  ;;  %v920_v46 = vrot.slane %v899_v19, 4  ;;  %v1844_v10 = vsel %vm8634_vm8, %v1839_v0, %v1843_v1  ;;  %v1867_v13 = vrot.slane %v1865_v59, 5 }
 0x187   : > { %1585 = vrot.lane.b32.xlu0 %v1539_v11, %s8315_s28  ;;  %v938_v61 = vsel %vm926_vm13, %v921_v42, %v901_v14  ;;  %v2025_v14 = vrot.slane %v1952_v8, 5  ;;  %v1858_v27 = vsel %vm8634_vm8, %v1853_v16, %v1857_v51 }
 0x188   : > { %v445_v34 = vpop.permute.xlu1 %444  ;;  %v937_v63 = vsel %vm926_vm13, %v920_v46, %v899_v19  ;;  %v1955_v19 = vld [vmem:[#allocation2 + $0x70] sm:$0xf]  ;;  %v1868_v22 = vsel %vm8634_vm8, %v1863_v12, %v1867_v13  ;;  %v2760_v46 = vld [vmem:[#allocation4 + $0x8] sm:$0xff] }
 0x189   : > { %482 = vst.msk [vmem:[#allocation5 + $0x84] sm:$0xf] %vm470_vm10, %v445_v34  ;;  %v443_v43 = vpop.permute.xlu0 %442  ;;  %v2027_v23 = vrot.slane %v2025_v14, 4  ;;  %v2032_v25 = vrot.slane %v1955_v19, 5  ;;  %v2026_v38 = vsel %vm8623_vm5, %v7122_v28, %v2025_v14 }
 0x18a   : > { %481 = vst.msk [vmem:[#allocation5 + $0x78] sm:$0xf] %vm470_vm10, %v443_v43  ;;  %2059 = vrot.lane.b32.xlu1 %v2022_v24, %s8314_s24  ;;  %v2028_v24 = vrot.slane %v1953_v18, 5 }
 0x18b   : > { %v7766_v47 = vld [vmem:[#allocation5 + $0x64] ss:$12 sps:$4 sm:$0xff]   ;;  %2057 = vrot.lane.b32.xlu0 %v2019_v20, %s8314_s24  ;;  %v2034_v34 = vrot.slane %v2032_v25, 4  ;;  %v2033_v44 = vsel %vm8623_vm5, %v7123_v39, %v2032_v25 }
 0x18c   : > { %v729_v54 = vpop.permute.xlu1 %728  ;;  %2517 = vmatprep.mubr.bf16.mxu0 %v7766_v47  ;;  %v2029_v32 = vsel %vm8623_vm5, %v2027_v23, %v2028_v24  ;;  %v2759_v47 = vld [vmem:[#allocation4] sm:$0xff] }
 0x18d   : > { %766 = vst.msk [vmem:[#allocation5 + $0x84] sm:$0xf] %vm754_vm14, %v729_v54  ;;  %v727_v62 = vpop.permute.xlu0 %726  ;;  %2518 = vmatmul.mubr.bf16.gmra.mxu0 %v7768_v48  ;;  %v2036_v42 = vsel %vm8623_vm5, %v2034_v34, %v2035_v36 }
 0x18e   : > { %973 = vst.msk [vmem:[#allocation5 + $0x84] sm:$0xff] %vm8795_vm15, %v938_v61  ;;  %1322 = vrot.lane.b32.xlu1 %v1291_v35, %s8314_s24 }
 0x18f   : > { %765 = vst.msk [vmem:[#allocation5 + $0x78] sm:$0xf] %vm754_vm14, %v727_v62  ;;  %1320 = vrot.lane.b32.xlu0 %v1281_v55, %s8314_s24 }
 0x190   : > { %972 = vst.msk [vmem:[#allocation5 + $0x78] sm:$0xff] %vm8795_vm15, %v937_v63  ;;  %v1872_v3 = vpop.permute.xlu1 %1871 }
 0x191   : > { %1918 = vst.msk [vmem:[#allocation5 + $0x14] sm:$0xf] %vm1059_vm0, %v1872_v3  ;;  %v1870_v9 = vpop.permute.xlu0 %1869 }
 0x192   : > { %1917 = vst.msk [vmem:[#allocation5 + $0x8] sm:$0xf] %vm1059_vm0, %v1870_v9  ;;  %1490 = vrot.lane.b32.xlu1 %v1459_v53, %s8316_s27 }
 0x193   : > { %1488 = vrot.lane.b32.xlu0 %v1456_v4, %s8316_s27 }
 0x194   : > { %v1876_v11 = vpop.permute.xlu1 %1875 }
 0x195   : > { %1920 = vst.msk [vmem:[#allocation5 + $0x2c] sm:$0xf] %vm1059_vm0, %v1876_v11  ;;  %v1874_v20 = vpop.permute.xlu0 %1873 }
 0x196   : > { %1919 = vst.msk [vmem:[#allocation5 + $0x20] sm:$0xf] %vm1059_vm0, %v1874_v20  ;;  %1895 = vrot.lane.b32.xlu1 %v1844_v10, %s8317_s5 }
 0x197   : > { %1893 = vrot.lane.b32.xlu0 %v1834_v15, %s8317_s5  ;;  %v7778_v2 = vld [vmem:[#allocation5 + $0x78] ss:$12 sps:$4 sm:$0xff]  }
 0x198   : > { %v2040_v26 = vpop.permute.xlu1 %2039 }
 0x199   : > { %2086 = vst.msk [vmem:[#allocation5 + $0x14] sm:$0xf] %vm470_vm10, %v2040_v26  ;;  %v2038_v30 = vpop.permute.xlu0 %2037 }
 0x19a   : > { %2085 = vst.msk [vmem:[#allocation5 + $0x8] sm:$0xf] %vm470_vm10, %v2038_v30  ;;  %1899 = vrot.lane.b32.xlu1 %v1868_v22, %s8317_s5 }
 0x19b   : > { %1897 = vrot.lane.b32.xlu0 %v1858_v27, %s8317_s5 }
 0x19c   : > { %v1034_v37 = vpop.permute.xlu1 %1033 }
 0x19d   : > { %1071 = vst.msk [vmem:[#allocation5 + $0x88] sm:$0xf] %vm1059_vm0, %v1034_v37  ;;  %v1032_v40 = vpop.permute.xlu0 %1031 }
 0x19e   : > { %1070 = vst.msk [vmem:[#allocation5 + $0x7c] sm:$0xf] %vm1059_vm0, %v1032_v40  ;;  %2063 = vrot.lane.b32.xlu1 %v2029_v32, %s8314_s24 }
 0x19f   : > { %2061 = vrot.lane.b32.xlu0 %v2026_v38, %s8314_s24 }
 0x1a0   : > { %v1580_v43 = vpop.permute.xlu1 %1579 }
 0x1a1   : > { %v1578_v41 = vpop.permute.xlu0 %1577  ;;  %v7772_v45 = vld [vmem:[#allocation5 + $0x8] ss:$12 sps:$4 sm:$0xff]   ;;  %v1600_v50 = vrot.slane %v1580_v43, 4 }
 0x1a2   : > { %2067 = vrot.lane.b32.xlu1 %v2036_v42, %s8314_s24  ;;  %7560 = vmatprep.mubr.msk.bf16.mxu1 %vm2424_vm2, %v7772_v45  ;;  %v1599_v52 = vrot.slane %v1578_v41, 4 }
 0x1a3   : > { %2065 = vrot.lane.b32.xlu0 %v2033_v44, %s8314_s24  ;;  %v1616_v55 = vsel %vm926_vm13, %v1600_v50, %v1580_v43 }
 0x1a4   : > { %v2044_v35 = vpop.permute.xlu1 %2043  ;;  %v1615_v58 = vsel %vm926_vm13, %v1599_v52, %v1578_v41 }
 0x1a5   : > { %2088 = vst.msk [vmem:[#allocation5 + $0x2c] sm:$0xf] %vm470_vm10, %v2044_v35  ;;  %v2042_v48 = vpop.permute.xlu0 %2041 }
 0x1a6   : > { %2087 = vst.msk [vmem:[#allocation5 + $0x20] sm:$0xf] %vm470_vm10, %v2042_v48  ;;  %2793 = vrot.lane.b32.xlu1 %v2760_v46, %s8318_s6 }
 0x1a7   : > { %2791 = vrot.lane.b32.xlu0 %v2759_v47, %s8318_s6 }
 0x1a8   : > { %v1315_v49 = vpop.permute.xlu1 %1314 }
 0x1a9   : > { %1351 = vst.msk [vmem:[#allocation5 + $0x88] sm:$0xf] %vm470_vm10, %v1315_v49  ;;  %v1313_v51 = vpop.permute.xlu0 %1312 }
 0x1aa   : > { %1350 = vst.msk [vmem:[#allocation5 + $0x7c] sm:$0xf] %vm470_vm10, %v1313_v51 }
 0x1ac   : > { %v1483_v54 = vpop.permute.xlu1 %1482 }
 0x1ad   : > { %1519 = vst.msk [vmem:[#allocation5 + $0x88] sm:$0xf] %vm754_vm14, %v1483_v54  ;;  %v1481_v56 = vpop.permute.xlu0 %1480  ;;  %v7775_v57 = vld [vmem:[#allocation5 + $0x20] ss:$12 sps:$4 sm:$0xff]  }
 0x1ae   : > { %1648 = vst.msk [vmem:[#allocation5 + $0x88] sm:$0xff] %vm8795_vm15, %v1616_v55  ;;  %7561 = vmatmul.mubr.msk.bf16.vlgmr.msra.gmra.mxu1 %vm2424_vm2, %v7775_v57 }
 0x1af   : > { %1518 = vst.msk [vmem:[#allocation5 + $0x7c] sm:$0xf] %vm754_vm14, %v1481_v56 }
 0x1b0   : > { %1647 = vst.msk [vmem:[#allocation5 + $0x7c] sm:$0xff] %vm8795_vm15, %v1615_v58  ;;  %v905_v60 = vpop.permute.xlu1 %904 }
 0x1b1   : > { %v903_v61 = vpop.permute.xlu0 %902  ;;  %v923_v63 = vrot.slane %v905_v60, 4 }
 0x1b2   : > { %v922_v0 = vrot.slane %v903_v61, 4 }
 0x1b3   : > { %v940_v3 = vsel %vm926_vm13, %v923_v63, %v905_v60 }
 0x1b4   : > { %v449_v62 = vpop.permute.xlu1 %448  ;;  %v939_v5 = vsel %vm926_vm13, %v922_v0, %v903_v61 }
 0x1b5   : > { %484 = vst.msk [vmem:[#allocation5 + $0x9c] sm:$0xf] %vm470_vm10, %v449_v62  ;;  %v447_v53 = vpop.permute.xlu0 %446 }
 0x1b6   : > { %483 = vst.msk [vmem:[#allocation5 + $0x90] sm:$0xf] %vm470_vm10, %v447_v53 }
 0x1b7   : > { %v7776_v1 = vld [vmem:[#allocation5 + $0x7c] ss:$12 sps:$4 sm:$0xff]  }
 0x1b8   : > { %v733_v59 = vpop.permute.xlu1 %732  ;;  %2525 = vmatprep.mubr.bf16.mxu0 %v7776_v1 }
 0x1b9   : > { %768 = vst.msk [vmem:[#allocation5 + $0x9c] sm:$0xf] %vm754_vm14, %v733_v59  ;;  %v731_v4 = vpop.permute.xlu0 %730  ;;  %2526 = vmatmul.mubr.bf16.gmra.mxu0 %v7778_v2 }
 0x1ba   : > { %975 = vst.msk [vmem:[#allocation5 + $0x9c] sm:$0xff] %vm8795_vm15, %v940_v3 }
 0x1bb   : > { %767 = vst.msk [vmem:[#allocation5 + $0x90] sm:$0xf] %vm754_vm14, %v731_v4 }
 0x1bc   : > { %974 = vst.msk [vmem:[#allocation5 + $0x90] sm:$0xff] %vm8795_vm15, %v939_v5  ;;  %v1880_v7 = vpop.permute.xlu1 %1879 }
 0x1bd   : > { %1922 = vst.msk [vmem:[#allocation5 + $0x44] sm:$0xf] %vm1059_vm0, %v1880_v7  ;;  %v1878_v8 = vpop.permute.xlu0 %1877 }
 0x1be   : > { %1921 = vst.msk [vmem:[#allocation5 + $0x38] sm:$0xf] %vm1059_vm0, %v1878_v8 }
 0x1c0   : > { %v1884_v9 = vpop.permute.xlu1 %1883 }
 0x1c1   : > { %1924 = vst.msk [vmem:[#allocation5 + $0x5c] sm:$0xf] %vm1059_vm0, %v1884_v9  ;;  %v1882_v10 = vpop.permute.xlu0 %1881 }
 0x1c2   : > { %1923 = vst.msk [vmem:[#allocation5 + $0x50] sm:$0xf] %vm1059_vm0, %v1882_v10 }
 0x1c3   : > { %v7783_v39 = vld [vmem:[#allocation5 + $0x90] ss:$12 sps:$4 sm:$0xff]  }
 0x1c4   : > { %v2048_v12 = vpop.permute.xlu1 %2047 }
 0x1c5   : > { %2090 = vst.msk [vmem:[#allocation5 + $0x44] sm:$0xf] %vm470_vm10, %v2048_v12  ;;  %v2046_v13 = vpop.permute.xlu0 %2045 }
 0x1c6   : > { %2089 = vst.msk [vmem:[#allocation5 + $0x38] sm:$0xf] %vm470_vm10, %v2046_v13 }
 0x1c8   : > { %v1038_v14 = vpop.permute.xlu1 %1037 }
 0x1c9   : > { %1073 = vst.msk [vmem:[#allocation5 + $0xa0] sm:$0xf] %vm1059_vm0, %v1038_v14  ;;  %v1036_v11 = vpop.permute.xlu0 %1035 }
 0x1ca   : > { %1072 = vst.msk [vmem:[#allocation5 + $0x94] sm:$0xf] %vm1059_vm0, %v1036_v11 }
 0x1cc   : > { %v1584_v15 = vpop.permute.xlu1 %1583 }
 0x1cd   : > { %v1582_v16 = vpop.permute.xlu0 %1581  ;;  %v7779_v18 = vld [vmem:[#allocation5 + $0x38] ss:$12 sps:$4 sm:$0xff]   ;;  %v1602_v22 = vrot.slane %v1584_v15, 4 }
 0x1ce   : > { %7564 = vmatprep.mubr.msk.bf16.mxu1 %vm2424_vm2, %v7779_v18  ;;  %v1601_v24 = vrot.slane %v1582_v16, 4 }
 0x1cf   : > { %v1618_v26 = vsel %vm926_vm13, %v1602_v22, %v1584_v15 }
 0x1d0   : > { %v2052_v19 = vpop.permute.xlu1 %2051  ;;  %v1617_v29 = vsel %vm926_vm13, %v1601_v24, %v1582_v16 }
 0x1d1   : > { %2092 = vst.msk [vmem:[#allocation5 + $0x5c] sm:$0xf] %vm470_vm10, %v2052_v19  ;;  %v2050_v20 = vpop.permute.xlu0 %2049 }
 0x1d2   : > { %2091 = vst.msk [vmem:[#allocation5 + $0x50] sm:$0xf] %vm470_vm10, %v2050_v20 }
 0x1d4   : > { %v1319_v21 = vpop.permute.xlu1 %1318 }
 0x1d5   : > { %1353 = vst.msk [vmem:[#allocation5 + $0xa0] sm:$0xf] %vm470_vm10, %v1319_v21  ;;  %v1317_v23 = vpop.permute.xlu0 %1316 }
 0x1d6   : > { %1352 = vst.msk [vmem:[#allocation5 + $0x94] sm:$0xf] %vm470_vm10, %v1317_v23  ;;  %v9301_v23 = vld [vmem:[#allocation9] ss:$0 sm:$0xff] }
 0x1d8   : > { %v1487_v25 = vpop.permute.xlu1 %1486 }
 0x1d9   : > { %1521 = vst.msk [vmem:[#allocation5 + $0xa0] sm:$0xf] %vm754_vm14, %v1487_v25  ;;  %v1485_v27 = vpop.permute.xlu0 %1484  ;;  %v7780_v28 = vld [vmem:[#allocation5 + $0x50] ss:$12 sps:$4 sm:$0xff]  }
 0x1da   : > { %1650 = vst.msk [vmem:[#allocation5 + $0xa0] sm:$0xff] %vm8795_vm15, %v1618_v26  ;;  %7565 = vmatmul.mubr.msk.bf16.gmra.mxu1 %vm2424_vm2, %v7780_v28 }
 0x1db   : > { %1520 = vst.msk [vmem:[#allocation5 + $0x94] sm:$0xf] %vm754_vm14, %v1485_v27 }
 0x1dc   : > { %1649 = vst.msk [vmem:[#allocation5 + $0x94] sm:$0xff] %vm8795_vm15, %v1617_v29  ;;  %v909_v30 = vpop.permute.xlu1 %908 }
 0x1dd   : > { %v907_v31 = vpop.permute.xlu0 %906  ;;  %v925_v34 = vrot.slane %v909_v30, 4  ;;  %v7412_v11 = vpop.f32.mrf.mxu0 }
 0x1de   : > { %v924_v37 = vrot.slane %v907_v31, 4 }
 0x1df   : > { %v942_v42 = vsel %vm926_vm13, %v925_v34, %v909_v30  ;;  %v7413_v15 = vpop.f32.mrf.mxu0 }
 0x1e0   : > { %v453_v32 = vpop.permute.xlu1 %452  ;;  %v941_v44 = vsel %vm926_vm13, %v924_v37, %v907_v31  ;;  %v7414_v21 = vadd.f32 %v7413_v15, %v7412_v11 }
 0x1e1   : > { %486 = vst.msk [vmem:[#allocation5 + $0xb4] sm:$0xf] %vm470_vm10, %v453_v32  ;;  %v451_v36 = vpop.permute.xlu0 %450  ;;  %v7415_v16 = vpop.f32.mrf.mxu0 }
 0x1e2   : > { %485 = vst.msk [vmem:[#allocation5 + $0xa8] sm:$0xf] %vm470_vm10, %v451_v36  ;;  %v2488_v28 = vadd.f32 %v7414_v21, %v9301_v23 }
 0x1e3   : > { %v7781_v38 = vld [vmem:[#allocation5 + $0x94] ss:$12 sps:$4 sm:$0xff]   ;;  %v7416_v18 = vpop.f32.mrf.mxu0 }
 0x1e4   : > { %v737_v40 = vpop.permute.xlu1 %736  ;;  %2533 = vmatprep.mubr.bf16.mxu0 %v7781_v38  ;;  %v7417_v26 = vadd.f32 %v7416_v18, %v7415_v16 }
 0x1e5   : > { %770 = vst.msk [vmem:[#allocation5 + $0xb4] sm:$0xf] %vm754_vm14, %v737_v40  ;;  %v735_v43 = vpop.permute.xlu0 %734  ;;  %2534 = vmatmul.mubr.bf16.gmra.mxu0 %v7783_v39 }
 0x1e6   : > { %977 = vst.msk [vmem:[#allocation5 + $0xb4] sm:$0xff] %vm8795_vm15, %v942_v42  ;;  %v2491_v37 = vadd.f32 %v7417_v26, %v9301_v23 }
 0x1e7   : > { %769 = vst.msk [vmem:[#allocation5 + $0xa8] sm:$0xf] %vm754_vm14, %v735_v43 }
 0x1e8   : > { %976 = vst.msk [vmem:[#allocation5 + $0xa8] sm:$0xff] %vm8795_vm15, %v941_v44  ;;  %v1888_v41 = vpop.permute.xlu1 %1887 }
 0x1e9   : > { %1926 = vst.msk [vmem:[#allocation5 + $0x74] sm:$0xf] %vm1059_vm0, %v1888_v41  ;;  %v1886_v45 = vpop.permute.xlu0 %1885 }
 0x1ea   : > { %1925 = vst.msk [vmem:[#allocation5 + $0x68] sm:$0xf] %vm1059_vm0, %v1886_v45 }
 0x1ec   : > { %v1892_v46 = vpop.permute.xlu1 %1891 }
 0x1ed   : > { %1928 = vst.msk [vmem:[#allocation5 + $0x8c] sm:$0xf] %vm1059_vm0, %v1892_v46  ;;  %v1890_v35 = vpop.permute.xlu0 %1889 }
 0x1ee   : > { %1927 = vst.msk [vmem:[#allocation5 + $0x80] sm:$0xf] %vm1059_vm0, %v1890_v35 }
 0x1ef   : > { %v7788_v7 = vld [vmem:[#allocation5 + $0xa8] ss:$12 sps:$4 sm:$0xff]  }
 0x1f0   : > { %v2056_v47 = vpop.permute.xlu1 %2055 }
 0x1f1   : > { %2094 = vst.msk [vmem:[#allocation5 + $0x74] sm:$0xf] %vm470_vm10, %v2056_v47  ;;  %v2054_v48 = vpop.permute.xlu0 %2053 }
 0x1f2   : > { %2093 = vst.msk [vmem:[#allocation5 + $0x68] sm:$0xf] %vm470_vm10, %v2054_v48 }
 0x1f4   : > { %v1042_v49 = vpop.permute.xlu1 %1041 }
 0x1f5   : > { %1075 = vst.msk [vmem:[#allocation5 + $0xb8] sm:$0xf] %vm1059_vm0, %v1042_v49  ;;  %v1040_v50 = vpop.permute.xlu0 %1039 }
 0x1f6   : > { %1074 = vst.msk [vmem:[#allocation5 + $0xac] sm:$0xf] %vm1059_vm0, %v1040_v50 }
 0x1f8   : > { %v1588_v51 = vpop.permute.xlu1 %1587 }
 0x1f9   : > { %v1586_v52 = vpop.permute.xlu0 %1585  ;;  %v7784_v54 = vld [vmem:[#allocation5 + $0x68] ss:$12 sps:$4 sm:$0xff]   ;;  %v1604_v58 = vrot.slane %v1588_v51, 4  ;;  %v7418_v19 = vpop.f32.mrf.mxu0 }
 0x1fa   : > { %7568 = vmatprep.mubr.msk.bf16.mxu1 %vm2424_vm2, %v7784_v54  ;;  %v1603_v61 = vrot.slane %v1586_v52, 4 }
 0x1fb   : > { %v1620_v63 = vsel %vm926_vm13, %v1604_v58, %v1588_v51  ;;  %v7419_v20 = vpop.f32.mrf.mxu0 }
 0x1fc   : > { %v2060_v55 = vpop.permute.xlu1 %2059  ;;  %v1619_v1 = vsel %vm926_vm13, %v1603_v61, %v1586_v52  ;;  %v7420_v24 = vadd.f32 %v7419_v20, %v7418_v19 }
 0x1fd   : > { %2096 = vst.msk [vmem:[#allocation5 + $0x8c] sm:$0xf] %vm470_vm10, %v2060_v55  ;;  %v2058_v56 = vpop.permute.xlu0 %2057  ;;  %v7421_v22 = vpop.f32.mrf.mxu0 }
 0x1fe   : > { %2095 = vst.msk [vmem:[#allocation5 + $0x80] sm:$0xf] %vm470_vm10, %v2058_v56  ;;  %v2496_v30 = vadd.f32 %v7420_v24, %v9301_v23 }
 0x1ff   : > { %v7422_v27 = vpop.f32.mrf.mxu0 }
 0x200   : > { %v1323_v57 = vpop.permute.xlu1 %1322  ;;  %v7423_v32 = vadd.f32 %v7422_v27, %v7421_v22 }
 0x201   : > { %1355 = vst.msk [vmem:[#allocation5 + $0xb8] sm:$0xf] %vm470_vm10, %v1323_v57  ;;  %v1321_v60 = vpop.permute.xlu0 %1320 }
 0x202   : > { %1354 = vst.msk [vmem:[#allocation5 + $0xac] sm:$0xf] %vm470_vm10, %v1321_v60  ;;  %v2499_v40 = vadd.f32 %v7423_v32, %v9301_v23 }
 0x204   : > { %v1491_v62 = vpop.permute.xlu1 %1490 }
 0x205   : > { %1523 = vst.msk [vmem:[#allocation5 + $0xb8] sm:$0xf] %vm754_vm14, %v1491_v62  ;;  %v1489_v53 = vpop.permute.xlu0 %1488  ;;  %v7785_v0 = vld [vmem:[#allocation5 + $0x80] ss:$12 sps:$4 sm:$0xff]  }
 0x206   : > { %1652 = vst.msk [vmem:[#allocation5 + $0xb8] sm:$0xff] %vm8795_vm15, %v1620_v63  ;;  %7569 = vmatmul.mubr.msk.bf16.gmra.mxu1 %vm2424_vm2, %v7785_v0 }
 0x207   : > { %1522 = vst.msk [vmem:[#allocation5 + $0xac] sm:$0xf] %vm754_vm14, %v1489_v53 }
 0x208   : > { %1651 = vst.msk [vmem:[#allocation5 + $0xac] sm:$0xff] %vm8795_vm15, %v1619_v1  ;;  %v1896_v2 = vpop.permute.xlu1 %1895 }
 0x209   : > { %v1894_v59 = vpop.permute.xlu0 %1893  ;;  %1930 = vst.msk [vmem:[#allocation5 + $0xa4] sm:$0xf] %vm1059_vm0, %v1896_v2 }
 0x20a   : > { %1929 = vst.msk [vmem:[#allocation5 + $0x98] sm:$0xf] %vm1059_vm0, %v1894_v59 }
 0x20c   : > { %v1900_v3 = vpop.permute.xlu1 %1899 }
 0x20d   : > { %v1898_v4 = vpop.permute.xlu0 %1897  ;;  %1932 = vst.msk [vmem:[#allocation5 + $0xbc] sm:$0xf] %vm1059_vm0, %v1900_v3 }
 0x20e   : > { %1931 = vst.msk [vmem:[#allocation5 + $0xb0] sm:$0xf] %vm1059_vm0, %v1898_v4 }
 0x20f   : > { %v7786_v5 = vld [vmem:[#allocation5 + $0xac] ss:$12 sps:$4 sm:$0xff]  }
 0x210   : > { %v2064_v8 = vpop.permute.xlu1 %2063  ;;  %2541 = vmatprep.mubr.bf16.mxu0 %v7786_v5 }
 0x211   : > { %v2062_v9 = vpop.permute.xlu0 %2061  ;;  %2098 = vst.msk [vmem:[#allocation5 + $0xa4] sm:$0xf] %vm470_vm10, %v2064_v8  ;;  %2542 = vmatmul.mubr.bf16.gmra.mxu0 %v7788_v7 }
 0x212   : > { %2097 = vst.msk [vmem:[#allocation5 + $0x98] sm:$0xf] %vm470_vm10, %v2062_v9 }
 0x214   : > { %v2068_v10 = vpop.permute.xlu1 %2067 }
 0x215   : > { %v2066_v12 = vpop.permute.xlu0 %2065  ;;  %2100 = vst.msk [vmem:[#allocation5 + $0xbc] sm:$0xf] %vm470_vm10, %v2068_v10  ;;  %v7424_v44 = vpop.f32.mrf.mxu0 }
 0x216   : > { %2099 = vst.msk [vmem:[#allocation5 + $0xb0] sm:$0xf] %vm470_vm10, %v2066_v12 }
 0x217   : > { %v7425_v46 = vpop.f32.mrf.mxu0 }
 0x218   : > { %v7426_v51 = vadd.f32 %v7425_v46, %v7424_v44 }
 0x219   : > { %v7789_v13 = vld [vmem:[#allocation5 + $0x98] ss:$12 sps:$4 sm:$0xff]   ;;  %v7427_v47 = vpop.f32.mrf.mxu0 }
 0x21a   : > { %7572 = vmatprep.mubr.msk.bf16.mxu1 %vm2424_vm2, %v7789_v13  ;;  %v2504_v58 = vadd.f32 %v7426_v51, %v9301_v23 }
 0x21b   : > { %v7428_v48 = vpop.f32.mrf.mxu0 }
 0x21c   : > { %v7429_v56 = vadd.f32 %v7428_v48, %v7427_v47 }
 0x21d   : > { %v7790_v14 = vld [vmem:[#allocation5 + $0xb0] ss:$12 sps:$4 sm:$0xff]  }
 0x21e   : > { %7573 = vmatmul.mubr.msk.bf16.gmra.mxu1 %vm2424_vm2, %v7790_v14  ;;  %v2507_v1 = vadd.f32 %v7429_v56, %v9301_v23 }
 0x231   : > { %v7430_v49 = vpop.f32.mrf.mxu0 }
 0x233   : > { %v7431_v50 = vpop.f32.mrf.mxu0 }
 0x234   : > { %v7432_v54 = vadd.f32 %v7431_v50, %v7430_v49 }
 0x235   : > { %v7433_v52 = vpop.f32.mrf.mxu0 }
 0x236   : > { %v2512_v61 = vadd.f32 %v7432_v54, %v9301_v23 }
 0x237   : > { %v7434_v57 = vpop.f32.mrf.mxu0 }
 0x238   : > { %v7435_v63 = vadd.f32 %v7434_v57, %v7433_v52 }
 0x23a   : > { %v2515_v3 = vadd.f32 %v7435_v63, %v9301_v23 }
 0x24d   : > { %v7436_v5 = vpop.f32.mrf.mxu0 }
 0x24f   : > { %v7437_v8 = vpop.f32.mrf.mxu0 }
 0x250   : > { %v7438_v18 = vadd.f32 %v7437_v8, %v7436_v5 }
 0x251   : > { %v7439_v12 = vpop.f32.mrf.mxu0 }
 0x253   : > { %v7440_v14 = vpop.f32.mrf.mxu0 }
 0x254   : > { %v7441_v24 = vadd.f32 %v7440_v14, %v7439_v12 }
 0x26e   : > { %v7562_v25 = vpop.f32.mrf.mxu1 }
 0x26f   : > { %v9307_v36 = vadd.f32 %v7562_v25, %v2496_v30  ;;  %v2520_v25 = vadd.f32 %v7438_v18, %v9301_v23  ;;  %v2763_v18 = vld [vmem:[#allocation4 + $0x20] sm:$0xff] }
 0x270   : > { %v2584_v29 = vpop.f32.mrf.mxu1 }
 0x271   : > { %v9305_v31 = vadd.f32 %v2584_v29, %v2488_v28 }
 0x272   : > { %v7563_v34 = vpop.f32.mrf.mxu1 }
 0x273   : > { %7791 = vtanh.f32 %v9305_v31  ;;  %v9315_v42 = vadd.f32 %v7563_v34, %v2499_v40 }
 0x274   : > { %v2587_v38 = vpop.f32.mrf.mxu1  ;;  %7793 = vtanh.f32 %v9307_v36 }
 0x275   : > { %v9311_v39 = vadd.f32 %v2587_v38, %v2491_v37  ;;  %v2523_v37 = vadd.f32 %v7441_v24, %v9301_v23 }
 0x277   : > { %7795 = vtanh.f32 %v9311_v39  ;;  %v7179_v14 = vmul.f32 -1.442695, %v9311_v39  ;;  %v2762_v39 = vld [vmem:[#allocation4 + $0x18] sm:$0xff] }
 0x278   : > { %7797 = vtanh.f32 %v9315_v42 }
 0x279   : > { %v7442_v11 = vpop.f32.mrf.mxu0 }
 0x27b   : > { %v7443_v15 = vpop.f32.mrf.mxu0 }
 0x27c   : > { %v7444_v20 = vadd.f32 %v7443_v15, %v7442_v11  ;;  %v7181_v15 = vmul.f32 -1.442695, %v9315_v42 }
 0x27d   : > { %v7445_v16 = vpop.f32.mrf.mxu0 }
 0x27e   : > { %v2528_v28 = vadd.f32 %v7444_v20, %v9301_v23 }
 0x27f   : > { %v7446_v19 = vpop.f32.mrf.mxu0 }
 0x280   : > { %v7792_v43 = vpop.eup %7791  ;;  %v7447_v30 = vadd.f32 %v7446_v19, %v7445_v16  ;;  %v2761_v16 = vld [vmem:[#allocation4 + $0x10] sm:$0xff] }
 0x281   : > { %2871 = vrot.lane.b32.xlu0 %v7792_v43, %s8318_s6  ;;  %v7794_v41 = vpop.eup %7793 }
 0x282   : > { %v2531_v44 = vadd.f32 %v7447_v30, %v9301_v23 }
 0x284   : > { %v7796_v45 = vpop.eup %7795 }
 0x285   : > { %2873 = vrot.lane.b32.xlu1 %v7796_v45, %s8318_s6  ;;  %2875 = vrot.lane.b32.xlu0 %v7794_v41, %s8318_s6  ;;  %v7798_v35 = vpop.eup %7797 }
 0x289   : > { %2877 = vrot.lane.b32.xlu1 %v7798_v35, %s8318_s6 }
 0x29a   : > { %v7566_v55 = vpop.f32.mrf.mxu1 }
 0x29b   : > { %v9327_v0 = vadd.f32 %v7566_v55, %v2512_v61 }
 0x29c   : > { %v2600_v60 = vpop.f32.mrf.mxu1 }
 0x29d   : > { %v9325_v62 = vadd.f32 %v2600_v60, %v2504_v58  ;;  %v7184_v19 = vmul.f32 -1.442695, %v9327_v0 }
 0x29e   : > { %v7567_v53 = vpop.f32.mrf.mxu1 }
 0x29f   : > { %7799 = vtanh.f32 %v9325_v62  ;;  %v9335_v4 = vadd.f32 %v7567_v53, %v2515_v3 }
 0x2a0   : > { %v2603_v2 = vpop.f32.mrf.mxu1  ;;  %7801 = vtanh.f32 %v9327_v0 }
 0x2a1   : > { %v9331_v59 = vadd.f32 %v2603_v2, %v2507_v1  ;;  %v7185_v0 = vmul.f32 -1.442695, %v9335_v4 }
 0x2a3   : > { %7803 = vtanh.f32 %v9331_v59  ;;  %v7183_v20 = vmul.f32 -1.442695, %v9331_v59 }
 0x2a4   : > { %7805 = vtanh.f32 %v9335_v4  ;;  %v9400_v4 = vpop.permute.xlu0 %2791 }
 0x2a5   : > { %v7448_v21 = vpop.f32.mrf.mxu0 }
 0x2a7   : > { %v7449_v27 = vpop.f32.mrf.mxu0 }
 0x2a8   : > { %v7450_v48 = vadd.f32 %v7449_v27, %v7448_v21  ;;  %v2764_v21 = vld [vmem:[#allocation4 + $0x28] sm:$0xff]  ;;  %v2767_v27 = vld [vmem:[#allocation4 + $0x40] sm:$0xff] }
 0x2a9   : > { %v7451_v40 = vpop.f32.mrf.mxu0 }
 0x2aa   : > { %v2536_v57 = vadd.f32 %v7450_v48, %v9301_v23 }
 0x2ab   : > { %v7452_v45 = vpop.f32.mrf.mxu0 }
 0x2ac   : > { %v7800_v7 = vpop.eup %7799  ;;  %v7453_v55 = vadd.f32 %v7452_v45, %v7451_v40  ;;  %v2770_v40 = vld [vmem:[#allocation4 + $0x58] sm:$0xff] }
 0x2ad   : > { %2879 = vrot.lane.b32.xlu0 %v7800_v7, %s8318_s6  ;;  %v7802_v9 = vpop.eup %7801 }
 0x2ae   : > { %v2539_v3 = vadd.f32 %v7453_v55, %v9301_v23 }
 0x2b0   : > { %v7804_v10 = vpop.eup %7803 }
 0x2b1   : > { %2881 = vrot.lane.b32.xlu1 %v7804_v10, %s8318_s6  ;;  %2883 = vrot.lane.b32.xlu0 %v7802_v9, %s8318_s6  ;;  %v7806_v13 = vpop.eup %7805  ;;  %v7178_v10 = vmul.f32 -1.442695, %v9305_v31 }
 0x2b5   : > { %2885 = vrot.lane.b32.xlu1 %v7806_v13, %s8318_s6  ;;  %v7180_v13 = vmul.f32 -1.442695, %v9307_v36  ;;  %v7182_v36 = vmul.f32 -1.442695, %v9325_v62 }
 0x2c6   : > { %v7570_v22 = vpop.f32.mrf.mxu1 }
 0x2c7   : > { %v9347_v34 = vadd.f32 %v7570_v22, %v2528_v28  ;;  %v2765_v22 = vld [vmem:[#allocation4 + $0x30] sm:$0xff] }
 0x2c8   : > { %v2616_v26 = vpop.f32.mrf.mxu1 }
 0x2c9   : > { %v9345_v29 = vadd.f32 %v2616_v26, %v2520_v25  ;;  %v2766_v26 = vld [vmem:[#allocation4 + $0x38] sm:$0xff] }
 0x2ca   : > { %v7571_v32 = vpop.f32.mrf.mxu1 }
 0x2cb   : > { %7807 = vtanh.f32 %v9345_v29  ;;  %v9355_v41 = vadd.f32 %v7571_v32, %v2531_v44  ;;  %v2768_v32 = vld [vmem:[#allocation4 + $0x48] sm:$0xff]  ;;  %v2771_v44 = vld [vmem:[#allocation4 + $0x60] sm:$0xff] }
 0x2cc   : > { %v2619_v38 = vpop.f32.mrf.mxu1  ;;  %7809 = vtanh.f32 %v9347_v34 }
 0x2cd   : > { %v9351_v43 = vadd.f32 %v2619_v38, %v2523_v37  ;;  %v2769_v37 = vld [vmem:[#allocation4 + $0x50] sm:$0xff] }
 0x2cf   : > { %7811 = vtanh.f32 %v9351_v43 }
 0x2d0   : > { %7813 = vtanh.f32 %v9355_v41 }
 0x2d1   : > { %v7454_v46 = vpop.f32.mrf.mxu0 }
 0x2d3   : > { %v7455_v35 = vpop.f32.mrf.mxu0 }
 0x2d4   : > { %v7456_v52 = vadd.f32 %v7455_v35, %v7454_v46  ;;  %v9404_v35 = vpop.permute.xlu1 %2793 }
 0x2d5   : > { %v7457_v49 = vpop.f32.mrf.mxu0 }
 0x2d6   : > { %v2544_v61 = vadd.f32 %v7456_v52, %v9301_v23 }
 0x2d7   : > { %v7458_v56 = vpop.f32.mrf.mxu0 }
 0x2d8   : > { %v7808_v47 = vpop.eup %7807  ;;  %v7459_v53 = vadd.f32 %v7458_v56, %v7457_v49  ;;  %v2772_v49 = vld [vmem:[#allocation4 + $0x68] sm:$0xff] }
 0x2d9   : > { %2887 = vrot.lane.b32.xlu0 %v7808_v47, %s8318_s6  ;;  %v7810_v50 = vpop.eup %7809 }
 0x2da   : > { %v2547_v8 = vadd.f32 %v7459_v53, %v9301_v23 }
 0x2dc   : > { %v7812_v51 = vpop.eup %7811 }
 0x2dd   : > { %2889 = vrot.lane.b32.xlu1 %v7812_v51, %s8318_s6  ;;  %2891 = vrot.lane.b32.xlu0 %v7810_v50, %s8318_s6  ;;  %v7814_v60 = vpop.eup %7813  ;;  %v2773_v50 = vld [vmem:[#allocation4 + $0x70] sm:$0xff] }
 0x2de   : > { %v7574_v54 = vpop.f32.mrf.mxu1 }
 0x2df   : > { %v9367_v2 = vadd.f32 %v7574_v54, %v2544_v61 }
 0x2e0   : > { %v2632_v58 = vpop.f32.mrf.mxu1 }
 0x2e1   : > { %v9364_v63 = vadd.f32 %v2632_v58, %v2536_v57  ;;  %2893 = vrot.lane.b32.xlu1 %v7814_v60, %s8318_s6  ;;  %v2774_v57 = vld [vmem:[#allocation4 + $0x78] sm:$0xff] }
 0x2e2   : > { %v7575_v1 = vpop.f32.mrf.mxu1 }
 0x2e3   : > { %7815 = vtanh.f32 %v9364_v63  ;;  %v9375_v9 = vadd.f32 %v7575_v1, %v2547_v8 }
 0x2e4   : > { %v2635_v5 = vpop.f32.mrf.mxu1  ;;  %7817 = vtanh.f32 %v9367_v2 }
 0x2e5   : > { %v9371_v7 = vadd.f32 %v2635_v5, %v2539_v3 }
 0x2e7   : > { %7819 = vtanh.f32 %v9371_v7 }
 0x2e8   : > { %7821 = vtanh.f32 %v9375_v9 }
 0x2e9   : > { %7823 = vpow2.f32 %v7178_v10 }
 0x2ea   : > { %7825 = vpow2.f32 %v7180_v13 }
 0x2eb   : > { %7827 = vpow2.f32 %v7179_v14 }
 0x2ec   : > { %7829 = vpow2.f32 %v7181_v15 }
 0x2ed   : > { %7831 = vpow2.f32 %v7182_v36 }
 0x2ee   : > { %7833 = vpow2.f32 %v7184_v19  ;;  %v7186_v19 = vmul.f32 -1.442695, %v9345_v29 }
 0x2ef   : > { %7835 = vpow2.f32 %v7183_v20 }
 0x2f0   : > { %v7816_v12 = vpop.eup %7815 }
 0x2f1   : > { %2895 = vrot.lane.b32.xlu0 %v7816_v12, %s8318_s6  ;;  %v7818_v11 = vpop.eup %7817 }
 0x2f3   : > { %v2872_v48 = vpop.permute.xlu0 %2871 }
 0x2f4   : > { %v7820_v23 = vpop.eup %7819 }
 0x2f5   : > { %2897 = vrot.lane.b32.xlu1 %v7820_v23, %s8318_s6  ;;  %2899 = vrot.lane.b32.xlu0 %v7818_v11, %s8318_s6  ;;  %v7822_v31 = vpop.eup %7821 }
 0x2f6   : > { %v7824_v42 = vpop.eup %7823 }
 0x2f7   : > { %v7826_v24 = vpop.eup %7825  ;;  %v2695_v25 = vadd.f32 1.0, %v7824_v42  ;;  %v2874_v56 = vpop.permute.xlu1 %2873 }
 0x2f8   : > { %v7828_v62 = vpop.eup %7827  ;;  %v2697_v28 = vadd.f32 1.0, %v7826_v24  ;;  %v2876_v61 = vpop.permute.xlu0 %2875  ;;  %v7187_v24 = vmul.f32 -1.442695, %v9351_v43 }
 0x2f9   : > { %2901 = vrot.lane.b32.xlu1 %v7822_v31, %s8318_s6  ;;  %2795 = vrot.lane.b32.xlu0 %v2761_v16, %s8318_s6  ;;  %7837 = vrcp.f32 %v2695_v25  ;;  %v2696_v30 = vadd.f32 1.0, %v7828_v62  ;;  %v7830_v59 = vpop.eup %7829  ;;  %v7189_v25 = vmul.f32 -1.442695, %v9355_v41  ;;  %v7191_v41 = vmul.f32 -1.442695, %v9371_v7 }
 0x2fa   : > { %7839 = vpow2.f32 %v7185_v0  ;;  %v2698_v38 = vadd.f32 1.0, %v7830_v59  ;;  %v7832_v45 = vpop.eup %7831  ;;  %v7192_v59 = vmul.f32 -1.442695, %v9367_v2 }
 0x2fb   : > { %7841 = vrcp.f32 %v2697_v28  ;;  %v7834_v46 = vpop.eup %7833  ;;  %v2699_v47 = vadd.f32 1.0, %v7832_v45  ;;  %v2878_v10 = vpop.permute.xlu1 %2877 }
 0x2fc   : > { %7843 = vrcp.f32 %v2696_v30  ;;  %v7836_v51 = vpop.eup %7835  ;;  %v2701_v52 = vadd.f32 1.0, %v7834_v46 }
 0x2fd   : > { %2797 = vrot.lane.b32.xlu1 %v2762_v39, %s8318_s6  ;;  %2799 = vrot.lane.b32.xlu0 %v2763_v18, %s8318_s6  ;;  %7845 = vrcp.f32 %v2698_v38  ;;  %v2700_v55 = vadd.f32 1.0, %v7836_v51 }
 0x2fe   : > { %7847 = vrcp.f32 %v2699_v47 }
 0x2ff   : > { %7849 = vrcp.f32 %v2701_v52 }
 0x300   : > { %7851 = vrcp.f32 %v2700_v55 }
 0x301   : > { %2801 = vrot.lane.b32.xlu1 %v2764_v21, %s8318_s6  ;;  %2803 = vrot.lane.b32.xlu0 %v2765_v22, %s8318_s6  ;;  %v7188_v21 = vmul.f32 -1.442695, %v9347_v34  ;;  %v7190_v34 = vmul.f32 -1.442695, %v9364_v63 }
 0x305   : > { %2805 = vrot.lane.b32.xlu1 %v2766_v26, %s8318_s6  ;;  %2807 = vrot.lane.b32.xlu0 %v2767_v27, %s8318_s6 }
 0x306   : > { %v9408_v54 = vpop.eup %7837 }
 0x307   : > { %v7840_v58 = vpop.eup %7839  ;;  %v2919_v60 = vmul.f32 %v9408_v54, %v2872_v48 }
 0x308   : > { %v9411_v53 = vpop.eup %7841  ;;  %v2702_v3 = vadd.f32 1.0, %v7840_v58 }
 0x309   : > { %2809 = vrot.lane.b32.xlu1 %v2768_v32, %s8318_s6  ;;  %2811 = vrot.lane.b32.xlu0 %v2769_v37, %s8318_s6  ;;  %v9415_v1 = vpop.eup %7843  ;;  %v2921_v8 = vmul.f32 %v9411_v53, %v2876_v61  ;;  %v7193_v32 = vmul.f32 -1.442695, %v9375_v9 }
 0x30a   : > { %v2920_v5 = vmul.f32 %v9415_v1, %v2874_v56  ;;  %v9421_v12 = vpop.eup %7845  ;;  %7853 = vrcp.f32 %v2702_v3 }
 0x30b   : > { %v2922_v13 = vmul.f32 %v9421_v12, %v2878_v10  ;;  %v9425_v14 = vpop.eup %7847  ;;  %7855 = vpow2.f32 %v7186_v19 }
 0x30c   : > { %v9428_v15 = vpop.eup %7849  ;;  %7857 = vpow2.f32 %v7188_v21 }
 0x30d   : > { %2813 = vrot.lane.b32.xlu1 %v2770_v40, %s8318_s6  ;;  %2815 = vrot.lane.b32.xlu0 %v2771_v44, %s8318_s6  ;;  %v9431_v16 = vpop.eup %7851  ;;  %7859 = vpow2.f32 %v7187_v24 }
 0x30e   : > { %7861 = vpow2.f32 %v7189_v25 }
 0x311   : > { %2817 = vrot.lane.b32.xlu1 %v2772_v49, %s8318_s6  ;;  %2819 = vrot.lane.b32.xlu0 %v2773_v50, %s8318_s6 }
 0x315   : > { %2821 = vrot.lane.b32.xlu1 %v2774_v57, %s8318_s6  ;;  %2951 = vrot.lane.b32.xlu0 %v2919_v60, %s8318_s6 }
 0x317   : > { %v9438_v42 = vpop.eup %7853 }
 0x318   : > { %v7856_v29 = vpop.eup %7855 }
 0x319   : > { %2953 = vrot.lane.b32.xlu1 %v2920_v5, %s8318_s6  ;;  %2955 = vrot.lane.b32.xlu0 %v2921_v8, %s8318_s6  ;;  %v7858_v62 = vpop.eup %7857  ;;  %v2703_v26 = vadd.f32 1.0, %v7856_v29 }
 0x31a   : > { %v7860_v0 = vpop.eup %7859  ;;  %v2705_v27 = vadd.f32 1.0, %v7858_v62 }
 0x31b   : > { %v7862_v28 = vpop.eup %7861  ;;  %v2704_v30 = vadd.f32 1.0, %v7860_v0  ;;  %7863 = vrcp.f32 %v2703_v26 }
 0x31c   : > { %7865 = vrcp.f32 %v2705_v27  ;;  %v2706_v43 = vadd.f32 1.0, %v7862_v28 }
 0x31d   : > { %2957 = vrot.lane.b32.xlu1 %v2922_v13, %s8318_s6  ;;  %7867 = vrcp.f32 %v2704_v30  ;;  %v2839_v30 = vmul.f32 %v9408_v54, %v9400_v4 }
 0x31e   : > { %7869 = vpow2.f32 %v7190_v34 }
 0x31f   : > { %v2880_v11 = vpop.permute.xlu0 %2879  ;;  %7871 = vrcp.f32 %v2706_v43 }
 0x320   : > { %v2923_v23 = vmul.f32 %v9425_v14, %v2880_v11  ;;  %7873 = vpow2.f32 %v7192_v59 }
 0x321   : > { %7875 = vpow2.f32 %v7191_v41  ;;  %v2840_v41 = vmul.f32 %v9415_v1, %v9404_v35 }
 0x322   : > { %2959 = vrot.lane.b32.xlu0 %v2923_v23, %s8318_s6  ;;  %7877 = vpow2.f32 %v7193_v32 }
 0x323   : > { %v2882_v31 = vpop.permute.xlu1 %2881  ;;  %v2884_v36 = vpop.permute.xlu0 %2883 }
 0x324   : > { %v2924_v39 = vmul.f32 %v9431_v16, %v2882_v31  ;;  %v2925_v18 = vmul.f32 %v9428_v15, %v2884_v36 }
 0x326   : > { %2961 = vrot.lane.b32.xlu1 %v2924_v39, %s8318_s6  ;;  %2963 = vrot.lane.b32.xlu0 %v2925_v18, %s8318_s6 }
 0x327   : > { %v2886_v20 = vpop.permute.xlu1 %2885 }
 0x328   : > { %v2926_v22 = vmul.f32 %v9438_v42, %v2886_v20  ;;  %v9449_v37 = vpop.eup %7863 }
 0x329   : > { %v9452_v63 = vpop.eup %7865 }
 0x32a   : > { %2965 = vrot.lane.b32.xlu1 %v2926_v22, %s8318_s6  ;;  %v9454_v44 = vpop.eup %7867 }
 0x32b   : > { %v7870_v2 = vpop.eup %7869 }
 0x32c   : > { %v9459_v47 = vpop.eup %7871  ;;  %v2707_v49 = vadd.f32 1.0, %v7870_v2 }
 0x32d   : > { %v7874_v48 = vpop.eup %7873 }
 0x32e   : > { %v7876_v50 = vpop.eup %7875  ;;  %v2709_v55 = vadd.f32 1.0, %v7874_v48  ;;  %7879 = vrcp.f32 %v2707_v49 }
 0x32f   : > { %v2708_v56 = vadd.f32 1.0, %v7876_v50  ;;  %v7878_v57 = vpop.eup %7877 }
 0x330   : > { %7881 = vrcp.f32 %v2709_v55  ;;  %v2710_v58 = vadd.f32 1.0, %v7878_v57 }
 0x331   : > { %7883 = vrcp.f32 %v2708_v56 }
 0x332   : > { %7885 = vrcp.f32 %v2710_v58 }
 0x33b   : > { %v9465_v60 = vpop.eup %7879 }
 0x33d   : > { %v9468_v5 = vpop.eup %7881 }
 0x33e   : > { %v9471_v8 = vpop.eup %7883 }
 0x33f   : > { %v9477_v31 = vpop.eup %7885 }
 0x34b   : > { %v2888_v38 = vpop.permute.xlu0 %2887 }
 0x34c   : > { %v2927_v40 = vmul.f32 %v9449_v37, %v2888_v38 }
 0x34e   : > { %2967 = vrot.lane.b32.xlu0 %v2927_v40, %s8318_s6 }
 0x34f   : > { %v2890_v45 = vpop.permute.xlu1 %2889  ;;  %v2892_v7 = vpop.permute.xlu0 %2891 }
 0x350   : > { %v2928_v46 = vmul.f32 %v9454_v44, %v2890_v45  ;;  %v2929_v9 = vmul.f32 %v9452_v63, %v2892_v7 }
 0x352   : > { %2969 = vrot.lane.b32.xlu1 %v2928_v46, %s8318_s6  ;;  %2971 = vrot.lane.b32.xlu0 %v2929_v9, %s8318_s6 }
 0x353   : > { %v2894_v51 = vpop.permute.xlu1 %2893 }
 0x354   : > { %v2930_v52 = vmul.f32 %v9459_v47, %v2894_v51 }
 0x356   : > { %2973 = vrot.lane.b32.xlu1 %v2930_v52, %s8318_s6 }
 0x363   : > { %v2896_v61 = vpop.permute.xlu0 %2895 }
 0x364   : > { %v2931_v3 = vmul.f32 %v9465_v60, %v2896_v61 }
 0x366   : > { %2975 = vrot.lane.b32.xlu0 %v2931_v3, %s8318_s6 }
 0x367   : > { %v2898_v10 = vpop.permute.xlu1 %2897  ;;  %v2900_v13 = vpop.permute.xlu0 %2899 }
 0x368   : > { %v2932_v11 = vmul.f32 %v9471_v8, %v2898_v10  ;;  %v2933_v23 = vmul.f32 %v9468_v5, %v2900_v13 }
 0x36a   : > { %2977 = vrot.lane.b32.xlu1 %v2932_v11, %s8318_s6  ;;  %2979 = vrot.lane.b32.xlu0 %v2933_v23, %s8318_s6 }
 0x36b   : > { %v2902_v36 = vpop.permute.xlu1 %2901  ;;  %v2796_v39 = vpop.permute.xlu0 %2795 }
 0x36c   : > { %v2934_v18 = vmul.f32 %v9477_v31, %v2902_v36  ;;  %v2841_v32 = vmul.f32 %v9411_v53, %v2796_v39 }
 0x36e   : > { %2981 = vrot.lane.b32.xlu1 %v2934_v18, %s8318_s6 }
 0x36f   : > { %v2798_v19 = vpop.permute.xlu1 %2797  ;;  %v2800_v20 = vpop.permute.xlu0 %2799 }
 0x370   : > { %v2842_v7 = vmul.f32 %v9421_v12, %v2798_v19  ;;  %v2843_v35 = vmul.f32 %v9425_v14, %v2800_v20 }
 0x373   : > { %v2802_v21 = vpop.permute.xlu1 %2801  ;;  %v2804_v22 = vpop.permute.xlu0 %2803 }
 0x374   : > { %v2844_v50 = vmul.f32 %v9431_v16, %v2802_v21  ;;  %v2845_v58 = vmul.f32 %v9428_v15, %v2804_v22 }
 0x377   : > { %v2806_v24 = vpop.permute.xlu1 %2805  ;;  %v2808_v25 = vpop.permute.xlu0 %2807 }
 0x378   : > { %v2846_v13 = vmul.f32 %v9438_v42, %v2806_v24  ;;  %v2847_v39 = vmul.f32 %v9449_v37, %v2808_v25 }
 0x37b   : > { %v9481_v29 = vpop.permute.xlu1 %2809  ;;  %v9483_v62 = vpop.permute.xlu0 %2811 }
 0x37c   : > { %v2848_v20 = vmul.f32 %v9454_v44, %v9481_v29 }
 0x37f   : > { %v9485_v0 = vpop.permute.xlu1 %2813  ;;  %v9487_v26 = vpop.permute.xlu0 %2815 }
 0x380   : > { %v2850_v29 = vmul.f32 %v9459_v47, %v9485_v0 }
 0x383   : > { %v9489_v27 = vpop.permute.xlu1 %2817  ;;  %v9491_v28 = vpop.permute.xlu0 %2819 }
 0x387   : > { %v9495_v34 = vpop.permute.xlu1 %2821  ;;  %v2952_v43 = vpop.permute.xlu0 %2951 }
 0x388   : > { %v2999_v59 = vadd.f32 %v2952_v43, %v2839_v30  ;;  %v2849_v43 = vmul.f32 %v9452_v63, %v9483_v62 }
 0x38a   : > { %7887 = vtanh.f32 %v2999_v59  ;;  %3127 = vrot.lane.b32.xlu0 %v2999_v59, %s8319_s9 }
 0x38b   : > { %v2954_v38 = vpop.permute.xlu1 %2953  ;;  %v2956_v40 = vpop.permute.xlu0 %2955 }
 0x38c   : > { %v3000_v2 = vadd.f32 %v2954_v38, %v2840_v41  ;;  %v3001_v45 = vadd.f32 %v2956_v40, %v2841_v32  ;;  %v2851_v40 = vmul.f32 %v9465_v60, %v9487_v26 }
 0x38e   : > { %7889 = vtanh.f32 %v3000_v2  ;;  %3129 = vrot.lane.b32.xlu1 %v3000_v2, %s8319_s9  ;;  %3131 = vrot.lane.b32.xlu0 %v3001_v45, %s8319_s9 }
 0x38f   : > { %v2958_v4 = vpop.permute.xlu1 %2957  ;;  %7891 = vtanh.f32 %v3001_v45  ;;  %v2852_v45 = vmul.f32 %v9471_v8, %v9489_v27 }
 0x390   : > { %v3002_v46 = vadd.f32 %v2958_v4, %v2842_v7  ;;  %v2853_v7 = vmul.f32 %v9468_v5, %v9491_v28 }
 0x392   : > { %3133 = vrot.lane.b32.xlu1 %v3002_v46, %s8319_s9  ;;  %7893 = vtanh.f32 %v3002_v46 }
 0x394   : > { %v2960_v9 = vpop.permute.xlu0 %2959 }
 0x395   : > { %v3003_v48 = vadd.f32 %v2960_v9, %v2843_v35 }
 0x397   : > { %v7888_v49 = vpop.eup %7887  ;;  %7895 = vtanh.f32 %v3003_v48 }
 0x398   : > { %v2962_v51 = vpop.permute.xlu1 %2961  ;;  %3047 = vrot.lane.b32.xlu0 %v7888_v49, %s8318_s6  ;;  %v2964_v57 = vpop.permute.xlu0 %2963  ;;  %v2854_v49 = vmul.f32 %v9477_v31, %v9495_v34 }
 0x399   : > { %v3004_v52 = vadd.f32 %v2962_v51, %v2844_v50  ;;  %v3005_v61 = vadd.f32 %v2964_v57, %v2845_v58 }
 0x39b   : > { %v7890_v55 = vpop.eup %7889  ;;  %7897 = vtanh.f32 %v3004_v52 }
 0x39c   : > { %3049 = vrot.lane.b32.xlu1 %v7890_v55, %s8318_s6  ;;  %3135 = vrot.lane.b32.xlu0 %v3003_v48, %s8319_s9  ;;  %v7892_v56 = vpop.eup %7891  ;;  %v2966_v10 = vpop.permute.xlu1 %2965  ;;  %7899 = vtanh.f32 %v3005_v61 }
 0x39d   : > { %v3006_v11 = vadd.f32 %v2966_v10, %v2846_v13 }
 0x39f   : > { %v7894_v3 = vpop.eup %7893  ;;  %7901 = vtanh.f32 %v3006_v11 }
 0x3a0   : > { %3137 = vrot.lane.b32.xlu1 %v3004_v52, %s8319_s9  ;;  %3051 = vrot.lane.b32.xlu0 %v7892_v56, %s8318_s6 }
 0x3a4   : > { %3053 = vrot.lane.b32.xlu1 %v7894_v3, %s8318_s6  ;;  %3139 = vrot.lane.b32.xlu0 %v3005_v61, %s8319_s9  ;;  %v7896_v23 = vpop.eup %7895 }
 0x3a8   : > { %3141 = vrot.lane.b32.xlu1 %v3006_v11, %s8319_s9  ;;  %3055 = vrot.lane.b32.xlu0 %v7896_v23, %s8318_s6  ;;  %v7898_v36 = vpop.eup %7897 }
 0x3a9   : > { %v7900_v24 = vpop.eup %7899 }
 0x3ac   : > { %3057 = vrot.lane.b32.xlu1 %v7898_v36, %s8318_s6  ;;  %v7902_v59 = vpop.eup %7901 }
 0x3c0   : > { %v2968_v18 = vpop.permute.xlu0 %2967 }
 0x3c1   : > { %v3007_v19 = vadd.f32 %v2968_v18, %v2847_v39 }
 0x3c3   : > { %7903 = vtanh.f32 %v3007_v19  ;;  %3143 = vrot.lane.b32.xlu0 %v3007_v19, %s8319_s9 }
 0x3c4   : > { %v2970_v21 = vpop.permute.xlu1 %2969  ;;  %v2972_v30 = vpop.permute.xlu0 %2971 }
 0x3c5   : > { %v3008_v22 = vadd.f32 %v2970_v21, %v2848_v20  ;;  %v3009_v25 = vadd.f32 %v2972_v30, %v2849_v43 }
 0x3c7   : > { %7905 = vtanh.f32 %v3008_v22  ;;  %3145 = vrot.lane.b32.xlu1 %v3008_v22, %s8319_s9  ;;  %3059 = vrot.lane.b32.xlu0 %v7900_v24, %s8318_s6 }
 0x3c8   : > { %v2974_v41 = vpop.permute.xlu1 %2973  ;;  %7907 = vtanh.f32 %v3009_v25 }
 0x3c9   : > { %v3010_v32 = vadd.f32 %v2974_v41, %v2850_v29 }
 0x3cb   : > { %3061 = vrot.lane.b32.xlu1 %v7902_v59, %s8318_s6  ;;  %3147 = vrot.lane.b32.xlu0 %v3009_v25, %s8319_s9  ;;  %7909 = vtanh.f32 %v3010_v32 }
 0x3cf   : > { %3149 = vrot.lane.b32.xlu1 %v3010_v32, %s8319_s9 }
 0x3d0   : > { %v7904_v38 = vpop.eup %7903 }
 0x3d1   : > { %3063 = vrot.lane.b32.xlu0 %v7904_v38, %s8318_s6 }
 0x3d4   : > { %v7906_v62 = vpop.eup %7905 }
 0x3d5   : > { %3065 = vrot.lane.b32.xlu1 %v7906_v62, %s8318_s6  ;;  %v7908_v48 = vpop.eup %7907 }
 0x3d8   : > { %v2976_v2 = vpop.permute.xlu0 %2975  ;;  %v7910_v28 = vpop.eup %7909 }
 0x3d9   : > { %v3011_v0 = vadd.f32 %v2976_v2, %v2851_v40 }
 0x3db   : > { %7911 = vtanh.f32 %v3011_v0  ;;  %3151 = vrot.lane.b32.xlu0 %v3011_v0, %s8319_s9 }
 0x3dc   : > { %v2978_v4 = vpop.permute.xlu1 %2977  ;;  %v2980_v46 = vpop.permute.xlu0 %2979 }
 0x3dd   : > { %v3012_v35 = vadd.f32 %v2978_v4, %v2852_v45  ;;  %v3013_v9 = vadd.f32 %v2980_v46, %v2853_v7 }
 0x3df   : > { %7913 = vtanh.f32 %v3012_v35  ;;  %3153 = vrot.lane.b32.xlu1 %v3012_v35, %s8319_s9  ;;  %3067 = vrot.lane.b32.xlu0 %v7908_v48, %s8318_s6 }
 0x3e0   : > { %7915 = vtanh.f32 %v3013_v9  ;;  %v2982_v26 = vpop.permute.xlu1 %2981 }
 0x3e1   : > { %v3014_v27 = vadd.f32 %v2982_v26, %v2854_v49 }
 0x3e3   : > { %7917 = vtanh.f32 %v3014_v27  ;;  %3069 = vrot.lane.b32.xlu1 %v7910_v28, %s8318_s6  ;;  %3155 = vrot.lane.b32.xlu0 %v3013_v9, %s8319_s9 }
 0x3e7   : > { %3157 = vrot.lane.b32.xlu1 %v3014_v27, %s8319_s9 }
 0x3e8   : > { %v7912_v50 = vpop.eup %7911 }
 0x3e9   : > { %3071 = vrot.lane.b32.xlu0 %v7912_v50, %s8318_s6 }
 0x3ec   : > { %v7914_v34 = vpop.eup %7913 }
 0x3ed   : > { %v7916_v51 = vpop.eup %7915  ;;  %3073 = vrot.lane.b32.xlu1 %v7914_v34, %s8318_s6 }
 0x3ee   : > { %3075 = vrot.lane.b32.xlu0 %v7916_v51, %s8318_s6 }
 0x3f0   : > { %v7918_v52 = vpop.eup %7917 }
 0x3f1   : > { %3077 = vrot.lane.b32.xlu1 %v7918_v52, %s8318_s6 }
 0x3fc   : > { %v9552_v55 = vpop.permute.xlu0 %3127 }
 0x3fd   : > { %3176 = vst.msk [vmem:[#allocation4] sm:$0xff] %vm3175_vm3, %v9552_v55 }
 0x400   : > { %v9556_v56 = vpop.permute.xlu1 %3129  ;;  %v9558_v57 = vpop.permute.xlu0 %3131 }
 0x401   : > { %3177 = vst.msk [vmem:[#allocation4 + $0x8] sm:$0xff] %vm3175_vm3, %v9556_v56  ;;  %3178 = vst.msk [vmem:[#allocation4 + $0x10] sm:$0xff] %vm3175_vm3, %v9558_v57 }
 0x404   : > { %v9564_v58 = vpop.permute.xlu1 %3133 }
 0x405   : > { %3179 = vst.msk [vmem:[#allocation4 + $0x18] sm:$0xff] %vm3175_vm3, %v9564_v58 }
 0x40a   : > { %v3048_v61 = vpop.permute.xlu0 %3047 }
 0x40b   : > { %v3095_v3 = vmul.f32 %v9408_v54, %v3048_v61 }
 0x40d   : > { %3321 = vrot.lane.b32.xlu0 %v3095_v3, %s8320_s8  ;;  %v7363_v11 = vpack.c.bf16 %v3095_v3, %v3095_v3 }
 0x40e   : > { %v3050_v10 = vpop.permute.xlu1 %3049  ;;  %v9570_v13 = vpop.permute.xlu0 %3135 }
 0x40f   : > { %v3096_v23 = vmul.f32 %v9415_v1, %v3050_v10  ;;  %3180 = vst.msk [vmem:[#allocation4 + $0x20] sm:$0xff] %vm3175_vm3, %v9570_v13 }
 0x411   : > { %3323 = vrot.lane.b32.xlu1 %v3096_v23, %s8320_s8  ;;  %3240 = vrot.lane.b32.xlu0 %v7363_v11, %s8320_s8  ;;  %v7364_v54 = vpack.c.bf16 %v3096_v23, %v3096_v23 }
 0x412   : > { %v9577_v36 = vpop.permute.xlu1 %3137  ;;  %v3052_v39 = vpop.permute.xlu0 %3051 }
 0x413   : > { %3181 = vst.msk [vmem:[#allocation4 + $0x28] sm:$0xff] %vm3175_vm3, %v9577_v36  ;;  %v3097_v18 = vmul.f32 %v9411_v53, %v3052_v39 }
 0x415   : > { %3242 = vrot.lane.b32.xlu1 %v7364_v54, %s8320_s8  ;;  %3325 = vrot.lane.b32.xlu0 %v3097_v18, %s8320_s8  ;;  %v7365_v20 = vpack.c.bf16 %v3097_v18, %v3097_v18 }
 0x416   : > { %v3054_v1 = vpop.permute.xlu1 %3053  ;;  %v9584_v19 = vpop.permute.xlu0 %3139 }
 0x417   : > { %v3098_v21 = vmul.f32 %v9421_v12, %v3054_v1  ;;  %3182 = vst.msk [vmem:[#allocation4 + $0x30] sm:$0xff] %vm3175_vm3, %v9584_v19 }
 0x419   : > { %3327 = vrot.lane.b32.xlu1 %v3098_v21, %s8320_s8  ;;  %3244 = vrot.lane.b32.xlu0 %v7365_v20, %s8320_s8  ;;  %v7366_v24 = vpack.c.bf16 %v3098_v21, %v3098_v21 }
 0x41a   : > { %v9591_v22 = vpop.permute.xlu1 %3141  ;;  %v3056_v53 = vpop.permute.xlu0 %3055 }
 0x41b   : > { %3183 = vst.msk [vmem:[#allocation4 + $0x38] sm:$0xff] %vm3175_vm3, %v9591_v22  ;;  %v3099_v30 = vmul.f32 %v9425_v14, %v3056_v53 }
 0x41d   : > { %3246 = vrot.lane.b32.xlu1 %v7366_v24, %s8320_s8  ;;  %3329 = vrot.lane.b32.xlu0 %v3099_v30, %s8320_s8  ;;  %v7367_v43 = vpack.c.bf16 %v3099_v30, %v3099_v30 }
 0x41e   : > { %v3058_v12 = vpop.permute.xlu1 %3057 }
 0x41f   : > { %v3100_v25 = vmul.f32 %v9431_v16, %v3058_v12 }
 0x421   : > { %3331 = vrot.lane.b32.xlu1 %v3100_v25, %s8320_s8  ;;  %3248 = vrot.lane.b32.xlu0 %v7367_v43, %s8320_s8  ;;  %v7368_v59 = vpack.c.bf16 %v3100_v25, %v3100_v25 }
 0x425   : > { %3250 = vrot.lane.b32.xlu1 %v7368_v59, %s8320_s8 }
 0x435   : > { %v9602_v41 = vpop.permute.xlu0 %3143 }
 0x436   : > { %3184 = vst.msk [vmem:[#allocation4 + $0x40] sm:$0xff] %vm3175_vm3, %v9602_v41 }
 0x439   : > { %v9606_v14 = vpop.permute.xlu1 %3145  ;;  %v3060_v29 = vpop.permute.xlu0 %3059 }
 0x43a   : > { %3185 = vst.msk [vmem:[#allocation4 + $0x48] sm:$0xff] %vm3175_vm3, %v9606_v14  ;;  %v3101_v16 = vmul.f32 %v9428_v15, %v3060_v29 }
 0x43c   : > { %3333 = vrot.lane.b32.xlu0 %v3101_v16, %s8320_s8  ;;  %v7369_v62 = vpack.c.bf16 %v3101_v16, %v3101_v16 }
 0x43d   : > { %v3062_v32 = vpop.permute.xlu1 %3061  ;;  %v9612_v38 = vpop.permute.xlu0 %3147 }
 0x43e   : > { %v3102_v40 = vmul.f32 %v9438_v42, %v3062_v32  ;;  %3186 = vst.msk [vmem:[#allocation4 + $0x50] sm:$0xff] %vm3175_vm3, %v9612_v38 }
 0x440   : > { %3335 = vrot.lane.b32.xlu1 %v3102_v40, %s8320_s8  ;;  %3252 = vrot.lane.b32.xlu0 %v7369_v62, %s8320_s8  ;;  %v7370_v0 = vpack.c.bf16 %v3102_v40, %v3102_v40 }
 0x441   : > { %v9619_v2 = vpop.permute.xlu1 %3149 }
 0x442   : > { %3187 = vst.msk [vmem:[#allocation4 + $0x58] sm:$0xff] %vm3175_vm3, %v9619_v2 }
 0x443   : > { %v3064_v15 = vpop.permute.xlu0 %3063 }
 0x444   : > { %v3103_v45 = vmul.f32 %v9449_v37, %v3064_v15  ;;  %3254 = vrot.lane.b32.xlu1 %v7370_v0, %s8320_s8 }
 0x446   : > { %3337 = vrot.lane.b32.xlu0 %v3103_v45, %s8320_s8  ;;  %v7371_v7 = vpack.c.bf16 %v3103_v45, %v3103_v45 }
 0x447   : > { %v3066_v42 = vpop.permute.xlu1 %3065 }
 0x448   : > { %v3104_v4 = vmul.f32 %v9454_v44, %v3066_v42 }
 0x44a   : > { %3339 = vrot.lane.b32.xlu1 %v3104_v4, %s8320_s8  ;;  %3256 = vrot.lane.b32.xlu0 %v7371_v7, %s8320_s8  ;;  %v7372_v46 = vpack.c.bf16 %v3104_v4, %v3104_v4 }
 0x44d   : > { %v9629_v35 = vpop.permute.xlu0 %3151 }
 0x44e   : > { %3188 = vst.msk [vmem:[#allocation4 + $0x60] sm:$0xff] %vm3175_vm3, %v9629_v35  ;;  %3258 = vrot.lane.b32.xlu1 %v7372_v46, %s8320_s8 }
 0x451   : > { %v9634_v37 = vpop.permute.xlu1 %3153  ;;  %v3068_v9 = vpop.permute.xlu0 %3067 }
 0x452   : > { %3189 = vst.msk [vmem:[#allocation4 + $0x68] sm:$0xff] %vm3175_vm3, %v9634_v37  ;;  %v3105_v44 = vmul.f32 %v9452_v63, %v3068_v9 }
 0x454   : > { %3341 = vrot.lane.b32.xlu0 %v3105_v44, %s8320_s8  ;;  %v7373_v26 = vpack.c.bf16 %v3105_v44, %v3105_v44 }
 0x455   : > { %v3070_v48 = vpop.permute.xlu1 %3069  ;;  %v9640_v49 = vpop.permute.xlu0 %3155 }
 0x456   : > { %v3106_v27 = vmul.f32 %v9459_v47, %v3070_v48  ;;  %3190 = vst.msk [vmem:[#allocation4 + $0x70] sm:$0xff] %vm3175_vm3, %v9640_v49 }
 0x458   : > { %3343 = vrot.lane.b32.xlu1 %v3106_v27, %s8320_s8  ;;  %3260 = vrot.lane.b32.xlu0 %v7373_v26, %s8320_s8  ;;  %v7374_v50 = vpack.c.bf16 %v3106_v27, %v3106_v27 }
 0x459   : > { %v9647_v28 = vpop.permute.xlu1 %3157 }
 0x45a   : > { %3191 = vst.msk [vmem:[#allocation4 + $0x78] sm:$0xff] %vm3175_vm3, %v9647_v28 }
 0x45b   : > { %v3072_v63 = vpop.permute.xlu0 %3071 }
 0x45c   : > { %v3107_v34 = vmul.f32 %v9465_v60, %v3072_v63  ;;  %3262 = vrot.lane.b32.xlu1 %v7374_v50, %s8320_s8 }
 0x45e   : > { %3345 = vrot.lane.b32.xlu0 %v3107_v34, %s8320_s8  ;;  %v7375_v51 = vpack.c.bf16 %v3107_v34, %v3107_v34 }
 0x45f   : > { %v3074_v47 = vpop.permute.xlu1 %3073 }
 0x460   : > { %v3108_v52 = vmul.f32 %v9471_v8, %v3074_v47  ;;  %v3076_v61 = vpop.permute.xlu0 %3075 }
 0x461   : > { %v3109_v3 = vmul.f32 %v9468_v5, %v3076_v61 }
 0x462   : > { %3347 = vrot.lane.b32.xlu1 %v3108_v52, %s8320_s8  ;;  %3264 = vrot.lane.b32.xlu0 %v7375_v51, %s8320_s8  ;;  %v7376_v11 = vpack.c.bf16 %v3108_v52, %v3108_v52 }
 0x463   : > { %v3078_v10 = vpop.permute.xlu1 %3077  ;;  %v7377_v60 = vpack.c.bf16 %v3109_v3, %v3109_v3 }
 0x464   : > { %v3110_v23 = vmul.f32 %v9477_v31, %v3078_v10 }
 0x466   : > { %3266 = vrot.lane.b32.xlu1 %v7376_v11, %s8320_s8  ;;  %3268 = vrot.lane.b32.xlu0 %v7377_v60, %s8320_s8  ;;  %v7378_v8 = vpack.c.bf16 %v3110_v23, %v3110_v23 }
 0x46a   : > { %3270 = vrot.lane.b32.xlu1 %v7378_v8, %s8320_s8  ;;  %3349 = vrot.lane.b32.xlu0 %v3109_v3, %s8320_s8 }
 0x46e   : > { %3351 = vrot.lane.b32.xlu1 %v3110_v23, %s8320_s8 }
 0x47f   : > { %v3322_v5 = vpop.permute.xlu0 %3321 }
 0x480   : > { %3369 = vst.msk [vmem:[%s8531_s1] sm:$0xff] %vm3175_vm3, %v3322_v5 }
 0x483   : > { %v3324_v39 = vpop.permute.xlu1 %3323  ;;  %v3241_v31 = vpop.permute.xlu0 %3240 }
 0x484   : > { %3370 = vst.msk [vmem:[%s8531_s1 + $0x8] sm:$0xff] %vm3175_vm3, %v3324_v39 }
 0x485   : > { %3289 = vst.msk [vmem:[#allocation3] sm:$0xf] %vm3288_vm4, %v3241_v31 }
 0x487   : > { %v3243_v54 = vpop.permute.xlu1 %3242  ;;  %v3326_v18 = vpop.permute.xlu0 %3325 }
 0x488   : > { %3290 = vst.msk [vmem:[#allocation3 + $0x4] sm:$0xf] %vm3288_vm4, %v3243_v54 }
 0x489   : > { %3371 = vst.msk [vmem:[%s8531_s1 + $0x10] sm:$0xff] %vm3175_vm3, %v3326_v18 }
 0x48b   : > { %v3328_v1 = vpop.permute.xlu1 %3327  ;;  %v3245_v20 = vpop.permute.xlu0 %3244 }
 0x48c   : > { %3372 = vst.msk [vmem:[%s8531_s1 + $0x18] sm:$0xff] %vm3175_vm3, %v3328_v1 }
 0x48d   : > { %3291 = vst.msk [vmem:[#allocation3 + $0x8] sm:$0xf] %vm3288_vm4, %v3245_v20 }
 0x48f   : > { %v3247_v21 = vpop.permute.xlu1 %3246  ;;  %v3330_v53 = vpop.permute.xlu0 %3329 }
 0x490   : > { %3292 = vst.msk [vmem:[#allocation3 + $0xc] sm:$0xf] %vm3288_vm4, %v3247_v21 }
 0x491   : > { %3373 = vst.msk [vmem:[%s8531_s1 + $0x20] sm:$0xff] %vm3175_vm3, %v3330_v53 }
 0x493   : > { %v3332_v24 = vpop.permute.xlu1 %3331  ;;  %v3249_v30 = vpop.permute.xlu0 %3248 }
 0x494   : > { %3374 = vst.msk [vmem:[%s8531_s1 + $0x28] sm:$0xff] %vm3175_vm3, %v3332_v24 }
 0x495   : > { %3293 = vst.msk [vmem:[#allocation3 + $0x10] sm:$0xf] %vm3288_vm4, %v3249_v30 }
 0x497   : > { %v3251_v12 = vpop.permute.xlu1 %3250 }
 0x498   : > { %3294 = vst.msk [vmem:[#allocation3 + $0x14] sm:$0xf] %vm3288_vm4, %v3251_v12 }
 0x4ae   : > { %v3334_v43 = vpop.permute.xlu0 %3333 }
 0x4af   : > { %3375 = vst.msk [vmem:[%s8531_s1 + $0x30] sm:$0xff] %vm3175_vm3, %v3334_v43 }
 0x4b2   : > { %v3336_v25 = vpop.permute.xlu1 %3335  ;;  %v3253_v59 = vpop.permute.xlu0 %3252 }
 0x4b3   : > { %3376 = vst.msk [vmem:[%s8531_s1 + $0x38] sm:$0xff] %vm3175_vm3, %v3336_v25 }
 0x4b4   : > { %3295 = vst.msk [vmem:[#allocation3 + $0x18] sm:$0xf] %vm3288_vm4, %v3253_v59 }
 0x4b6   : > { %v3255_v29 = vpop.permute.xlu1 %3254 }
 0x4b7   : > { %3296 = vst.msk [vmem:[#allocation3 + $0x1c] sm:$0xf] %vm3288_vm4, %v3255_v29 }
 0x4b8   : > { %v3338_v16 = vpop.permute.xlu0 %3337 }
 0x4b9   : > { %3377 = vst.msk [vmem:[%s8531_s1 + $0x40] sm:$0xff] %vm3175_vm3, %v3338_v16 }
 0x4bc   : > { %v3340_v32 = vpop.permute.xlu1 %3339  ;;  %v3257_v62 = vpop.permute.xlu0 %3256 }
 0x4bd   : > { %3378 = vst.msk [vmem:[%s8531_s1 + $0x48] sm:$0xff] %vm3175_vm3, %v3340_v32 }
 0x4be   : > { %3297 = vst.msk [vmem:[#allocation3 + $0x20] sm:$0xf] %vm3288_vm4, %v3257_v62 }
 0x4c0   : > { %v3259_v40 = vpop.permute.xlu1 %3258 }
 0x4c1   : > { %3298 = vst.msk [vmem:[#allocation3 + $0x24] sm:$0xf] %vm3288_vm4, %v3259_v40 }
 0x4c6   : > { %v3342_v0 = vpop.permute.xlu0 %3341 }
 0x4c7   : > { %3379 = vst.msk [vmem:[%s8531_s1 + $0x50] sm:$0xff] %vm3175_vm3, %v3342_v0 }
 0x4ca   : > { %v3344_v15 = vpop.permute.xlu1 %3343  ;;  %v3261_v45 = vpop.permute.xlu0 %3260 }
 0x4cb   : > { %3380 = vst.msk [vmem:[%s8531_s1 + $0x58] sm:$0xff] %vm3175_vm3, %v3344_v15 }
 0x4cc   : > { %3299 = vst.msk [vmem:[#allocation3 + $0x28] sm:$0xf] %vm3288_vm4, %v3261_v45 }
 0x4ce   : > { %v3263_v42 = vpop.permute.xlu1 %3262 }
 0x4cf   : > { %3300 = vst.msk [vmem:[#allocation3 + $0x2c] sm:$0xf] %vm3288_vm4, %v3263_v42 }
 0x4d0   : > { %v3346_v7 = vpop.permute.xlu0 %3345 }
 0x4d1   : > { %3381 = vst.msk [vmem:[%s8531_s1 + $0x60] sm:$0xff] %vm3175_vm3, %v3346_v7 }
 0x4d4   : > { %v3348_v4 = vpop.permute.xlu1 %3347  ;;  %v3265_v46 = vpop.permute.xlu0 %3264 }
 0x4d5   : > { %3382 = vst.msk [vmem:[%s8531_s1 + $0x68] sm:$0xff] %vm3175_vm3, %v3348_v4 }
 0x4d6   : > { %3301 = vst.msk [vmem:[#allocation3 + $0x30] sm:$0xf] %vm3288_vm4, %v3265_v46 }
 0x4d8   : > { %v3267_v9 = vpop.permute.xlu1 %3266  ;;  %v3269_v44 = vpop.permute.xlu0 %3268 }
 0x4d9   : > { %3302 = vst.msk [vmem:[#allocation3 + $0x34] sm:$0xf] %vm3288_vm4, %v3267_v9  ;;  %3303 = vst.msk [vmem:[#allocation3 + $0x38] sm:$0xf] %vm3288_vm4, %v3269_v44 }
 0x4dc   : > { %v3271_v48 = vpop.permute.xlu1 %3270  ;;  %v3350_v26 = vpop.permute.xlu0 %3349 }
 0x4dd   : > { %3304 = vst.msk [vmem:[#allocation3 + $0x3c] sm:$0xf] %vm3288_vm4, %v3271_v48  ;;  %3388 = sbr.rel (%p7210_p2) target bundleno = 1258 (0x4ea), region = 48 }
 0x4de   : > { %3383 = vst.msk [vmem:[%s8531_s1 + $0x70] sm:$0xff] %vm3175_vm3, %v3350_v26 }
 0x4e0   : > { %v3352_v27 = vpop.permute.xlu1 %3351 }
 0x4e1   : > { %3384 = vst.msk [vmem:[%s8531_s1 + $0x78] sm:$0xff] %vm3175_vm3, %v3352_v27 }
 0x4e2   : > { %3389 = vst.msk [vmem:[%s8533_s2] sm:$0xff] %vm3175_vm3, %v9552_v55  ;;  %3390 = vst.msk [vmem:[%s8533_s2 + $0x8] sm:$0xff] %vm3175_vm3, %v9556_v56 }
 0x4e3   : > { %3391 = vst.msk [vmem:[%s8533_s2 + $0x10] sm:$0xff] %vm3175_vm3, %v9558_v57  ;;  %3392 = vst.msk [vmem:[%s8533_s2 + $0x18] sm:$0xff] %vm3175_vm3, %v9564_v58 }
 0x4e4   : > { %3393 = vst.msk [vmem:[%s8533_s2 + $0x20] sm:$0xff] %vm3175_vm3, %v9570_v13  ;;  %3394 = vst.msk [vmem:[%s8533_s2 + $0x28] sm:$0xff] %vm3175_vm3, %v9577_v36 }
 0x4e5   : > { %3395 = vst.msk [vmem:[%s8533_s2 + $0x30] sm:$0xff] %vm3175_vm3, %v9584_v19  ;;  %3396 = vst.msk [vmem:[%s8533_s2 + $0x38] sm:$0xff] %vm3175_vm3, %v9591_v22 }
 0x4e6   : > { %3397 = vst.msk [vmem:[%s8533_s2 + $0x40] sm:$0xff] %vm3175_vm3, %v9602_v41  ;;  %3398 = vst.msk [vmem:[%s8533_s2 + $0x48] sm:$0xff] %vm3175_vm3, %v9606_v14 }
 0x4e7   : > { %3399 = vst.msk [vmem:[%s8533_s2 + $0x50] sm:$0xff] %vm3175_vm3, %v9612_v38  ;;  %3400 = vst.msk [vmem:[%s8533_s2 + $0x58] sm:$0xff] %vm3175_vm3, %v9619_v2 }
 0x4e8   : > { %3401 = vst.msk [vmem:[%s8533_s2 + $0x60] sm:$0xff] %vm3175_vm3, %v9629_v35  ;;  %3402 = vst.msk [vmem:[%s8533_s2 + $0x68] sm:$0xff] %vm3175_vm3, %v9634_v37 }
 0x4e9   : > { %3403 = vst.msk [vmem:[%s8533_s2 + $0x70] sm:$0xff] %vm3175_vm3, %v9640_v49  ;;  %3404 = vst.msk [vmem:[%s8533_s2 + $0x78] sm:$0xff] %vm3175_vm3, %v9647_v28 }
 0x4ea PF: > { %v3438_v55 = vld [vmem:[#allocation2 + $0x60] sm:$0xf]  ;;  %v3815_v57 = vld [vmem:[#allocation2 + $0x64] sm:$0xf]  ;;  %v3816_v19 = vld [vmem:[#allocation2 + $0x68] sm:$0x1] }
 0x4eb   : > { %v3814_v56 = vld [vmem:[#allocation2 + $0x60] sm:$0xe]  ;;  %3470 = vrot.lane.b32.xlu1 %v3438_v55, %s8314_s24  ;;  %v3864_v13 = vrot.slane %v3815_v57, 5  ;;  %v3439_v36 = vld [vmem:[#allocation2 + $0x64] sm:$0xf]  ;;  %v3867_v22 = vrot.slane %v3816_v19, 5 }
 0x4ec   : > { %v7211_v58 = vrot.slane %v3814_v56, 9  ;;  %v3535_v41 = vld [vmem:[#allocation2 + $0x64] sm:$0xf]  ;;  %v3536_v14 = vld [vmem:[#allocation2 + $0x68] sm:$0x1]  ;;  %v7919_v38 = vld [vmem:[#allocation6 + $0x78] sm:$0xff]  }
 0x4ed   : > { %v3866_v35 = vrot.slane %v3864_v13, 4  ;;  %v3568_v37 = vshll.u32 %v3535_v41, 16  ;;  %v3572_v49 = vshrl.u32 %v3535_v41, 16  ;;  %v3534_v28 = vld [vmem:[#allocation2 + $0x60] sm:$0xf]  ;;  %v7920_v50 = vld [vmem:[#allocation6 + $0x38] sm:$0xff]   ;;  %7473 = vmatprep.subr.bf16.mxu1 %v7919_v38 }
 0x4ee   : > { %v3865_v2 = vsel %vm8623_vm5, %v7211_v58, %v3864_v13  ;;  %v3578_v63 = vshll.u32 %v3536_v14, 16  ;;  %v3559_v34 = vshrl.u32 %v3534_v28, 16  ;;  %v3562_v47 = vshll.u32 %v3534_v28, 16  ;;  %v7921_v51 = vld [vmem:[#allocation6 + $0x70] sm:$0xff]   ;;  %7474 = vmatpush3.bf16.msra.mxu1 %v7920_v50  ;;  %v4112_v5 = vld [vmem:[#allocation2 + $0x70] sm:$0xf] }
 0x4ef   : > { %3918 = vrot.lane.b32.xlu0 %v3865_v2, %s8315_s28  ;;  %3472 = vrot.lane.b32.xlu1 %v3439_v36, %s8314_s24  ;;  %v3868_v52 = vsel %vm8623_vm5, %v3866_v35, %v3867_v22  ;;  %v3570_v61 = vrot.slane %v3568_v37, 5  ;;  %v3574_v3 = vrot.slane %v3572_v49, 4  ;;  %v7922_v60 = vld [vmem:[#allocation6 + $0x30] sm:$0xff]   ;;  %v4145_v54 = vshll.u32 %v4112_v5, 16  ;;  %v7923_v1 = vld [vmem:[#allocation6 + $0x68] sm:$0xff]   ;;  %v7925_v45 = vld [vmem:[#allocation6 + $0x60] sm:$0xff]  }
 0x4f0   : > { %v3561_v10 = vrot.slane %v3559_v34, 4  ;;  %v3564_v11 = vrot.slane %v3562_v47, 5  ;;  %7475 = vmatprep.subr.bf16.mxu1 %v7921_v51  ;;  %v3580_v8 = vrot.slane %v3578_v63, 5  ;;  %v4111_v39 = vld [vmem:[#allocation2 + $0x6c] sm:$0xf]  ;;  %v4149_v18 = vshrl.u32 %v4112_v5, 16 }
 0x4f1   : > { %v3575_v23 = vor.u32 %v3574_v3, %v3570_v61  ;;  %v4136_v21 = vshrl.u32 %v4111_v39, 16  ;;  %v4139_v53 = vshll.u32 %v4111_v39, 16  ;;  %v4113_v30 = vld [vmem:[#allocation2 + $0x74] sm:$0x1]  ;;  %v4147_v12 = vrot.slane %v4145_v54, 5  ;;  %v7924_v16 = vld [vmem:[#allocation6 + $0x28] sm:$0xff]  }
 0x4f2   : > { %v3565_v31 = vor.u32 %v3564_v11, %v3561_v10  ;;  %7476 = vmatpush3.bf16.msra.mxu1 %v7922_v60  ;;  %v4151_v43 = vrot.slane %v4149_v18, 4  ;;  %v4016_v62 = vld [vmem:[#allocation2 + $0x70] sm:$0xf]  ;;  %v4155_v0 = vshll.u32 %v4113_v30, 16  ;;  %v4015_v42 = vld [vmem:[#allocation2 + $0x6c] sm:$0xf] }
 0x4f3   : > { %3920 = vrot.lane.b32.xlu0 %v3868_v52, %s8315_s28  ;;  %v3576_v20 = vrot.slane %v3575_v23, 4  ;;  %7477 = vmatprep.subr.bf16.mxu1 %v7923_v1  ;;  %v4138_v59 = vrot.slane %v4136_v21, 4  ;;  %v4141_v29 = vrot.slane %v4139_v53, 5  ;;  %v4392_v15 = vld [vmem:[#allocation2 + $0x70] sm:$0xf]  ;;  %v7926_v4 = vld [vmem:[#allocation6 + $0x20] sm:$0xff]  }
 0x4f4   : > { %v3566_v24 = vrot.slane %v3565_v31, 4  ;;  %v4152_v40 = vor.u32 %v4151_v43, %v4147_v12  ;;  %v7927_v46 = vld [vmem:[#allocation6 + $0x58] sm:$0xff]   ;;  %v4561_v9 = vld [vmem:[#allocation2 + $0x7c] sm:$0xf]  ;;  %v4441_v44 = vrot.slane %v4392_v15, 5  ;;  %v4157_v27 = vrot.slane %v4155_v0, 5 }
 0x4f5   : > { %v3581_v25 = vsel %vm8634_vm8, %v3576_v20, %v3580_v8  ;;  %v4142_v7 = vor.u32 %v4141_v29, %v4138_v59  ;;  %v4560_v48 = vld [vmem:[#allocation2 + $0x78] sm:$0xf]  ;;  %v4393_v55 = vld [vmem:[#allocation2 + $0x74] sm:$0x1]  ;;  %v3818_v57 = vld [vmem:[#allocation2 + $0x70] sm:$0xf] }
 0x4f6   : > { %3752 = vrot.lane.b32.xlu1 %v3581_v25, %s8316_s27  ;;  %v3571_v32 = vsel %vm8634_vm8, %v3566_v24, %v3570_v61  ;;  %7478 = vmatpush3.bf16.msra.mxu1 %v7924_v16  ;;  %v4153_v26 = vrot.slane %v4152_v40, 4  ;;  %v3538_v58 = vld [vmem:[#allocation2 + $0x70] sm:$0xf]  ;;  %v4391_v36 = vld [vmem:[#allocation2 + $0x6c] sm:$0xe]  ;;  %v4443_v41 = vrot.slane %v4441_v44, 4 }
 0x4f7   : > { %3750 = vrot.lane.b32.xlu0 %v3571_v32, %s8316_s27  ;;  %7479 = vmatprep.subr.bf16.mxu1 %v7925_v45  ;;  %v4143_v56 = vrot.slane %v4142_v7, 4  ;;  %v7928_v13 = vld [vmem:[#allocation6 + $0x18] sm:$0xff]   ;;  %v3537_v19 = vld [vmem:[#allocation2 + $0x6c] sm:$0xf]  ;;  %v4444_v14 = vrot.slane %v4393_v55, 5  ;;  %v3871_v35 = vrot.slane %v3818_v57, 5 }
 0x4f8   : > { %v7929_v22 = vld [vmem:[#allocation6 + $0x50] sm:$0xff]   ;;  %v4158_v38 = vsel %vm8634_vm8, %v4153_v26, %v4157_v27  ;;  %v3819_v2 = vld [vmem:[#allocation2 + $0x74] sm:$0x1]  ;;  %v3592_v37 = vshll.u32 %v3538_v58, 16  ;;  %v3596_v49 = vshrl.u32 %v3538_v58, 16  ;;  %v7219_v63 = vrot.slane %v4391_v36, 9 }
 0x4f9   : > { %v7930_v28 = vld [vmem:[#allocation6 + $0x10] sm:$0xff]   ;;  %v4148_v50 = vsel %vm8634_vm8, %v4143_v56, %v4147_v12  ;;  %v3583_v34 = vshrl.u32 %v3537_v19, 16  ;;  %v3586_v47 = vshll.u32 %v3537_v19, 16  ;;  %v7931_v51 = vld [vmem:[#allocation6 + $0x48] sm:$0xff]   ;;  %v3874_v61 = vrot.slane %v3819_v2, 5  ;;  %v7933_v18 = vld [vmem:[#allocation6 + $0x40] sm:$0xff]  }
 0x4fa   : > { %4049 = vrot.lane.b32.xlu1 %v4016_v62, %s8317_s5  ;;  %7480 = vmatpush3.bf16.msra.mxu1 %v7926_v4  ;;  %v3817_v52 = vld [vmem:[#allocation2 + $0x6c] sm:$0xe]  ;;  %v4445_v3 = vsel %vm8623_vm5, %v4443_v41, %v4444_v14  ;;  %v3873_v10 = vrot.slane %v3871_v35, 4  ;;  %v3594_v11 = vrot.slane %v3592_v37, 5  ;;  %v3598_v60 = vrot.slane %v3596_v49, 4  ;;  %v7932_v23 = vld [vmem:[#allocation6 + $0x8] sm:$0xff]  }
 0x4fb   : > { %4047 = vrot.lane.b32.xlu0 %v4015_v42, %s8317_s5  ;;  %7481 = vmatprep.subr.bf16.mxu1 %v7927_v46  ;;  %v4442_v8 = vsel %vm8623_vm5, %v7219_v63, %v4441_v44  ;;  %v7212_v5 = vrot.slane %v3817_v52, 9  ;;  %v3539_v39 = vld [vmem:[#allocation2 + $0x74] sm:$0x1]  ;;  %v3585_v31 = vrot.slane %v3583_v34, 4  ;;  %v3588_v54 = vrot.slane %v3586_v47, 5  ;;  %v7934_v53 = vld [vmem:[#allocation6] sm:$0xff]  }
 0x4fc   : > { %v3875_v1 = vsel %vm8623_vm5, %v3873_v10, %v3874_v61  ;;  %v3599_v20 = vor.u32 %v3598_v60, %v3594_v11  ;;  %v3602_v21 = vshll.u32 %v3539_v39, 16  ;;  %v4115_v12 = vld [vmem:[#allocation2 + $0x7c] sm:$0xf]  ;;  %v4114_v43 = vld [vmem:[#allocation2 + $0x78] sm:$0xf] }
 0x4fd   : > { %v3872_v24 = vsel %vm8623_vm5, %v7212_v5, %v3871_v35  ;;  %v3589_v30 = vor.u32 %v3588_v54, %v3585_v31  ;;  %v3441_v25 = vld [vmem:[#allocation2 + $0x70] sm:$0xf]  ;;  %v4169_v16 = vshll.u32 %v4115_v12, 16  ;;  %v4173_v32 = vshrl.u32 %v4115_v12, 16  ;;  %v3440_v62 = vld [vmem:[#allocation2 + $0x6c] sm:$0xf] }
 0x4fe   : > { %4594 = vrot.lane.b32.xlu1 %v4561_v9, %s8315_s28  ;;  %7482 = vmatpush3.bf16.msra.mxu1 %v7928_v13  ;;  %v3600_v59 = vrot.slane %v3599_v20, 4  ;;  %v3604_v29 = vrot.slane %v3602_v21, 5  ;;  %v4160_v0 = vshrl.u32 %v4114_v43, 16  ;;  %v4163_v15 = vshll.u32 %v4114_v43, 16  ;;  %v4116_v46 = vld [vmem:[#allocation2 + $0x80] sm:$0x1] }
 0x4ff   : > { %4592 = vrot.lane.b32.xlu0 %v4560_v48, %s8315_s28  ;;  %7483 = vmatprep.subr.bf16.mxu1 %v7929_v22  ;;  %v3590_v40 = vrot.slane %v3589_v30, 4  ;;  %v4171_v42 = vrot.slane %v4169_v16, 5  ;;  %v4175_v7 = vrot.slane %v4173_v32, 4  ;;  %v4018_v48 = vld [vmem:[#allocation2 + $0x7c] sm:$0xf]  ;;  %v4179_v27 = vshll.u32 %v4116_v46, 16 }
 0x500   : > { %v3605_v45 = vsel %vm8634_vm8, %v3600_v59, %v3604_v29  ;;  %v4162_v9 = vrot.slane %v4160_v0, 4  ;;  %v4165_v44 = vrot.slane %v4163_v15, 5  ;;  %v4017_v55 = vld [vmem:[#allocation2 + $0x78] sm:$0xf]  ;;  %v4395_v57 = vld [vmem:[#allocation2 + $0x7c] sm:$0xf] }
 0x501   : > { %v3595_v4 = vsel %vm8634_vm8, %v3590_v40, %v3594_v11  ;;  %v4176_v26 = vor.u32 %v4175_v7, %v4171_v42  ;;  %v4563_v58 = vld [vmem:[#allocation2 + $0x88] sm:$0xf]  ;;  %v4396_v13 = vld [vmem:[#allocation2 + $0x80] sm:$0x1]  ;;  %v4181_v19 = vrot.slane %v4179_v27, 5  ;;  %v4448_v22 = vrot.slane %v4395_v57, 5 }
 0x502   : > { %4329 = vrot.lane.b32.xlu1 %v4158_v38, %s8314_s24  ;;  %7484 = vmatpush3.bf16.msra.mxu1 %v7930_v28  ;;  %v4166_v56 = vor.u32 %v4165_v44, %v4162_v9  ;;  %v3821_v41 = vld [vmem:[#allocation2 + $0x7c] sm:$0xf]  ;;  %v4562_v14 = vld [vmem:[#allocation2 + $0x84] sm:$0xf]  ;;  %v4394_v35 = vld [vmem:[#allocation2 + $0x78] sm:$0xe] }
 0x503   : > { %4327 = vrot.lane.b32.xlu0 %v4148_v50, %s8314_s24  ;;  %7485 = vmatprep.subr.bf16.mxu1 %v7931_v51  ;;  %v4177_v36 = vrot.slane %v4176_v26, 4  ;;  %v3541_v2 = vld [vmem:[#allocation2 + $0x7c] sm:$0xf]  ;;  %v3540_v37 = vld [vmem:[#allocation2 + $0x78] sm:$0xf]  ;;  %v4451_v49 = vrot.slane %v4396_v13, 5 }
 0x504   : > { %v4167_v38 = vrot.slane %v4166_v56, 4  ;;  %v3822_v28 = vld [vmem:[#allocation2 + $0x80] sm:$0x1]  ;;  %v3878_v50 = vrot.slane %v3821_v41, 5  ;;  %v4450_v34 = vrot.slane %v4448_v22, 4  ;;  %v3616_v51 = vshll.u32 %v3541_v2, 16 }
 0x505   : > { %v4182_v63 = vsel %vm8634_vm8, %v4177_v36, %v4181_v19  ;;  %v3820_v47 = vld [vmem:[#allocation2 + $0x78] sm:$0xe]  ;;  %v3620_v52 = vshrl.u32 %v3541_v2, 16  ;;  %v3607_v10 = vshrl.u32 %v3540_v37, 16  ;;  %v3610_v11 = vshll.u32 %v3540_v37, 16 }
 0x506   : > { %4497 = vrot.lane.b32.xlu1 %v4445_v3, %s8316_s27  ;;  %7486 = vmatpush3.bf16.msra.mxu1 %v7932_v23  ;;  %v4172_v61 = vsel %vm8634_vm8, %v4167_v38, %v4171_v42  ;;  %v7220_v3 = vrot.slane %v4394_v35, 9  ;;  %v3405_v60 = vld [vmem:[%s8529_s12 + $0x40] sm:$0xf]  ;;  %v3880_v23 = vrot.slane %v3878_v50, 4  ;;  %v7213_v5 = vrot.slane %v3820_v47, 9 }
 0x507   : > { %4495 = vrot.lane.b32.xlu0 %v4442_v8, %s8316_s27  ;;  %7487 = vmatprep.subr.bf16.mxu1 %v7933_v18  ;;  %v3881_v8 = vrot.slane %v3822_v28, 5  ;;  %3421 = vst.msk [vmem:[#allocation5] sm:$0xf] %vm373_vm9, %v3405_v60  ;;  %v4452_v39 = vsel %vm8623_vm5, %v4450_v34, %v4451_v49  ;;  %v3542_v31 = vld [vmem:[#allocation2 + $0x80] sm:$0x1]  ;;  %v3618_v54 = vrot.slane %v3616_v51, 5 }
 0x508   : > { %v3622_v18 = vrot.slane %v3620_v52, 4  ;;  %v4449_v20 = vsel %vm8623_vm5, %v7220_v3, %v4448_v22  ;;  %v3609_v21 = vrot.slane %v3607_v10, 4  ;;  %v3626_v12 = vshll.u32 %v3542_v31, 16  ;;  %v4118_v43 = vld [vmem:[#allocation2 + $0x88] sm:$0xf] }
 0x509   : > { %v3443_v29 = vld [vmem:[#allocation2 + $0x7c] sm:$0xf]  ;;  %v4117_v16 = vld [vmem:[#allocation2 + $0x84] sm:$0xf]  ;;  %v3442_v32 = vld [vmem:[#allocation2 + $0x78] sm:$0xf] }
 0x50a   : > { %3924 = vrot.lane.b32.xlu1 %v3875_v1, %s8315_s28  ;;  %7488 = vmatpush3.bf16.msra.mxu1 %v7934_v53  ;;  %v3406_v1 = vld [vmem:[%s8529_s12 + $0x44] sm:$0xf]  ;;  %v3612_v53 = vrot.slane %v3610_v11, 5  ;;  %v3623_v30 = vor.u32 %v3622_v18, %v3618_v54  ;;  %v3628_v40 = vrot.slane %v3626_v12, 5  ;;  %v4193_v0 = vshll.u32 %v4118_v43, 16 }
 0x50b   : > { %3922 = vrot.lane.b32.xlu0 %v3872_v24, %s8315_s28  ;;  %3422 = vst.msk [vmem:[#allocation5 + $0xc] sm:$0xf] %vm373_vm9, %v3406_v1  ;;  %v3882_v24 = vsel %vm8623_vm5, %v3880_v23, %v3881_v8  ;;  %v4197_v15 = vshrl.u32 %v4118_v43, 16  ;;  %v4184_v42 = vshrl.u32 %v4117_v16, 16  ;;  %v4187_v7 = vshll.u32 %v4117_v16, 16 }
 0x50c   : > { %v3613_v59 = vor.u32 %v3612_v53, %v3609_v21  ;;  %v4195_v46 = vrot.slane %v4193_v0, 5  ;;  %v4020_v56 = vld [vmem:[#allocation2 + $0x88] sm:$0xf]  ;;  %v4019_v13 = vld [vmem:[#allocation2 + $0x84] sm:$0xf] }
 0x50d   : > { %v4199_v9 = vrot.slane %v4197_v15, 4  ;;  %v4186_v26 = vrot.slane %v4184_v42, 4  ;;  %v4189_v27 = vrot.slane %v4187_v7, 5  ;;  %v4399_v19 = vld [vmem:[#allocation2 + $0x8c] sm:$0x1] }
 0x50e   : > { %3476 = vrot.lane.b32.xlu1 %v3441_v25, %s8314_s24  ;;  %v3879_v25 = vsel %vm8623_vm5, %v7213_v5, %v3878_v50  ;;  %v4565_v22 = vld [vmem:[#allocation2 + $0x94] sm:$0xf]  ;;  %v4397_v38 = vld [vmem:[#allocation2 + $0x84] sm:$0xe]  ;;  %v3824_v37 = vld [vmem:[#allocation2 + $0x88] sm:$0xf] }
 0x50f   : > { %3474 = vrot.lane.b32.xlu0 %v3440_v62, %s8314_s24  ;;  %v3624_v62 = vrot.slane %v3623_v30, 4  ;;  %v4200_v57 = vor.u32 %v4199_v9, %v4195_v46  ;;  %v4190_v36 = vor.u32 %v4189_v27, %v4186_v26  ;;  %v3544_v49 = vld [vmem:[#allocation2 + $0x88] sm:$0xf]  ;;  %v4458_v50 = vrot.slane %v4399_v19, 5  ;;  %v3543_v34 = vld [vmem:[#allocation2 + $0x84] sm:$0xf] }
 0x510   : > { %v7221_v51 = vrot.slane %v4397_v38, 9  ;;  %v3408_v52 = vld [vmem:[%s8529_s12 + $0x4c] sm:$0xf]  ;;  %v3885_v10 = vrot.slane %v3824_v37, 5  ;;  %v3640_v11 = vshll.u32 %v3544_v49, 16  ;;  %v3644_v60 = vshrl.u32 %v3544_v49, 16 }
 0x511   : > { %v4201_v2 = vrot.slane %v4200_v57, 4  ;;  %v4191_v28 = vrot.slane %v4190_v36, 4  ;;  %3424 = vst.msk [vmem:[#allocation5 + $0x24] sm:$0xf] %vm373_vm9, %v3408_v52  ;;  %v3631_v8 = vshrl.u32 %v3543_v34, 16  ;;  %v3634_v5 = vshll.u32 %v3543_v34, 16 }
 0x512   : > { %3756 = vrot.lane.b32.xlu1 %v3605_v45, %s8316_s27  ;;  %v3614_v45 = vrot.slane %v3613_v59, 4  ;;  %v3887_v18 = vrot.slane %v3885_v10, 4  ;;  %v3642_v1 = vrot.slane %v3640_v11, 5  ;;  %v3444_v7 = vld [vmem:[#allocation2 + $0x84] sm:$0xf] }
 0x513   : > { %3754 = vrot.lane.b32.xlu0 %v3595_v4, %s8316_s27  ;;  %v3629_v4 = vsel %vm8634_vm8, %v3624_v62, %v3628_v40  ;;  %v4196_v23 = vsel %vm8634_vm8, %v4191_v28, %v4195_v46  ;;  %v3633_v30 = vrot.slane %v3631_v8, 4  ;;  %v3636_v12 = vrot.slane %v3634_v5, 5  ;;  %v4120_v62 = vld [vmem:[#allocation2 + $0x90] sm:$0xf]  ;;  %v3445_v40 = vld [vmem:[#allocation2 + $0x88] sm:$0xf] }
 0x514   : > { %v3619_v44 = vsel %vm8634_vm8, %v3614_v45, %v3618_v54  ;;  %v4208_v46 = vshrl.u32 %v4120_v62, 16  ;;  %v4211_v9 = vshll.u32 %v4120_v62, 16  ;;  %v4122_v57 = vld [vmem:[#allocation2 + $0x98] sm:$0x1]  ;;  %v4022_v36 = vld [vmem:[#allocation2 + $0x94] sm:$0xf] }
 0x515   : > { %v3637_v16 = vor.u32 %v3636_v12, %v3633_v30  ;;  %v4566_v37 = vld [vmem:[#allocation2 + $0x9c] sm:$0xf]  ;;  %v3827_v34 = vld [vmem:[#allocation2 + $0x94] sm:$0xf]  ;;  %v3546_v52 = vld [vmem:[#allocation2 + $0x90] sm:$0xf] }
 0x516   : > { %4053 = vrot.lane.b32.xlu1 %v4018_v48, %s8317_s5  ;;  %v4119_v48 = vld [vmem:[#allocation2 + $0x8c] sm:$0x1]  ;;  %v3828_v11 = vld [vmem:[#allocation2 + $0x98] sm:$0x1] }
 0x517   : > { %4051 = vrot.lane.b32.xlu0 %v4017_v55, %s8317_s5  ;;  %v4398_v55 = vld [vmem:[#allocation2 + $0x88] sm:$0xf] }
 0x518   : > { %v4455_v41 = vrot.slane %v4398_v55, 5 }
 0x51a   : > { %4598 = vrot.lane.b32.xlu1 %v4563_v58, %s8315_s28  ;;  %v4203_v58 = vshll.u32 %v4119_v48, 16  ;;  %v4457_v47 = vrot.slane %v4455_v41, 4  ;;  %v4456_v21 = vsel %vm8623_vm5, %v7221_v51, %v4455_v41  ;;  %v3409_v48 = vld [vmem:[%s8529_s12 + $0x50] sm:$0xf]  ;;  %v4401_v41 = vld [vmem:[#allocation2 + $0x94] sm:$0xf] }
 0x51b   : > { %4596 = vrot.lane.b32.xlu0 %v4562_v14, %s8315_s28  ;;  %v4564_v14 = vld [vmem:[#allocation2 + $0x90] sm:$0xf]  ;;  %3425 = vst.msk [vmem:[#allocation5 + $0x30] sm:$0xf] %vm373_vm9, %v3409_v48 }
 0x51c   : > { %v4205_v35 = vrot.slane %v4203_v58, 5  ;;  %v4459_v54 = vsel %vm8623_vm5, %v4457_v47, %v4458_v50  ;;  %v4210_v58 = vrot.slane %v4208_v46, 4  ;;  %v4402_v50 = vld [vmem:[#allocation2 + $0x98] sm:$0x1]  ;;  %v3547_v47 = vld [vmem:[#allocation2 + $0x94] sm:$0xf] }
 0x51d   : > { %v4400_v51 = vld [vmem:[#allocation2 + $0x90] sm:$0xe]  ;;  %v3668_v8 = vshrl.u32 %v3547_v47, 16 }
 0x51e   : > { %4333 = vrot.lane.b32.xlu1 %v4182_v63, %s8314_s24  ;;  %v3825_v63 = vld [vmem:[#allocation2 + $0x8c] sm:$0x1]  ;;  %v4206_v3 = vsel %vm8634_vm8, %v4201_v2, %v4205_v35  ;;  %v4567_v2 = vld [vmem:[#allocation2 + $0xa0] sm:$0xf]  ;;  %v4462_v35 = vrot.slane %v4401_v41, 5 }
 0x51f   : > { %4331 = vrot.lane.b32.xlu0 %v4172_v61, %s8314_s24  ;;  %v3407_v61 = vld [vmem:[%s8529_s12 + $0x48] sm:$0xf]  ;;  %v3888_v31 = vrot.slane %v3825_v63, 5  ;;  %v3670_v12 = vrot.slane %v3668_v8, 4  ;;  %v3830_v8 = vld [vmem:[#allocation2 + $0xa0] sm:$0xf] }
 0x520   : > { %3423 = vst.msk [vmem:[#allocation5 + $0x18] sm:$0xf] %vm373_vm9, %v3407_v61  ;;  %v4464_v61 = vrot.slane %v4462_v35, 4 }
 0x521   : > { %v3889_v43 = vsel %vm8623_vm5, %v3887_v18, %v3888_v31  ;;  %v3655_v31 = vshrl.u32 %v3546_v52, 16  ;;  %v3826_v18 = vld [vmem:[#allocation2 + $0x90] sm:$0xe] }
 0x522   : > { %4501 = vrot.lane.b32.xlu1 %v4452_v39, %s8316_s27  ;;  %v3823_v39 = vld [vmem:[#allocation2 + $0x84] sm:$0xe] }
 0x523   : > { %4499 = vrot.lane.b32.xlu0 %v4449_v20, %s8316_s27  ;;  %v3646_v20 = vrot.slane %v3644_v60, 4  ;;  %v7214_v53 = vrot.slane %v3823_v39, 9  ;;  %v3892_v60 = vrot.slane %v3827_v34, 5  ;;  %v7222_v39 = vrot.slane %v4400_v51, 9  ;;  %v4024_v34 = vld [vmem:[#allocation2 + $0xa0] sm:$0xf] }
 0x526   : > { %3928 = vrot.lane.b32.xlu1 %v3882_v24, %s8315_s28  ;;  %v3545_v24 = vld [vmem:[#allocation2 + $0x8c] sm:$0x1] }
 0x527   : > { %3926 = vrot.lane.b32.xlu0 %v3879_v25, %s8315_s28  ;;  %v3647_v25 = vor.u32 %v3646_v20, %v3642_v1  ;;  %v3650_v59 = vshll.u32 %v3545_v24, 16  ;;  %v3895_v20 = vrot.slane %v3828_v11, 5  ;;  %v3894_v24 = vrot.slane %v3892_v60, 4 }
 0x529   : > { %v3648_v0 = vrot.slane %v3647_v25, 4  ;;  %v3652_v15 = vrot.slane %v3650_v59, 5  ;;  %v7215_v25 = vrot.slane %v3826_v18, 9  ;;  %v3548_v59 = vld [vmem:[#allocation2 + $0x98] sm:$0x1] }
 0x52a   : > { %3480 = vrot.lane.b32.xlu1 %v3443_v29, %s8314_s24  ;;  %v3886_v29 = vsel %vm8623_vm5, %v7214_v53, %v3885_v10 }
 0x52b   : > { %3478 = vrot.lane.b32.xlu0 %v3442_v32, %s8314_s24  ;;  %v4121_v32 = vld [vmem:[#allocation2 + $0x94] sm:$0xf]  ;;  %v3653_v26 = vsel %vm8634_vm8, %v3648_v0, %v3652_v15  ;;  %v3893_v0 = vsel %vm8623_vm5, %v7215_v25, %v3892_v60  ;;  %v4569_v60 = vld [vmem:[#allocation2 + $0xac] sm:$0xf]  ;;  %v3829_v25 = vld [vmem:[#allocation2 + $0x9c] sm:$0xe] }
 0x52c   : > { %v4217_v45 = vshll.u32 %v4121_v32, 16  ;;  %v4221_v42 = vshrl.u32 %v4121_v32, 16  ;;  %v3896_v32 = vsel %vm8623_vm5, %v3894_v24, %v3895_v20  ;;  %v4403_v24 = vld [vmem:[#allocation2 + $0x9c] sm:$0xe] }
 0x52e   : > { %3760 = vrot.lane.b32.xlu1 %v3629_v4, %s8316_s27  ;;  %v3638_v4 = vrot.slane %v3637_v16, 4  ;;  %v4219_v27 = vrot.slane %v4217_v45, 5  ;;  %v4223_v55 = vrot.slane %v4221_v42, 4  ;;  %v4124_v45 = vld [vmem:[#allocation2 + $0xa0] sm:$0xf] }
 0x52f   : > { %3758 = vrot.lane.b32.xlu0 %v3619_v44, %s8316_s27  ;;  %v3410_v44 = vld [vmem:[%s8529_s12 + $0x54] sm:$0xf]  ;;  %v4245_v48 = vshrl.u32 %v4124_v45, 16 }
 0x530   : > { %3426 = vst.msk [vmem:[#allocation5 + $0x3c] sm:$0xf] %vm373_vm9, %v3410_v44  ;;  %v4224_v19 = vor.u32 %v4223_v55, %v4219_v27  ;;  %v4241_v44 = vshll.u32 %v4124_v45, 16 }
 0x532   : > { %4057 = vrot.lane.b32.xlu1 %v4020_v56, %s8317_s5  ;;  %v3643_v56 = vsel %vm8634_vm8, %v3638_v4, %v3642_v1  ;;  %v4225_v49 = vrot.slane %v4224_v19, 4  ;;  %v3412_v1 = vld [vmem:[%s8529_s12 + $0x5c] sm:$0xf]  ;;  %v3447_v4 = vld [vmem:[#allocation2 + $0x94] sm:$0xf]  ;;  %v9911_v19 = vrot.slane %v4241_v44, 5 }
 0x533   : > { %4055 = vrot.lane.b32.xlu0 %v4019_v13, %s8317_s5  ;;  %v4213_v13 = vrot.slane %v4211_v9, 5  ;;  %3428 = vst.msk [vmem:[#allocation5 + $0x54] sm:$0xf] %vm373_vm9, %v3412_v1  ;;  %v4568_v1 = vld [vmem:[#allocation2 + $0xa8] sm:$0xf] }
 0x534   : > { %v3551_v44 = vld [vmem:[#allocation2 + $0xa4] sm:$0x1] }
 0x535   : > { %v4214_v38 = vor.u32 %v4213_v13, %v4210_v58 }
 0x536   : > { %4602 = vrot.lane.b32.xlu1 %v4565_v22, %s8315_s28  ;;  %v4227_v22 = vshll.u32 %v4122_v57, 16 }
 0x537   : > { %4600 = vrot.lane.b32.xlu0 %v4564_v14, %s8315_s28  ;;  %v4021_v14 = vld [vmem:[#allocation2 + $0x90] sm:$0xf]  ;;  %v4215_v63 = vrot.slane %v4214_v38, 4 }
 0x538   : > { %v4229_v28 = vrot.slane %v4227_v22, 5  ;;  %v4247_v22 = vrot.slane %v4245_v48, 4  ;;  %v4688_v48 = vld [vmem:[#allocation2 + $0x78] sm:$0xf] }
 0x539   : > { %v4220_v5 = vsel %vm8634_vm8, %v4215_v63, %v4219_v27  ;;  %v3446_v27 = vld [vmem:[#allocation2 + $0x90] sm:$0xf] }
 0x53a   : > { %4337 = vrot.lane.b32.xlu1 %v4206_v3, %s8314_s24  ;;  %v4465_v3 = vrot.slane %v4402_v50, 5  ;;  %v4230_v10 = vsel %vm8634_vm8, %v4225_v49, %v4229_v28  ;;  %v3413_v50 = vld [vmem:[%s8529_s12 + $0x60] sm:$0xf] }
 0x53b   : > { %4335 = vrot.lane.b32.xlu0 %v4196_v23, %s8314_s24  ;;  %v3664_v23 = vshll.u32 %v3547_v47, 16  ;;  %v4248_v47 = vor.u32 %v4247_v22, %v9911_v19  ;;  %3429 = vst.msk [vmem:[#allocation5 + $0x60] sm:$0xf] %vm373_vm9, %v3413_v50  ;;  %v4691_v50 = vld [vmem:[#allocation2 + $0x84] sm:$0xf] }
 0x53c   : > { %v4466_v53 = vsel %vm8623_vm5, %v4464_v61, %v4465_v3  ;;  %v4404_v3 = vld [vmem:[#allocation2 + $0xa0] sm:$0xf] }
 0x53d   : > { %v3666_v30 = vrot.slane %v3664_v23, 5 }
 0x53e   : > { %4505 = vrot.lane.b32.xlu1 %v4459_v54, %s8316_s27  ;;  %v3658_v54 = vshll.u32 %v3546_v52, 16  ;;  %v4023_v52 = vld [vmem:[#allocation2 + $0x9c] sm:$0xf] }
 0x53f   : > { %4503 = vrot.lane.b32.xlu0 %v4456_v21, %s8316_s27  ;;  %v3411_v21 = vld [vmem:[%s8529_s12 + $0x58] sm:$0xf]  ;;  %v3671_v62 = vor.u32 %v3670_v12, %v3666_v30  ;;  %v3899_v12 = vrot.slane %v3830_v8, 5 }
 0x540   : > { %3427 = vst.msk [vmem:[#allocation5 + $0x48] sm:$0xf] %vm373_vm9, %v3411_v21  ;;  %v3660_v16 = vrot.slane %v3658_v54, 5  ;;  %v3550_v54 = vld [vmem:[#allocation2 + $0xa0] sm:$0xf] }
 0x541   : > { %v3672_v46 = vrot.slane %v3671_v62, 4  ;;  %v3549_v21 = vld [vmem:[#allocation2 + $0x9c] sm:$0xf] }
 0x542   : > { %3932 = vrot.lane.b32.xlu1 %v3889_v43, %s8315_s28  ;;  %v4463_v43 = vsel %vm8623_vm5, %v7222_v39, %v4462_v35  ;;  %v4405_v39 = vld [vmem:[#allocation2 + $0xa4] sm:$0x1]  ;;  %v3679_v62 = vshrl.u32 %v3549_v21, 16 }
 0x543   : > { %3930 = vrot.lane.b32.xlu0 %v3886_v29, %s8315_s28  ;;  %v3657_v29 = vrot.slane %v3655_v31, 4  ;;  %v4469_v31 = vrot.slane %v4404_v3, 5 }
 0x545   : > { %v3661_v15 = vor.u32 %v3660_v16, %v3657_v29  ;;  %v3692_v29 = vshrl.u32 %v3550_v54, 16 }
 0x546   : > { %3484 = vrot.lane.b32.xlu1 %v3445_v40, %s8314_s24  ;;  %v3674_v40 = vshll.u32 %v3548_v59, 16  ;;  %v3688_v59 = vshll.u32 %v3550_v54, 16 }
 0x547   : > { %3482 = vrot.lane.b32.xlu0 %v3444_v7, %s8314_s24  ;;  %v4123_v7 = vld [vmem:[#allocation2 + $0x9c] sm:$0xf]  ;;  %v3662_v55 = vrot.slane %v3661_v15, 4 }
 0x548   : > { %v3676_v9 = vrot.slane %v3674_v40, 5  ;;  %v4235_v57 = vshll.u32 %v4123_v7, 16  ;;  %v3682_v40 = vshll.u32 %v3549_v21, 16 }
 0x54a   : > { %3764 = vrot.lane.b32.xlu1 %v3653_v26, %s8316_s27  ;;  %v3677_v13 = vsel %vm8634_vm8, %v3672_v46, %v3676_v9  ;;  %v3901_v46 = vrot.slane %v3899_v12, 4  ;;  %v7216_v9 = vrot.slane %v3829_v25, 9 }
 0x54b   : > { %3762 = vrot.lane.b32.xlu0 %v3643_v56, %s8316_s27  ;;  %v4232_v56 = vshrl.u32 %v4123_v7, 16 }
 0x54d   : > { %v4234_v38 = vrot.slane %v4232_v56, 4  ;;  %v3416_v56 = vld [vmem:[%s8529_s12 + $0x6c] sm:$0xf] }
 0x54e   : > { %4061 = vrot.lane.b32.xlu1 %v4022_v36, %s8317_s5  ;;  %v4125_v36 = vld [vmem:[#allocation2 + $0xa4] sm:$0x1]  ;;  %3432 = vst.msk [vmem:[#allocation5 + $0x84] sm:$0xf] %vm373_vm9, %v3416_v56 }
 0x54f   : > { %4059 = vrot.lane.b32.xlu0 %v4021_v14, %s8317_s5  ;;  %v3667_v14 = vsel %vm8634_vm8, %v3662_v55, %v3666_v30  ;;  %v4251_v28 = vshll.u32 %v4125_v36, 16  ;;  %v3831_v30 = vld [vmem:[#allocation2 + $0xa4] sm:$0x1] }
 0x550   : > { %v3902_v7 = vrot.slane %v3831_v30, 5 }
 0x551   : > { %v4253_v23 = vrot.slane %v4251_v28, 5  ;;  %v3900_v28 = vsel %vm8623_vm5, %v7216_v9, %v3899_v12 }
 0x552   : > { %4606 = vrot.lane.b32.xlu1 %v4567_v2, %s8315_s28  ;;  %v4237_v2 = vrot.slane %v4235_v57, 5 }
 0x553   : > { %4604 = vrot.lane.b32.xlu0 %v4566_v37, %s8315_s28  ;;  %v3414_v37 = vld [vmem:[%s8529_s12 + $0x64] sm:$0xf] }
 0x554   : > { %3430 = vst.msk [vmem:[#allocation5 + $0x6c] sm:$0xf] %vm373_vm9, %v3414_v37  ;;  %v4238_v61 = vor.u32 %v4237_v2, %v4234_v38  ;;  %v4716_v38 = vshll.u32 %v4688_v48, 16  ;;  %v4692_v2 = vld [vmem:[#allocation2 + $0x88] sm:$0xf] }
 0x556   : > { %4341 = vrot.lane.b32.xlu1 %v4230_v10, %s8314_s24  ;;  %v4239_v20 = vrot.slane %v4238_v61, 4  ;;  %v4690_v61 = vld [vmem:[#allocation2 + $0x80] sm:$0x1]  ;;  %v4718_v8 = vrot.slane %v4716_v38, 5 }
 0x557   : > { %4339 = vrot.lane.b32.xlu0 %v4220_v5, %s8314_s24  ;;  %v4249_v5 = vrot.slane %v4248_v47, 4  ;;  %v3698_v47 = vshll.u32 %v3551_v44, 16  ;;  %v4732_v21 = vshll.u32 %v4690_v61, 16  ;;  %v4970_v38 = vld [vmem:[#allocation2 + $0x80] sm:$0x1] }
 0x558   : > { %v4244_v45 = vsel %vm8634_vm8, %v4239_v20, %v9911_v19  ;;  %v3415_v19 = vld [vmem:[%s8529_s12 + $0x68] sm:$0xf] }
 0x559   : > { %v4254_v16 = vsel %vm8634_vm8, %v4249_v5, %v4253_v23  ;;  %3431 = vst.msk [vmem:[#allocation5 + $0x78] sm:$0xf] %vm373_vm9, %v3415_v19  ;;  %v4737_v5 = vshrl.u32 %v4691_v50, 16  ;;  %v3700_v20 = vrot.slane %v3698_v47, 5  ;;  %v5021_v47 = vrot.slane %v4970_v38, 5 }
 0x55a   : > { %4509 = vrot.lane.b32.xlu1 %v4466_v53, %s8316_s27 }
 0x55b   : > { %4507 = vrot.lane.b32.xlu0 %v4463_v43, %s8316_s27  ;;  %v4472_v43 = vrot.slane %v4405_v39, 5  ;;  %v4740_v39 = vshll.u32 %v4691_v50, 16  ;;  %v7951_v50 = vld [vmem:[#allocation6 + $0x98] sm:$0xff]  }
 0x55d   : > { %v3471_v42 = vpop.permute.xlu1 %3470 }
 0x55e   : > { %3936 = vrot.lane.b32.xlu1 %v3896_v32, %s8315_s28  ;;  %3518 = vst.msk [vmem:[#allocation5] sm:$0xf] %vm470_vm10, %v3471_v42  ;;  %v4471_v32 = vrot.slane %v4469_v31, 4  ;;  %v7223_v42 = vrot.slane %v4403_v24, 9 }
 0x55f   : > { %3934 = vrot.lane.b32.xlu0 %v3893_v0, %s8315_s28  ;;  %v4689_v0 = vld [vmem:[#allocation2 + $0x7c] sm:$0xf] }
 0x560   : > { %v4722_v55 = vshll.u32 %v4689_v0, 16  ;;  %v4473_v57 = vsel %vm8623_vm5, %v4471_v32, %v4472_v43  ;;  %v4726_v36 = vshrl.u32 %v4689_v0, 16  ;;  %v4739_v32 = vrot.slane %v4737_v5, 4 }
 0x561   : > { %v3919_v26 = vpop.permute.xlu0 %3918  ;;  %v3473_v58 = vpop.permute.xlu1 %3472  ;;  %v4734_v0 = vrot.slane %v4732_v21, 5 }
 0x562   : > { %3488 = vrot.lane.b32.xlu1 %v3447_v4, %s8314_s24  ;;  %3519 = vst.msk [vmem:[#allocation5 + $0xc] sm:$0xf] %vm470_vm10, %v3473_v58  ;;  %v3950_v49 = vrot.slane %v3919_v26, 4  ;;  %v3681_v58 = vrot.slane %v3679_v62, 4  ;;  %v4728_v3 = vrot.slane %v4726_v36, 4  ;;  %v4742_v62 = vrot.slane %v4740_v39, 5 }
 0x563   : > { %3486 = vrot.lane.b32.xlu0 %v3446_v27, %s8314_s24  ;;  %v3694_v27 = vrot.slane %v3692_v29, 4 }
 0x564   : > { %v3966_v11 = vsel %vm926_vm13, %v3950_v49, %v3919_v26  ;;  %v9942_v26 = vrot.slane %v3688_v59, 5  ;;  %v3903_v49 = vsel %vm8623_vm5, %v3901_v46, %v3902_v7 }
 0x565   : > { %v3921_v41 = vpop.permute.xlu0 %3920 }
 0x566   : > { %v3951_v35 = vrot.slane %v3921_v41, 4  ;;  %3768 = vrot.lane.b32.xlu1 %v3677_v13, %s8316_s27  ;;  %v3684_v13 = vrot.slane %v3682_v40, 5 }
 0x567   : > { %3766 = vrot.lane.b32.xlu0 %v3667_v14, %s8316_s27  ;;  %v4713_v14 = vshrl.u32 %v4688_v48, 16  ;;  %v4743_v48 = vor.u32 %v4742_v62, %v4739_v32 }
 0x568   : > { %v3967_v63 = vsel %vm926_vm13, %v3951_v35, %v3921_v41  ;;  %v3753_v51 = vpop.permute.xlu1 %3752  ;;  %v4470_v41 = vsel %vm8623_vm5, %v7223_v42, %v4469_v31 }
 0x569   : > { %3799 = vst.msk [vmem:[#allocation5 + $0xc] sm:$0xf] %vm754_vm14, %v3753_v51  ;;  %v3751_v10 = vpop.permute.xlu0 %3750  ;;  %v9961_v51 = vrot.slane %v4722_v55, 5  ;;  %v4715_v23 = vrot.slane %v4713_v14, 4  ;;  %v4744_v14 = vrot.slane %v4743_v48, 4 }
 0x56a   : > { %3999 = vst.msk [vmem:[#allocation5 + $0xc] sm:$0xff] %vm8795_vm15, %v3967_v63  ;;  %4065 = vrot.lane.b32.xlu1 %v4024_v34, %s8317_s5  ;;  %v3695_v34 = vor.u32 %v3694_v27, %v9942_v26  ;;  %v10034_v48 = vld [vmem:[#allocation2 + $0xac] sm:$0xf] }
 0x56b   : > { %3798 = vst.msk [vmem:[#allocation5] sm:$0xf] %vm754_vm14, %v3751_v10  ;;  %4063 = vrot.lane.b32.xlu0 %v4023_v52, %s8317_s5  ;;  %v3685_v52 = vor.u32 %v3684_v13, %v3681_v58  ;;  %v4746_v10 = vshll.u32 %v4692_v2, 16  ;;  %v4729_v30 = vor.u32 %v4728_v3, %v9961_v51  ;;  %v4719_v29 = vor.u32 %v4718_v8, %v4715_v23  ;;  %v7952_v23 = vld [vmem:[#allocation6 + $0x90] sm:$0xff]  }
 0x56c   : > { %3998 = vst.msk [vmem:[#allocation5] sm:$0xff] %vm8795_vm15, %v3966_v11  ;;  %v4050_v18 = vpop.permute.xlu1 %4049  ;;  %v4750_v11 = vshrl.u32 %v4692_v2, 16  ;;  %v3696_v24 = vrot.slane %v3695_v34, 4 }
 0x56d   : > { %4096 = vst.msk [vmem:[#allocation5 + $0x10] sm:$0xf] %vm1059_vm0, %v4050_v18  ;;  %v4048_v53 = vpop.permute.xlu0 %4047  ;;  %v9975_v12 = vrot.slane %v4746_v10, 5  ;;  %v3686_v59 = vrot.slane %v3685_v52, 4  ;;  %v4730_v42 = vrot.slane %v4729_v30, 4  ;;  %v4720_v44 = vrot.slane %v4719_v29, 4 }
 0x56e   : > { %4095 = vst.msk [vmem:[#allocation5 + $0x4] sm:$0xf] %vm1059_vm0, %v4048_v53  ;;  %4610 = vrot.lane.b32.xlu1 %v4569_v60, %s8315_s28  ;;  %v3448_v53 = vld [vmem:[#allocation2 + $0x9c] sm:$0xf]  ;;  %v4752_v43 = vrot.slane %v4750_v11, 4 }
 0x56f   : > { %4608 = vrot.lane.b32.xlu0 %v4568_v1, %s8315_s28  ;;  %v3449_v1 = vld [vmem:[#allocation2 + $0xa0] sm:$0xf]  ;;  %v3691_v9 = vsel %vm8634_vm8, %v3686_v59, %v9942_v26  ;;  %v4735_v13 = vsel %vm8634_vm8, %v4730_v42, %v4734_v0  ;;  %v4749_v61 = vsel %vm8634_vm8, %v4744_v14, %v9975_v12  ;;  %v4127_v10 = vld [vmem:[#allocation2 + $0xac] sm:$0xf]  ;;  %v4025_v29 = vld [vmem:[#allocation2 + $0xa8] sm:$0xf] }
 0x570   : > { %v4595_v15 = vpop.permute.xlu1 %4594  ;;  %v4753_v7 = vor.u32 %v4752_v43, %v9975_v12  ;;  %v4265_v5 = vshll.u32 %v4127_v10, 16  ;;  %v4269_v39 = vshrl.u32 %v4127_v10, 16  ;;  %v4128_v12 = vld [vmem:[#allocation2 + $0xb0] sm:$0x1]  ;;  %v4476_v14 = vrot.slane %v10034_v48, 5 }
 0x571   : > { %v4593_v4 = vpop.permute.xlu0 %4592  ;;  %v4625_v35 = vrot.slane %v4595_v15, 4  ;;  %v4275_v42 = vshll.u32 %v4128_v12, 16 }
 0x572   : > { %4345 = vrot.lane.b32.xlu1 %v4254_v16, %s8314_s24  ;;  %v4624_v63 = vrot.slane %v4593_v4, 4  ;;  %v4693_v16 = vld [vmem:[#allocation2 + $0x8c] sm:$0x1]  ;;  %v4754_v36 = vrot.slane %v4753_v7, 4  ;;  %v10027_v43 = vrot.slane %v4265_v5, 5  ;;  %v7955_v7 = vld [vmem:[#allocation6 + $0x80] sm:$0xff]  }
 0x573   : > { %4343 = vrot.lane.b32.xlu0 %v4244_v45, %s8314_s24  ;;  %v4641_v31 = vsel %vm926_vm13, %v4625_v35, %v4595_v15  ;;  %v9978_v15 = vld [vmem:[#allocation2 + $0x7c] sm:$0xf]  ;;  %v3701_v45 = vsel %vm8634_vm8, %v3696_v24, %v3700_v20  ;;  %v7954_v24 = vld [vmem:[#allocation6 + $0x88] sm:$0xff]  }
 0x574   : > { %v4330_v22 = vpop.permute.xlu1 %4329  ;;  %v4640_v18 = vsel %vm926_vm13, %v4624_v63, %v4593_v4  ;;  %v4756_v4 = vshll.u32 %v4693_v16, 16  ;;  %v5018_v19 = vrot.slane %v9978_v15, 5  ;;  %v4973_v16 = vld [vmem:[#allocation2 + $0x8c] sm:$0x1]  ;;  %v4971_v15 = vld [vmem:[#allocation2 + $0x84] sm:$0xe] }
 0x575   : > { %4376 = vst.msk [vmem:[#allocation5 + $0x10] sm:$0xf] %vm470_vm10, %v4330_v22  ;;  %v4328_v37 = vpop.permute.xlu0 %4327 }
 0x576   : > { %4375 = vst.msk [vmem:[#allocation5 + $0x4] sm:$0xf] %vm470_vm10, %v4328_v37  ;;  %4513 = vrot.lane.b32.xlu1 %v4473_v57, %s8316_s27  ;;  %v7935_v57 = vld [vmem:[#allocation5] ss:$12 sps:$4 sm:$0xff]   ;;  %v4758_v26 = vrot.slane %v4756_v4, 5  ;;  %v5020_v34 = vrot.slane %v5018_v19, 4 }
 0x577   : > { %4511 = vrot.lane.b32.xlu0 %v4470_v41, %s8316_s27  ;;  %v4725_v41 = vsel %vm8634_vm8, %v4720_v44, %v9961_v51  ;;  %v4968_v37 = vld [vmem:[#allocation2 + $0x78] sm:$0xe] }
 0x578   : > { %v4498_v60 = vpop.permute.xlu1 %4497  ;;  %v4759_v63 = vsel %vm8634_vm8, %v4754_v36, %v4758_v26  ;;  %v7227_v3 = vrot.slane %v4968_v37, 9  ;;  %v5022_v8 = vsel %vm8623_vm5, %v5020_v34, %v5021_v47  ;;  %v4571_v4 = vld [vmem:[#allocation2 + $0xb8] sm:$0xf]  ;;  %v3553_v26 = vld [vmem:[#allocation2 + $0xac] sm:$0xf] }
 0x579   : > { %4544 = vst.msk [vmem:[#allocation5 + $0x10] sm:$0xf] %vm754_vm14, %v4498_v60  ;;  %v4496_v54 = vpop.permute.xlu0 %4495  ;;  %v4126_v60 = vld [vmem:[#allocation2 + $0xa8] sm:$0xf]  ;;  %v3834_v37 = vld [vmem:[#allocation2 + $0xb0] sm:$0x1] }
 0x57a   : > { %4673 = vst.msk [vmem:[#allocation5 + $0x10] sm:$0xff] %vm8795_vm15, %v4641_v31  ;;  %3940 = vrot.lane.b32.xlu1 %v3903_v49, %s8315_s28  ;;  %v7950_v49 = vld [vmem:[#allocation6 + $0xa0] ss:$0 sps:$4 sm:$0x33]   ;;  %v4259_v20 = vshll.u32 %v4126_v60, 16  ;;  %v3712_v47 = vshll.u32 %v3553_v26, 16 }
 0x57b   : > { %4543 = vst.msk [vmem:[#allocation5 + $0x4] sm:$0xf] %vm754_vm14, %v4496_v54  ;;  %3938 = vrot.lane.b32.xlu0 %v3900_v28, %s8315_s28  ;;  %7603 = vmatprep.subr.msk.bf16.mxu0 %vm2449_vm1, %v7950_v49  ;;  %v5484_v51 = vsel %vm2449_vm1, %v7950_v49, 0  ;;  %v5019_v54 = vsel %vm8623_vm5, %v7227_v3, %v5018_v19  ;;  %v3832_v34 = vld [vmem:[#allocation2 + $0xa8] sm:$0xe]  ;;  %v4478_v3 = vrot.slane %v4476_v14, 4 }
 0x57c   : > { %4672 = vst.msk [vmem:[#allocation5 + $0x4] sm:$0xff] %vm8795_vm15, %v4640_v18  ;;  %v3925_v25 = vpop.permute.xlu1 %3924  ;;  %7577 = vmatpush3.bf16.msra.mxu0 %v5484_v51  ;;  %v10022_v18 = vld [vmem:[#allocation2 + $0x88] sm:$0xf]  ;;  %v4261_v62 = vrot.slane %v4259_v20, 5  ;;  %v7217_v5 = vrot.slane %v3832_v34, 9  ;;  %v10061_v20 = vrot.slane %v3712_v47, 5 }
 0x57d   : > { %v3923_v40 = vpop.permute.xlu0 %3922  ;;  %v3953_v27 = vrot.slane %v3925_v25, 4  ;;  %7578 = vmatprep.subr.bf16.mxu0 %v7951_v50  ;;  %v5025_v30 = vrot.slane %v10022_v18, 5  ;;  %v3552_v51 = vld [vmem:[#allocation2 + $0xa8] sm:$0xf] }
 0x57e   : > { %3492 = vrot.lane.b32.xlu1 %v3449_v1, %s8314_s24  ;;  %v3952_v56 = vrot.slane %v3923_v40, 4  ;;  %v4256_v1 = vshrl.u32 %v4126_v60, 16  ;;  %v3909_v60 = vrot.slane %v3834_v37, 5  ;;  %v3450_v34 = vld [vmem:[#allocation2 + $0xa8] sm:$0xf] }
 0x57f   : > { %3490 = vrot.lane.b32.xlu0 %v3448_v53, %s8314_s24  ;;  %v3969_v2 = vsel %vm926_vm13, %v3953_v27, %v3925_v25  ;;  %v4026_v53 = vld [vmem:[#allocation2 + $0xac] sm:$0xf]  ;;  %v4271_v25 = vrot.slane %v4269_v39, 4  ;;  %v3703_v39 = vshrl.u32 %v3552_v51, 16 }
 0x580   : > { %v3477_v46 = vpop.permute.xlu1 %3476  ;;  %v3968_v28 = vsel %vm926_vm13, %v3952_v56, %v3923_v40  ;;  %7579 = vmatpush3.bf16.msra.mxu0 %v7951_v50  ;;  %v4258_v32 = vrot.slane %v4256_v1, 4  ;;  %v7228_v56 = vrot.slane %v4971_v15, 9 }
 0x581   : > { %3521 = vst.msk [vmem:[#allocation5 + $0x24] sm:$0xf] %vm470_vm10, %v3477_v46  ;;  %v3475_v55 = vpop.permute.xlu0 %3474  ;;  %7580 = vmatprep.subr.bf16.mxu0 %v7952_v23  ;;  %v5027_v46 = vrot.slane %v5025_v30, 4  ;;  %v4272_v44 = vor.u32 %v4271_v25, %v10027_v43 }
 0x582   : > { %3520 = vst.msk [vmem:[#allocation5 + $0x18] sm:$0xf] %vm470_vm10, %v3475_v55  ;;  %3772 = vrot.lane.b32.xlu1 %v3701_v45, %s8316_s27  ;;  %v4570_v55 = vld [vmem:[#allocation2 + $0xb4] sm:$0xf]  ;;  %v5026_v50 = vsel %vm8623_vm5, %v7228_v56, %v5025_v30 }
 0x583   : > { %v7937_v58 = vld [vmem:[#allocation5 + $0x4] ss:$12 sps:$4 sm:$0xff]   ;;  %3770 = vrot.lane.b32.xlu0 %v3691_v9, %s8316_s27  ;;  %v5028_v9 = vrot.slane %v4973_v16, 5 }
 0x584   : > { %v3757_v22 = vpop.permute.xlu1 %3756  ;;  %5518 = vmatprep.mubr.bf16.mxu1 %v7937_v58  ;;  %7581 = vmatpush3.bf16.msra.mxu0 %v7952_v23  ;;  %v10036_v58 = vld [vmem:[#allocation2 + $0xac] sm:$0xf]  ;;  %v4695_v23 = vld [vmem:[#allocation2 + $0x94] sm:$0xf] }
 0x585   : > { %3801 = vst.msk [vmem:[#allocation5 + $0x24] sm:$0xf] %vm754_vm14, %v3757_v22  ;;  %v3755_v35 = vpop.permute.xlu0 %3754  ;;  %5519 = vmatmul.mubr.bf16.vlgmr.msra.gmra.mxu1 %v7935_v57  ;;  %7582 = vmatprep.subr.bf16.mxu0 %v7954_v24  ;;  %v4262_v57 = vor.u32 %v4261_v62, %v4258_v32  ;;  %v4277_v22 = vrot.slane %v4275_v42, 5  ;;  %v5029_v38 = vsel %vm8623_vm5, %v5027_v46, %v5028_v9  ;;  %v3906_v49 = vrot.slane %v10036_v58, 5  ;;  %v3554_v62 = vld [vmem:[#allocation2 + $0xb0] sm:$0x1] }
 0x586   : > { %4001 = vst.msk [vmem:[#allocation5 + $0x24] sm:$0xff] %vm8795_vm15, %v3969_v2  ;;  %4906 = vrot.lane.b32.xlu1 %v4735_v13, %s8317_s5  ;;  %v4273_v2 = vrot.slane %v4272_v44, 4  ;;  %v4770_v25 = vshll.u32 %v4695_v23, 16  ;;  %v4774_v15 = vshrl.u32 %v4695_v23, 16  ;;  %v4698_v46 = vld [vmem:[#allocation2 + $0xa0] sm:$0xf] }
 0x587   : > { %3800 = vst.msk [vmem:[#allocation5 + $0x18] sm:$0xf] %vm754_vm14, %v3755_v35  ;;  %4904 = vrot.lane.b32.xlu0 %v4725_v41, %s8317_s5  ;;  %v4408_v41 = vld [vmem:[#allocation2 + $0xb0] sm:$0x1]  ;;  %v4406_v35 = vld [vmem:[#allocation2 + $0xa8] sm:$0xe] }
 0x588   : > { %4000 = vst.msk [vmem:[#allocation5 + $0x18] sm:$0xff] %vm8795_vm15, %v3968_v28  ;;  %v4054_v52 = vpop.permute.xlu1 %4053  ;;  %7583 = vmatpush3.bf16.msra.mxu0 %v7954_v24  ;;  %v4479_v10 = vrot.slane %v4408_v41, 5  ;;  %v3908_v1 = vrot.slane %v3906_v49, 4  ;;  %v3722_v58 = vshll.u32 %v3554_v62, 16  ;;  %v4798_v41 = vshrl.u32 %v4698_v46, 16 }
 0x589   : > { %4098 = vst.msk [vmem:[#allocation5 + $0x28] sm:$0xf] %vm1059_vm0, %v4054_v52  ;;  %v4052_v11 = vpop.permute.xlu0 %4051  ;;  %7584 = vmatprep.subr.bf16.mxu0 %v7955_v7 }
 0x58a   : > { %4097 = vst.msk [vmem:[#allocation5 + $0x1c] sm:$0xf] %vm1059_vm0, %v4052_v11  ;;  %4910 = vrot.lane.b32.xlu1 %v4759_v63, %s8317_s5  ;;  %v4263_v63 = vrot.slane %v4262_v57, 4  ;;  %v7224_v11 = vrot.slane %v4406_v35, 9  ;;  %v4480_v32 = vsel %vm8623_vm5, %v4478_v3, %v4479_v10  ;;  %v3910_v48 = vsel %vm8623_vm5, %v3908_v1, %v3909_v60  ;;  %v4699_v60 = vld [vmem:[#allocation2 + $0xa4] sm:$0x1] }
 0x58b   : > { %4908 = vrot.lane.b32.xlu0 %v4749_v61, %s8317_s5  ;;  %v3716_v61 = vshrl.u32 %v3553_v26, 16  ;;  %v4696_v26 = vld [vmem:[#allocation2 + $0x98] sm:$0x1]  ;;  %v4804_v1 = vshll.u32 %v4699_v60, 16 }
 0x58c   : > { %v4599_v31 = vpop.permute.xlu1 %4598  ;;  %7585 = vmatpush3.bf16.msra.mxu0 %v7955_v7  ;;  %v4268_v18 = vsel %vm8634_vm8, %v4263_v63, %v10027_v43  ;;  %v4477_v42 = vsel %vm8623_vm5, %v7224_v11, %v4476_v14  ;;  %v4780_v63 = vshll.u32 %v4696_v26, 16 }
 0x58d   : > { %v4597_v21 = vpop.permute.xlu0 %4596  ;;  %v4627_v40 = vrot.slane %v4599_v31, 4  ;;  %v3718_v12 = vrot.slane %v3716_v61, 4  ;;  %v4800_v61 = vrot.slane %v4798_v41, 4  ;;  %v4978_v41 = vld [vmem:[#allocation2 + $0xa0] sm:$0xf] }
 0x58e   : > { %5074 = vrot.lane.b32.xlu1 %v5022_v8, %s8314_s24  ;;  %v4626_v45 = vrot.slane %v4597_v21, 4  ;;  %v4278_v8 = vsel %vm8634_vm8, %v4273_v2, %v4277_v22  ;;  %v4794_v22 = vshll.u32 %v4698_v46, 16  ;;  %v4130_v46 = vld [vmem:[#allocation2 + $0xb8] sm:$0xf] }
 0x58f   : > { %5072 = vrot.lane.b32.xlu0 %v5019_v54, %s8314_s24  ;;  %v4643_v13 = vsel %vm926_vm13, %v4627_v40, %v4599_v31  ;;  %v3706_v31 = vshll.u32 %v3552_v51, 16  ;;  %v7940_v16 = vld [vmem:[#allocation5 + $0x18] ss:$12 sps:$4 sm:$0xff]   ;;  %v3705_v40 = vrot.slane %v3703_v39, 4  ;;  %v3719_v57 = vor.u32 %v3718_v12, %v10061_v20  ;;  %v4975_v12 = vld [vmem:[#allocation2 + $0x94] sm:$0xf] }
 0x590   : > { %v4334_v59 = vpop.permute.xlu1 %4333  ;;  %v4642_v19 = vsel %vm926_vm13, %v4626_v45, %v4597_v21  ;;  %v4694_v21 = vld [vmem:[#allocation2 + $0x90] sm:$0xf]  ;;  %v4782_v39 = vrot.slane %v4780_v63, 5 }
 0x591   : > { %4378 = vst.msk [vmem:[#allocation5 + $0x28] sm:$0xf] %vm470_vm10, %v4334_v59  ;;  %v4332_v0 = vpop.permute.xlu0 %4331  ;;  %v3417_v59 = vld [vmem:[%s8529_s12 + $0x70] sm:$0xf]  ;;  %v4761_v7 = vshrl.u32 %v4694_v21, 16  ;;  %v3720_v47 = vrot.slane %v3719_v57, 4 }
 0x592   : > { %4377 = vst.msk [vmem:[#allocation5 + $0x1c] sm:$0xf] %vm470_vm10, %v4332_v0  ;;  %4069 = vrot.lane.b32.xlu1 %v4026_v53, %s8317_s5  ;;  %v3418_v53 = vld [vmem:[%s8529_s12 + $0x74] sm:$0xf]  ;;  %v3708_v0 = vrot.slane %v3706_v31, 5 }
 0x593   : > { %4067 = vrot.lane.b32.xlu0 %v4025_v29, %s8317_s5  ;;  %3434 = vst.msk [vmem:[#allocation5 + $0x9c] sm:$0xf] %vm373_vm9, %v3418_v53  ;;  %3433 = vst.msk [vmem:[#allocation5 + $0x90] sm:$0xf] %vm373_vm9, %v3417_v59 }
 0x594   : > { %v4502_v27 = vpop.permute.xlu1 %4501 }
 0x595   : > { %4546 = vst.msk [vmem:[#allocation5 + $0x28] sm:$0xf] %vm754_vm14, %v4502_v27  ;;  %v4500_v36 = vpop.permute.xlu0 %4499  ;;  %v3907_v27 = vsel %vm8623_vm5, %v7217_v5, %v3906_v49 }
 0x596   : > { %4675 = vst.msk [vmem:[#allocation5 + $0x28] sm:$0xff] %vm8795_vm15, %v4643_v13  ;;  %4614 = vrot.lane.b32.xlu1 %v4571_v4, %s8315_s28  ;;  %v4764_v4 = vshll.u32 %v4694_v21, 16  ;;  %v10087_v13 = vrot.slane %v4770_v25, 5 }
 0x597   : > { %4545 = vst.msk [vmem:[#allocation5 + $0x1c] sm:$0xf] %vm754_vm14, %v4500_v36  ;;  %4612 = vrot.lane.b32.xlu0 %v4570_v55, %s8315_s28  ;;  %v4697_v55 = vld [vmem:[#allocation2 + $0x9c] sm:$0xf]  ;;  %v3709_v36 = vor.u32 %v3708_v0, %v3705_v40 }
 0x598   : > { %4674 = vst.msk [vmem:[#allocation5 + $0x1c] sm:$0xff] %vm8795_vm15, %v4642_v19  ;;  %v3929_v28 = vpop.permute.xlu1 %3928  ;;  %v4776_v19 = vrot.slane %v4774_v15, 4  ;;  %v4766_v2 = vrot.slane %v4764_v4, 5  ;;  %v4785_v35 = vshrl.u32 %v4697_v55, 16  ;;  %v4788_v37 = vshll.u32 %v4697_v55, 16 }
 0x599   : > { %v3927_v52 = vpop.permute.xlu0 %3926  ;;  %v3955_v24 = vrot.slane %v3929_v28, 4  ;;  %v3710_v10 = vrot.slane %v3709_v36, 4  ;;  %v4976_v15 = vld [vmem:[#allocation2 + $0x98] sm:$0x1]  ;;  %v4129_v36 = vld [vmem:[#allocation2 + $0xb4] sm:$0xf] }
 0x59a   : > { %5078 = vrot.lane.b32.xlu1 %v5029_v38, %s8314_s24  ;;  %v3954_v29 = vrot.slane %v3927_v52, 4  ;;  %v4763_v38 = vrot.slane %v4761_v7, 4  ;;  %v4777_v51 = vor.u32 %v4776_v19, %v10087_v13  ;;  %v4787_v23 = vrot.slane %v4785_v35, 4  ;;  %v4974_v7 = vld [vmem:[#allocation2 + $0x90] sm:$0xe] }
 0x59b   : > { %5076 = vrot.lane.b32.xlu0 %v5026_v50, %s8314_s24  ;;  %v3971_v9 = vsel %vm926_vm13, %v3955_v24, %v3929_v28  ;;  %v3451_v28 = vld [vmem:[#allocation2 + $0xac] sm:$0xf]  ;;  %v3724_v50 = vrot.slane %v3722_v58, 5  ;;  %v3715_v53 = vsel %vm8634_vm8, %v3710_v10, %v10061_v20  ;;  %v5032_v20 = vrot.slane %v4975_v12, 5 }
 0x59c   : > { %v3481_v54 = vpop.permute.xlu1 %3480  ;;  %v3970_v56 = vsel %vm926_vm13, %v3954_v29, %v3927_v52  ;;  %v4796_v52 = vrot.slane %v4794_v22, 5  ;;  %v4767_v11 = vor.u32 %v4766_v2, %v4763_v38  ;;  %v4289_v58 = vshll.u32 %v4130_v46, 16 }
 0x59d   : > { %3523 = vst.msk [vmem:[#allocation5 + $0x3c] sm:$0xf] %vm470_vm10, %v3481_v54  ;;  %v3479_v30 = vpop.permute.xlu0 %3478  ;;  %v3725_v31 = vsel %vm8634_vm8, %v3720_v47, %v3724_v50  ;;  %v4778_v54 = vrot.slane %v4777_v51, 4  ;;  %v4283_v38 = vshll.u32 %v4129_v36, 16  ;;  %v5039_v47 = vrot.slane %v4978_v41, 5 }
 0x59e   : > { %3522 = vst.msk [vmem:[#allocation5 + $0x30] sm:$0xf] %vm470_vm10, %v3479_v30  ;;  %4349 = vrot.lane.b32.xlu1 %v4278_v8, %s8314_s24  ;;  %v4790_v8 = vrot.slane %v4788_v37, 5  ;;  %v4768_v24 = vrot.slane %v4767_v11, 4  ;;  %v10134_v37 = vrot.slane %v4289_v58, 5 }
 0x59f   : > { %v7938_v43 = vld [vmem:[#allocation5 + $0x1c] ss:$12 sps:$4 sm:$0xff]   ;;  %4347 = vrot.lane.b32.xlu0 %v4268_v18, %s8314_s24  ;;  %v4801_v18 = vor.u32 %v4800_v61, %v4796_v52  ;;  %v4131_v51 = vld [vmem:[#allocation2 + $0xbc] sm:$0x1]  ;;  %v4285_v11 = vrot.slane %v4283_v38, 5 }
 0x5a0   : > { %v3761_v45 = vpop.permute.xlu1 %3760  ;;  %5526 = vmatprep.mubr.bf16.mxu1 %v7938_v43  ;;  %v4791_v30 = vor.u32 %v4790_v8, %v4787_v23  ;;  %v4783_v43 = vsel %vm8634_vm8, %v4778_v54, %v4782_v39  ;;  %v4773_v40 = vsel %vm8634_vm8, %v4768_v24, %v10087_v13  ;;  %v4293_v13 = vshrl.u32 %v4130_v46, 16  ;;  %v4027_v61 = vld [vmem:[#allocation2 + $0xb4] sm:$0xf]  ;;  %v4977_v8 = vld [vmem:[#allocation2 + $0x9c] sm:$0xe] }
 0x5a1   : > { %3803 = vst.msk [vmem:[#allocation5 + $0x3c] sm:$0xf] %vm754_vm14, %v3761_v45  ;;  %v3759_v44 = vpop.permute.xlu0 %3758  ;;  %5527 = vmatmul.mubr.bf16.gmra.mxu1 %v7940_v16  ;;  %v4802_v16 = vrot.slane %v4801_v18, 4  ;;  %v4573_v54 = vld [vmem:[#allocation2 + $0xc4] sm:$0xf]  ;;  %v5041_v18 = vrot.slane %v5039_v47, 4 }
 0x5a2   : > { %4003 = vst.msk [vmem:[#allocation5 + $0x3c] sm:$0xff] %vm8795_vm15, %v3971_v9  ;;  %4517 = vrot.lane.b32.xlu1 %v4480_v32, %s8316_s27  ;;  %v4806_v32 = vrot.slane %v4804_v1, 5  ;;  %v4792_v0 = vrot.slane %v4791_v30, 4  ;;  %v4572_v24 = vld [vmem:[#allocation2 + $0xc0] sm:$0xf]  ;;  %v7230_v30 = vrot.slane %v4977_v8, 9 }
 0x5a3   : > { %3802 = vst.msk [vmem:[#allocation5 + $0x30] sm:$0xf] %vm754_vm14, %v3759_v44  ;;  %4515 = vrot.lane.b32.xlu0 %v4477_v42, %s8316_s27  ;;  %v5034_v44 = vrot.slane %v5032_v20, 4  ;;  %v3837_v46 = vld [vmem:[#allocation2 + $0xbc] sm:$0x1] }
 0x5a4   : > { %4002 = vst.msk [vmem:[#allocation5 + $0x30] sm:$0xff] %vm8795_vm15, %v3970_v56  ;;  %v4058_v14 = vpop.permute.xlu1 %4057  ;;  %v4807_v9 = vsel %vm8634_vm8, %v4802_v16, %v4806_v32  ;;  %v4797_v55 = vsel %vm8634_vm8, %v4792_v0, %v4796_v52  ;;  %v7229_v56 = vrot.slane %v4974_v7, 9  ;;  %v3916_v41 = vrot.slane %v3837_v46, 5  ;;  %v4704_v8 = vld [vmem:[#allocation2 + $0xb8] sm:$0xf] }
 0x5a5   : > { %4100 = vst.msk [vmem:[#allocation5 + $0x40] sm:$0xf] %vm1059_vm0, %v4058_v14  ;;  %v4056_v49 = vpop.permute.xlu0 %4055  ;;  %v4280_v14 = vshrl.u32 %v4129_v36, 16 }
 0x5a6   : > { %4099 = vst.msk [vmem:[#allocation5 + $0x34] sm:$0xf] %vm1059_vm0, %v4056_v49  ;;  %3944 = vrot.lane.b32.xlu1 %v3910_v48, %s8315_s28  ;;  %v5035_v48 = vrot.slane %v4976_v15, 5  ;;  %v5033_v22 = vsel %vm8623_vm5, %v7229_v56, %v5032_v20  ;;  %v4295_v49 = vrot.slane %v4293_v13, 4  ;;  %v4411_v20 = vld [vmem:[#allocation2 + $0xbc] sm:$0x1] }
 0x5a7   : > { %3942 = vrot.lane.b32.xlu0 %v3907_v27, %s8315_s28  ;;  %v4282_v10 = vrot.slane %v4280_v14, 4  ;;  %v4701_v13 = vld [vmem:[#allocation2 + $0xac] sm:$0xf]  ;;  %v3420_v14 = vld [vmem:[%s8529_s12 + $0x7c] sm:$0xf] }
 0x5a8   : > { %v4603_v3 = vpop.permute.xlu1 %4602  ;;  %v5036_v26 = vsel %vm8623_vm5, %v5034_v44, %v5035_v48  ;;  %v4296_v39 = vor.u32 %v4295_v49, %v10134_v37  ;;  %v4486_v48 = vrot.slane %v4411_v20, 5  ;;  %v4700_v49 = vld [vmem:[#allocation2 + $0xa8] sm:$0xf]  ;;  %3436 = vst.msk [vmem:[#allocation5 + $0xb4] sm:$0xf] %vm373_vm9, %v3420_v14 }
 0x5a9   : > { %v4601_v5 = vpop.permute.xlu0 %4600  ;;  %v4629_v25 = vrot.slane %v4603_v3, 4  ;;  %v4286_v12 = vor.u32 %v4285_v11, %v4282_v10 }
 0x5aa   : > { %3496 = vrot.lane.b32.xlu1 %v3451_v28, %s8314_s24  ;;  %v4628_v29 = vrot.slane %v4601_v5, 4 }
 0x5ab   : > { %3494 = vrot.lane.b32.xlu0 %v3450_v34, %s8314_s24  ;;  %v4645_v45 = vsel %vm926_vm13, %v4629_v25, %v4603_v3  ;;  %v7943_v63 = vld [vmem:[#allocation5 + $0x30] ss:$12 sps:$4 sm:$0xff]   ;;  %v4028_v34 = vld [vmem:[#allocation2 + $0xb8] sm:$0xf]  ;;  %v4979_v3 = vld [vmem:[#allocation2 + $0xa4] sm:$0x1] }
 0x5ac   : > { %v4338_v21 = vpop.permute.xlu1 %4337  ;;  %v4644_v4 = vsel %vm926_vm13, %v4628_v29, %v4601_v5  ;;  %v5042_v1 = vrot.slane %v4979_v3, 5  ;;  %v4297_v29 = vrot.slane %v4296_v39, 4  ;;  %v4287_v0 = vrot.slane %v4286_v12, 4 }
 0x5ad   : > { %4380 = vst.msk [vmem:[#allocation5 + $0x40] sm:$0xf] %vm470_vm10, %v4338_v21  ;;  %v4336_v59 = vpop.permute.xlu0 %4335  ;;  %v10150_v21 = vld [vmem:[#allocation2 + $0xb8] sm:$0xf] }
 0x5ae   : > { %4379 = vst.msk [vmem:[#allocation5 + $0x34] sm:$0xf] %vm470_vm10, %v4336_v59  ;;  %3776 = vrot.lane.b32.xlu1 %v3725_v31, %s8316_s27  ;;  %v4299_v31 = vshll.u32 %v4131_v51, 16  ;;  %v10153_v59 = vld [vmem:[#allocation2 + $0xb8] sm:$0xf]  ;;  %v4483_v16 = vrot.slane %v10150_v21, 5  ;;  %v5043_v32 = vsel %vm8623_vm5, %v5041_v18, %v5042_v1 }
 0x5af   : > { %3774 = vrot.lane.b32.xlu0 %v3715_v53, %s8316_s27  ;;  %v3913_v15 = vrot.slane %v10153_v59, 5  ;;  %v4703_v18 = vld [vmem:[#allocation2 + $0xb4] sm:$0xf]  ;;  %v4842_v59 = vshll.u32 %v4704_v8, 16 }
 0x5b0   : > { %v4506_v62 = vpop.permute.xlu1 %4505  ;;  %v4485_v44 = vrot.slane %v4483_v16, 4  ;;  %v4833_v20 = vshrl.u32 %v4703_v18, 16 }
 0x5b1   : > { %4548 = vst.msk [vmem:[#allocation5 + $0x40] sm:$0xf] %vm754_vm14, %v4506_v62  ;;  %v4504_v42 = vpop.permute.xlu0 %4503  ;;  %v10205_v46 = vrot.slane %v4842_v59, 5 }
 0x5b2   : > { %4677 = vst.msk [vmem:[#allocation5 + $0x40] sm:$0xff] %vm8795_vm15, %v4645_v45  ;;  %4914 = vrot.lane.b32.xlu1 %v4783_v43, %s8317_s5  ;;  %v4301_v43 = vrot.slane %v4299_v31, 5  ;;  %v3556_v45 = vld [vmem:[#allocation2 + $0xb8] sm:$0xf] }
 0x5b3   : > { %4547 = vst.msk [vmem:[#allocation5 + $0x34] sm:$0xf] %vm754_vm14, %v4504_v42  ;;  %4912 = vrot.lane.b32.xlu0 %v4773_v40, %s8317_s5  ;;  %v5040_v40 = vsel %vm8623_vm5, %v7230_v30, %v5039_v47  ;;  %v3555_v42 = vld [vmem:[#allocation2 + $0xb4] sm:$0xf]  ;;  %v3740_v56 = vshrl.u32 %v3556_v45, 16 }
 0x5b4   : > { %4676 = vst.msk [vmem:[#allocation5 + $0x34] sm:$0xff] %vm8795_vm15, %v4644_v4  ;;  %v3933_v27 = vpop.permute.xlu1 %3932  ;;  %v4409_v4 = vld [vmem:[#allocation2 + $0xb4] sm:$0xe]  ;;  %v3730_v58 = vshll.u32 %v3555_v42, 16  ;;  %v3557_v47 = vld [vmem:[#allocation2 + $0xbc] sm:$0x1] }
 0x5b5   : > { %v3931_v57 = vpop.permute.xlu0 %3930  ;;  %v3957_v2 = vrot.slane %v3933_v27, 4  ;;  %v3746_v21 = vshll.u32 %v3557_v47, 16 }
 0x5b6   : > { %4918 = vrot.lane.b32.xlu1 %v4807_v9, %s8317_s5  ;;  %v3956_v28 = vrot.slane %v3931_v57, 4  ;;  %v4302_v9 = vsel %vm8634_vm8, %v4297_v29, %v4301_v43  ;;  %v3732_v3 = vrot.slane %v3730_v58, 5  ;;  %v4846_v29 = vshrl.u32 %v4704_v8, 16 }
 0x5b7   : > { %4916 = vrot.lane.b32.xlu0 %v4797_v55, %s8317_s5  ;;  %v3973_v60 = vsel %vm926_vm13, %v3957_v2, %v3933_v27  ;;  %v3835_v27 = vld [vmem:[#allocation2 + $0xb4] sm:$0xe]  ;;  %v3736_v55 = vshll.u32 %v3556_v45, 16  ;;  %v3748_v45 = vrot.slane %v3746_v21, 5 }
 0x5b8   : > { %v3485_v19 = vpop.permute.xlu1 %3484  ;;  %v3972_v5 = vsel %vm926_vm13, %v3956_v28, %v3931_v57  ;;  %v3727_v57 = vshrl.u32 %v3555_v42, 16  ;;  %v3419_v28 = vld [vmem:[%s8529_s12 + $0x78] sm:$0xf]  ;;  %v3452_v42 = vld [vmem:[#allocation2 + $0xb4] sm:$0xf] }
 0x5b9   : > { %3525 = vst.msk [vmem:[#allocation5 + $0x54] sm:$0xf] %vm470_vm10, %v3485_v19  ;;  %v3483_v35 = vpop.permute.xlu0 %3482  ;;  %v7225_v19 = vrot.slane %v4409_v4, 9  ;;  %v10181_v51 = vrot.slane %v3736_v55, 5  ;;  %v4705_v55 = vld [vmem:[#allocation2 + $0xbc] sm:$0x1] }
 0x5ba   : > { %3524 = vst.msk [vmem:[#allocation5 + $0x48] sm:$0xf] %vm470_vm10, %v3483_v35  ;;  %5082 = vrot.lane.b32.xlu1 %v5036_v26, %s8314_s24  ;;  %v4292_v26 = vsel %vm8634_vm8, %v4287_v0, %v10134_v37  ;;  %v7218_v35 = vrot.slane %v3835_v27, 9  ;;  %v4487_v37 = vsel %vm8623_vm5, %v4485_v44, %v4486_v48 }
 0x5bb   : > { %v7941_v50 = vld [vmem:[#allocation5 + $0x34] ss:$12 sps:$4 sm:$0xff]   ;;  %5080 = vrot.lane.b32.xlu0 %v5033_v22, %s8314_s24  ;;  %v3915_v22 = vrot.slane %v3913_v15, 4  ;;  %3435 = vst.msk [vmem:[#allocation5 + $0xa8] sm:$0xf] %vm373_vm9, %v3419_v28  ;;  %v4484_v11 = vsel %vm8623_vm5, %v7225_v19, %v4483_v16 }
 0x5bc   : > { %v3765_v52 = vpop.permute.xlu1 %3764  ;;  %5534 = vmatprep.mubr.bf16.mxu1 %v7941_v50 }
 0x5bd   : > { %3805 = vst.msk [vmem:[#allocation5 + $0x54] sm:$0xf] %vm754_vm14, %v3765_v52  ;;  %v3763_v23 = vpop.permute.xlu0 %3762  ;;  %5535 = vmatmul.mubr.bf16.gmra.mxu1 %v7943_v63  ;;  %v4818_v63 = vshll.u32 %v4701_v13, 16  ;;  %v3742_v52 = vrot.slane %v3740_v56, 4  ;;  %v3917_v31 = vsel %vm8623_vm5, %v3915_v22, %v3916_v41  ;;  %v4835_v56 = vrot.slane %v4833_v20, 4 }
 0x5be   : > { %4005 = vst.msk [vmem:[#allocation5 + $0x54] sm:$0xff] %vm8795_vm15, %v3973_v60  ;;  %4073 = vrot.lane.b32.xlu1 %v4028_v34, %s8317_s5  ;;  %v4822_v34 = vshrl.u32 %v4701_v13, 16  ;;  %v4809_v60 = vshrl.u32 %v4700_v49, 16 }
 0x5bf   : > { %3804 = vst.msk [vmem:[#allocation5 + $0x48] sm:$0xf] %vm754_vm14, %v3763_v23  ;;  %4071 = vrot.lane.b32.xlu0 %v4027_v61, %s8317_s5  ;;  %v3729_v61 = vrot.slane %v3727_v57, 4  ;;  %v4812_v23 = vshll.u32 %v4700_v49, 16  ;;  %v3743_v12 = vor.u32 %v3742_v52, %v10181_v51 }
 0x5c0   : > { %4004 = vst.msk [vmem:[#allocation5 + $0x48] sm:$0xff] %vm8795_vm15, %v3972_v5  ;;  %v4062_v53 = vpop.permute.xlu1 %4061  ;;  %v4824_v30 = vrot.slane %v4822_v34, 4  ;;  %v4811_v16 = vrot.slane %v4809_v60, 4 }
 0x5c1   : > { %4102 = vst.msk [vmem:[#allocation5 + $0x58] sm:$0xf] %vm1059_vm0, %v4062_v53  ;;  %v4060_v25 = vpop.permute.xlu0 %4059  ;;  %v4702_v53 = vld [vmem:[#allocation2 + $0xb0] sm:$0x1] }
 0x5c2   : > { %4101 = vst.msk [vmem:[#allocation5 + $0x4c] sm:$0xf] %vm1059_vm0, %v4060_v25  ;;  %4618 = vrot.lane.b32.xlu1 %v4573_v54, %s8315_s28  ;;  %v3914_v54 = vsel %vm8623_vm5, %v7218_v35, %v3913_v15  ;;  %v3733_v25 = vor.u32 %v3732_v3, %v3729_v61  ;;  %v4828_v0 = vshll.u32 %v4702_v53, 16  ;;  %v3453_v15 = vld [vmem:[#allocation2 + $0xb8] sm:$0xf] }
 0x5c3   : > { %4616 = vrot.lane.b32.xlu0 %v4572_v24, %s8315_s28  ;;  %v10196_v24 = vrot.slane %v4818_v63, 5 }
 0x5c4   : > { %v4607_v62 = vpop.permute.xlu1 %4606  ;;  %v3734_v48 = vrot.slane %v3733_v25, 4 }
 0x5c5   : > { %v4605_v7 = vpop.permute.xlu0 %4604  ;;  %v4631_v38 = vrot.slane %v4607_v62, 4  ;;  %v4825_v4 = vor.u32 %v4824_v30, %v10196_v24  ;;  %v4132_v30 = vld [vmem:[#allocation2 + $0xc0] sm:$0xf] }
 0x5c6   : > { %5086 = vrot.lane.b32.xlu1 %v5043_v32, %s8314_s24  ;;  %v4630_v50 = vrot.slane %v4605_v7, 4  ;;  %v4814_v32 = vrot.slane %v4812_v23, 5  ;;  %v3739_v49 = vsel %vm8634_vm8, %v3734_v48, %v10181_v51  ;;  %v4982_v23 = vld [vmem:[#allocation2 + $0xb0] sm:$0x1]  ;;  %v4307_v20 = vshll.u32 %v4132_v30, 16 }
 0x5c7   : > { %5084 = vrot.lane.b32.xlu0 %v5040_v40, %s8314_s24  ;;  %v4647_v5 = vsel %vm926_vm13, %v4631_v38, %v4607_v62  ;;  %v4836_v62 = vshll.u32 %v4703_v18, 16  ;;  %v7946_v22 = vld [vmem:[#allocation5 + $0x48] ss:$12 sps:$4 sm:$0xff]   ;;  %v4826_v14 = vrot.slane %v4825_v4, 4  ;;  %v4133_v18 = vld [vmem:[#allocation2 + $0xc4] sm:$0xf] }
 0x5c8   : > { %v4342_v36 = vpop.permute.xlu1 %4341  ;;  %v4646_v1 = vsel %vm926_vm13, %v4630_v50, %v4605_v7  ;;  %v3744_v7 = vrot.slane %v3743_v12, 4  ;;  %v4815_v27 = vor.u32 %v4814_v32, %v4811_v16  ;;  %v4984_v12 = vld [vmem:[#allocation2 + $0xb8] sm:$0xf]  ;;  %v4313_v25 = vshll.u32 %v4133_v18, 16 }
 0x5c9   : > { %4382 = vst.msk [vmem:[#allocation5 + $0x58] sm:$0xf] %vm470_vm10, %v4342_v36  ;;  %v4340_v2 = vpop.permute.xlu0 %4339  ;;  %v4838_v57 = vrot.slane %v4836_v62, 5  ;;  %v4830_v36 = vrot.slane %v4828_v0, 5  ;;  %v4317_v59 = vshrl.u32 %v4133_v18, 16  ;;  %v4304_v32 = vshrl.u32 %v4132_v30, 16 }
 0x5ca   : > { %4381 = vst.msk [vmem:[#allocation5 + $0x4c] sm:$0xf] %vm470_vm10, %v4340_v2  ;;  %4353 = vrot.lane.b32.xlu1 %v4302_v9, %s8314_s24  ;;  %v4848_v9 = vrot.slane %v4846_v29, 4  ;;  %v3749_v41 = vsel %vm8634_vm8, %v3744_v7, %v3748_v45  ;;  %v4852_v2 = vshll.u32 %v4705_v55, 16  ;;  %v4816_v28 = vrot.slane %v4815_v27, 4 }
 0x5cb   : > { %4351 = vrot.lane.b32.xlu0 %v4292_v26, %s8314_s24  ;;  %v4839_v50 = vor.u32 %v4838_v57, %v4835_v56  ;;  %v4831_v51 = vsel %vm8634_vm8, %v4826_v14, %v4830_v36  ;;  %v4985_v0 = vld [vmem:[#allocation2 + $0xbc] sm:$0x1]  ;;  %v10250_v7 = vrot.slane %v4313_v25, 5  ;;  %v4319_v4 = vrot.slane %v4317_v59, 4  ;;  %v4029_v27 = vld [vmem:[#allocation2 + $0xc0] sm:$0xf] }
 0x5cc   : > { %v4510_v10 = vpop.permute.xlu1 %4509  ;;  %v4849_v38 = vor.u32 %v4848_v9, %v10205_v46  ;;  %v4854_v61 = vrot.slane %v4852_v2, 5  ;;  %v4134_v9 = vld [vmem:[#allocation2 + $0xc8] sm:$0x1]  ;;  %v4306_v55 = vrot.slane %v4304_v32, 4  ;;  %v4309_v56 = vrot.slane %v4307_v20, 5 }
 0x5cd   : > { %4550 = vst.msk [vmem:[#allocation5 + $0x58] sm:$0xf] %vm754_vm14, %v4510_v10  ;;  %v4508_v39 = vpop.permute.xlu0 %4507  ;;  %v4840_v60 = vrot.slane %v4839_v50, 4  ;;  %v4707_v57 = vld [vmem:[#allocation2 + $0xc4] sm:$0xf]  ;;  %v4323_v14 = vshll.u32 %v4134_v9, 16 }
 0x5ce   : > { %4679 = vst.msk [vmem:[#allocation5 + $0x58] sm:$0xff] %vm8795_vm15, %v4647_v5  ;;  %4521 = vrot.lane.b32.xlu1 %v4487_v37, %s8316_s27  ;;  %v4981_v37 = vld [vmem:[#allocation2 + $0xac] sm:$0xf]  ;;  %v4850_v52 = vrot.slane %v4849_v38, 4  ;;  %v4980_v5 = vld [vmem:[#allocation2 + $0xa8] sm:$0xe] }
 0x5cf   : > { %4549 = vst.msk [vmem:[#allocation5 + $0x4c] sm:$0xf] %vm754_vm14, %v4508_v39  ;;  %4519 = vrot.lane.b32.xlu0 %v4484_v11, %s8316_s27  ;;  %v5046_v3 = vrot.slane %v4981_v37, 5  ;;  %v4821_v11 = vsel %vm8634_vm8, %v4816_v28, %v10196_v24  ;;  %v4845_v21 = vsel %vm8634_vm8, %v4840_v60, %v10205_v46  ;;  %v7231_v53 = vrot.slane %v4980_v5, 9  ;;  %v4030_v46 = vld [vmem:[#allocation2 + $0xc4] sm:$0xf] }
 0x5d0   : > { %4678 = vst.msk [vmem:[#allocation5 + $0x4c] sm:$0xff] %vm8795_vm15, %v4646_v1  ;;  %v3937_v43 = vpop.permute.xlu1 %3936  ;;  %v4855_v39 = vsel %vm8634_vm8, %v4850_v52, %v4854_v61  ;;  %v10261_v38 = vld [vmem:[#allocation2 + $0xc4] sm:$0xf]  ;;  %v4870_v28 = vshrl.u32 %v4707_v57, 16  ;;  %v4574_v37 = vld [vmem:[#allocation2 + $0xcc] sm:$0xf] }
 0x5d1   : > { %v3935_v40 = vpop.permute.xlu0 %3934  ;;  %v3959_v58 = vrot.slane %v3937_v43, 4  ;;  %v5047_v16 = vsel %vm8623_vm5, %v7231_v53, %v5046_v3  ;;  %v4414_v61 = vld [vmem:[#allocation2 + $0xc8] sm:$0x1] }
 0x5d2   : > { %3948 = vrot.lane.b32.xlu1 %v3917_v31, %s8315_s28  ;;  %v3958_v26 = vrot.slane %v3935_v40, 4  ;;  %v5048_v31 = vrot.slane %v5046_v3, 4  ;;  %v4490_v3 = vrot.slane %v10261_v38, 5  ;;  %v4987_v38 = vld [vmem:[#allocation2 + $0xc4] sm:$0xf] }
 0x5d3   : > { %3946 = vrot.lane.b32.xlu0 %v3914_v54, %s8315_s28  ;;  %v3975_v63 = vsel %vm926_vm13, %v3959_v58, %v3937_v43  ;;  %v5049_v54 = vrot.slane %v4982_v23, 5  ;;  %v4325_v23 = vrot.slane %v4323_v14, 5 }
 0x5d4   : > { %v3489_v44 = vpop.permute.xlu1 %3488  ;;  %v3974_v47 = vsel %vm926_vm13, %v3958_v26, %v3935_v40  ;;  %v5056_v26 = vrot.slane %v4985_v0, 5 }
 0x5d5   : > { %3527 = vst.msk [vmem:[#allocation5 + $0x6c] sm:$0xf] %vm470_vm10, %v3489_v44  ;;  %v3487_v13 = vpop.permute.xlu0 %3486  ;;  %v5050_v29 = vsel %vm8623_vm5, %v5048_v31, %v5049_v54  ;;  %v4706_v44 = vld [vmem:[#allocation2 + $0xc0] sm:$0xf]  ;;  %v4872_v31 = vrot.slane %v4870_v28, 4 }
 0x5d6   : > { %3526 = vst.msk [vmem:[#allocation5 + $0x60] sm:$0xf] %vm470_vm10, %v3487_v13  ;;  %3500 = vrot.lane.b32.xlu1 %v3453_v15, %s8314_s24  ;;  %v5053_v15 = vrot.slane %v4984_v12, 5  ;;  %v4857_v2 = vshrl.u32 %v4706_v44, 16 }
 0x5d7   : > { %v7944_v19 = vld [vmem:[#allocation5 + $0x4c] ss:$12 sps:$4 sm:$0xff]   ;;  %3498 = vrot.lane.b32.xlu0 %v3452_v42, %s8314_s24  ;;  %v4983_v42 = vld [vmem:[#allocation2 + $0xb4] sm:$0xe] }
 0x5d8   : > { %v3769_v35 = vpop.permute.xlu1 %3768  ;;  %5542 = vmatprep.mubr.bf16.mxu1 %v7944_v19  ;;  %v5055_v36 = vrot.slane %v5053_v15, 4  ;;  %v7232_v19 = vrot.slane %v4983_v42, 9  ;;  %v4859_v5 = vrot.slane %v4857_v2, 4 }
 0x5d9   : > { %3807 = vst.msk [vmem:[#allocation5 + $0x6c] sm:$0xf] %vm754_vm14, %v3769_v35  ;;  %v3767_v34 = vpop.permute.xlu0 %3766  ;;  %5543 = vmatmul.mubr.bf16.gmra.mxu1 %v7946_v22  ;;  %v4575_v35 = vld [vmem:[#allocation2 + $0xd0] sm:$0xf] }
 0x5da   : > { %4007 = vst.msk [vmem:[#allocation5 + $0x6c] sm:$0xff] %vm8795_vm15, %v3975_v63  ;;  %3780 = vrot.lane.b32.xlu1 %v3749_v41, %s8316_s27  ;;  %v4320_v41 = vor.u32 %v4319_v4, %v10250_v7  ;;  %v4310_v63 = vor.u32 %v4309_v56, %v4306_v55  ;;  %v5057_v52 = vsel %vm8623_vm5, %v5055_v36, %v5056_v26 }
 0x5db   : > { %3806 = vst.msk [vmem:[#allocation5 + $0x60] sm:$0xf] %vm754_vm14, %v3767_v34  ;;  %3778 = vrot.lane.b32.xlu0 %v3739_v49, %s8316_s27  ;;  %v4866_v49 = vshll.u32 %v4707_v57, 16  ;;  %v4860_v34 = vshll.u32 %v4706_v44, 16 }
 0x5dc   : > { %4006 = vst.msk [vmem:[#allocation5 + $0x60] sm:$0xff] %vm8795_vm15, %v3974_v47  ;;  %v4066_v10 = vpop.permute.xlu1 %4065  ;;  %v4710_v47 = vld [vmem:[#allocation2 + $0xd0] sm:$0xf]  ;;  %v4321_v60 = vrot.slane %v4320_v41, 4 }
 0x5dd   : > { %4104 = vst.msk [vmem:[#allocation5 + $0x70] sm:$0xf] %vm1059_vm0, %v4066_v10  ;;  %v4064_v8 = vpop.permute.xlu0 %4063  ;;  %v4709_v10 = vld [vmem:[#allocation2 + $0xcc] sm:$0xf]  ;;  %v4890_v54 = vshll.u32 %v4710_v47, 16  ;;  %v4894_v18 = vshrl.u32 %v4710_v47, 16 }
 0x5de   : > { %4103 = vst.msk [vmem:[#allocation5 + $0x64] sm:$0xf] %vm1059_vm0, %v4064_v8  ;;  %4922 = vrot.lane.b32.xlu1 %v4831_v51, %s8317_s5  ;;  %v4412_v8 = vld [vmem:[#allocation2 + $0xc0] sm:$0xe]  ;;  %v4862_v53 = vrot.slane %v4860_v34, 5  ;;  %v4881_v30 = vshrl.u32 %v4709_v10, 16  ;;  %v4326_v20 = vsel %vm8634_vm8, %v4321_v60, %v4325_v23 }
 0x5df   : > { %4920 = vrot.lane.b32.xlu0 %v4821_v11, %s8317_s5  ;;  %v5054_v11 = vsel %vm8623_vm5, %v7232_v19, %v5053_v15  ;;  %v4884_v12 = vshll.u32 %v4709_v10, 16  ;;  %v4896_v42 = vrot.slane %v4894_v18, 4  ;;  %v4988_v47 = vld [vmem:[#allocation2 + $0xc8] sm:$0x1] }
 0x5e0   : > { %v4611_v1 = vpop.permute.xlu1 %4610  ;;  %v4863_v9 = vor.u32 %v4862_v53, %v4859_v5  ;;  %v4883_v44 = vrot.slane %v4881_v30, 4 }
 0x5e1   : > { %v4609_v24 = vpop.permute.xlu0 %4608  ;;  %v4633_v62 = vrot.slane %v4611_v1, 4 }
 0x5e2   : > { %4926 = vrot.lane.b32.xlu1 %v4855_v39, %s8317_s5  ;;  %v4632_v45 = vrot.slane %v4609_v24, 4  ;;  %v10273_v39 = vrot.slane %v4866_v49, 5  ;;  %v4864_v41 = vrot.slane %v4863_v9, 4 }
 0x5e3   : > { %4924 = vrot.lane.b32.xlu0 %v4845_v21, %s8317_s5  ;;  %v4649_v58 = vsel %vm926_vm13, %v4633_v62, %v4611_v1  ;;  %v4311_v21 = vrot.slane %v4310_v63, 4 }
 0x5e4   : > { %v4346_v43 = vpop.permute.xlu1 %4345  ;;  %v4648_v22 = vsel %vm926_vm13, %v4632_v45, %v4609_v24  ;;  %v4708_v24 = vld [vmem:[#allocation2 + $0xc8] sm:$0x1]  ;;  %v4873_v0 = vor.u32 %v4872_v31, %v10273_v39  ;;  %v4892_v45 = vrot.slane %v4890_v54, 5  ;;  %v4869_v63 = vsel %vm8634_vm8, %v4864_v41, %v10273_v39  ;;  %v4991_v39 = vld [vmem:[#allocation2 + $0xd4] sm:$0x1] }
 0x5e5   : > { %4384 = vst.msk [vmem:[#allocation5 + $0x70] sm:$0xf] %vm470_vm10, %v4346_v43  ;;  %v4344_v40 = vpop.permute.xlu0 %4343  ;;  %v4493_v43 = vrot.slane %v4414_v61, 5  ;;  %v4876_v15 = vshll.u32 %v4708_v24, 16  ;;  %v4986_v61 = vld [vmem:[#allocation2 + $0xc0] sm:$0xe] }
 0x5e6   : > { %4383 = vst.msk [vmem:[#allocation5 + $0x64] sm:$0xf] %vm470_vm10, %v4344_v40  ;;  %5090 = vrot.lane.b32.xlu1 %v5050_v29, %s8314_s24  ;;  %v4492_v29 = vrot.slane %v4490_v3, 4  ;;  %v7949_v40 = vld [vmem:[#allocation5 + $0x60] ss:$12 sps:$4 sm:$0xff]   ;;  %v4897_v36 = vor.u32 %v4896_v42, %v4892_v45  ;;  %v7233_v5 = vrot.slane %v4986_v61, 9 }
 0x5e7   : > { %5088 = vrot.lane.b32.xlu0 %v5047_v16, %s8314_s24  ;;  %v7226_v16 = vrot.slane %v4412_v8, 9  ;;  %v4989_v54 = vld [vmem:[#allocation2 + $0xcc] sm:$0xe] }
 0x5e8   : > { %v4514_v48 = vpop.permute.xlu1 %4513  ;;  %v4898_v49 = vrot.slane %v4897_v36, 4  ;;  %v7234_v24 = vrot.slane %v4989_v54, 9 }
 0x5e9   : > { %4552 = vst.msk [vmem:[#allocation5 + $0x70] sm:$0xf] %vm754_vm14, %v4514_v48  ;;  %v4512_v13 = vpop.permute.xlu0 %4511  ;;  %v4886_v48 = vrot.slane %v4884_v12, 5 }
 0x5ea   : > { %4681 = vst.msk [vmem:[#allocation5 + $0x70] sm:$0xff] %vm8795_vm15, %v4649_v58  ;;  %4077 = vrot.lane.b32.xlu1 %v4030_v46, %s8317_s5  ;;  %v4316_v46 = vsel %vm8634_vm8, %v4311_v21, %v10250_v7  ;;  %v4494_v7 = vsel %vm8623_vm5, %v4492_v29, %v4493_v43  ;;  %v4874_v58 = vrot.slane %v4873_v0, 4  ;;  %v5070_v21 = vrot.slane %v4991_v39, 5 }
 0x5eb   : > { %4551 = vst.msk [vmem:[#allocation5 + $0x64] sm:$0xf] %vm754_vm14, %v4512_v13  ;;  %4075 = vrot.lane.b32.xlu0 %v4029_v27, %s8317_s5  ;;  %v4711_v27 = vld [vmem:[#allocation2 + $0xd4] sm:$0x1]  ;;  %v4878_v13 = vrot.slane %v4876_v15, 5  ;;  %v4887_v14 = vor.u32 %v4886_v48, %v4883_v44 }
 0x5ec   : > { %4680 = vst.msk [vmem:[#allocation5 + $0x64] sm:$0xff] %vm8795_vm15, %v4648_v22  ;;  %v3941_v50 = vpop.permute.xlu1 %3940  ;;  %v4900_v26 = vshll.u32 %v4711_v27, 16  ;;  %v4491_v22 = vsel %vm8623_vm5, %v7226_v16, %v4490_v3  ;;  %v5793_v16 = vld [vmem:[#allocation4 + $0x88] sm:$0xff] }
 0x5ed   : > { %v3939_v51 = vpop.permute.xlu0 %3938  ;;  %v3961_v25 = vrot.slane %v3941_v50, 4  ;;  %v4888_v34 = vrot.slane %v4887_v14, 4 }
 0x5ee   : > { %4622 = vrot.lane.b32.xlu1 %v4575_v35, %s8315_s28  ;;  %v3960_v32 = vrot.slane %v3939_v51, 4  ;;  %v4879_v35 = vsel %vm8634_vm8, %v4874_v58, %v4878_v13  ;;  %v4902_v28 = vrot.slane %v4900_v26, 5 }
 0x5ef   : > { %4620 = vrot.lane.b32.xlu0 %v4574_v37, %s8315_s28  ;;  %v3977_v55 = vsel %vm926_vm13, %v3961_v25, %v3941_v50  ;;  %v5060_v50 = vrot.slane %v4987_v38, 5  ;;  %v4893_v8 = vsel %vm8634_vm8, %v4888_v34, %v4892_v45 }
 0x5f0   : > { %v3493_v1 = vpop.permute.xlu1 %3492  ;;  %v3976_v57 = vsel %vm926_vm13, %v3960_v32, %v3939_v51  ;;  %v4990_v51 = vld [vmem:[#allocation2 + $0xd0] sm:$0xf]  ;;  %v4903_v3 = vsel %vm8634_vm8, %v4898_v49, %v4902_v28 }
 0x5f1   : > { %3529 = vst.msk [vmem:[#allocation5 + $0x84] sm:$0xf] %vm470_vm10, %v3493_v1  ;;  %v3491_v59 = vpop.permute.xlu0 %3490  ;;  %v5062_v10 = vrot.slane %v5060_v50, 4  ;;  %v5067_v60 = vrot.slane %v4990_v51, 5  ;;  %v5061_v33 = vsel %vm8623_vm5, %v7233_v5, %v5060_v50 }
 0x5f2   : > { %3528 = vst.msk [vmem:[#allocation5 + $0x78] sm:$0xf] %vm470_vm10, %v3491_v59  ;;  %5094 = vrot.lane.b32.xlu1 %v5057_v52, %s8314_s24 }
 0x5f3   : > { %v7947_v62 = vld [vmem:[#allocation5 + $0x64] ss:$12 sps:$4 sm:$0xff]   ;;  %5092 = vrot.lane.b32.xlu0 %v5054_v11, %s8314_s24  ;;  %v5063_v11 = vrot.slane %v4988_v47, 5  ;;  %v5069_v1 = vrot.slane %v5067_v60, 4  ;;  %v5068_v59 = vsel %vm8623_vm5, %v7234_v24, %v5067_v60 }
 0x5f4   : > { %v3773_v4 = vpop.permute.xlu1 %3772  ;;  %5550 = vmatprep.mubr.bf16.mxu1 %v7947_v62 }
 0x5f5   : > { %3809 = vst.msk [vmem:[#allocation5 + $0x84] sm:$0xf] %vm754_vm14, %v3773_v4  ;;  %v3771_v56 = vpop.permute.xlu0 %3770  ;;  %5551 = vmatmul.mubr.bf16.gmra.mxu1 %v7949_v40  ;;  %v5064_v18 = vsel %vm8623_vm5, %v5062_v10, %v5063_v11  ;;  %v5071_v12 = vsel %vm8623_vm5, %v5069_v1, %v5070_v21 }
 0x5f6   : > { %4009 = vst.msk [vmem:[#allocation5 + $0x84] sm:$0xff] %vm8795_vm15, %v3977_v55  ;;  %4357 = vrot.lane.b32.xlu1 %v4326_v20, %s8314_s24  ;;  %v5792_v20 = vld [vmem:[#allocation4 + $0x80] sm:$0xff] }
 0x5f7   : > { %3808 = vst.msk [vmem:[#allocation5 + $0x78] sm:$0xf] %vm754_vm14, %v3771_v56  ;;  %4355 = vrot.lane.b32.xlu0 %v4316_v46, %s8314_s24 }
 0x5f8   : > { %4008 = vst.msk [vmem:[#allocation5 + $0x78] sm:$0xff] %vm8795_vm15, %v3976_v57  ;;  %v4907_v19 = vpop.permute.xlu1 %4906 }
 0x5f9   : > { %4953 = vst.msk [vmem:[#allocation5 + $0x14] sm:$0xf] %vm1059_vm0, %v4907_v19  ;;  %v4905_v2 = vpop.permute.xlu0 %4904 }
 0x5fa   : > { %4952 = vst.msk [vmem:[#allocation5 + $0x8] sm:$0xf] %vm1059_vm0, %v4905_v2  ;;  %4525 = vrot.lane.b32.xlu1 %v4494_v7, %s8316_s27 }
 0x5fb   : > { %4523 = vrot.lane.b32.xlu0 %v4491_v22, %s8316_s27 }
 0x5fc   : > { %v4911_v37 = vpop.permute.xlu1 %4910 }
 0x5fd   : > { %4955 = vst.msk [vmem:[#allocation5 + $0x2c] sm:$0xf] %vm1059_vm0, %v4911_v37  ;;  %v4909_v52 = vpop.permute.xlu0 %4908 }
 0x5fe   : > { %4954 = vst.msk [vmem:[#allocation5 + $0x20] sm:$0xf] %vm1059_vm0, %v4909_v52  ;;  %4930 = vrot.lane.b32.xlu1 %v4879_v35, %s8317_s5 }
 0x5ff   : > { %4928 = vrot.lane.b32.xlu0 %v4869_v63, %s8317_s5  ;;  %v7959_v58 = vld [vmem:[#allocation5 + $0x78] ss:$12 sps:$4 sm:$0xff]  }
 0x600   : > { %v5075_v23 = vpop.permute.xlu1 %5074 }
 0x601   : > { %5121 = vst.msk [vmem:[#allocation5 + $0x14] sm:$0xf] %vm470_vm10, %v5075_v23  ;;  %v5073_v31 = vpop.permute.xlu0 %5072 }
 0x602   : > { %5120 = vst.msk [vmem:[#allocation5 + $0x8] sm:$0xf] %vm470_vm10, %v5073_v31  ;;  %4934 = vrot.lane.b32.xlu1 %v4903_v3, %s8317_s5 }
 0x603   : > { %4932 = vrot.lane.b32.xlu0 %v4893_v8, %s8317_s5 }
 0x604   : > { %v4070_v53 = vpop.permute.xlu1 %4069 }
 0x605   : > { %4106 = vst.msk [vmem:[#allocation5 + $0x88] sm:$0xf] %vm1059_vm0, %v4070_v53  ;;  %v4068_v30 = vpop.permute.xlu0 %4067 }
 0x606   : > { %4105 = vst.msk [vmem:[#allocation5 + $0x7c] sm:$0xf] %vm1059_vm0, %v4068_v30  ;;  %5098 = vrot.lane.b32.xlu1 %v5064_v18, %s8314_s24 }
 0x607   : > { %5096 = vrot.lane.b32.xlu0 %v5061_v33, %s8314_s24 }
 0x608   : > { %v4615_v25 = vpop.permute.xlu1 %4614 }
 0x609   : > { %v4613_v29 = vpop.permute.xlu0 %4612  ;;  %v7953_v43 = vld [vmem:[#allocation5 + $0x8] ss:$12 sps:$4 sm:$0xff]   ;;  %v4635_v40 = vrot.slane %v4615_v25, 4 }
 0x60a   : > { %5102 = vrot.lane.b32.xlu1 %v5071_v12, %s8314_s24  ;;  %7586 = vmatprep.mubr.msk.bf16.mxu0 %vm2424_vm2, %v7953_v43  ;;  %v4634_v15 = vrot.slane %v4613_v29, 4 }
 0x60b   : > { %5100 = vrot.lane.b32.xlu0 %v5068_v59, %s8314_s24  ;;  %v4651_v42 = vsel %vm926_vm13, %v4635_v40, %v4615_v25 }
 0x60c   : > { %v5079_v32 = vpop.permute.xlu1 %5078  ;;  %v4650_v9 = vsel %vm926_vm13, %v4634_v15, %v4613_v29 }
 0x60d   : > { %5123 = vst.msk [vmem:[#allocation5 + $0x2c] sm:$0xf] %vm470_vm10, %v5079_v32  ;;  %v5077_v62 = vpop.permute.xlu0 %5076 }
 0x60e   : > { %5122 = vst.msk [vmem:[#allocation5 + $0x20] sm:$0xf] %vm470_vm10, %v5077_v62  ;;  %5826 = vrot.lane.b32.xlu1 %v5793_v16, %s8318_s6 }
 0x60f   : > { %5824 = vrot.lane.b32.xlu0 %v5792_v20, %s8318_s6 }
 0x610   : > { %v4350_v6 = vpop.permute.xlu1 %4349 }
 0x611   : > { %4386 = vst.msk [vmem:[#allocation5 + $0x88] sm:$0xf] %vm470_vm10, %v4350_v6  ;;  %v4348_v0 = vpop.permute.xlu0 %4347 }
 0x612   : > { %4385 = vst.msk [vmem:[#allocation5 + $0x7c] sm:$0xf] %vm470_vm10, %v4348_v0 }
 0x614   : > { %v4518_v45 = vpop.permute.xlu1 %4517 }
 0x615   : > { %4554 = vst.msk [vmem:[#allocation5 + $0x88] sm:$0xf] %vm754_vm14, %v4518_v45  ;;  %v4516_v4 = vpop.permute.xlu0 %4515  ;;  %v7956_v46 = vld [vmem:[#allocation5 + $0x20] ss:$12 sps:$4 sm:$0xff]  }
 0x616   : > { %4683 = vst.msk [vmem:[#allocation5 + $0x88] sm:$0xff] %vm8795_vm15, %v4651_v42  ;;  %7587 = vmatmul.mubr.msk.bf16.vlgmr.msra.gmra.mxu0 %vm2424_vm2, %v7956_v46 }
 0x617   : > { %4553 = vst.msk [vmem:[#allocation5 + $0x7c] sm:$0xf] %vm754_vm14, %v4516_v4 }
 0x618   : > { %4682 = vst.msk [vmem:[#allocation5 + $0x7c] sm:$0xff] %vm8795_vm15, %v4650_v9  ;;  %v3945_v44 = vpop.permute.xlu1 %3944 }
 0x619   : > { %v3943_v48 = vpop.permute.xlu0 %3942  ;;  %v3963_v55 = vrot.slane %v3945_v44, 4 }
 0x61a   : > { %v3962_v57 = vrot.slane %v3943_v48, 4 }
 0x61b   : > { %v3979_v36 = vsel %vm926_vm13, %v3963_v55, %v3945_v44 }
 0x61c   : > { %v3497_v27 = vpop.permute.xlu1 %3496  ;;  %v3978_v19 = vsel %vm926_vm13, %v3962_v57, %v3943_v48 }
 0x61d   : > { %3531 = vst.msk [vmem:[#allocation5 + $0x9c] sm:$0xf] %vm470_vm10, %v3497_v27  ;;  %v3495_v56 = vpop.permute.xlu0 %3494 }
 0x61e   : > { %3530 = vst.msk [vmem:[#allocation5 + $0x90] sm:$0xf] %vm470_vm10, %v3495_v56 }
 0x61f   : > { %v7957_v7 = vld [vmem:[#allocation5 + $0x7c] ss:$12 sps:$4 sm:$0xff]  }
 0x620   : > { %v3777_v13 = vpop.permute.xlu1 %3776  ;;  %5558 = vmatprep.mubr.bf16.mxu1 %v7957_v7 }
 0x621   : > { %3811 = vst.msk [vmem:[#allocation5 + $0x9c] sm:$0xf] %vm754_vm14, %v3777_v13  ;;  %v3775_v26 = vpop.permute.xlu0 %3774  ;;  %5559 = vmatmul.mubr.bf16.gmra.mxu1 %v7959_v58 }
 0x622   : > { %4011 = vst.msk [vmem:[#allocation5 + $0x9c] sm:$0xff] %vm8795_vm15, %v3979_v36 }
 0x623   : > { %3810 = vst.msk [vmem:[#allocation5 + $0x90] sm:$0xf] %vm754_vm14, %v3775_v26 }
 0x624   : > { %4010 = vst.msk [vmem:[#allocation5 + $0x90] sm:$0xff] %vm8795_vm15, %v3978_v19  ;;  %v4915_v22 = vpop.permute.xlu1 %4914 }
 0x625   : > { %4957 = vst.msk [vmem:[#allocation5 + $0x44] sm:$0xf] %vm1059_vm0, %v4915_v22  ;;  %v4913_v41 = vpop.permute.xlu0 %4912 }
 0x626   : > { %4956 = vst.msk [vmem:[#allocation5 + $0x38] sm:$0xf] %vm1059_vm0, %v4913_v41 }
 0x628   : > { %v4919_v14 = vpop.permute.xlu1 %4918 }
 0x629   : > { %4959 = vst.msk [vmem:[#allocation5 + $0x5c] sm:$0xf] %vm1059_vm0, %v4919_v14  ;;  %v4917_v38 = vpop.permute.xlu0 %4916 }
 0x62a   : > { %4958 = vst.msk [vmem:[#allocation5 + $0x50] sm:$0xf] %vm1059_vm0, %v4917_v38 }
 0x62b   : > { %v7964_v53 = vld [vmem:[#allocation5 + $0x90] ss:$12 sps:$4 sm:$0xff]  }
 0x62c   : > { %v5083_v2 = vpop.permute.xlu1 %5082 }
 0x62d   : > { %5125 = vst.msk [vmem:[#allocation5 + $0x44] sm:$0xf] %vm470_vm10, %v5083_v2  ;;  %v5081_v35 = vpop.permute.xlu0 %5080 }
 0x62e   : > { %5124 = vst.msk [vmem:[#allocation5 + $0x38] sm:$0xf] %vm470_vm10, %v5081_v35 }
 0x630   : > { %v4074_v49 = vpop.permute.xlu1 %4073 }
 0x631   : > { %4108 = vst.msk [vmem:[#allocation5 + $0xa0] sm:$0xf] %vm1059_vm0, %v4074_v49  ;;  %v4072_v28 = vpop.permute.xlu0 %4071 }
 0x632   : > { %4107 = vst.msk [vmem:[#allocation5 + $0x94] sm:$0xf] %vm1059_vm0, %v4072_v28 }
 0x634   : > { %v4619_v50 = vpop.permute.xlu1 %4618 }
 0x635   : > { %v4617_v37 = vpop.permute.xlu0 %4616  ;;  %v7960_v63 = vld [vmem:[#allocation5 + $0x38] ss:$12 sps:$4 sm:$0xff]   ;;  %v4637_v52 = vrot.slane %v4619_v50, 4 }
 0x636   : > { %7590 = vmatprep.mubr.msk.bf16.mxu0 %vm2424_vm2, %v7960_v63  ;;  %v4636_v3 = vrot.slane %v4617_v37, 4 }
 0x637   : > { %v4653_v11 = vsel %vm926_vm13, %v4637_v52, %v4619_v50 }
 0x638   : > { %v5087_v34 = vpop.permute.xlu1 %5086  ;;  %v4652_v8 = vsel %vm926_vm13, %v4636_v3, %v4617_v37 }
 0x639   : > { %5127 = vst.msk [vmem:[#allocation5 + $0x5c] sm:$0xf] %vm470_vm10, %v5087_v34  ;;  %v5085_v47 = vpop.permute.xlu0 %5084 }
 0x63a   : > { %5126 = vst.msk [vmem:[#allocation5 + $0x50] sm:$0xf] %vm470_vm10, %v5085_v47  ;;  %v10424_v47 = vld [vmem:[#allocation9] ss:$0 sm:$0xff] }
 0x63c   : > { %v4354_v51 = vpop.permute.xlu1 %4353 }
 0x63d   : > { %4388 = vst.msk [vmem:[#allocation5 + $0xa0] sm:$0xf] %vm470_vm10, %v4354_v51  ;;  %v4352_v61 = vpop.permute.xlu0 %4351 }
 0x63e   : > { %4387 = vst.msk [vmem:[#allocation5 + $0x94] sm:$0xf] %vm470_vm10, %v4352_v61 }
 0x640   : > { %v4522_v10 = vpop.permute.xlu1 %4521 }
 0x641   : > { %4556 = vst.msk [vmem:[#allocation5 + $0xa0] sm:$0xf] %vm754_vm14, %v4522_v10  ;;  %v4520_v60 = vpop.permute.xlu0 %4519  ;;  %v7961_v23 = vld [vmem:[#allocation5 + $0x50] ss:$12 sps:$4 sm:$0xff]  }
 0x642   : > { %4685 = vst.msk [vmem:[#allocation5 + $0xa0] sm:$0xff] %vm8795_vm15, %v4653_v11  ;;  %7591 = vmatmul.mubr.msk.bf16.gmra.mxu0 %vm2424_vm2, %v7961_v23 }
 0x643   : > { %4555 = vst.msk [vmem:[#allocation5 + $0x94] sm:$0xf] %vm754_vm14, %v4520_v60 }
 0x644   : > { %4684 = vst.msk [vmem:[#allocation5 + $0x94] sm:$0xff] %vm8795_vm15, %v4652_v8  ;;  %v3949_v5 = vpop.permute.xlu1 %3948 }
 0x645   : > { %v3947_v39 = vpop.permute.xlu0 %3946  ;;  %v3965_v54 = vrot.slane %v3949_v5, 4  ;;  %v7489_v2 = vpop.f32.mrf.mxu1 }
 0x646   : > { %v3964_v1 = vrot.slane %v3947_v39, 4 }
 0x647   : > { %v3981_v24 = vsel %vm926_vm13, %v3965_v54, %v3949_v5  ;;  %v7490_v35 = vpop.f32.mrf.mxu1 }
 0x648   : > { %v3501_v31 = vpop.permute.xlu1 %3500  ;;  %v3980_v12 = vsel %vm926_vm13, %v3964_v1, %v3947_v39  ;;  %v7491_v63 = vadd.f32 %v7490_v35, %v7489_v2 }
 0x649   : > { %3533 = vst.msk [vmem:[#allocation5 + $0xb4] sm:$0xf] %vm470_vm10, %v3501_v31  ;;  %v3499_v18 = vpop.permute.xlu0 %3498  ;;  %v7492_v49 = vpop.f32.mrf.mxu1 }
 0x64a   : > { %3532 = vst.msk [vmem:[#allocation5 + $0xa8] sm:$0xf] %vm470_vm10, %v3499_v18  ;;  %v5521_v10 = vadd.f32 %v7491_v63, %v10424_v47 }
 0x64b   : > { %v7962_v21 = vld [vmem:[#allocation5 + $0x94] ss:$12 sps:$4 sm:$0xff]   ;;  %v7493_v28 = vpop.f32.mrf.mxu1 }
 0x64c   : > { %v3781_v33 = vpop.permute.xlu1 %3780  ;;  %5566 = vmatprep.mubr.bf16.mxu1 %v7962_v21  ;;  %v7494_v61 = vadd.f32 %v7493_v28, %v7492_v49 }
 0x64d   : > { %3813 = vst.msk [vmem:[#allocation5 + $0xb4] sm:$0xf] %vm754_vm14, %v3781_v33  ;;  %v3779_v30 = vpop.permute.xlu0 %3778  ;;  %5567 = vmatmul.mubr.bf16.gmra.mxu1 %v7964_v53 }
 0x64e   : > { %4013 = vst.msk [vmem:[#allocation5 + $0xb4] sm:$0xff] %vm8795_vm15, %v3981_v24  ;;  %v5524_v31 = vadd.f32 %v7494_v61, %v10424_v47 }
 0x64f   : > { %3812 = vst.msk [vmem:[#allocation5 + $0xa8] sm:$0xf] %vm754_vm14, %v3779_v30 }
 0x650   : > { %4012 = vst.msk [vmem:[#allocation5 + $0xa8] sm:$0xff] %vm8795_vm15, %v3980_v12  ;;  %v4923_v25 = vpop.permute.xlu1 %4922 }
 0x651   : > { %4961 = vst.msk [vmem:[#allocation5 + $0x74] sm:$0xf] %vm1059_vm0, %v4923_v25  ;;  %v4921_v59 = vpop.permute.xlu0 %4920 }
 0x652   : > { %4960 = vst.msk [vmem:[#allocation5 + $0x68] sm:$0xf] %vm1059_vm0, %v4921_v59 }
 0x654   : > { %v4927_v29 = vpop.permute.xlu1 %4926 }
 0x655   : > { %4963 = vst.msk [vmem:[#allocation5 + $0x8c] sm:$0xf] %vm1059_vm0, %v4927_v29  ;;  %v4925_v43 = vpop.permute.xlu0 %4924 }
 0x656   : > { %4962 = vst.msk [vmem:[#allocation5 + $0x80] sm:$0xf] %vm1059_vm0, %v4925_v43 }
 0x657   : > { %v7969_v26 = vld [vmem:[#allocation5 + $0xa8] ss:$12 sps:$4 sm:$0xff]  }
 0x658   : > { %v5091_v16 = vpop.permute.xlu1 %5090 }
 0x659   : > { %5129 = vst.msk [vmem:[#allocation5 + $0x74] sm:$0xf] %vm470_vm10, %v5091_v16  ;;  %v5089_v32 = vpop.permute.xlu0 %5088 }
 0x65a   : > { %5128 = vst.msk [vmem:[#allocation5 + $0x68] sm:$0xf] %vm470_vm10, %v5089_v32 }
 0x65c   : > { %v4078_v20 = vpop.permute.xlu1 %4077 }
 0x65d   : > { %4110 = vst.msk [vmem:[#allocation5 + $0xb8] sm:$0xf] %vm1059_vm0, %v4078_v20  ;;  %v4076_v62 = vpop.permute.xlu0 %4075 }
 0x65e   : > { %4109 = vst.msk [vmem:[#allocation5 + $0xac] sm:$0xf] %vm1059_vm0, %v4076_v62 }
 0x660   : > { %v4623_v6 = vpop.permute.xlu1 %4622 }
 0x661   : > { %v4621_v40 = vpop.permute.xlu0 %4620  ;;  %v7965_v0 = vld [vmem:[#allocation5 + $0x68] ss:$12 sps:$4 sm:$0xff]   ;;  %v4639_v4 = vrot.slane %v4623_v6, 4  ;;  %v7495_v50 = vpop.f32.mrf.mxu1 }
 0x662   : > { %7594 = vmatprep.mubr.msk.bf16.mxu0 %vm2424_vm2, %v7965_v0  ;;  %v4638_v9 = vrot.slane %v4621_v40, 4 }
 0x663   : > { %v4655_v48 = vsel %vm926_vm13, %v4639_v4, %v4623_v6  ;;  %v7496_v37 = vpop.f32.mrf.mxu1 }
 0x664   : > { %v5095_v15 = vpop.permute.xlu1 %5094  ;;  %v4654_v56 = vsel %vm926_vm13, %v4638_v9, %v4621_v40  ;;  %v7497_v51 = vadd.f32 %v7496_v37, %v7495_v50 }
 0x665   : > { %5131 = vst.msk [vmem:[#allocation5 + $0x8c] sm:$0xf] %vm470_vm10, %v5095_v15  ;;  %v5093_v45 = vpop.permute.xlu0 %5092  ;;  %v7498_v34 = vpop.f32.mrf.mxu1 }
 0x666   : > { %5130 = vst.msk [vmem:[#allocation5 + $0x80] sm:$0xf] %vm470_vm10, %v5093_v45  ;;  %v5529_v60 = vadd.f32 %v7497_v51, %v10424_v47 }
 0x667   : > { %v7499_v3 = vpop.f32.mrf.mxu1 }
 0x668   : > { %v4358_v42 = vpop.permute.xlu1 %4357  ;;  %v7500_v8 = vadd.f32 %v7499_v3, %v7498_v34 }
 0x669   : > { %4390 = vst.msk [vmem:[#allocation5 + $0xb8] sm:$0xf] %vm470_vm10, %v4358_v42  ;;  %v4356_v46 = vpop.permute.xlu0 %4355 }
 0x66a   : > { %4389 = vst.msk [vmem:[#allocation5 + $0xac] sm:$0xf] %vm470_vm10, %v4356_v46  ;;  %v5532_v1 = vadd.f32 %v7500_v8, %v10424_v47 }
 0x66c   : > { %v4526_v44 = vpop.permute.xlu1 %4525 }
 0x66d   : > { %4558 = vst.msk [vmem:[#allocation5 + $0xb8] sm:$0xf] %vm754_vm14, %v4526_v44  ;;  %v4524_v27 = vpop.permute.xlu0 %4523  ;;  %v7966_v55 = vld [vmem:[#allocation5 + $0x80] ss:$12 sps:$4 sm:$0xff]  }
 0x66e   : > { %4687 = vst.msk [vmem:[#allocation5 + $0xb8] sm:$0xff] %vm8795_vm15, %v4655_v48  ;;  %7595 = vmatmul.mubr.msk.bf16.gmra.mxu0 %vm2424_vm2, %v7966_v55 }
 0x66f   : > { %4557 = vst.msk [vmem:[#allocation5 + $0xac] sm:$0xf] %vm754_vm14, %v4524_v27 }
 0x670   : > { %4686 = vst.msk [vmem:[#allocation5 + $0xac] sm:$0xff] %vm8795_vm15, %v4654_v56  ;;  %v4931_v57 = vpop.permute.xlu1 %4930 }
 0x671   : > { %v4929_v7 = vpop.permute.xlu0 %4928  ;;  %4965 = vst.msk [vmem:[#allocation5 + $0xa4] sm:$0xf] %vm1059_vm0, %v4931_v57 }
 0x672   : > { %4964 = vst.msk [vmem:[#allocation5 + $0x98] sm:$0xf] %vm1059_vm0, %v4929_v7 }
 0x674   : > { %v4935_v58 = vpop.permute.xlu1 %4934 }
 0x675   : > { %v4933_v13 = vpop.permute.xlu0 %4932  ;;  %4967 = vst.msk [vmem:[#allocation5 + $0xbc] sm:$0xf] %vm1059_vm0, %v4935_v58 }
 0x676   : > { %4966 = vst.msk [vmem:[#allocation5 + $0xb0] sm:$0xf] %vm1059_vm0, %v4933_v13 }
 0x677   : > { %v7967_v36 = vld [vmem:[#allocation5 + $0xac] ss:$12 sps:$4 sm:$0xff]  }
 0x678   : > { %v5099_v19 = vpop.permute.xlu1 %5098  ;;  %5574 = vmatprep.mubr.bf16.mxu1 %v7967_v36 }
 0x679   : > { %v5097_v17 = vpop.permute.xlu0 %5096  ;;  %5133 = vst.msk [vmem:[#allocation5 + $0xa4] sm:$0xf] %vm470_vm10, %v5099_v19  ;;  %5575 = vmatmul.mubr.bf16.gmra.mxu1 %v7969_v26 }
 0x67a   : > { %5132 = vst.msk [vmem:[#allocation5 + $0x98] sm:$0xf] %vm470_vm10, %v5097_v17 }
 0x67c   : > { %v5103_v22 = vpop.permute.xlu1 %5102 }
 0x67d   : > { %v5101_v41 = vpop.permute.xlu0 %5100  ;;  %5135 = vst.msk [vmem:[#allocation5 + $0xbc] sm:$0xf] %vm470_vm10, %v5103_v22  ;;  %v7501_v33 = vpop.f32.mrf.mxu1 }
 0x67e   : > { %5134 = vst.msk [vmem:[#allocation5 + $0xb0] sm:$0xf] %vm470_vm10, %v5101_v41 }
 0x67f   : > { %v7502_v12 = vpop.f32.mrf.mxu1 }
 0x680   : > { %v7503_v32 = vadd.f32 %v7502_v12, %v7501_v33 }
 0x681   : > { %v7970_v14 = vld [vmem:[#allocation5 + $0x98] ss:$12 sps:$4 sm:$0xff]   ;;  %v7504_v59 = vpop.f32.mrf.mxu1 }
 0x682   : > { %7598 = vmatprep.mubr.msk.bf16.mxu0 %vm2424_vm2, %v7970_v14  ;;  %v5537_v15 = vadd.f32 %v7503_v32, %v10424_v47 }
 0x683   : > { %v7505_v29 = vpop.f32.mrf.mxu1 }
 0x684   : > { %v7506_v40 = vadd.f32 %v7505_v29, %v7504_v59 }
 0x685   : > { %v7971_v38 = vld [vmem:[#allocation5 + $0xb0] ss:$12 sps:$4 sm:$0xff]  }
 0x686   : > { %7599 = vmatmul.mubr.msk.bf16.gmra.mxu0 %vm2424_vm2, %v7971_v38  ;;  %v5540_v48 = vadd.f32 %v7506_v40, %v10424_v47 }
 0x699   : > { %v7507_v43 = vpop.f32.mrf.mxu1 }
 0x69b   : > { %v7508_v16 = vpop.f32.mrf.mxu1 }
 0x69c   : > { %v7509_v62 = vadd.f32 %v7508_v16, %v7507_v43 }
 0x69d   : > { %v7510_v20 = vpop.f32.mrf.mxu1 }
 0x69e   : > { %v5545_v42 = vadd.f32 %v7509_v62, %v10424_v47 }
 0x69f   : > { %v7511_v0 = vpop.f32.mrf.mxu1 }
 0x6a0   : > { %v7512_v46 = vadd.f32 %v7511_v0, %v7510_v20 }
 0x6a2   : > { %v5548_v56 = vadd.f32 %v7512_v46, %v10424_v47 }
 0x6b5   : > { %v7513_v7 = vpop.f32.mrf.mxu1 }
 0x6b7   : > { %v7514_v13 = vpop.f32.mrf.mxu1 }
 0x6b8   : > { %v7515_v2 = vadd.f32 %v7514_v13, %v7513_v7 }
 0x6b9   : > { %v7516_v19 = vpop.f32.mrf.mxu1 }
 0x6ba   : > { %v5553_v63 = vadd.f32 %v7515_v2, %v10424_v47  ;;  %v5797_v2 = vld [vmem:[#allocation4 + $0xa8] sm:$0xff] }
 0x6bb   : > { %v7517_v22 = vpop.f32.mrf.mxu1 }
 0x6bc   : > { %v7518_v37 = vadd.f32 %v7517_v22, %v7516_v19  ;;  %v5794_v22 = vld [vmem:[#allocation4 + $0x90] sm:$0xff] }
 0x6d6   : > { %v7588_v52 = vpop.f32.mrf.mxu0 }
 0x6d7   : > { %v10430_v39 = vadd.f32 %v7588_v52, %v5529_v60  ;;  %v5556_v60 = vadd.f32 %v7518_v37, %v10424_v47  ;;  %v5800_v37 = vld [vmem:[#allocation4 + $0xc0] sm:$0xff] }
 0x6d8   : > { %v5617_v11 = vpop.f32.mrf.mxu0 }
 0x6d9   : > { %v10428_v23 = vadd.f32 %v5617_v11, %v5521_v10 }
 0x6da   : > { %v7589_v5 = vpop.f32.mrf.mxu0 }
 0x6db   : > { %7972 = vtanh.f32 %v10428_v23  ;;  %v10438_v21 = vadd.f32 %v7589_v5, %v5532_v1 }
 0x6dc   : > { %v5620_v54 = vpop.f32.mrf.mxu0  ;;  %7974 = vtanh.f32 %v10430_v39 }
 0x6dd   : > { %v10434_v18 = vadd.f32 %v5620_v54, %v5524_v31 }
 0x6df   : > { %7976 = vtanh.f32 %v10434_v18 }
 0x6e0   : > { %7978 = vtanh.f32 %v10438_v21 }
 0x6e1   : > { %v7519_v41 = vpop.f32.mrf.mxu1 }
 0x6e3   : > { %v7520_v14 = vpop.f32.mrf.mxu1 }
 0x6e4   : > { %v7521_v49 = vadd.f32 %v7520_v14, %v7519_v41  ;;  %v5796_v41 = vld [vmem:[#allocation4 + $0xa0] sm:$0xff] }
 0x6e5   : > { %v7522_v38 = vpop.f32.mrf.mxu1 }
 0x6e6   : > { %v5561_v52 = vadd.f32 %v7521_v49, %v10424_v47 }
 0x6e7   : > { %v7523_v35 = vpop.f32.mrf.mxu1 }
 0x6e8   : > { %v7973_v53 = vpop.eup %7972  ;;  %v7524_v3 = vadd.f32 %v7523_v35, %v7522_v38  ;;  %v5798_v35 = vld [vmem:[#allocation4 + $0xb0] sm:$0xff] }
 0x6e9   : > { %5904 = vrot.lane.b32.xlu0 %v7973_v53, %s8318_s6  ;;  %v7975_v24 = vpop.eup %7974 }
 0x6ea   : > { %v5564_v54 = vadd.f32 %v7524_v3, %v10424_v47 }
 0x6ec   : > { %v7977_v30 = vpop.eup %7976 }
 0x6ed   : > { %5906 = vrot.lane.b32.xlu1 %v7977_v30, %s8318_s6  ;;  %5908 = vrot.lane.b32.xlu0 %v7975_v24, %s8318_s6  ;;  %v7979_v25 = vpop.eup %7978 }
 0x6f1   : > { %5910 = vrot.lane.b32.xlu1 %v7979_v25, %s8318_s6 }
 0x702   : > { %v7592_v6 = vpop.f32.mrf.mxu0 }
 0x703   : > { %v10450_v44 = vadd.f32 %v7592_v6, %v5545_v42 }
 0x704   : > { %v5633_v45 = vpop.f32.mrf.mxu0 }
 0x705   : > { %v10448_v4 = vadd.f32 %v5633_v45, %v5537_v15  ;;  %v7295_v14 = vmul.f32 -1.442695, %v10450_v44 }
 0x706   : > { %v7593_v9 = vpop.f32.mrf.mxu0 }
 0x707   : > { %7980 = vtanh.f32 %v10448_v4  ;;  %v10458_v57 = vadd.f32 %v7593_v9, %v5548_v56 }
 0x708   : > { %v5636_v27 = vpop.f32.mrf.mxu0  ;;  %7982 = vtanh.f32 %v10450_v44 }
 0x709   : > { %v10454_v55 = vadd.f32 %v5636_v27, %v5540_v48  ;;  %v7296_v44 = vmul.f32 -1.442695, %v10458_v57 }
 0x70b   : > { %7984 = vtanh.f32 %v10454_v55  ;;  %v7294_v38 = vmul.f32 -1.442695, %v10454_v55 }
 0x70c   : > { %7986 = vtanh.f32 %v10458_v57  ;;  %v10523_v57 = vpop.permute.xlu0 %5824 }
 0x70d   : > { %v7525_v28 = vpop.f32.mrf.mxu1 }
 0x70f   : > { %v7526_v51 = vpop.f32.mrf.mxu1 }
 0x710   : > { %v7527_v12 = vadd.f32 %v7526_v51, %v7525_v28  ;;  %v5801_v51 = vld [vmem:[#allocation4 + $0xc8] sm:$0xff] }
 0x711   : > { %v7528_v5 = vpop.f32.mrf.mxu1 }
 0x712   : > { %v5569_v62 = vadd.f32 %v7527_v12, %v10424_v47 }
 0x713   : > { %v7529_v53 = vpop.f32.mrf.mxu1 }
 0x714   : > { %v7981_v58 = vpop.eup %7980  ;;  %v7530_v32 = vadd.f32 %v7529_v53, %v7528_v5 }
 0x715   : > { %5912 = vrot.lane.b32.xlu0 %v7981_v58, %s8318_s6  ;;  %v7983_v36 = vpop.eup %7982  ;;  %v7289_v58 = vmul.f32 -1.442695, %v10428_v23 }
 0x716   : > { %v5572_v9 = vadd.f32 %v7530_v32, %v10424_v47 }
 0x718   : > { %v7985_v26 = vpop.eup %7984 }
 0x719   : > { %5914 = vrot.lane.b32.xlu1 %v7985_v26, %s8318_s6  ;;  %5916 = vrot.lane.b32.xlu0 %v7983_v36, %s8318_s6  ;;  %v7987_v17 = vpop.eup %7986  ;;  %v7291_v36 = vmul.f32 -1.442695, %v10430_v39  ;;  %v7290_v26 = vmul.f32 -1.442695, %v10434_v18  ;;  %v7293_v39 = vmul.f32 -1.442695, %v10448_v4 }
 0x71a   : > { %v5795_v18 = vld [vmem:[#allocation4 + $0x98] sm:$0xff] }
 0x71d   : > { %5918 = vrot.lane.b32.xlu1 %v7987_v17, %s8318_s6  ;;  %v7292_v17 = vmul.f32 -1.442695, %v10438_v21 }
 0x72e   : > { %v7596_v50 = vpop.f32.mrf.mxu0 }
 0x72f   : > { %v10470_v11 = vadd.f32 %v7596_v50, %v5561_v52  ;;  %v5799_v50 = vld [vmem:[#allocation4 + $0xb8] sm:$0xff]  ;;  %v5802_v52 = vld [vmem:[#allocation4 + $0xd0] sm:$0xff] }
 0x730   : > { %v5649_v34 = vpop.f32.mrf.mxu0 }
 0x731   : > { %v10468_v61 = vadd.f32 %v5649_v34, %v5553_v63 }
 0x732   : > { %v7597_v10 = vpop.f32.mrf.mxu0 }
 0x733   : > { %7988 = vtanh.f32 %v10468_v61  ;;  %v10478_v1 = vadd.f32 %v7597_v10, %v5564_v54  ;;  %v5803_v10 = vld [vmem:[#allocation4 + $0xd8] sm:$0xff]  ;;  %v10527_v54 = vpop.permute.xlu1 %5826 }
 0x734   : > { %v5652_v8 = vpop.f32.mrf.mxu0  ;;  %7990 = vtanh.f32 %v10470_v11 }
 0x735   : > { %v10474_v31 = vadd.f32 %v5652_v8, %v5556_v60  ;;  %v5804_v60 = vld [vmem:[#allocation4 + $0xe0] sm:$0xff] }
 0x737   : > { %7992 = vtanh.f32 %v10474_v31 }
 0x738   : > { %7994 = vtanh.f32 %v10478_v1 }
 0x739   : > { %v7531_v33 = vpop.f32.mrf.mxu1 }
 0x73b   : > { %v7532_v24 = vpop.f32.mrf.mxu1 }
 0x73c   : > { %v7533_v43 = vadd.f32 %v7532_v24, %v7531_v33  ;;  %v5805_v24 = vld [vmem:[#allocation4 + $0xe8] sm:$0xff] }
 0x73d   : > { %v7534_v25 = vpop.f32.mrf.mxu1 }
 0x73e   : > { %v5577_v0 = vadd.f32 %v7533_v43, %v10424_v47 }
 0x73f   : > { %v7535_v20 = vpop.f32.mrf.mxu1 }
 0x740   : > { %v7989_v30 = vpop.eup %7988  ;;  %v7536_v45 = vadd.f32 %v7535_v20, %v7534_v25 }
 0x741   : > { %5920 = vrot.lane.b32.xlu0 %v7989_v30, %s8318_s6  ;;  %v7991_v59 = vpop.eup %7990  ;;  %v5806_v30 = vld [vmem:[#allocation4 + $0xf0] sm:$0xff] }
 0x742   : > { %v5580_v56 = vadd.f32 %v7536_v45, %v10424_v47 }
 0x744   : > { %v7993_v29 = vpop.eup %7992 }
 0x745   : > { %5922 = vrot.lane.b32.xlu1 %v7993_v29, %s8318_s6  ;;  %5924 = vrot.lane.b32.xlu0 %v7991_v59, %s8318_s6  ;;  %v7995_v40 = vpop.eup %7994 }
 0x746   : > { %v7600_v16 = vpop.f32.mrf.mxu0 }
 0x747   : > { %v10490_v46 = vadd.f32 %v7600_v16, %v5577_v0  ;;  %v5807_v16 = vld [vmem:[#allocation4 + $0xf8] sm:$0xff] }
 0x748   : > { %v5665_v6 = vpop.f32.mrf.mxu0 }
 0x749   : > { %v10487_v15 = vadd.f32 %v5665_v6, %v5569_v62  ;;  %5926 = vrot.lane.b32.xlu1 %v7995_v40, %s8318_s6 }
 0x74a   : > { %v7601_v42 = vpop.f32.mrf.mxu0 }
 0x74b   : > { %7996 = vtanh.f32 %v10487_v15  ;;  %v10498_v7 = vadd.f32 %v7601_v42, %v5580_v56 }
 0x74c   : > { %v5668_v48 = vpop.f32.mrf.mxu0  ;;  %7998 = vtanh.f32 %v10490_v46 }
 0x74d   : > { %v10494_v27 = vadd.f32 %v5668_v48, %v5572_v9 }
 0x74f   : > { %8000 = vtanh.f32 %v10494_v27 }
 0x750   : > { %8002 = vtanh.f32 %v10498_v7 }
 0x751   : > { %8004 = vpow2.f32 %v7289_v58 }
 0x752   : > { %8006 = vpow2.f32 %v7291_v36 }
 0x753   : > { %8008 = vpow2.f32 %v7290_v26 }
 0x754   : > { %8010 = vpow2.f32 %v7292_v17 }
 0x755   : > { %8012 = vpow2.f32 %v7293_v39  ;;  %v7297_v39 = vmul.f32 -1.442695, %v10468_v61 }
 0x756   : > { %8014 = vpow2.f32 %v7295_v14  ;;  %v7299_v14 = vmul.f32 -1.442695, %v10470_v11  ;;  %v7301_v11 = vmul.f32 -1.442695, %v10487_v15 }
 0x757   : > { %8016 = vpow2.f32 %v7294_v38  ;;  %v7298_v38 = vmul.f32 -1.442695, %v10474_v31 }
 0x758   : > { %v7997_v13 = vpop.eup %7996 }
 0x759   : > { %5928 = vrot.lane.b32.xlu0 %v7997_v13, %s8318_s6  ;;  %v7999_v19 = vpop.eup %7998 }
 0x75b   : > { %v5905_v33 = vpop.permute.xlu0 %5904 }
 0x75c   : > { %v8001_v47 = vpop.eup %8000 }
 0x75d   : > { %5930 = vrot.lane.b32.xlu1 %v8001_v47, %s8318_s6  ;;  %5932 = vrot.lane.b32.xlu0 %v7999_v19, %s8318_s6  ;;  %v8003_v23 = vpop.eup %8002 }
 0x75e   : > { %v8005_v21 = vpop.eup %8004 }
 0x75f   : > { %v8007_v49 = vpop.eup %8006  ;;  %v5728_v28 = vadd.f32 1.0, %v8005_v21  ;;  %v5907_v43 = vpop.permute.xlu1 %5906 }
 0x760   : > { %v8009_v4 = vpop.eup %8008  ;;  %v5730_v63 = vadd.f32 1.0, %v8007_v49  ;;  %v5909_v62 = vpop.permute.xlu0 %5908 }
 0x761   : > { %5934 = vrot.lane.b32.xlu1 %v8003_v23, %s8318_s6  ;;  %5828 = vrot.lane.b32.xlu0 %v5794_v22, %s8318_s6  ;;  %8018 = vrcp.f32 %v5728_v28  ;;  %v5729_v34 = vadd.f32 1.0, %v8009_v4  ;;  %v8011_v55 = vpop.eup %8010 }
 0x762   : > { %8020 = vpow2.f32 %v7296_v44  ;;  %v5731_v3 = vadd.f32 1.0, %v8011_v55  ;;  %v8013_v8 = vpop.eup %8012 }
 0x763   : > { %8022 = vrcp.f32 %v5730_v63  ;;  %v8015_v5 = vpop.eup %8014  ;;  %v5732_v53 = vadd.f32 1.0, %v8013_v8  ;;  %v5911_v9 = vpop.permute.xlu1 %5910  ;;  %v7304_v63 = vmul.f32 -1.442695, %v10498_v7 }
 0x764   : > { %8024 = vrcp.f32 %v5729_v34  ;;  %v8017_v12 = vpop.eup %8016  ;;  %v5734_v25 = vadd.f32 1.0, %v8015_v5 }
 0x765   : > { %5830 = vrot.lane.b32.xlu1 %v5795_v18, %s8318_s6  ;;  %5832 = vrot.lane.b32.xlu0 %v5796_v41, %s8318_s6  ;;  %8026 = vrcp.f32 %v5731_v3  ;;  %v5733_v29 = vadd.f32 1.0, %v8017_v12 }
 0x766   : > { %8028 = vrcp.f32 %v5732_v53 }
 0x767   : > { %8030 = vrcp.f32 %v5734_v25 }
 0x768   : > { %8032 = vrcp.f32 %v5733_v29 }
 0x769   : > { %5834 = vrot.lane.b32.xlu1 %v5797_v2, %s8318_s6  ;;  %5836 = vrot.lane.b32.xlu0 %v5798_v35, %s8318_s6  ;;  %v7300_v2 = vmul.f32 -1.442695, %v10478_v1  ;;  %v7302_v1 = vmul.f32 -1.442695, %v10494_v27 }
 0x76d   : > { %5838 = vrot.lane.b32.xlu1 %v5799_v50, %s8318_s6  ;;  %5840 = vrot.lane.b32.xlu0 %v5800_v37, %s8318_s6  ;;  %v7303_v37 = vmul.f32 -1.442695, %v10490_v46 }
 0x76e   : > { %v10531_v59 = vpop.eup %8018 }
 0x76f   : > { %v8021_v32 = vpop.eup %8020  ;;  %v5952_v20 = vmul.f32 %v10531_v59, %v5905_v33 }
 0x770   : > { %v10534_v6 = vpop.eup %8022  ;;  %v5735_v0 = vadd.f32 1.0, %v8021_v32 }
 0x771   : > { %5842 = vrot.lane.b32.xlu1 %v5801_v51, %s8318_s6  ;;  %5844 = vrot.lane.b32.xlu0 %v5802_v52, %s8318_s6  ;;  %v10538_v40 = vpop.eup %8024  ;;  %v5954_v42 = vmul.f32 %v10534_v6, %v5909_v62 }
 0x772   : > { %v5953_v45 = vmul.f32 %v10538_v40, %v5907_v43  ;;  %v10544_v48 = vpop.eup %8026  ;;  %8034 = vrcp.f32 %v5735_v0 }
 0x773   : > { %v5955_v56 = vmul.f32 %v10544_v48, %v5911_v9  ;;  %v10548_v58 = vpop.eup %8028  ;;  %8036 = vpow2.f32 %v7297_v39 }
 0x774   : > { %v10551_v26 = vpop.eup %8030  ;;  %8038 = vpow2.f32 %v7299_v14 }
 0x775   : > { %5846 = vrot.lane.b32.xlu1 %v5803_v10, %s8318_s6  ;;  %5848 = vrot.lane.b32.xlu0 %v5804_v60, %s8318_s6  ;;  %v10554_v19 = vpop.eup %8032  ;;  %8040 = vpow2.f32 %v7298_v38 }
 0x776   : > { %8042 = vpow2.f32 %v7300_v2 }
 0x779   : > { %5850 = vrot.lane.b32.xlu1 %v5805_v24, %s8318_s6  ;;  %5852 = vrot.lane.b32.xlu0 %v5806_v30, %s8318_s6 }
 0x77d   : > { %5854 = vrot.lane.b32.xlu1 %v5807_v16, %s8318_s6  ;;  %5984 = vrot.lane.b32.xlu0 %v5952_v20, %s8318_s6 }
 0x77f   : > { %v10561_v18 = vpop.eup %8034 }
 0x780   : > { %v8037_v61 = vpop.eup %8036 }
 0x781   : > { %5986 = vrot.lane.b32.xlu1 %v5953_v45, %s8318_s6  ;;  %5988 = vrot.lane.b32.xlu0 %v5954_v42, %s8318_s6  ;;  %v8039_v35 = vpop.eup %8038  ;;  %v5736_v28 = vadd.f32 1.0, %v8037_v61 }
 0x782   : > { %v8041_v49 = vpop.eup %8040  ;;  %v5738_v4 = vadd.f32 1.0, %v8039_v35 }
 0x783   : > { %v8043_v44 = vpop.eup %8042  ;;  %v5737_v50 = vadd.f32 1.0, %v8041_v49  ;;  %8044 = vrcp.f32 %v5736_v28  ;;  %v5872_v28 = vmul.f32 %v10531_v59, %v10523_v57 }
 0x784   : > { %8046 = vrcp.f32 %v5738_v4  ;;  %v5739_v31 = vadd.f32 1.0, %v8043_v44 }
 0x785   : > { %5990 = vrot.lane.b32.xlu1 %v5955_v56, %s8318_s6  ;;  %8048 = vrcp.f32 %v5737_v50 }
 0x786   : > { %8050 = vpow2.f32 %v7301_v11  ;;  %v5873_v11 = vmul.f32 %v10538_v40, %v10527_v54 }
 0x787   : > { %v5913_v13 = vpop.permute.xlu0 %5912  ;;  %8052 = vrcp.f32 %v5739_v31 }
 0x788   : > { %v5956_v36 = vmul.f32 %v10548_v58, %v5913_v13  ;;  %8054 = vpow2.f32 %v7303_v37 }
 0x789   : > { %8056 = vpow2.f32 %v7302_v1 }
 0x78a   : > { %5992 = vrot.lane.b32.xlu0 %v5956_v36, %s8318_s6  ;;  %8058 = vpow2.f32 %v7304_v63 }
 0x78b   : > { %v5915_v47 = vpop.permute.xlu1 %5914  ;;  %v5917_v17 = vpop.permute.xlu0 %5916 }
 0x78c   : > { %v5957_v22 = vmul.f32 %v10554_v19, %v5915_v47  ;;  %v5958_v23 = vmul.f32 %v10551_v26, %v5917_v17 }
 0x78e   : > { %5994 = vrot.lane.b32.xlu1 %v5957_v22, %s8318_s6  ;;  %5996 = vrot.lane.b32.xlu0 %v5958_v23, %s8318_s6 }
 0x78f   : > { %v5919_v41 = vpop.permute.xlu1 %5918 }
 0x790   : > { %v5959_v21 = vmul.f32 %v10561_v18, %v5919_v41  ;;  %v10572_v34 = vpop.eup %8044 }
 0x791   : > { %v10575_v15 = vpop.eup %8046 }
 0x792   : > { %5998 = vrot.lane.b32.xlu1 %v5959_v21, %s8318_s6  ;;  %v10577_v52 = vpop.eup %8048 }
 0x793   : > { %v8051_v46 = vpop.eup %8050 }
 0x794   : > { %v10582_v60 = vpop.eup %8052  ;;  %v5740_v5 = vadd.f32 1.0, %v8051_v46 }
 0x795   : > { %v8055_v8 = vpop.eup %8054 }
 0x796   : > { %v8057_v53 = vpop.eup %8056  ;;  %v5742_v30 = vadd.f32 1.0, %v8055_v8  ;;  %8060 = vrcp.f32 %v5740_v5 }
 0x797   : > { %v5741_v12 = vadd.f32 1.0, %v8057_v53  ;;  %v8059_v25 = vpop.eup %8058 }
 0x798   : > { %8062 = vrcp.f32 %v5742_v30  ;;  %v5743_v29 = vadd.f32 1.0, %v8059_v25 }
 0x799   : > { %8064 = vrcp.f32 %v5741_v12 }
 0x79a   : > { %8066 = vrcp.f32 %v5743_v29 }
 0x7a3   : > { %v10588_v43 = vpop.eup %8060 }
 0x7a5   : > { %v10591_v20 = vpop.eup %8062 }
 0x7a6   : > { %v10594_v62 = vpop.eup %8064 }
 0x7a7   : > { %v10600_v56 = vpop.eup %8066 }
 0x7b3   : > { %v5921_v55 = vpop.permute.xlu0 %5920 }
 0x7b4   : > { %v5960_v51 = vmul.f32 %v10572_v34, %v5921_v55 }
 0x7b6   : > { %6000 = vrot.lane.b32.xlu0 %v5960_v51, %s8318_s6 }
 0x7b7   : > { %v5923_v3 = vpop.permute.xlu1 %5922  ;;  %v5925_v27 = vpop.permute.xlu0 %5924 }
 0x7b8   : > { %v5961_v10 = vmul.f32 %v10577_v52, %v5923_v3  ;;  %v5962_v7 = vmul.f32 %v10575_v15, %v5925_v27 }
 0x7ba   : > { %6002 = vrot.lane.b32.xlu1 %v5961_v10, %s8318_s6  ;;  %6004 = vrot.lane.b32.xlu0 %v5962_v7, %s8318_s6 }
 0x7bb   : > { %v5927_v33 = vpop.permute.xlu1 %5926 }
 0x7bc   : > { %v5963_v24 = vmul.f32 %v10582_v60, %v5927_v33 }
 0x7be   : > { %6006 = vrot.lane.b32.xlu1 %v5963_v24, %s8318_s6 }
 0x7cb   : > { %v5929_v16 = vpop.permute.xlu0 %5928 }
 0x7cc   : > { %v5964_v32 = vmul.f32 %v10588_v43, %v5929_v16 }
 0x7ce   : > { %6008 = vrot.lane.b32.xlu0 %v5964_v32, %s8318_s6 }
 0x7cf   : > { %v5931_v0 = vpop.permute.xlu1 %5930  ;;  %v5933_v45 = vpop.permute.xlu0 %5932 }
 0x7d0   : > { %v5965_v42 = vmul.f32 %v10594_v62, %v5931_v0  ;;  %v5966_v9 = vmul.f32 %v10591_v20, %v5933_v45 }
 0x7d2   : > { %6010 = vrot.lane.b32.xlu1 %v5965_v42, %s8318_s6  ;;  %6012 = vrot.lane.b32.xlu0 %v5966_v9, %s8318_s6 }
 0x7d3   : > { %v5935_v13 = vpop.permute.xlu1 %5934  ;;  %v5829_v36 = vpop.permute.xlu0 %5828 }
 0x7d4   : > { %v5967_v47 = vmul.f32 %v10600_v56, %v5935_v13  ;;  %v5874_v31 = vmul.f32 %v10534_v6, %v5829_v36 }
 0x7d6   : > { %6014 = vrot.lane.b32.xlu1 %v5967_v47, %s8318_s6 }
 0x7d7   : > { %v5831_v17 = vpop.permute.xlu1 %5830  ;;  %v5833_v22 = vpop.permute.xlu0 %5832 }
 0x7d8   : > { %v5875_v51 = vmul.f32 %v10544_v48, %v5831_v17  ;;  %v5876_v54 = vmul.f32 %v10548_v58, %v5833_v22 }
 0x7db   : > { %v5835_v23 = vpop.permute.xlu1 %5834  ;;  %v5837_v39 = vpop.permute.xlu0 %5836 }
 0x7dc   : > { %v5877_v7 = vmul.f32 %v10554_v19, %v5835_v23  ;;  %v5878_v30 = vmul.f32 %v10551_v26, %v5837_v39 }
 0x7df   : > { %v5839_v41 = vpop.permute.xlu1 %5838  ;;  %v5841_v14 = vpop.permute.xlu0 %5840 }
 0x7e0   : > { %v5879_v16 = vmul.f32 %v10561_v18, %v5839_v41  ;;  %v5880_v42 = vmul.f32 %v10572_v34, %v5841_v14 }
 0x7e3   : > { %v5843_v21 = vpop.permute.xlu1 %5842  ;;  %v10604_v38 = vpop.permute.xlu0 %5844 }
 0x7e4   : > { %v5881_v36 = vmul.f32 %v10577_v52, %v5843_v21  ;;  %v5882_v39 = vmul.f32 %v10575_v15, %v10604_v38 }
 0x7e7   : > { %v10606_v2 = vpop.permute.xlu1 %5846  ;;  %v10608_v61 = vpop.permute.xlu0 %5848 }
 0x7e8   : > { %v5883_v21 = vmul.f32 %v10582_v60, %v10606_v2 }
 0x7eb   : > { %v10610_v35 = vpop.permute.xlu1 %5850  ;;  %v10612_v49 = vpop.permute.xlu0 %5852 }
 0x7ef   : > { %v10616_v4 = vpop.permute.xlu1 %5854  ;;  %v5985_v44 = vpop.permute.xlu0 %5984 }
 0x7f0   : > { %v6032_v50 = vadd.f32 %v5985_v44, %v5872_v28 }
 0x7f2   : > { %8068 = vtanh.f32 %v6032_v50  ;;  %6160 = vrot.lane.b32.xlu0 %v6032_v50, %s8319_s9 }
 0x7f3   : > { %v5987_v37 = vpop.permute.xlu1 %5986  ;;  %v5989_v1 = vpop.permute.xlu0 %5988 }
 0x7f4   : > { %v6033_v63 = vadd.f32 %v5987_v37, %v5873_v11  ;;  %v6034_v55 = vadd.f32 %v5989_v1, %v5874_v31  ;;  %v5884_v11 = vmul.f32 %v10588_v43, %v10608_v61  ;;  %v5885_v37 = vmul.f32 %v10594_v62, %v10610_v35 }
 0x7f5   : > { %v5886_v1 = vmul.f32 %v10591_v20, %v10612_v49 }
 0x7f6   : > { %8070 = vtanh.f32 %v6033_v63  ;;  %6162 = vrot.lane.b32.xlu1 %v6033_v63, %s8319_s9  ;;  %6164 = vrot.lane.b32.xlu0 %v6034_v55, %s8319_s9 }
 0x7f7   : > { %v5991_v57 = vpop.permute.xlu1 %5990  ;;  %8072 = vtanh.f32 %v6034_v55 }
 0x7f8   : > { %v6035_v46 = vadd.f32 %v5991_v57, %v5875_v51 }
 0x7fa   : > { %6166 = vrot.lane.b32.xlu1 %v6035_v46, %s8319_s9  ;;  %8074 = vtanh.f32 %v6035_v46 }
 0x7fc   : > { %v5993_v3 = vpop.permute.xlu0 %5992 }
 0x7fd   : > { %v6036_v27 = vadd.f32 %v5993_v3, %v5876_v54  ;;  %v5887_v54 = vmul.f32 %v10600_v56, %v10616_v4 }
 0x7ff   : > { %v8069_v10 = vpop.eup %8068  ;;  %8076 = vtanh.f32 %v6036_v27 }
 0x800   : > { %v5995_v8 = vpop.permute.xlu1 %5994  ;;  %6080 = vrot.lane.b32.xlu0 %v8069_v10, %s8318_s6  ;;  %v5997_v24 = vpop.permute.xlu0 %5996 }
 0x801   : > { %v6037_v5 = vadd.f32 %v5995_v8, %v5877_v7  ;;  %v6038_v12 = vadd.f32 %v5997_v24, %v5878_v30 }
 0x803   : > { %v8071_v53 = vpop.eup %8070  ;;  %8078 = vtanh.f32 %v6037_v5 }
 0x804   : > { %6082 = vrot.lane.b32.xlu1 %v8071_v53, %s8318_s6  ;;  %6168 = vrot.lane.b32.xlu0 %v6036_v27, %s8319_s9  ;;  %v8073_v33 = vpop.eup %8072  ;;  %v5999_v29 = vpop.permute.xlu1 %5998  ;;  %8080 = vtanh.f32 %v6038_v12 }
 0x805   : > { %v6039_v32 = vadd.f32 %v5999_v29, %v5879_v16 }
 0x807   : > { %v8075_v25 = vpop.eup %8074  ;;  %8082 = vtanh.f32 %v6039_v32 }
 0x808   : > { %6170 = vrot.lane.b32.xlu1 %v6037_v5, %s8319_s9  ;;  %6084 = vrot.lane.b32.xlu0 %v8073_v33, %s8318_s6 }
 0x80c   : > { %6086 = vrot.lane.b32.xlu1 %v8075_v25, %s8318_s6  ;;  %6172 = vrot.lane.b32.xlu0 %v6038_v12, %s8319_s9  ;;  %v8077_v0 = vpop.eup %8076 }
 0x810   : > { %6174 = vrot.lane.b32.xlu1 %v6039_v32, %s8319_s9  ;;  %6088 = vrot.lane.b32.xlu0 %v8077_v0, %s8318_s6  ;;  %v8079_v45 = vpop.eup %8078 }
 0x811   : > { %v8081_v22 = vpop.eup %8080 }
 0x814   : > { %6090 = vrot.lane.b32.xlu1 %v8079_v45, %s8318_s6  ;;  %v8083_v14 = vpop.eup %8082 }
 0x828   : > { %v6001_v9 = vpop.permute.xlu0 %6000 }
 0x829   : > { %v6040_v13 = vadd.f32 %v6001_v9, %v5880_v42 }
 0x82b   : > { %8084 = vtanh.f32 %v6040_v13  ;;  %6176 = vrot.lane.b32.xlu0 %v6040_v13, %s8319_s9 }
 0x82c   : > { %v6003_v47 = vpop.permute.xlu1 %6002  ;;  %v6005_v23 = vpop.permute.xlu0 %6004 }
 0x82d   : > { %v6041_v17 = vadd.f32 %v6003_v47, %v5881_v36  ;;  %v6042_v41 = vadd.f32 %v6005_v23, %v5882_v39 }
 0x82f   : > { %8086 = vtanh.f32 %v6041_v17  ;;  %6178 = vrot.lane.b32.xlu1 %v6041_v17, %s8319_s9  ;;  %6092 = vrot.lane.b32.xlu0 %v8081_v22, %s8318_s6 }
 0x830   : > { %v6007_v28 = vpop.permute.xlu1 %6006  ;;  %8088 = vtanh.f32 %v6042_v41 }
 0x831   : > { %v6043_v44 = vadd.f32 %v6007_v28, %v5883_v21 }
 0x833   : > { %6094 = vrot.lane.b32.xlu1 %v8083_v14, %s8318_s6  ;;  %6180 = vrot.lane.b32.xlu0 %v6042_v41, %s8319_s9  ;;  %8090 = vtanh.f32 %v6043_v44 }
 0x837   : > { %6182 = vrot.lane.b32.xlu1 %v6043_v44, %s8319_s9 }
 0x838   : > { %v8085_v50 = vpop.eup %8084 }
 0x839   : > { %6096 = vrot.lane.b32.xlu0 %v8085_v50, %s8318_s6 }
 0x83c   : > { %v8087_v38 = vpop.eup %8086 }
 0x83d   : > { %6098 = vrot.lane.b32.xlu1 %v8087_v38, %s8318_s6  ;;  %v8089_v46 = vpop.eup %8088 }
 0x840   : > { %v6009_v31 = vpop.permute.xlu0 %6008  ;;  %v8091_v49 = vpop.eup %8090 }
 0x841   : > { %v6044_v2 = vadd.f32 %v6009_v31, %v5884_v11 }
 0x843   : > { %8092 = vtanh.f32 %v6044_v2  ;;  %6184 = vrot.lane.b32.xlu0 %v6044_v2, %s8319_s9 }
 0x844   : > { %v6011_v63 = vpop.permute.xlu1 %6010  ;;  %v6013_v55 = vpop.permute.xlu0 %6012 }
 0x845   : > { %v6045_v51 = vadd.f32 %v6011_v63, %v5885_v37  ;;  %v6046_v57 = vadd.f32 %v6013_v55, %v5886_v1 }
 0x847   : > { %8094 = vtanh.f32 %v6045_v51  ;;  %6186 = vrot.lane.b32.xlu1 %v6045_v51, %s8319_s9  ;;  %6100 = vrot.lane.b32.xlu0 %v8089_v46, %s8318_s6 }
 0x848   : > { %8096 = vtanh.f32 %v6046_v57  ;;  %v6015_v61 = vpop.permute.xlu1 %6014 }
 0x849   : > { %v6047_v35 = vadd.f32 %v6015_v61, %v5887_v54 }
 0x84b   : > { %8098 = vtanh.f32 %v6047_v35  ;;  %6102 = vrot.lane.b32.xlu1 %v8091_v49, %s8318_s6  ;;  %6188 = vrot.lane.b32.xlu0 %v6046_v57, %s8319_s9 }
 0x84f   : > { %6190 = vrot.lane.b32.xlu1 %v6047_v35, %s8319_s9 }
 0x850   : > { %v8093_v3 = vpop.eup %8092 }
 0x851   : > { %6104 = vrot.lane.b32.xlu0 %v8093_v3, %s8318_s6 }
 0x854   : > { %v8095_v4 = vpop.eup %8094 }
 0x855   : > { %v8097_v27 = vpop.eup %8096  ;;  %6106 = vrot.lane.b32.xlu1 %v8095_v4, %s8318_s6 }
 0x856   : > { %6108 = vrot.lane.b32.xlu0 %v8097_v27, %s8318_s6 }
 0x858   : > { %v8099_v10 = vpop.eup %8098 }
 0x859   : > { %6110 = vrot.lane.b32.xlu1 %v8099_v10, %s8318_s6 }
 0x864   : > { %v10672_v7 = vpop.permute.xlu0 %6160 }
 0x865   : > { %6208 = vst.msk [vmem:[#allocation4 + $0x80] sm:$0xff] %vm3175_vm3, %v10672_v7 }
 0x868   : > { %v10676_v8 = vpop.permute.xlu1 %6162  ;;  %v10678_v5 = vpop.permute.xlu0 %6164 }
 0x869   : > { %6209 = vst.msk [vmem:[#allocation4 + $0x88] sm:$0xff] %vm3175_vm3, %v10676_v8  ;;  %6210 = vst.msk [vmem:[#allocation4 + $0x90] sm:$0xff] %vm3175_vm3, %v10678_v5 }
 0x86c   : > { %v10684_v53 = vpop.permute.xlu1 %6166 }
 0x86d   : > { %6211 = vst.msk [vmem:[#allocation4 + $0x98] sm:$0xff] %vm3175_vm3, %v10684_v53 }
 0x872   : > { %v6081_v33 = vpop.permute.xlu0 %6080 }
 0x873   : > { %v6128_v24 = vmul.f32 %v10531_v59, %v6081_v33 }
 0x875   : > { %6352 = vrot.lane.b32.xlu0 %v6128_v24, %s8320_s8  ;;  %v7379_v25 = vpack.c.bf16 %v6128_v24, %v6128_v24 }
 0x876   : > { %v6083_v30 = vpop.permute.xlu1 %6082  ;;  %v10690_v12 = vpop.permute.xlu0 %6168 }
 0x877   : > { %v6129_v29 = vmul.f32 %v10538_v40, %v6083_v30  ;;  %6212 = vst.msk [vmem:[#allocation4 + $0xa0] sm:$0xff] %vm3175_vm3, %v10690_v12 }
 0x879   : > { %6354 = vrot.lane.b32.xlu1 %v6129_v29, %s8320_s8  ;;  %6272 = vrot.lane.b32.xlu0 %v7379_v25, %s8320_s8  ;;  %v7380_v0 = vpack.c.bf16 %v6129_v29, %v6129_v29 }
 0x87a   : > { %v10697_v16 = vpop.permute.xlu1 %6170  ;;  %v6085_v32 = vpop.permute.xlu0 %6084 }
 0x87b   : > { %6213 = vst.msk [vmem:[#allocation4 + $0xa8] sm:$0xff] %vm3175_vm3, %v10697_v16  ;;  %v6130_v59 = vmul.f32 %v10534_v6, %v6085_v32 }
 0x87d   : > { %6274 = vrot.lane.b32.xlu1 %v7380_v0, %s8320_s8  ;;  %6356 = vrot.lane.b32.xlu0 %v6130_v59, %s8320_s8  ;;  %v7381_v42 = vpack.c.bf16 %v6130_v59, %v6130_v59 }
 0x87e   : > { %v6087_v40 = vpop.permute.xlu1 %6086  ;;  %v10704_v45 = vpop.permute.xlu0 %6172 }
 0x87f   : > { %v6131_v9 = vmul.f32 %v10544_v48, %v6087_v40  ;;  %6214 = vst.msk [vmem:[#allocation4 + $0xb0] sm:$0xff] %vm3175_vm3, %v10704_v45 }
 0x881   : > { %6358 = vrot.lane.b32.xlu1 %v6131_v9, %s8320_s8  ;;  %6276 = vrot.lane.b32.xlu0 %v7381_v42, %s8320_s8  ;;  %v7382_v36 = vpack.c.bf16 %v6131_v9, %v6131_v9 }
 0x882   : > { %v10711_v13 = vpop.permute.xlu1 %6174  ;;  %v6089_v6 = vpop.permute.xlu0 %6088 }
 0x883   : > { %6215 = vst.msk [vmem:[#allocation4 + $0xb8] sm:$0xff] %vm3175_vm3, %v10711_v13  ;;  %v6132_v47 = vmul.f32 %v10548_v58, %v6089_v6 }
 0x885   : > { %6278 = vrot.lane.b32.xlu1 %v7382_v36, %s8320_s8  ;;  %6360 = vrot.lane.b32.xlu0 %v6132_v47, %s8320_s8  ;;  %v7383_v17 = vpack.c.bf16 %v6132_v47, %v6132_v47 }
 0x886   : > { %v6091_v48 = vpop.permute.xlu1 %6090 }
 0x887   : > { %v6133_v22 = vmul.f32 %v10554_v19, %v6091_v48 }
 0x889   : > { %6362 = vrot.lane.b32.xlu1 %v6133_v22, %s8320_s8  ;;  %6280 = vrot.lane.b32.xlu0 %v7383_v17, %s8320_s8  ;;  %v7384_v23 = vpack.c.bf16 %v6133_v22, %v6133_v22 }
 0x88d   : > { %6282 = vrot.lane.b32.xlu1 %v7384_v23, %s8320_s8 }
 0x89d   : > { %v10722_v39 = vpop.permute.xlu0 %6176 }
 0x89e   : > { %6216 = vst.msk [vmem:[#allocation4 + $0xc0] sm:$0xff] %vm3175_vm3, %v10722_v39 }
 0x8a1   : > { %v10726_v58 = vpop.permute.xlu1 %6178  ;;  %v6093_v41 = vpop.permute.xlu0 %6092 }
 0x8a2   : > { %6217 = vst.msk [vmem:[#allocation4 + $0xc8] sm:$0xff] %vm3175_vm3, %v10726_v58  ;;  %v6134_v19 = vmul.f32 %v10551_v26, %v6093_v41 }
 0x8a4   : > { %6364 = vrot.lane.b32.xlu0 %v6134_v19, %s8320_s8  ;;  %v7385_v21 = vpack.c.bf16 %v6134_v19, %v6134_v19 }
 0x8a5   : > { %v6095_v14 = vpop.permute.xlu1 %6094  ;;  %v10732_v28 = vpop.permute.xlu0 %6180 }
 0x8a6   : > { %v6135_v44 = vmul.f32 %v10561_v18, %v6095_v14  ;;  %6218 = vst.msk [vmem:[#allocation4 + $0xd0] sm:$0xff] %vm3175_vm3, %v10732_v28 }
 0x8a8   : > { %6366 = vrot.lane.b32.xlu1 %v6135_v44, %s8320_s8  ;;  %6284 = vrot.lane.b32.xlu0 %v7385_v21, %s8320_s8  ;;  %v7386_v38 = vpack.c.bf16 %v6135_v44, %v6135_v44 }
 0x8a9   : > { %v10739_v50 = vpop.permute.xlu1 %6182 }
 0x8aa   : > { %6219 = vst.msk [vmem:[#allocation4 + $0xd8] sm:$0xff] %vm3175_vm3, %v10739_v50 }
 0x8ab   : > { %v6097_v26 = vpop.permute.xlu0 %6096 }
 0x8ac   : > { %v6136_v11 = vmul.f32 %v10572_v34, %v6097_v26  ;;  %6286 = vrot.lane.b32.xlu1 %v7386_v38, %s8320_s8 }
 0x8ae   : > { %6368 = vrot.lane.b32.xlu0 %v6136_v11, %s8320_s8  ;;  %v7387_v31 = vpack.c.bf16 %v6136_v11, %v6136_v11 }
 0x8af   : > { %v6099_v18 = vpop.permute.xlu1 %6098 }
 0x8b0   : > { %v6137_v2 = vmul.f32 %v10577_v52, %v6099_v18 }
 0x8b2   : > { %6370 = vrot.lane.b32.xlu1 %v6137_v2, %s8320_s8  ;;  %6288 = vrot.lane.b32.xlu0 %v7387_v31, %s8320_s8  ;;  %v7388_v37 = vpack.c.bf16 %v6137_v2, %v6137_v2 }
 0x8b5   : > { %v10749_v1 = vpop.permute.xlu0 %6184 }
 0x8b6   : > { %6220 = vst.msk [vmem:[#allocation4 + $0xe0] sm:$0xff] %vm3175_vm3, %v10749_v1  ;;  %6290 = vrot.lane.b32.xlu1 %v7388_v37, %s8320_s8 }
 0x8b9   : > { %v10754_v34 = vpop.permute.xlu1 %6186  ;;  %v6101_v63 = vpop.permute.xlu0 %6100 }
 0x8ba   : > { %6221 = vst.msk [vmem:[#allocation4 + $0xe8] sm:$0xff] %vm3175_vm3, %v10754_v34  ;;  %v6138_v52 = vmul.f32 %v10575_v15, %v6101_v63 }
 0x8bc   : > { %6372 = vrot.lane.b32.xlu0 %v6138_v52, %s8320_s8  ;;  %v7389_v57 = vpack.c.bf16 %v6138_v52, %v6138_v52 }
 0x8bd   : > { %v6103_v55 = vpop.permute.xlu1 %6102  ;;  %v10760_v51 = vpop.permute.xlu0 %6188 }
 0x8be   : > { %v6139_v46 = vmul.f32 %v10582_v60, %v6103_v55  ;;  %6222 = vst.msk [vmem:[#allocation4 + $0xf0] sm:$0xff] %vm3175_vm3, %v10760_v51 }
 0x8c0   : > { %6374 = vrot.lane.b32.xlu1 %v6139_v46, %s8320_s8  ;;  %6292 = vrot.lane.b32.xlu0 %v7389_v57, %s8320_s8  ;;  %v7390_v61 = vpack.c.bf16 %v6139_v46, %v6139_v46 }
 0x8c1   : > { %v10767_v54 = vpop.permute.xlu1 %6190 }
 0x8c2   : > { %6223 = vst.msk [vmem:[#allocation4 + $0xf8] sm:$0xff] %vm3175_vm3, %v10767_v54 }
 0x8c3   : > { %v6105_v15 = vpop.permute.xlu0 %6104 }
 0x8c4   : > { %v6140_v35 = vmul.f32 %v10588_v43, %v6105_v15  ;;  %6294 = vrot.lane.b32.xlu1 %v7390_v61, %s8320_s8 }
 0x8c6   : > { %6376 = vrot.lane.b32.xlu0 %v6140_v35, %s8320_s8  ;;  %v7391_v49 = vpack.c.bf16 %v6140_v35, %v6140_v35 }
 0x8c7   : > { %v6107_v60 = vpop.permute.xlu1 %6106 }
 0x8c8   : > { %v6141_v3 = vmul.f32 %v10594_v62, %v6107_v60  ;;  %v6109_v4 = vpop.permute.xlu0 %6108 }
 0x8c9   : > { %v6142_v27 = vmul.f32 %v10591_v20, %v6109_v4 }
 0x8ca   : > { %6378 = vrot.lane.b32.xlu1 %v6141_v3, %s8320_s8  ;;  %6296 = vrot.lane.b32.xlu0 %v7391_v49, %s8320_s8  ;;  %v7392_v33 = vpack.c.bf16 %v6141_v3, %v6141_v3 }
 0x8cb   : > { %v6111_v10 = vpop.permute.xlu1 %6110  ;;  %v7393_v43 = vpack.c.bf16 %v6142_v27, %v6142_v27 }
 0x8cc   : > { %v6143_v24 = vmul.f32 %v10600_v56, %v6111_v10 }
 0x8ce   : > { %6298 = vrot.lane.b32.xlu1 %v7392_v33, %s8320_s8  ;;  %6300 = vrot.lane.b32.xlu0 %v7393_v43, %s8320_s8  ;;  %v7394_v62 = vpack.c.bf16 %v6143_v24, %v6143_v24 }
 0x8d2   : > { %6302 = vrot.lane.b32.xlu1 %v7394_v62, %s8320_s8  ;;  %6380 = vrot.lane.b32.xlu0 %v6142_v27, %s8320_s8 }
 0x8d6   : > { %6382 = vrot.lane.b32.xlu1 %v6143_v24, %s8320_s8 }
 0x8e7   : > { %v6353_v20 = vpop.permute.xlu0 %6352 }
 0x8e8   : > { %7321 = vst.msk [vmem:[%s8531_s1 + $0x80] sm:$0xff] %vm3175_vm3, %v6353_v20 }
 0x8eb   : > { %v6355_v30 = vpop.permute.xlu1 %6354  ;;  %v6273_v25 = vpop.permute.xlu0 %6272 }
 0x8ec   : > { %7322 = vst.msk [vmem:[%s8531_s1 + $0x88] sm:$0xff] %vm3175_vm3, %v6355_v30 }
 0x8ed   : > { %6320 = vst.msk [vmem:[#allocation3 + $0x40] sm:$0xf] %vm3288_vm4, %v6273_v25 }
 0x8ef   : > { %v6275_v56 = vpop.permute.xlu1 %6274  ;;  %v6357_v29 = vpop.permute.xlu0 %6356 }
 0x8f0   : > { %6321 = vst.msk [vmem:[#allocation3 + $0x44] sm:$0xf] %vm3288_vm4, %v6275_v56 }
 0x8f1   : > { %7323 = vst.msk [vmem:[%s8531_s1 + $0x90] sm:$0xff] %vm3175_vm3, %v6357_v29 }
 0x8f3   : > { %v6359_v32 = vpop.permute.xlu1 %6358  ;;  %v6277_v0 = vpop.permute.xlu0 %6276 }
 0x8f4   : > { %7324 = vst.msk [vmem:[%s8531_s1 + $0x98] sm:$0xff] %vm3175_vm3, %v6359_v32 }
 0x8f5   : > { %6322 = vst.msk [vmem:[#allocation3 + $0x48] sm:$0xf] %vm3288_vm4, %v6277_v0 }
 0x8f7   : > { %v6279_v59 = vpop.permute.xlu1 %6278  ;;  %v6361_v40 = vpop.permute.xlu0 %6360 }
 0x8f8   : > { %6323 = vst.msk [vmem:[#allocation3 + $0x4c] sm:$0xf] %vm3288_vm4, %v6279_v59 }
 0x8f9   : > { %7325 = vst.msk [vmem:[%s8531_s1 + $0xa0] sm:$0xff] %vm3175_vm3, %v6361_v40 }
 0x8fb   : > { %v6363_v42 = vpop.permute.xlu1 %6362  ;;  %v6281_v9 = vpop.permute.xlu0 %6280 }
 0x8fc   : > { %7326 = vst.msk [vmem:[%s8531_s1 + $0xa8] sm:$0xff] %vm3175_vm3, %v6363_v42 }
 0x8fd   : > { %6324 = vst.msk [vmem:[#allocation3 + $0x50] sm:$0xf] %vm3288_vm4, %v6281_v9 }
 0x8ff   : > { %v6283_v6 = vpop.permute.xlu1 %6282 }
 0x900   : > { %6325 = vst.msk [vmem:[#allocation3 + $0x54] sm:$0xf] %vm3288_vm4, %v6283_v6 }
 0x916   : > { %v6365_v36 = vpop.permute.xlu0 %6364 }
 0x917   : > { %7327 = vst.msk [vmem:[%s8531_s1 + $0xb0] sm:$0xff] %vm3175_vm3, %v6365_v36 }
 0x91a   : > { %v6367_v47 = vpop.permute.xlu1 %6366  ;;  %v6285_v48 = vpop.permute.xlu0 %6284 }
 0x91b   : > { %7328 = vst.msk [vmem:[%s8531_s1 + $0xb8] sm:$0xff] %vm3175_vm3, %v6367_v47 }
 0x91c   : > { %6326 = vst.msk [vmem:[#allocation3 + $0x58] sm:$0xf] %vm3288_vm4, %v6285_v48 }
 0x91e   : > { %v6287_v17 = vpop.permute.xlu1 %6286 }
 0x91f   : > { %6327 = vst.msk [vmem:[#allocation3 + $0x5c] sm:$0xf] %vm3288_vm4, %v6287_v17 }
 0x920   : > { %v6369_v22 = vpop.permute.xlu0 %6368 }
 0x921   : > { %7329 = vst.msk [vmem:[%s8531_s1 + $0xc0] sm:$0xff] %vm3175_vm3, %v6369_v22 }
 0x924   : > { %v6371_v23 = vpop.permute.xlu1 %6370  ;;  %v6289_v41 = vpop.permute.xlu0 %6288 }
 0x925   : > { %7330 = vst.msk [vmem:[%s8531_s1 + $0xc8] sm:$0xff] %vm3175_vm3, %v6371_v23 }
 0x926   : > { %6328 = vst.msk [vmem:[#allocation3 + $0x60] sm:$0xf] %vm3288_vm4, %v6289_v41 }
 0x928   : > { %v6291_v19 = vpop.permute.xlu1 %6290 }
 0x929   : > { %6329 = vst.msk [vmem:[#allocation3 + $0x64] sm:$0xf] %vm3288_vm4, %v6291_v19 }
 0x92e   : > { %v6373_v14 = vpop.permute.xlu0 %6372 }
 0x92f   : > { %7331 = vst.msk [vmem:[%s8531_s1 + $0xd0] sm:$0xff] %vm3175_vm3, %v6373_v14 }
 0x932   : > { %v6375_v21 = vpop.permute.xlu1 %6374  ;;  %v6293_v44 = vpop.permute.xlu0 %6292 }
 0x933   : > { %7332 = vst.msk [vmem:[%s8531_s1 + $0xd8] sm:$0xff] %vm3175_vm3, %v6375_v21 }
 0x934   : > { %6330 = vst.msk [vmem:[#allocation3 + $0x68] sm:$0xf] %vm3288_vm4, %v6293_v44 }
 0x936   : > { %v6295_v38 = vpop.permute.xlu1 %6294 }
 0x937   : > { %6331 = vst.msk [vmem:[#allocation3 + $0x6c] sm:$0xf] %vm3288_vm4, %v6295_v38 }
 0x938   : > { %v6377_v26 = vpop.permute.xlu0 %6376 }
 0x939   : > { %7333 = vst.msk [vmem:[%s8531_s1 + $0xe0] sm:$0xff] %vm3175_vm3, %v6377_v26 }
 0x93c   : > { %v6379_v11 = vpop.permute.xlu1 %6378  ;;  %v6297_v18 = vpop.permute.xlu0 %6296 }
 0x93d   : > { %7334 = vst.msk [vmem:[%s8531_s1 + $0xe8] sm:$0xff] %vm3175_vm3, %v6379_v11 }
 0x93e   : > { %6332 = vst.msk [vmem:[#allocation3 + $0x70] sm:$0xf] %vm3288_vm4, %v6297_v18 }
 0x940   : > { %v6299_v31 = vpop.permute.xlu1 %6298  ;;  %v6301_v2 = vpop.permute.xlu0 %6300 }
 0x941   : > { %6333 = vst.msk [vmem:[#allocation3 + $0x74] sm:$0xf] %vm3288_vm4, %v6299_v31  ;;  %6334 = vst.msk [vmem:[#allocation3 + $0x78] sm:$0xf] %vm3288_vm4, %v6301_v2 }
 0x944   : > { %v6303_v37 = vpop.permute.xlu1 %6302  ;;  %v6381_v63 = vpop.permute.xlu0 %6380 }
 0x945   : > { %6335 = vst.msk [vmem:[#allocation3 + $0x7c] sm:$0xf] %vm3288_vm4, %v6303_v37  ;;  %6419 = sbr.rel (%p7210_p2) target bundleno = 2386 (0x952), region = 52 }
 0x946   : > { %7335 = vst.msk [vmem:[%s8531_s1 + $0xf0] sm:$0xff] %vm3175_vm3, %v6381_v63 }
 0x948   : > { %v6383_v52 = vpop.permute.xlu1 %6382 }
 0x949   : > { %7336 = vst.msk [vmem:[%s8531_s1 + $0xf8] sm:$0xff] %vm3175_vm3, %v6383_v52 }
 0x94a   : > { %7338 = vst.msk [vmem:[%s8533_s2 + $0x80] sm:$0xff] %vm3175_vm3, %v10672_v7  ;;  %7339 = vst.msk [vmem:[%s8533_s2 + $0x88] sm:$0xff] %vm3175_vm3, %v10676_v8 }
 0x94b   : > { %7340 = vst.msk [vmem:[%s8533_s2 + $0x90] sm:$0xff] %vm3175_vm3, %v10678_v5  ;;  %7341 = vst.msk [vmem:[%s8533_s2 + $0x98] sm:$0xff] %vm3175_vm3, %v10684_v53 }
 0x94c   : > { %7342 = vst.msk [vmem:[%s8533_s2 + $0xa0] sm:$0xff] %vm3175_vm3, %v10690_v12  ;;  %7343 = vst.msk [vmem:[%s8533_s2 + $0xa8] sm:$0xff] %vm3175_vm3, %v10697_v16 }
 0x94d   : > { %7344 = vst.msk [vmem:[%s8533_s2 + $0xb0] sm:$0xff] %vm3175_vm3, %v10704_v45  ;;  %7345 = vst.msk [vmem:[%s8533_s2 + $0xb8] sm:$0xff] %vm3175_vm3, %v10711_v13 }
 0x94e   : > { %7346 = vst.msk [vmem:[%s8533_s2 + $0xc0] sm:$0xff] %vm3175_vm3, %v10722_v39  ;;  %7347 = vst.msk [vmem:[%s8533_s2 + $0xc8] sm:$0xff] %vm3175_vm3, %v10726_v58 }
 0x94f   : > { %7348 = vst.msk [vmem:[%s8533_s2 + $0xd0] sm:$0xff] %vm3175_vm3, %v10732_v28  ;;  %7349 = vst.msk [vmem:[%s8533_s2 + $0xd8] sm:$0xff] %vm3175_vm3, %v10739_v50 }
 0x950   : > { %7350 = vst.msk [vmem:[%s8533_s2 + $0xe0] sm:$0xff] %vm3175_vm3, %v10749_v1  ;;  %7351 = vst.msk [vmem:[%s8533_s2 + $0xe8] sm:$0xff] %vm3175_vm3, %v10754_v34 }
 0x951   : > { %7352 = vst.msk [vmem:[%s8533_s2 + $0xf0] sm:$0xff] %vm3175_vm3, %v10760_v51  ;;  %7353 = vst.msk [vmem:[%s8533_s2 + $0xf8] sm:$0xff] %vm3175_vm3, %v10767_v54 }
 0x952 PF: > { %v6437_v7 = vld [vmem:[#allocation3] sm:$0xf]  ;;  %vm6793_vm5 = vsmask.f32 7938  ;;  %v6438_v53 = vld [vmem:[#allocation3 + $0x4] sm:$0xf] }
 0x953   : > { %v6473_v8 = vshrl.u32 %v6437_v7, 16  ;;  %v6476_v5 = vshll.u32 %v6437_v7, 16  ;;  %vm6469_vm6 = vsmask.f32 256  ;;  %vm6470_vm7 = vsmask.f32 4368  ;;  %vm10883_vm9 = vmand %vm3288_vm4, %vm6793_vm5 }
 0x954   : > { %v6481_v12 = vshrl.u32 %v6438_v53, 16  ;;  %v6484_v16 = vshll.u32 %v6438_v53, 16  ;;  %vm6799_vm8 = vcmask 253952   ;;  %v6439_v39 = vld [vmem:[#allocation3 + $0x8] sm:$0xf]  ;;  %s7356_s11 = sshll.u32 %s8290_s21, 5  ;;  %vm10889_vm10 = vmor %vm6469_vm6, %vm6470_vm7 }
 0x955   : > { %v6475_v45 = vrot.slane %v6473_v8, 7  ;;  %v6795_v58 = vld [vmem:[#allocation2 + $0xc] sm:$0xf]  ;;  %v6490_v1 = vshrl.u32 %v6439_v39, 16  ;;  %v6493_v34 = vshll.u32 %v6439_v39, 16  ;;  %s7357_s30 = sshll.u32 %s8294_s22, 8  ;;  %vm10895_vm11 = vmand %vm6799_vm8, %vm6469_vm6 }
 0x956   : > { %v6483_v50 = vrot.slane %v6481_v12, 7  ;;  %v6801_v46 = vld [vmem:[#allocation2 + $0x14] sm:$0x1]  ;;  %v6440_v54 = vld [vmem:[#allocation3 + $0xc] sm:$0xf]  ;;  %s10899_s21 = sadd.s32 %s7357_s30, %s7356_s11  ;;  %s6930_s29 = sshll.u32 %s8531_s1, 4  ;;  %s10915_s29 = int_to_ptr.vmem [resolvable:$true] %s6930_s29 }
 0x957   : > { %v6478_v55 = vor.u32 %v6476_v5, %v6475_v45  ;;  %v6479_v51 = vrot.slane %v6475_v45, 4  ;;  %v6492_v35 = vrot.slane %v6490_v1, 7  ;;  %v6498_v60 = vshrl.u32 %v6440_v54, 16  ;;  %v6441_v49 = vld [vmem:[#allocation3 + $0x10] sm:$0xf]  ;;  %s7358_s12 = sshll.u32 %s10899_s21, 7 }
 0x958   : > { %v6486_v61 = vor.u32 %v6484_v16, %v6483_v50  ;;  %v6488_v15 = vrot.slane %v6483_v50, 4  ;;  %v6804_v4 = vld [vmem:[#allocation2 + $0x18] sm:$0xf]  ;;  %v6501_v27 = vshll.u32 %v6440_v54, 16  ;;  %v6507_v10 = vshrl.u32 %v6441_v49, 16  ;;  %s10925_s28 = scalar_lea.hbm %s11171_s3, %s7358_s12  ;;  %s10946_s27 = scalar_lea.sflag [#allocation8], %s244_s20 }
 0x959   : > { %v6796_v3 = vsel %vm10883_vm9, %v6478_v55, %v6795_v58  ;;  %v6510_v33 = vshll.u32 %v6441_v49, 16  ;;  %v6495_v62 = vor.u32 %v6493_v34, %v6492_v35  ;;  %v6808_v20 = vld [vmem:[#allocation2 + $0x20] sm:$0x1]  ;;  %v6811_v30 = vld [vmem:[#allocation2 + $0x24] sm:$0xf]  ;;  %v6496_v56 = vrot.slane %v6492_v35, 4 }
 0x95a   : > { %6797 = vst [vmem:[#allocation2 + $0xc] sm:$0xf] %v6796_v3  ;;  %v6487_v43 = vsel %vm10889_vm10, %v6479_v51, %v6486_v61  ;;  %v6802_v24 = vsel %vm10895_vm11, %v6488_v15, %v6801_v46  ;;  %v10909_v25 = vld [vmem:[#allocation3 + $0x14] sm:$0xf]  ;;  %v6500_v29 = vrot.slane %v6498_v60, 7  ;;  %v10912_v32 = vrot.slane %v6507_v10, 7 }
 0x95b   : > { %6798 = vst.msk [vmem:[#allocation2 + $0x10] sm:$0xf] %vm3288_vm4, %v6487_v43  ;;  %6803 = vst [vmem:[#allocation2 + $0x14] sm:$0x1] %v6802_v24  ;;  %v6515_v0 = vshrl.u32 %v10909_v25, 16  ;;  %v6805_v40 = vsel %vm10883_vm9, %v6495_v62, %v6804_v4  ;;  %v6518_v42 = vshll.u32 %v10909_v25, 16 }
 0x95c   : > { %v6443_v59 = vld [vmem:[#allocation3 + $0x18] sm:$0xf]  ;;  %v10920_v36 = vld [vmem:[#allocation3 + $0x1c] sm:$0xf]  ;;  %6806 = vst [vmem:[#allocation2 + $0x18] sm:$0xf] %v6805_v40  ;;  %v6503_v47 = vor.u32 %v6501_v27, %v6500_v29  ;;  %v6512_v17 = vor.u32 %v6510_v33, %v10912_v32 }
 0x95d   : > { %v6524_v9 = vshrl.u32 %v6443_v59, 16  ;;  %v6527_v6 = vshll.u32 %v6443_v59, 16  ;;  %v6505_v48 = vrot.slane %v6500_v29, 4  ;;  %v6513_v22 = vrot.slane %v10912_v32, 4  ;;  %v10929_v23 = vld [vmem:[#allocation3 + $0x20] sm:$0xf] }
 0x95e   : > { %v6517_v41 = vrot.slane %v6515_v0, 7  ;;  %v6815_v19 = vld [vmem:[#allocation2 + $0x2c] sm:$0x1]  ;;  %v6532_v21 = vshrl.u32 %v10920_v36, 16  ;;  %v6535_v44 = vshll.u32 %v10920_v36, 16  ;;  %v6504_v38 = vsel %vm10889_vm10, %v6496_v56, %v6503_v47  ;;  %s8152_s5 = scalar_lea.vmem %s10915_s29, 4096 }
 0x95f   : > { %v10931_v14 = vrot.slane %v6524_v9, 7  ;;  %v6809_v26 = vsel %vm10895_vm11, %v6505_v48, %v6808_v20  ;;  %v6812_v11 = vsel %vm10883_vm9, %v6512_v17, %v6811_v30  ;;  %v6818_v18 = vld [vmem:[#allocation2 + $0x30] sm:$0xf]  ;;  %v6541_v31 = vshrl.u32 %v10929_v23, 16  ;;  %v10942_v2 = vld [vmem:[#allocation3 + $0x24] sm:$0xf]  ;;  %p8153_p6 = scmp.ne.s32.totalorder %s10915_s29, %s8152_s5 }
 0x960   : > { %s8321_s6 = smov [#allocation11]  }
 0x961   : > { %p8154_p8 = pnand %p8153_p6, %p8425_p3  ;;  %s8156_s9 = sshll.u32 %s8321_s6, 4  ;;  %s8157_s9 = int_to_ptr.vmem [resolvable:$false] %s8156_s9 }
 0x962   : > { %s8158_s8 = scalar_lea.vmem %s8157_s9, 8192  ;;  %p8159_p5 = scmp.lt.s32.totalorder %s10915_s29, %s8157_s9 }
 0x963   : > { %p8155_p1 = pneg %p8154_p8  ;;  %p8160_p9 = scmp.lt.s32.totalorder %s8158_s8, %s8152_s5 }
 0x965   : > { %p8161_p10 = por %p8160_p9, %p8159_p5 }
 0x967   : > { %p8162_p0 = pnand %p8161_p10, %p8155_p1 }
 0x969   : > { %8165 = shalt.err (!%p8162_p0)
}
 0x96a   : > { %s8166_s20 = scalar_lea.hbm %s10925_s28, 4096  ;;  %s8170_s21 = scalar_lea.hbm %s11171_s3, 65536 }
 0x96b   : > { %p8167_p13 = scmp.ne.s32.totalorder %s10925_s28, %s8166_s20  ;;  %p8171_p12 = scmp.lt.s32.totalorder %s10925_s28, %s11171_s3 }
 0x96c   : > { %p8172_p4 = scmp.lt.s32.totalorder %s8170_s21, %s8166_s20 }
 0x96d   : > { %p8168_p11 = pnand %p8167_p13, %p8425_p3 }
 0x96e   : > { %p8173_p2 = por %p8172_p4, %p8171_p12 }
 0x96f   : > { %p8169_p7 = pneg %p8168_p11 }
 0x971   : > { %p8174_p6 = pnand %p8173_p2, %p8169_p7 }
 0x973   : > { %8177 = shalt.err (!%p8174_p6)
}
 0x974   : > { %s8322_s24 = smov 128   ;;  %s8323_s5 = smov 8   ;;  %6807 = vst.msk [vmem:[#allocation2 + $0x1c] sm:$0xf] %vm3288_vm4, %v6504_v38  ;;  %6810 = vst [vmem:[#allocation2 + $0x20] sm:$0x1] %v6809_v26  ;;  %v6520_v37 = vor.u32 %v6518_v42, %v6517_v41  ;;  %v6529_v52 = vor.u32 %v6527_v6, %v10931_v14 }
 0x975   : > { %7612 = dma.vmem_to_hbm [thread:$0]  (%p8425_p3), %s10915_s29, 4096, %s10925_s28, %s10946_s27, %s8322_s24, %s8322_s24, %s8323_s5   ;;  %6813 = vst [vmem:[#allocation2 + $0x24] sm:$0xf] %v6812_v11  ;;  %v6522_v63 = vrot.slane %v6517_v41, 4  ;;  %v6530_v7 = vrot.slane %v10931_v14, 4  ;;  %v6534_v5 = vrot.slane %v6532_v21, 7 }
 0x976   : > { %v6447_v8 = vld [vmem:[#allocation3 + $0x28] sm:$0xf]  ;;  %v6543_v53 = vrot.slane %v6541_v31, 7  ;;  %v6544_v12 = vshll.u32 %v10929_v23, 16  ;;  %v6549_v16 = vshrl.u32 %v10942_v2, 16  ;;  %v6521_v39 = vsel %vm10889_vm10, %v6513_v22, %v6520_v37  ;;  %s7395_s7 = sshll.u32 %s8294_s22, 12 }
 0x977   : > { %v10977_v45 = vld [vmem:[#allocation3 + $0x2c] sm:$0xf]  ;;  %v6816_v58 = vsel %vm10895_vm11, %v6522_v63, %v6815_v19  ;;  %v6819_v50 = vsel %vm10883_vm9, %v6529_v52, %v6818_v18  ;;  %v6822_v1 = vld [vmem:[#allocation2 + $0x38] sm:$0x1]  ;;  %v6825_v34 = vld [vmem:[#allocation2 + $0x3c] sm:$0xf]  ;;  %v6537_v51 = vor.u32 %v6535_v44, %v6534_v5  ;;  %s11006_s27 = scalar_lea.hbm %s11172_s4, %s7395_s7 }
 0x978   : > { %v6552_v55 = vshll.u32 %v10942_v2, 16  ;;  %6814 = vst.msk [vmem:[#allocation2 + $0x28] sm:$0xf] %vm3288_vm4, %v6521_v39  ;;  %6817 = vst [vmem:[#allocation2 + $0x2c] sm:$0x1] %v6816_v58  ;;  %v6539_v46 = vrot.slane %v6534_v5, 4  ;;  %v6546_v54 = vor.u32 %v6544_v12, %v6543_v53 }
 0x979   : > { %6820 = vst [vmem:[#allocation2 + $0x30] sm:$0xf] %v6819_v50  ;;  %v6547_v61 = vrot.slane %v6543_v53, 4  ;;  %v6829_v15 = vld [vmem:[#allocation2 + $0x44] sm:$0x1]  ;;  %v6551_v60 = vrot.slane %v6549_v16, 7  ;;  %v6538_v10 = vsel %vm10889_vm10, %v6530_v7, %v6537_v51 }
 0x97a   : > { %v10987_v35 = vld [vmem:[#allocation3 + $0x30] sm:$0xf]  ;;  %v6558_v49 = vshrl.u32 %v6447_v8, 16  ;;  %v6561_v3 = vshll.u32 %v6447_v8, 16  ;;  %v6566_v4 = vshrl.u32 %v10977_v45, 16  ;;  %v6823_v33 = vsel %vm10895_vm11, %v6539_v46, %v6822_v1  ;;  %s6946_s6 = sshll.u32 %s8533_s2, 4  ;;  %s11015_s6 = int_to_ptr.vmem [resolvable:$true] %s6946_s6 }
 0x97b   : > { %v10990_v27 = vld [vmem:[#allocation3 + $0x34] sm:$0xf]  ;;  %v6826_v43 = vsel %vm10883_vm9, %v6546_v54, %v6825_v34  ;;  %v6832_v24 = vld [vmem:[#allocation2 + $0x48] sm:$0xf]  ;;  %v6569_v62 = vshll.u32 %v10977_v45, 16  ;;  %v6554_v20 = vor.u32 %v6552_v55, %v6551_v60  ;;  %v6556_v30 = vrot.slane %v6551_v60, 4 }
 0x97c   : > { %6821 = vst.msk [vmem:[#allocation2 + $0x34] sm:$0xf] %vm3288_vm4, %v6538_v10  ;;  %6824 = vst [vmem:[#allocation2 + $0x38] sm:$0x1] %v6823_v33  ;;  %v6560_v25 = vrot.slane %v6558_v49, 7  ;;  %v6568_v56 = vrot.slane %v6566_v4, 7 }
 0x97d   : > { %6827 = vst [vmem:[#allocation2 + $0x3c] sm:$0xf] %v6826_v43  ;;  %v11001_v29 = vld [vmem:[#allocation3 + $0x38] sm:$0xf]  ;;  %v6575_v32 = vshrl.u32 %v10987_v35, 16  ;;  %v6578_v0 = vshll.u32 %v10987_v35, 16  ;;  %v6555_v9 = vsel %vm10889_vm10, %v6547_v61, %v6554_v20  ;;  %v6830_v6 = vsel %vm10895_vm11, %v6556_v30, %v6829_v15 }
 0x97e   : > { %v6583_v59 = vshrl.u32 %v10990_v27, 16  ;;  %v6586_v40 = vshll.u32 %v10990_v27, 16  ;;  %v11013_v42 = vld [vmem:[#allocation3 + $0x3c] sm:$0xf]  ;;  %v6563_v36 = vor.u32 %v6561_v3, %v6560_v25  ;;  %v6564_v47 = vrot.slane %v6560_v25, 4  ;;  %s6915_s2 = scalar_lea.sflag [#allocation13], %s251_s23 }
 0x97f   : > { %v6836_v48 = vld [vmem:[#allocation2 + $0x50] sm:$0x1]  ;;  %s8178_s22 = scalar_lea.vmem %s11015_s6, 4096  ;;  %p11212_p8 = scmp.ne.s32.totalorder %s11191_s13, 0 }
 0x980   : > { %p8179_p3 = scmp.ne.s32.totalorder %s11015_s6, %s8178_s22  ;;  %s8324_s9 = smov [#allocation12]  }
 0x981   : > { %s8182_s8 = sshll.u32 %s8324_s9, 4  ;;  %s8183_s8 = int_to_ptr.vmem [resolvable:$false] %s8182_s8 }
 0x982   : > { %p8180_p1 = pnand %p8179_p3, %p11212_p8  ;;  %s8184_s20 = scalar_lea.vmem %s8183_s8, 8192 }
 0x983   : > { %p8185_p9 = scmp.lt.s32.totalorder %s11015_s6, %s8183_s8  ;;  %p8186_p10 = scmp.lt.s32.totalorder %s8184_s20, %s8178_s22 }
 0x984   : > { %p8181_p5 = pneg %p8180_p1 }
 0x985   : > { %p8187_p0 = por %p8186_p10, %p8185_p9 }
 0x987   : > { %p8188_p13 = pnand %p8187_p0, %p8181_p5 }
 0x989   : > { %8191 = shalt.err (!%p8188_p13)
}
 0x98a   : > { %s8192_s11 = scalar_lea.hbm %s11006_s27, 4096  ;;  %s8196_s21 = scalar_lea.hbm %s11172_s4, 8192 }
 0x98b   : > { %p8193_p11 = scmp.ne.s32.totalorder %s11006_s27, %s8192_s11  ;;  %p8197_p4 = scmp.lt.s32.totalorder %s11006_s27, %s11172_s4 }
 0x98c   : > { %p8198_p2 = scmp.lt.s32.totalorder %s8196_s21, %s8192_s11 }
 0x98d   : > { %p8194_p7 = pnand %p8193_p11, %p11212_p8 }
 0x98e   : > { %p8199_p6 = por %p8198_p2, %p8197_p4 }
 0x98f   : > { %p8195_p12 = pneg %p8194_p7 }
 0x991   : > { %p8200_p3 = pnand %p8199_p6, %p8195_p12 }
 0x993   : > { %8203 = shalt.err (!%p8200_p3)
}
 0x994   : > { %7613 = dma.vmem_to_hbm [thread:$0]  (%p11212_p8), %s11015_s6, 4096, %s11006_s27, %s6915_s2, %s8322_s24, %s8322_s24, %s8323_s5   ;;  %6828 = vst.msk [vmem:[#allocation2 + $0x40] sm:$0xf] %vm3288_vm4, %v6555_v9  ;;  %6831 = vst [vmem:[#allocation2 + $0x44] sm:$0x1] %v6830_v6  ;;  %v6571_v17 = vor.u32 %v6569_v62, %v6568_v56  ;;  %v6573_v22 = vrot.slane %v6568_v56, 4  ;;  %v6833_v14 = vsel %vm10883_vm9, %v6563_v36, %v6832_v24 }
 0x995   : > { %v6577_v23 = vrot.slane %v6575_v32, 7  ;;  %v6839_v41 = vld [vmem:[#allocation2 + $0x54] sm:$0xf]  ;;  %v6585_v19 = vrot.slane %v6583_v59, 7  ;;  %v6592_v21 = vshrl.u32 %v11001_v29, 16  ;;  %v6595_v44 = vshll.u32 %v11001_v29, 16 }
 0x996   : > { %v6600_v38 = vshrl.u32 %v11013_v42, 16  ;;  %v6453_v26 = vld [vmem:[#allocation3 + $0x40] sm:$0xf]  ;;  %6834 = vst [vmem:[#allocation2 + $0x48] sm:$0xf] %v6833_v14  ;;  %v6572_v11 = vsel %vm10889_vm10, %v6564_v47, %v6571_v17  ;;  %v6837_v18 = vsel %vm10895_vm11, %v6573_v22, %v6836_v48  ;;  %v6603_v45 = vshll.u32 %v11013_v42, 16 }
 0x997   : > { %v6580_v31 = vor.u32 %v6578_v0, %v6577_v23  ;;  %v6581_v2 = vrot.slane %v6577_v23, 4  ;;  %v6843_v37 = vld [vmem:[#allocation2 + $0x5c] sm:$0x1]  ;;  %v6846_v63 = vld [vmem:[#allocation2 + $0x60] sm:$0xf]  ;;  %v6588_v52 = vor.u32 %v6586_v40, %v6585_v19  ;;  %v6590_v7 = vrot.slane %v6585_v19, 4 }
 0x998   : > { %6835 = vst.msk [vmem:[#allocation2 + $0x4c] sm:$0xf] %vm3288_vm4, %v6572_v11  ;;  %6838 = vst [vmem:[#allocation2 + $0x50] sm:$0x1] %v6837_v18  ;;  %v6594_v8 = vrot.slane %v6592_v21, 7  ;;  %v6602_v5 = vrot.slane %v6600_v38, 7 }
 0x999   : > { %v6850_v53 = vld [vmem:[#allocation2 + $0x68] sm:$0x1]  ;;  %v6454_v12 = vld [vmem:[#allocation3 + $0x44] sm:$0xf]  ;;  %v6840_v16 = vsel %vm10883_vm9, %v6580_v31, %v6839_v41  ;;  %v6609_v39 = vshrl.u32 %v6453_v26, 16  ;;  %v6612_v58 = vshll.u32 %v6453_v26, 16  ;;  %v6589_v1 = vsel %vm10889_vm10, %v6581_v2, %v6588_v52 }
 0x99a   : > { %v6455_v50 = vld [vmem:[#allocation3 + $0x48] sm:$0xf]  ;;  %6841 = vst [vmem:[#allocation2 + $0x54] sm:$0xf] %v6840_v16  ;;  %v6844_v34 = vsel %vm10895_vm11, %v6590_v7, %v6843_v37  ;;  %v6597_v55 = vor.u32 %v6595_v44, %v6594_v8  ;;  %v6598_v51 = vrot.slane %v6594_v8, 4  ;;  %v6605_v61 = vor.u32 %v6603_v45, %v6602_v5 }
 0x99b   : > { %v6853_v46 = vld [vmem:[#allocation2 + $0x6c] sm:$0xf]  ;;  %v6456_v54 = vld [vmem:[#allocation3 + $0x4c] sm:$0xf]  ;;  %6842 = vst.msk [vmem:[#allocation2 + $0x58] sm:$0xf] %vm3288_vm4, %v6589_v1 }
 0x99c   : > { %6845 = vst [vmem:[#allocation2 + $0x5c] sm:$0x1] %v6844_v34  ;;  %v6607_v15 = vrot.slane %v6602_v5, 4  ;;  %v6611_v35 = vrot.slane %v6609_v39, 7  ;;  %v6617_v60 = vshrl.u32 %v6454_v12, 16  ;;  %v6847_v3 = vsel %vm10883_vm9, %v6597_v55, %v6846_v63 }
 0x99d   : > { %v6457_v49 = vld [vmem:[#allocation3 + $0x50] sm:$0xf]  ;;  %v6620_v4 = vshll.u32 %v6454_v12, 16  ;;  %v6626_v27 = vshrl.u32 %v6455_v50, 16  ;;  %v6629_v10 = vshll.u32 %v6455_v50, 16  ;;  %v6606_v43 = vsel %vm10889_vm10, %v6598_v51, %v6605_v61 }
 0x99e   : > { %v6458_v33 = vld [vmem:[#allocation3 + $0x54] sm:$0xf]  ;;  %6848 = vst [vmem:[#allocation2 + $0x60] sm:$0xf] %v6847_v3  ;;  %v6851_v24 = vsel %vm10895_vm11, %v6607_v15, %v6850_v53  ;;  %v6614_v62 = vor.u32 %v6612_v58, %v6611_v35  ;;  %v6615_v20 = vrot.slane %v6611_v35, 4  ;;  %v6619_v25 = vrot.slane %v6617_v60, 7 }
 0x99f   : > { %v6857_v30 = vld [vmem:[#allocation2 + $0x74] sm:$0x1]  ;;  %6849 = vst.msk [vmem:[#allocation2 + $0x64] sm:$0xf] %vm3288_vm4, %v6606_v43  ;;  %6852 = vst [vmem:[#allocation2 + $0x68] sm:$0x1] %v6851_v24 }
 0x9a0   : > { %v6628_v56 = vrot.slane %v6626_v27, 7  ;;  %v6860_v29 = vld [vmem:[#allocation2 + $0x78] sm:$0xf]  ;;  %v6634_v32 = vshrl.u32 %v6456_v54, 16  ;;  %v6637_v0 = vshll.u32 %v6456_v54, 16  ;;  %v6854_v59 = vsel %vm10883_vm9, %v6614_v62, %v6853_v46 }
 0x9a1   : > { %v6643_v40 = vshrl.u32 %v6457_v49, 16  ;;  %v6646_v42 = vshll.u32 %v6457_v49, 16  ;;  %v6651_v9 = vshrl.u32 %v6458_v33, 16  ;;  %v6459_v6 = vld [vmem:[#allocation3 + $0x58] sm:$0xf]  ;;  %v6622_v36 = vor.u32 %v6620_v4, %v6619_v25 }
 0x9a2   : > { %6855 = vst [vmem:[#allocation2 + $0x6c] sm:$0xf] %v6854_v59  ;;  %v6624_v47 = vrot.slane %v6619_v25, 4  ;;  %v6631_v48 = vor.u32 %v6629_v10, %v6628_v56  ;;  %v6632_v17 = vrot.slane %v6628_v56, 4  ;;  %v6636_v22 = vrot.slane %v6634_v32, 7 }
 0x9a3   : > { %v6864_v23 = vld [vmem:[#allocation2 + $0x80] sm:$0x1]  ;;  %v6645_v41 = vrot.slane %v6643_v40, 7  ;;  %v6653_v19 = vrot.slane %v6651_v9, 7  ;;  %v6654_v14 = vshll.u32 %v6458_v33, 16  ;;  %v6623_v21 = vsel %vm10889_vm10, %v6615_v20, %v6622_v36 }
 0x9a4   : > { %v6858_v44 = vsel %vm10895_vm11, %v6624_v47, %v6857_v30  ;;  %v6861_v38 = vsel %vm10883_vm9, %v6631_v48, %v6860_v29  ;;  %v6867_v26 = vld [vmem:[#allocation2 + $0x84] sm:$0xf]  ;;  %v6660_v11 = vshrl.u32 %v6459_v6, 16  ;;  %v6460_v18 = vld [vmem:[#allocation3 + $0x5c] sm:$0xf]  ;;  %v6639_v31 = vor.u32 %v6637_v0, %v6636_v22 }
 0x9a5   : > { %6856 = vst.msk [vmem:[#allocation2 + $0x70] sm:$0xf] %vm3288_vm4, %v6623_v21  ;;  %6859 = vst [vmem:[#allocation2 + $0x74] sm:$0x1] %v6858_v44  ;;  %v6641_v2 = vrot.slane %v6636_v22, 4  ;;  %v6648_v37 = vor.u32 %v6646_v42, %v6645_v41  ;;  %v6649_v63 = vrot.slane %v6645_v41, 4  ;;  %v6656_v8 = vor.u32 %v6654_v14, %v6653_v19 }
 0x9a6   : > { %6862 = vst [vmem:[#allocation2 + $0x78] sm:$0xf] %v6861_v38  ;;  %v6871_v52 = vld [vmem:[#allocation2 + $0x8c] sm:$0x1]  ;;  %v6874_v7 = vld [vmem:[#allocation2 + $0x90] sm:$0xf]  ;;  %v6640_v45 = vsel %vm10889_vm10, %v6632_v17, %v6639_v31 }
 0x9a7   : > { %v6658_v5 = vrot.slane %v6653_v19, 4  ;;  %v6662_v53 = vrot.slane %v6660_v11, 7  ;;  %v6663_v12 = vshll.u32 %v6459_v6, 16  ;;  %v6461_v16 = vld [vmem:[#allocation3 + $0x60] sm:$0xf]  ;;  %v6865_v39 = vsel %vm10895_vm11, %v6641_v2, %v6864_v23 }
 0x9a8   : > { %v6868_v58 = vsel %vm10883_vm9, %v6648_v37, %v6867_v26  ;;  %v6668_v50 = vshrl.u32 %v6460_v18, 16  ;;  %v6462_v1 = vld [vmem:[#allocation3 + $0x64] sm:$0xf]  ;;  %v6463_v34 = vld [vmem:[#allocation3 + $0x68] sm:$0xf]  ;;  %v6657_v55 = vsel %vm10889_vm10, %v6649_v63, %v6656_v8  ;;  %v6671_v35 = vshll.u32 %v6460_v18, 16 }
 0x9a9   : > { %6863 = vst.msk [vmem:[#allocation2 + $0x7c] sm:$0xf] %vm3288_vm4, %v6640_v45  ;;  %6866 = vst [vmem:[#allocation2 + $0x80] sm:$0x1] %v6865_v39  ;;  %v6872_v51 = vsel %vm10895_vm11, %v6658_v5, %v6871_v52  ;;  %v6665_v46 = vor.u32 %v6663_v12, %v6662_v53  ;;  %v6666_v54 = vrot.slane %v6662_v53, 4  ;;  %v6677_v60 = vshrl.u32 %v6461_v16, 16 }
 0x9aa   : > { %6869 = vst [vmem:[#allocation2 + $0x84] sm:$0xf] %v6868_v58  ;;  %v6878_v61 = vld [vmem:[#allocation2 + $0x98] sm:$0x1]  ;;  %6870 = vst.msk [vmem:[#allocation2 + $0x88] sm:$0xf] %vm3288_vm4, %v6657_v55 }
 0x9ab   : > { %6873 = vst [vmem:[#allocation2 + $0x8c] sm:$0x1] %v6872_v51  ;;  %v6670_v15 = vrot.slane %v6668_v50, 7  ;;  %v6680_v49 = vshll.u32 %v6461_v16, 16  ;;  %v6464_v3 = vld [vmem:[#allocation3 + $0x6c] sm:$0xf]  ;;  %v6875_v4 = vsel %vm10883_vm9, %v6665_v46, %v6874_v7 }
 0x9ac   : > { %v6881_v27 = vld [vmem:[#allocation2 + $0x9c] sm:$0xf]  ;;  %v6685_v10 = vshrl.u32 %v6462_v1, 16  ;;  %v6688_v33 = vshll.u32 %v6462_v1, 16  ;;  %v6694_v43 = vshrl.u32 %v6463_v34, 16  ;;  %v6679_v20 = vrot.slane %v6677_v60, 7 }
 0x9ad   : > { %6876 = vst [vmem:[#allocation2 + $0x90] sm:$0xf] %v6875_v4  ;;  %v6673_v24 = vor.u32 %v6671_v35, %v6670_v15  ;;  %v6675_v62 = vrot.slane %v6670_v15, 4  ;;  %v6885_v30 = vld [vmem:[#allocation2 + $0xa4] sm:$0x1]  ;;  %v6697_v25 = vshll.u32 %v6463_v34, 16 }
 0x9ae   : > { %v6687_v56 = vrot.slane %v6685_v10, 7  ;;  %v6696_v29 = vrot.slane %v6694_v43, 7  ;;  %v6702_v32 = vshrl.u32 %v6464_v3, 16  ;;  %v6705_v0 = vshll.u32 %v6464_v3, 16  ;;  %v6465_v59 = vld [vmem:[#allocation3 + $0x70] sm:$0xf] }
 0x9af   : > { %v6674_v40 = vsel %vm10889_vm10, %v6666_v54, %v6673_v24  ;;  %v6879_v42 = vsel %vm10895_vm11, %v6675_v62, %v6878_v61  ;;  %v6682_v9 = vor.u32 %v6680_v49, %v6679_v20  ;;  %v6683_v6 = vrot.slane %v6679_v20, 4  ;;  %v6888_v36 = vld [vmem:[#allocation2 + $0xa8] sm:$0xf]  ;;  %v6466_v47 = vld [vmem:[#allocation3 + $0x74] sm:$0xf] }
 0x9b0   : > { %6877 = vst.msk [vmem:[#allocation2 + $0x94] sm:$0xf] %vm3288_vm4, %v6674_v40  ;;  %6880 = vst [vmem:[#allocation2 + $0x98] sm:$0x1] %v6879_v42  ;;  %v6690_v48 = vor.u32 %v6688_v33, %v6687_v56  ;;  %v6692_v17 = vrot.slane %v6687_v56, 4  ;;  %v6699_v22 = vor.u32 %v6697_v25, %v6696_v29  ;;  %v6700_v23 = vrot.slane %v6696_v29, 4 }
 0x9b1   : > { %v6467_v41 = vld [vmem:[#allocation3 + $0x78] sm:$0xf]  ;;  %v6882_v19 = vsel %vm10883_vm9, %v6682_v9, %v6881_v27  ;;  %v6704_v14 = vrot.slane %v6702_v32, 7  ;;  %v6711_v21 = vshrl.u32 %v6465_v59, 16  ;;  %v6714_v44 = vshll.u32 %v6465_v59, 16 }
 0x9b2   : > { %v6468_v38 = vld [vmem:[#allocation3 + $0x7c] sm:$0xf]  ;;  %6883 = vst [vmem:[#allocation2 + $0x9c] sm:$0xf] %v6882_v19  ;;  %v6691_v26 = vsel %vm10889_vm10, %v6683_v6, %v6690_v48  ;;  %v6886_v11 = vsel %vm10895_vm11, %v6692_v17, %v6885_v30  ;;  %v6889_v18 = vsel %vm10883_vm9, %v6699_v22, %v6888_v36  ;;  %v6892_v31 = vld [vmem:[#allocation2 + $0xb0] sm:$0x1] }
 0x9b3   : > { %v6719_v2 = vshrl.u32 %v6466_v47, 16  ;;  %6884 = vst.msk [vmem:[#allocation2 + $0xa0] sm:$0xf] %vm3288_vm4, %v6691_v26  ;;  %6887 = vst [vmem:[#allocation2 + $0xa4] sm:$0x1] %v6886_v11  ;;  %v6707_v37 = vor.u32 %v6705_v0, %v6704_v14  ;;  %v6709_v63 = vrot.slane %v6704_v14, 4 }
 0x9b4   : > { %6890 = vst [vmem:[#allocation2 + $0xa8] sm:$0xf] %v6889_v18  ;;  %v6713_v52 = vrot.slane %v6711_v21, 7  ;;  %v6722_v7 = vshll.u32 %v6466_v47, 16  ;;  %v6895_v8 = vld [vmem:[#allocation2 + $0xb4] sm:$0xf] }
 0x9b5   : > { %v6721_v5 = vrot.slane %v6719_v2, 7  ;;  %v6728_v53 = vshrl.u32 %v6467_v41, 16  ;;  %v6731_v12 = vshll.u32 %v6467_v41, 16  ;;  %v6736_v16 = vshrl.u32 %v6468_v38, 16  ;;  %v6899_v1 = vld [vmem:[#allocation2 + $0xbc] sm:$0x1] }
 0x9b6   : > { %v6708_v45 = vsel %vm10889_vm10, %v6700_v23, %v6707_v37  ;;  %v6893_v39 = vsel %vm10895_vm11, %v6709_v63, %v6892_v31  ;;  %v6716_v58 = vor.u32 %v6714_v44, %v6713_v52  ;;  %v6717_v50 = vrot.slane %v6713_v52, 4  ;;  %v6902_v61 = vld [vmem:[#allocation2 + $0xc0] sm:$0xf]  ;;  %v6906_v4 = vld [vmem:[#allocation2 + $0xc8] sm:$0x1] }
 0x9b7   : > { %6891 = vst.msk [vmem:[#allocation2 + $0xac] sm:$0xf] %vm3288_vm4, %v6708_v45  ;;  %6894 = vst [vmem:[#allocation2 + $0xb0] sm:$0x1] %v6893_v39  ;;  %v6724_v34 = vor.u32 %v6722_v7, %v6721_v5  ;;  %v6726_v55 = vrot.slane %v6721_v5, 4  ;;  %v6730_v51 = vrot.slane %v6728_v53, 7 }
 0x9b8   : > { %v6738_v46 = vrot.slane %v6736_v16, 7  ;;  %v6896_v54 = vsel %vm10883_vm9, %v6716_v58, %v6895_v8  ;;  %v6739_v15 = vshll.u32 %v6468_v38, 16 }
 0x9b9   : > { %6897 = vst [vmem:[#allocation2 + $0xb4] sm:$0xf] %v6896_v54  ;;  %v6725_v35 = vsel %vm10889_vm10, %v6717_v50, %v6724_v34  ;;  %v6900_v60 = vsel %vm10895_vm11, %v6726_v55, %v6899_v1  ;;  %v6733_v49 = vor.u32 %v6731_v12, %v6730_v51  ;;  %v6734_v3 = vrot.slane %v6730_v51, 4 }
 0x9ba   : > { %6898 = vst.msk [vmem:[#allocation2 + $0xb8] sm:$0xf] %vm3288_vm4, %v6725_v35  ;;  %6901 = vst [vmem:[#allocation2 + $0xbc] sm:$0x1] %v6900_v60  ;;  %v6741_v27 = vor.u32 %v6739_v15, %v6738_v46  ;;  %v6743_v10 = vrot.slane %v6738_v46, 4 }
 0x9bb   : > { %v6903_v33 = vsel %vm10883_vm9, %v6733_v49, %v6902_v61 }
 0x9bc   : > { %6904 = vst [vmem:[#allocation2 + $0xc0] sm:$0xf] %v6903_v33  ;;  %v6742_v43 = vsel %vm10889_vm10, %v6734_v3, %v6741_v27  ;;  %v6907_v24 = vsel %vm10895_vm11, %v6743_v10, %v6906_v4 }
 0x9bd   : > { %6905 = vst.msk [vmem:[#allocation2 + $0xc4] sm:$0xf] %vm3288_vm4, %v6742_v43  ;;  %6908 = vst [vmem:[#allocation2 + $0xc8] sm:$0x1] %v6907_v24 }
 0x9be PF: > { %p7634_p8 = scmp.ge.s32.totalorder %s8306_s25, 2  ;;  %s6961_s13 = sand.u32 1, %s8278_s18  }
 0x9bf   : > { %p11213_p1 = scmp.ne.s32.totalorder %s11190_s10, 0  ;;  %s6962_s24 = scalar_lea.sflag [#allocation8], %s6961_s13 }
 0x9c1   : > { %p7624_p5 = pnand %p7634_p8, %p11213_p1 }
 0x9c3   : > { %p7625_p9 = pneg %p7624_p5 }
 0x9c5   : > { %8257 = dma.done.wait (%p7625_p9), %s6962_s24, 4096  }
 0x9c6   : > { %8259 = vsyncadd (%p7625_p9), %s6962_s24, 4294963200  ;;  %s6970_s5 = sand.u32 1, %s8266_s15   ;;  %p11214_p10 = scmp.ne.s32.totalorder %s11193_s26, 0 }
 0x9c7   : > { %s6971_s7 = scalar_lea.sflag [#allocation13], %s6970_s5 }
 0x9c8   : > { %p7627_p0 = pnand %p7634_p8, %p11214_p10 }
 0x9ca   : > { %p7628_p13 = pneg %p7627_p0 }
 0x9cc   : > { %8261 = dma.done.wait (%p7628_p13), %s6971_s7, 4096  }
 0x9cd   : > { %8263 = vsyncadd (%p7628_p13), %s6971_s7, 4294963200  ;;  %s23_s25 = sadd.s32 1, %s8306_s25   ;;  %s11215_s10 = sld [smem:[#allocation18_spill]] }
 0x9ce   : > { %p20_p11 = scmp.ge.s32.totalorder %s23_s25, 18   ;;  %s11216_s20 = sld [smem:[#allocation23_spill]] }
 0x9cf   : > { %s11217_s21 = sld [smem:[#allocation19_spill]]  ;;  %s11221_s15 = smov %s8270_s16 }
 0x9d0   : > { %s11218_s22 = sld [smem:[#allocation20_spill]]  ;;  %s11222_s16 = smov %s8274_s17 }
 0x9d1   : > { %s11219_s23 = sld [smem:[#allocation21_spill]]  ;;  %s11223_s17 = smov %s8457_s14 }
 0x9d2   : > { %s11220_s24 = sld [smem:[#allocation22_spill]]  ;;  %s11224_s18 = smov %s8282_s19 }
 0x9d3   : > { %s11225_s19 = smov %s11215_s10  ;;  %22 = sbr.rel (!%p20_p11) target bundleno = 14 (0xe), region = 112 }
 0x9d8   :  { %6976 = vsyncpa [#allocation7], 1 }
 0x9d9   :  { %6978 = vsyncpa [#allocation7 + $0x1], 1 }
 0x9da   :  { %6979 = vsyncpa [#allocation10], 1 }
 0x9db   :  { %6980 = vsyncpa [#allocation8], 1 }
 0x9dc   :  { %6982 = vsyncpa [#allocation8 + $0x1], 1 }
 0x9dd   :  { %6983 = vsyncpa [#allocation13], 1 }
 0x9de   :  { %6985 = vsyncpa [#allocation13 + $0x1], 1 }

</bundles_post_ra>
